<compile_context>
chip_gen: v5e
topology: v5e:2x2
jax: 0.10.0
libtpu: 0.0.40
codegen_flags: <defaults>
</compile_context>

<pallas_src>
import math
import functools
import numpy as np
import jax
import jax.numpy as jnp
from jax.experimental import pallas as pl
from jax.experimental.pallas import tpu as pltpu

NEG_BIAS = -1e9          # finite mask value (avoids exp(-inf - -inf) = NaN)
LN_EPS = 1e-5            # PyTorch nn.LayerNorm default


# ----------------------------- Pallas kernels -----------------------------

def _attn_sublayer_kernel(x_ref, kv_ref, g_ref, b_ref,
                          wq_ref, bq_ref, wkv_ref, bkv_ref, wo_ref, bo_ref,
                          bias_ref, o_ref, *, n_heads, norm_kv, eps):
    # One batch element per grid step.
    # x: [S, E] (residual stream), kv: [T, E] (memory; == x for self-attn),
    # bias: [1 or S, T] additive mask. Computes x + out_proj(MHA(LN(x), kv_src)).
    x = x_ref[0]
    E = x.shape[-1]
    dh = E // n_heads
    scale = 1.0 / math.sqrt(dh)
    g = g_ref[...]
    bln = b_ref[...]

    def ln(t):
        mu = jnp.mean(t, axis=-1, keepdims=True)
        tc = t - mu
        var = jnp.mean(tc * tc, axis=-1, keepdims=True)
        return tc * jax.lax.rsqrt(var + eps) * g + bln

    xn = ln(x)
    q = jnp.dot(xn.astype(jnp.bfloat16), wq_ref[...],
                preferred_element_type=jnp.float32) + bq_ref[...]

    # For self-attention the wrapper passes kv == x, so reuse LN(x).
    kvn = xn if norm_kv else kv_ref[0]
    kvp = jnp.dot(kvn.astype(jnp.bfloat16), wkv_ref[...],
                  preferred_element_type=jnp.float32) + bkv_ref[...]
    k = kvp[:, :E]
    v = kvp[:, E:]
    bias = bias_ref[0]                        # [1 or S, T] — broadcasts over rows

    # All heads handled inside this single kernel invocation (no per-head grid
    # steps); per-head output projections are summed (== concat(heads) @ Wo).
    acc = jnp.zeros(x.shape, jnp.float32)
    for h in range(n_heads):
        sl = slice(h * dh, (h + 1) * dh)
        qh = q[:, sl].astype(jnp.bfloat16)
        kh = k[:, sl].astype(jnp.bfloat16)
        vh = v[:, sl].astype(jnp.bfloat16)
        # contract last dims (no explicit k.T / XLU transpose)
        s = jax.lax.dot_general(qh, kh, (((1,), (1,)), ((), ())),
                                preferred_element_type=jnp.float32)
        s = s * scale + bias
        m = jnp.max(s, axis=-1, keepdims=True)
        p = jnp.exp(s - m)
        p = p * pl.reciprocal(jnp.sum(p, axis=-1, keepdims=True), approx=True)
        oh = jnp.dot(p.astype(jnp.bfloat16), vh,
                     preferred_element_type=jnp.float32)            # [S, dh]
        wo_h = wo_ref[sl, :].astype(jnp.bfloat16)                   # [dh, E]
        acc = acc + jnp.dot(oh.astype(jnp.bfloat16), wo_h,
                            preferred_element_type=jnp.float32)
    o_ref[0] = x + acc + bo_ref[...]


def _ffn_sublayer_kernel(x_ref, g_ref, b_ref, w1_ref, b1_ref, w2_ref, b2_ref,
                         o_ref, *, eps):
    # x + W2(relu(W1(LN(x)))) for one batch element.
    x = x_ref[0]
    mu = jnp.mean(x, axis=-1, keepdims=True)
    xc = x - mu
    var = jnp.mean(xc * xc, axis=-1, keepdims=True)
    xn = xc * jax.lax.rsqrt(var + eps) * g_ref[...] + b_ref[...]
    h = jnp.dot(xn.astype(jnp.bfloat16), w1_ref[...],
                preferred_element_type=jnp.float32) + b1_ref[...]
    h = jnp.maximum(h, 0.0)
    y = jnp.dot(h.astype(jnp.bfloat16), w2_ref[...],
                preferred_element_type=jnp.float32) + b2_ref[...]
    o_ref[0] = x + y


def _layernorm_kernel(x_ref, g_ref, b_ref, o_ref, *, eps):
    x = x_ref[0]
    mu = jnp.mean(x, axis=-1, keepdims=True)
    xc = x - mu
    var = jnp.mean(xc * xc, axis=-1, keepdims=True)
    o_ref[0] = xc * jax.lax.rsqrt(var + eps) * g_ref[...] + b_ref[...]


def _gen_ce_kernel(x_ref, g_ref, b_ref, w_ref, bw_ref, lbl_ref,
                   logit_ref, loss_ref, *, eps, inv_total):
    # decoder final LayerNorm + generator + mean cross-entropy (accumulated
    # across the batch grid axis into the (1,1) loss output block).
    b = pl.program_id(0)
    x = x_ref[0]                                   # [T, E]
    mu = jnp.mean(x, axis=-1, keepdims=True)
    xc = x - mu
    var = jnp.mean(xc * xc, axis=-1, keepdims=True)
    xn = xc * jax.lax.rsqrt(var + eps) * g_ref[...] + b_ref[...]
    logits = jnp.dot(xn.astype(jnp.bfloat16), w_ref[...],
                     preferred_element_type=jnp.float32) + bw_ref[...]
    logit_ref[0] = logits

    lbl = lbl_ref[0]                               # [T, 1] int32
    m = jnp.max(logits, axis=-1, keepdims=True)
    lse = jnp.log(jnp.sum(jnp.exp(logits - m), axis=-1, keepdims=True)) + m
    col = jax.lax.broadcasted_iota(jnp.int32, logits.shape, 1)
    tgt = jnp.sum(jnp.where(col == lbl, logits, 0.0), axis=-1, keepdims=True)
    part = jnp.sum(lse - tgt, axis=0, keepdims=True)    # (1, 1) partial sum

    @pl.when(b == 0)
    def _():
        loss_ref[...] = jnp.zeros_like(loss_ref)
    loss_ref[...] = loss_ref[...] + part * inv_total


# ----------------------------- Pallas wrappers -----------------------------

def _const_spec(shape):
    return pl.BlockSpec(shape, lambda b, _n=len(shape): (0,) * _n)


def attn_sublayer(x, kv, sub_p, attn_p, bias, n_heads, norm_kv):
    B, S, E = x.shape
    T = kv.shape[1]
    bias_B, bias_rows = bias.shape[0], bias.shape[1]
    bias_map = (lambda b: (b, 0, 0)) if bias_B == B else (lambda b: (0, 0, 0))
    return pl.pallas_call(
        functools.partial(_attn_sublayer_kernel,
                          n_heads=n_heads, norm_kv=norm_kv, eps=LN_EPS),
        out_shape=jax.ShapeDtypeStruct((B, S, E), jnp.float32),
        grid=(B,),
        in_specs=[
            pl.BlockSpec((1, S, E), lambda b: (b, 0, 0)),   # x
            pl.BlockSpec((1, T, E), lambda b: (b, 0, 0)),   # kv memory
            _const_spec((1, E)), _const_spec((1, E)),       # LN gamma / beta
            _const_spec((E, E)), _const_spec((1, E)),       # Wq (bf16), bq
            _const_spec((E, 2 * E)), _const_spec((1, 2 * E)),  # Wkv (bf16), bkv
            _const_spec((E, E)), _const_spec((1, E)),       # Wo (f32), bo
            pl.BlockSpec((1, bias_rows, T), bias_map),      # additive mask
        ],
        out_specs=pl.BlockSpec((1, S, E), lambda b: (b, 0, 0)),
        compiler_params=pltpu.CompilerParams(dimension_semantics=("parallel",)),
    )(x, kv, sub_p["g"], sub_p["b"],
      attn_p["wq"], attn_p["bq"], attn_p["wkv"], attn_p["bkv"],
      attn_p["wo"], attn_p["bo"], bias)


def ffn_sublayer(x, sub_p, ffn_p):
    B, S, E = x.shape
    F = ffn_p["w1"].shape[1]
    return pl.pallas_call(
        functools.partial(_ffn_sublayer_kernel, eps=LN_EPS),
        out_shape=jax.ShapeDtypeStruct((B, S, E), jnp.float32),
        grid=(B,),
        in_specs=[
            pl.BlockSpec((1, S, E), lambda b: (b, 0, 0)),
            _const_spec((1, E)), _const_spec((1, E)),
            _const_spec((E, F)), _const_spec((1, F)),
            _const_spec((F, E)), _const_spec((1, E)),
        ],
        out_specs=pl.BlockSpec((1, S, E), lambda b: (b, 0, 0)),
        compiler_params=pltpu.CompilerParams(dimension_semantics=("parallel",)),
    )(x, sub_p["g"], sub_p["b"],
      ffn_p["w1"], ffn_p["b1"], ffn_p["w2"], ffn_p["b2"])


def final_layernorm(x, norm_p):
    B, S, E = x.shape
    return pl.pallas_call(
        functools.partial(_layernorm_kernel, eps=LN_EPS),
        out_shape=jax.ShapeDtypeStruct((B, S, E), jnp.float32),
        grid=(B,),
        in_specs=[pl.BlockSpec((1, S, E), lambda b: (b, 0, 0)),
                  _const_spec((1, E)), _const_spec((1, E))],
        out_specs=pl.BlockSpec((1, S, E), lambda b: (b, 0, 0)),
        compiler_params=pltpu.CompilerParams(dimension_semantics=("parallel",)),
    )(x, norm_p["g"], norm_p["b"])


def generator_loss(x, norm_p, gen_p, labels, vocab):
    B, T, E = x.shape
    V = vocab
    lbl = labels.reshape(B, T, 1).astype(jnp.int32)
    logit, loss = pl.pallas_call(
        functools.partial(_gen_ce_kernel, eps=LN_EPS, inv_total=1.0 / float(B * T)),
        out_shape=(jax.ShapeDtypeStruct((B, T, V), jnp.float32),
                   jax.ShapeDtypeStruct((1, 1), jnp.float32)),
        grid=(B,),
        in_specs=[
            pl.BlockSpec((1, T, E), lambda b: (b, 0, 0)),
            _const_spec((1, E)), _const_spec((1, E)),       # decoder final LN
            _const_spec((E, V)), _const_spec((1, V)),       # generator
            pl.BlockSpec((1, T, 1), lambda b: (b, 0, 0)),   # labels
        ],
        out_specs=(pl.BlockSpec((1, T, V), lambda b: (b, 0, 0)),
                   pl.BlockSpec((1, 1), lambda b: (0, 0))),
        compiler_params=pltpu.CompilerParams(dimension_semantics=("arbitrary",)),
    )(x, norm_p["g"], norm_p["b"], gen_p["w"], gen_p["b"], lbl)
    return logit, loss[0, 0]


# ----------------------------- model glue (plain JAX) -----------------------------

def embed(p, tokens):
    # TODO(synk): Embeddings class definition not provided; assuming
    # token_embedding * sqrt(d_model) + sinusoidal positional encoding.
    E = p["table"].shape[1]
    T = tokens.shape[1]
    return p["table"][tokens] * math.sqrt(E) + p["pe"][:T][None, :, :]


def encoder_layer_apply(p, x, pad_bias, n_heads):
    x = attn_sublayer(x, x, p["sub0"], p["self_attn"], pad_bias, n_heads, norm_kv=True)
    x = ffn_sublayer(x, p["sub1"], p["pff"])
    return x


def run_encoder(p, tokens, pad_bias, n_heads):
    x = embed(p["emb"], tokens)
    for lp in p["layers"]:
        x = encoder_layer_apply(lp, x, pad_bias, n_heads)
    return final_layernorm(x, p["norm"])


def decoder_layer_apply(p, x, e_mem, e_bias, d_bias, h_mem, h_bias, n_heads):
    # DecoderLayer with fusion_flag=True (4 sublayers, hist_attn)
    x = attn_sublayer(x, x, p["sub0"], p["self_attn"], d_bias, n_heads, norm_kv=True)
    x = attn_sublayer(x, e_mem, p["sub1"], p["cross_attn"], e_bias, n_heads, norm_kv=False)
    x = attn_sublayer(x, h_mem, p["sub2"], p["hist_attn"], h_bias, n_heads, norm_kv=False)
    x = ffn_sublayer(x, p["sub3"], p["pff"])
    return x


def run_decoder(p, tokens, e_mem, e_bias, d_bias, h_mem, h_bias, n_heads):
    x = embed(p["emb"], tokens)
    for lp in p["layers"]:
        x = decoder_layer_apply(lp, x, e_mem, e_bias, d_bias, h_mem, h_bias, n_heads)
    return x  # final LayerNorm fused into the generator+CE kernel


def hist_model_forward(params, hist, x, y, cfg):
    # shift_y
    y_in, label = y[:, :-1], y[:, 1:]
    nh = cfg["n_heads"]
    # additive masks (finite large-negative; key padding as [B,1,T], causal [1,S,S])
    h_bias = jnp.where(hist == cfg["pad_id"], NEG_BIAS, 0.0).astype(jnp.float32)[:, None, :]
    e_bias = jnp.where(x == cfg["pad_id"], NEG_BIAS, 0.0).astype(jnp.float32)[:, None, :]
    T = y_in.shape[1]
    d_bias = jnp.triu(jnp.full((T, T), NEG_BIAS, jnp.float32), k=1)[None, :, :]
    # encoders (hist_model='std', enc_fuse=False) / decoder (dec_fuse=True)
    h_mem = run_encoder(params["hist_encoder"], hist, h_bias, nh)
    e_mem = run_encoder(params["encoder"], x, e_bias, nh)
    d_out = run_decoder(params["decoder"], y_in, e_mem, e_bias, d_bias, h_mem, h_bias, nh)
    # fused: decoder final norm + generator + CrossEntropyLoss (mean reduction)
    logit, loss = generator_loss(d_out, params["decoder"]["norm"],
                                 params["generator"], label, cfg["vocab_size"])
    return logit, loss


# ----------------------------- deterministic parameter init -----------------------------

def sinusoidal_pe(max_len, d):
    pos = np.arange(max_len)[:, None].astype(np.float32)
    i = np.arange(d)[None, :].astype(np.float32)
    angle = pos / np.power(10000.0, (2.0 * np.floor(i / 2.0)) / d)
    pe = np.where((np.arange(d)[None, :] % 2) == 0, np.sin(angle), np.cos(angle))
    return jnp.asarray(pe, jnp.float32)


def _normal(key, shape, std=0.02):
    return std * jax.random.normal(key, shape, jnp.float32)


def init_norm(D):
    return {"g": jnp.ones((1, D), jnp.float32), "b": jnp.zeros((1, D), jnp.float32)}


def init_mha(key, E):
    kq, kk, kv, ko = jax.random.split(key, 4)
    wk = _normal(kk, (E, E))
    wv = _normal(kv, (E, E))
    return {
        "wq": _normal(kq, (E, E)).astype(jnp.bfloat16),
        "bq": jnp.zeros((1, E), jnp.float32),
        "wkv": jnp.concatenate([wk, wv], axis=1).astype(jnp.bfloat16),  # fused K/V
        "bkv": jnp.zeros((1, 2 * E), jnp.float32),
        "wo": _normal(ko, (E, E)),              # f32: per-head row slices stay 8-aligned
        "bo": jnp.zeros((1, E), jnp.float32),
    }


def init_pff(key, E, F):
    k1, k2 = jax.random.split(key)
    return {"w1": _normal(k1, (E, F)).astype(jnp.bfloat16),
            "b1": jnp.zeros((1, F), jnp.float32),
            "w2": _normal(k2, (F, E)).astype(jnp.bfloat16),
            "b2": jnp.zeros((1, E), jnp.float32)}


def init_emb(key, V, E, max_len):
    return {"table": _normal(key, (V, E)), "pe": sinusoidal_pe(max_len, E)}


def init_encoder_layer(key, E, F):
    k1, k2 = jax.random.split(key)
    return {"self_attn": init_mha(k1, E), "pff": init_pff(k2, E, F),
            "sub0": init_norm(E), "sub1": init_norm(E)}


def init_decoder_layer(key, E, F):
    k1, k2, k3, k4 = jax.random.split(key, 4)
    return {"self_attn": init_mha(k1, E), "cross_attn": init_mha(k2, E),
            "hist_attn": init_mha(k3, E), "pff": init_pff(k4, E, F),
            "sub0": init_norm(E), "sub1": init_norm(E),
            "sub2": init_norm(E), "sub3": init_norm(E)}


def init_encoder(key, cfg):
    keys = jax.random.split(key, cfg["n_layers"] + 1)
    return {"emb": init_emb(keys[0], cfg["vocab_size"], cfg["hidden_dim"], cfg["max_len"]),
            "layers": [init_encoder_layer(k, cfg["hidden_dim"], cfg["ff_dim"])
                       for k in keys[1:]],
            "norm": init_norm(cfg["hidden_dim"])}


def init_decoder(key, cfg):
    keys = jax.random.split(key, cfg["n_layers"] + 1)
    return {"emb": init_emb(keys[0], cfg["vocab_size"], cfg["hidden_dim"], cfg["max_len"]),
            "layers": [init_decoder_layer(k, cfg["hidden_dim"], cfg["ff_dim"])
                       for k in keys[1:]],
            "norm": init_norm(cfg["hidden_dim"])}


def init_model(key, cfg):
    k1, k2, k3, k4 = jax.random.split(key, 4)
    return {"hist_encoder": init_encoder(k1, cfg),
            "encoder": init_encoder(k2, cfg),
            "decoder": init_decoder(k3, cfg),
            "generator": {"w": _normal(k4, (cfg["hidden_dim"], cfg["vocab_size"])).astype(jnp.bfloat16),
                          "b": jnp.zeros((1, cfg["vocab_size"]), jnp.float32)}}


# ----------------------------- main -----------------------------

if __name__ == "__main__":
    cfg = dict(vocab_size=128, hidden_dim=32, n_heads=4, n_layers=2, ff_dim=64,
               pad_id=0, max_len=64, enc_fuse=False, dec_fuse=True, hist_model="std")

    key = jax.random.PRNGKey(0)
    kp, kh, kx, ky = jax.random.split(key, 4)
    params = init_model(kp, cfg)

    B, S_hist, S_src, S_tgt = 2, 8, 8, 9
    hist = jax.random.randint(kh, (B, S_hist), 1, cfg["vocab_size"], dtype=jnp.int32)
    x = jax.random.randint(kx, (B, S_src), 1, cfg["vocab_size"], dtype=jnp.int32)
    y = jax.random.randint(ky, (B, S_tgt), 1, cfg["vocab_size"], dtype=jnp.int32)
    # introduce some padding so the pad masks are non-trivial
    hist = hist.at[:, -1].set(cfg["pad_id"])
    x = x.at[:, -2:].set(cfg["pad_id"])

    fwd = jax.jit(lambda p, h, xx, yy: hist_model_forward(p, h, xx, yy, cfg))
    logit, loss = fwd(params, hist, x, y)
    jax.block_until_ready((logit, loss))

    assert logit.shape == (B, S_tgt - 1, cfg["vocab_size"])
    assert loss.shape == ()
    assert bool(jnp.isfinite(loss))
    print("KERNEL_OK")
</pallas_src>

<mosaic_0001>
module attributes {stable_mosaic.version = 11 : i64} {
  func.func @_attn_sublayer_kernel(%arg0: i32, %arg1: memref<1x8x32xf32, #tpu.memory_space<vmem>>, %arg2: memref<1x8x32xf32, #tpu.memory_space<vmem>>, %arg3: memref<1x32xf32, #tpu.memory_space<vmem>>, %arg4: memref<1x32xf32, #tpu.memory_space<vmem>>, %arg5: memref<32x32xbf16, #tpu.memory_space<vmem>>, %arg6: memref<1x32xf32, #tpu.memory_space<vmem>>, %arg7: memref<32x64xbf16, #tpu.memory_space<vmem>>, %arg8: memref<1x64xf32, #tpu.memory_space<vmem>>, %arg9: memref<32x32xf32, #tpu.memory_space<vmem>>, %arg10: memref<1x32xf32, #tpu.memory_space<vmem>>, %arg11: memref<1x8x8xf32, #tpu.memory_space<vmem>>, %arg12: memref<1x8x32xf32, #tpu.memory_space<vmem>>) attributes {dimension_semantics = [#tpu.dimension_semantics<parallel>], iteration_bounds = array<i64: 2>, scalar_prefetch = 0 : i64, scratch_operands = 0 : i64, tpu.core_type = #tpu.core_type<tc>, window_params = [{transform_indices = @transform_0, window_bounds = array<i64: 1, 8, 32>}, {transform_indices = @transform_1, window_bounds = array<i64: 1, 8, 32>}, {pipeline_mode = #tpu.pipeline_mode<synchronous>, transform_indices = @transform_2, window_bounds = array<i64: 1, 32>}, {pipeline_mode = #tpu.pipeline_mode<synchronous>, transform_indices = @transform_3, window_bounds = array<i64: 1, 32>}, {pipeline_mode = #tpu.pipeline_mode<synchronous>, transform_indices = @transform_4, window_bounds = array<i64: 32, 32>}, {pipeline_mode = #tpu.pipeline_mode<synchronous>, transform_indices = @transform_5, window_bounds = array<i64: 1, 32>}, {pipeline_mode = #tpu.pipeline_mode<synchronous>, transform_indices = @transform_6, window_bounds = array<i64: 32, 64>}, {pipeline_mode = #tpu.pipeline_mode<synchronous>, transform_indices = @transform_7, window_bounds = array<i64: 1, 64>}, {pipeline_mode = #tpu.pipeline_mode<synchronous>, transform_indices = @transform_8, window_bounds = array<i64: 32, 32>}, {pipeline_mode = #tpu.pipeline_mode<synchronous>, transform_indices = @transform_9, window_bounds = array<i64: 1, 32>}, {pipeline_mode = #tpu.pipeline_mode<synchronous>, transform_indices = @transform_10, window_bounds = array<i64: 1, 8, 8>}, {transform_indices = @transform_11, window_bounds = array<i64: 1, 8, 32>}]} {
    %c0 = arith.constant 0 : index
    %c0_0 = arith.constant 0 : index
    %c0_1 = arith.constant 0 : index
    %0 = vector.load %arg1[%c0, %c0_0, %c0_1] : memref<1x8x32xf32, #tpu.memory_space<vmem>>, vector<1x8x32xf32>
    %1 = vector.shape_cast %0 : vector<1x8x32xf32> to vector<8x32xf32>
    %c0_2 = arith.constant 0 : index
    %c0_3 = arith.constant 0 : index
    %2 = vector.load %arg3[%c0_2, %c0_3] : memref<1x32xf32, #tpu.memory_space<vmem>>, vector<1x32xf32>
    %c0_4 = arith.constant 0 : index
    %c0_5 = arith.constant 0 : index
    %3 = vector.load %arg4[%c0_4, %c0_5] : memref<1x32xf32, #tpu.memory_space<vmem>>, vector<1x32xf32>
    %cst = arith.constant dense<0.000000e+00> : vector<8xf32>
    %4 = vector.multi_reduction <add>, %1, %cst [1] : vector<8x32xf32> to vector<8xf32>
    %5 = vector.shape_cast %4 : vector<8xf32> to vector<8x1xf32>
    %cst_6 = arith.constant 3.200000e+01 : f32
    %6 = vector.broadcast %cst_6 : f32 to vector<8x1xf32>
    %7 = arith.divf %5, %6 : vector<8x1xf32>
    %8 = vector.broadcast %7 : vector<8x1xf32> to vector<8x32xf32>
    %9 = arith.subf %1, %8 : vector<8x32xf32>
    %10 = arith.mulf %9, %9 : vector<8x32xf32>
    %cst_7 = arith.constant dense<0.000000e+00> : vector<8xf32>
    %11 = vector.multi_reduction <add>, %10, %cst_7 [1] : vector<8x32xf32> to vector<8xf32>
    %12 = vector.shape_cast %11 : vector<8xf32> to vector<8x1xf32>
    %cst_8 = arith.constant 3.200000e+01 : f32
    %13 = vector.broadcast %cst_8 : f32 to vector<8x1xf32>
    %14 = arith.divf %12, %13 : vector<8x1xf32>
    %cst_9 = arith.constant 9.99999974E-6 : f32
    %15 = vector.broadcast %cst_9 : f32 to vector<8x1xf32>
    %16 = arith.addf %14, %15 : vector<8x1xf32>
    %17 = math.rsqrt %16 : vector<8x1xf32>
    %18 = vector.broadcast %17 : vector<8x1xf32> to vector<8x32xf32>
    %19 = arith.mulf %9, %18 : vector<8x32xf32>
    %20 = vector.broadcast %2 : vector<1x32xf32> to vector<8x32xf32>
    %21 = arith.mulf %19, %20 : vector<8x32xf32>
    %22 = vector.broadcast %3 : vector<1x32xf32> to vector<8x32xf32>
    %23 = arith.addf %21, %22 : vector<8x32xf32>
    %24 = arith.truncf %23 : vector<8x32xf32> to vector<8x32xbf16>
    %c0_10 = arith.constant 0 : index
    %c0_11 = arith.constant 0 : index
    %25 = vector.load %arg5[%c0_10, %c0_11] : memref<32x32xbf16, #tpu.memory_space<vmem>>, vector<32x32xbf16>
    %cst_12 = arith.constant dense<0.000000e+00> : vector<8x32xf32>
    %26 = tpu.matmul %24, %25, %cst_12 {dimension_numbers = #tpu.dot_dimension_numbers<[1], [0], [0], [1], [0, 0, 1, 1], [], []>} : vector<8x32xbf16>, vector<32x32xbf16>, vector<8x32xf32> -> vector<8x32xf32>
    %c0_13 = arith.constant 0 : index
    %c0_14 = arith.constant 0 : index
    %27 = vector.load %arg6[%c0_13, %c0_14] : memref<1x32xf32, #tpu.memory_space<vmem>>, vector<1x32xf32>
    %28 = vector.broadcast %27 : vector<1x32xf32> to vector<8x32xf32>
    %29 = arith.addf %26, %28 : vector<8x32xf32>
    %30 = arith.truncf %23 : vector<8x32xf32> to vector<8x32xbf16>
    %c0_15 = arith.constant 0 : index
    %c0_16 = arith.constant 0 : index
    %31 = vector.load %arg7[%c0_15, %c0_16] : memref<32x64xbf16, #tpu.memory_space<vmem>>, vector<32x64xbf16>
    %cst_17 = arith.constant dense<0.000000e+00> : vector<8x64xf32>
    %32 = tpu.matmul %30, %31, %cst_17 {dimension_numbers = #tpu.dot_dimension_numbers<[1], [0], [0], [1], [0, 0, 1, 1], [], []>} : vector<8x32xbf16>, vector<32x64xbf16>, vector<8x64xf32> -> vector<8x64xf32>
    %c0_18 = arith.constant 0 : index
    %c0_19 = arith.constant 0 : index
    %33 = vector.load %arg8[%c0_18, %c0_19] : memref<1x64xf32, #tpu.memory_space<vmem>>, vector<1x64xf32>
    %34 = vector.broadcast %33 : vector<1x64xf32> to vector<8x64xf32>
    %35 = arith.addf %32, %34 : vector<8x64xf32>
    %36 = vector.extract_strided_slice %35 {offsets = [0, 0], sizes = [8, 32], strides = [1, 1]} : vector<8x64xf32> to vector<8x32xf32>
    %37 = vector.extract_strided_slice %35 {offsets = [0, 32], sizes = [8, 32], strides = [1, 1]} : vector<8x64xf32> to vector<8x32xf32>
    %c0_20 = arith.constant 0 : index
    %c0_21 = arith.constant 0 : index
    %c0_22 = arith.constant 0 : index
    %38 = vector.load %arg11[%c0_20, %c0_21, %c0_22] : memref<1x8x8xf32, #tpu.memory_space<vmem>>, vector<1x8x8xf32>
    %39 = vector.shape_cast %38 : vector<1x8x8xf32> to vector<8x8xf32>
    %cst_23 = arith.constant 0.000000e+00 : f32
    %40 = vector.broadcast %cst_23 : f32 to vector<8x32xf32>
    %41 = vector.extract_strided_slice %29 {offsets = [0, 0], sizes = [8, 8], strides = [1, 1]} : vector<8x32xf32> to vector<8x8xf32>
    %42 = arith.truncf %41 : vector<8x8xf32> to vector<8x8xbf16>
    %43 = vector.extract_strided_slice %36 {offsets = [0, 0], sizes = [8, 8], strides = [1, 1]} : vector<8x32xf32> to vector<8x8xf32>
    %44 = arith.truncf %43 : vector<8x8xf32> to vector<8x8xbf16>
    %45 = vector.extract_strided_slice %37 {offsets = [0, 0], sizes = [8, 8], strides = [1, 1]} : vector<8x32xf32> to vector<8x8xf32>
    %46 = arith.truncf %45 : vector<8x8xf32> to vector<8x8xbf16>
    %cst_24 = arith.constant dense<0.000000e+00> : vector<8x8xf32>
    %47 = tpu.matmul %42, %44, %cst_24 {dimension_numbers = #tpu.dot_dimension_numbers<[1], [1], [0], [0], [0, 0, 1, 0], [], []>} : vector<8x8xbf16>, vector<8x8xbf16>, vector<8x8xf32> -> vector<8x8xf32>
    %cst_25 = arith.constant 0.353553385 : f32
    %48 = vector.broadcast %cst_25 : f32 to vector<8x8xf32>
    %49 = arith.mulf %47, %48 : vector<8x8xf32>
    %50 = arith.addf %49, %39 : vector<8x8xf32>
    %cst_26 = arith.constant dense<0xFF800000> : vector<8xf32>
    %51 = vector.multi_reduction <maximumf>, %50, %cst_26 [1] : vector<8x8xf32> to vector<8xf32>
    %52 = vector.shape_cast %51 : vector<8xf32> to vector<8x1xf32>
    %53 = vector.broadcast %52 : vector<8x1xf32> to vector<8x8xf32>
    %54 = arith.subf %50, %53 : vector<8x8xf32>
    %55 = math.exp %54 : vector<8x8xf32>
    %cst_27 = arith.constant dense<0.000000e+00> : vector<8xf32>
    %56 = vector.multi_reduction <add>, %55, %cst_27 [1] : vector<8x8xf32> to vector<8xf32>
    %57 = vector.shape_cast %56 : vector<8xf32> to vector<8x1xf32>
    %58 = tpu.reciprocal %57 {approx = true} : vector<8x1xf32> -> vector<8x1xf32>
    %59 = vector.broadcast %58 : vector<8x1xf32> to vector<8x8xf32>
    %60 = arith.mulf %55, %59 : vector<8x8xf32>
    %61 = arith.truncf %60 : vector<8x8xf32> to vector<8x8xbf16>
    %cst_28 = arith.constant dense<0.000000e+00> : vector<8x8xf32>
    %62 = tpu.matmul %61, %46, %cst_28 {dimension_numbers = #tpu.dot_dimension_numbers<[1], [0], [0], [1], [0, 0, 1, 1], [], []>} : vector<8x8xbf16>, vector<8x8xbf16>, vector<8x8xf32> -> vector<8x8xf32>
    %c0_29 = arith.constant 0 : index
    %c0_30 = arith.constant 0 : index
    %63 = vector.load %arg9[%c0_29, %c0_30] : memref<32x32xf32, #tpu.memory_space<vmem>>, vector<8x32xf32>
    %64 = arith.truncf %63 : vector<8x32xf32> to vector<8x32xbf16>
    %65 = arith.truncf %62 : vector<8x8xf32> to vector<8x8xbf16>
    %cst_31 = arith.constant dense<0.000000e+00> : vector<8x32xf32>
    %66 = tpu.matmul %65, %64, %cst_31 {dimension_numbers = #tpu.dot_dimension_numbers<[1], [0], [0], [1], [0, 0, 1, 1], [], []>} : vector<8x8xbf16>, vector<8x32xbf16>, vector<8x32xf32> -> vector<8x32xf32>
    %67 = arith.addf %40, %66 : vector<8x32xf32>
    %68 = vector.extract_strided_slice %29 {offsets = [0, 8], sizes = [8, 8], strides = [1, 1]} : vector<8x32xf32> to vector<8x8xf32>
    %69 = arith.truncf %68 : vector<8x8xf32> to vector<8x8xbf16>
    %70 = vector.extract_strided_slice %36 {offsets = [0, 8], sizes = [8, 8], strides = [1, 1]} : vector<8x32xf32> to vector<8x8xf32>
    %71 = arith.truncf %70 : vector<8x8xf32> to vector<8x8xbf16>
    %72 = vector.extract_strided_slice %37 {offsets = [0, 8], sizes = [8, 8], strides = [1, 1]} : vector<8x32xf32> to vector<8x8xf32>
    %73 = arith.truncf %72 : vector<8x8xf32> to vector<8x8xbf16>
    %cst_32 = arith.constant dense<0.000000e+00> : vector<8x8xf32>
    %74 = tpu.matmul %69, %71, %cst_32 {dimension_numbers = #tpu.dot_dimension_numbers<[1], [1], [0], [0], [0, 0, 1, 0], [], []>} : vector<8x8xbf16>, vector<8x8xbf16>, vector<8x8xf32> -> vector<8x8xf32>
    %cst_33 = arith.constant 0.353553385 : f32
    %75 = vector.broadcast %cst_33 : f32 to vector<8x8xf32>
    %76 = arith.mulf %74, %75 : vector<8x8xf32>
    %77 = arith.addf %76, %39 : vector<8x8xf32>
    %cst_34 = arith.constant dense<0xFF800000> : vector<8xf32>
    %78 = vector.multi_reduction <maximumf>, %77, %cst_34 [1] : vector<8x8xf32> to vector<8xf32>
    %79 = vector.shape_cast %78 : vector<8xf32> to vector<8x1xf32>
    %80 = vector.broadcast %79 : vector<8x1xf32> to vector<8x8xf32>
    %81 = arith.subf %77, %80 : vector<8x8xf32>
    %82 = math.exp %81 : vector<8x8xf32>
    %cst_35 = arith.constant dense<0.000000e+00> : vector<8xf32>
    %83 = vector.multi_reduction <add>, %82, %cst_35 [1] : vector<8x8xf32> to vector<8xf32>
    %84 = vector.shape_cast %83 : vector<8xf32> to vector<8x1xf32>
    %85 = tpu.reciprocal %84 {approx = true} : vector<8x1xf32> -> vector<8x1xf32>
    %86 = vector.broadcast %85 : vector<8x1xf32> to vector<8x8xf32>
    %87 = arith.mulf %82, %86 : vector<8x8xf32>
    %88 = arith.truncf %87 : vector<8x8xf32> to vector<8x8xbf16>
    %cst_36 = arith.constant dense<0.000000e+00> : vector<8x8xf32>
    %89 = tpu.matmul %88, %73, %cst_36 {dimension_numbers = #tpu.dot_dimension_numbers<[1], [0], [0], [1], [0, 0, 1, 1], [], []>} : vector<8x8xbf16>, vector<8x8xbf16>, vector<8x8xf32> -> vector<8x8xf32>
    %c8 = arith.constant 8 : index
    %c0_37 = arith.constant 0 : index
    %90 = vector.load %arg9[%c8, %c0_37] : memref<32x32xf32, #tpu.memory_space<vmem>>, vector<8x32xf32>
    %91 = arith.truncf %90 : vector<8x32xf32> to vector<8x32xbf16>
    %92 = arith.truncf %89 : vector<8x8xf32> to vector<8x8xbf16>
    %cst_38 = arith.constant dense<0.000000e+00> : vector<8x32xf32>
    %93 = tpu.matmul %92, %91, %cst_38 {dimension_numbers = #tpu.dot_dimension_numbers<[1], [0], [0], [1], [0, 0, 1, 1], [], []>} : vector<8x8xbf16>, vector<8x32xbf16>, vector<8x32xf32> -> vector<8x32xf32>
    %94 = arith.addf %67, %93 : vector<8x32xf32>
    %95 = vector.extract_strided_slice %29 {offsets = [0, 16], sizes = [8, 8], strides = [1, 1]} : vector<8x32xf32> to vector<8x8xf32>
    %96 = arith.truncf %95 : vector<8x8xf32> to vector<8x8xbf16>
    %97 = vector.extract_strided_slice %36 {offsets = [0, 16], sizes = [8, 8], strides = [1, 1]} : vector<8x32xf32> to vector<8x8xf32>
    %98 = arith.truncf %97 : vector<8x8xf32> to vector<8x8xbf16>
    %99 = vector.extract_strided_slice %37 {offsets = [0, 16], sizes = [8, 8], strides = [1, 1]} : vector<8x32xf32> to vector<8x8xf32>
    %100 = arith.truncf %99 : vector<8x8xf32> to vector<8x8xbf16>
    %cst_39 = arith.constant dense<0.000000e+00> : vector<8x8xf32>
    %101 = tpu.matmul %96, %98, %cst_39 {dimension_numbers = #tpu.dot_dimension_numbers<[1], [1], [0], [0], [0, 0, 1, 0], [], []>} : vector<8x8xbf16>, vector<8x8xbf16>, vector<8x8xf32> -> vector<8x8xf32>
    %cst_40 = arith.constant 0.353553385 : f32
    %102 = vector.broadcast %cst_40 : f32 to vector<8x8xf32>
    %103 = arith.mulf %101, %102 : vector<8x8xf32>
    %104 = arith.addf %103, %39 : vector<8x8xf32>
    %cst_41 = arith.constant dense<0xFF800000> : vector<8xf32>
    %105 = vector.multi_reduction <maximumf>, %104, %cst_41 [1] : vector<8x8xf32> to vector<8xf32>
    %106 = vector.shape_cast %105 : vector<8xf32> to vector<8x1xf32>
    %107 = vector.broadcast %106 : vector<8x1xf32> to vector<8x8xf32>
    %108 = arith.subf %104, %107 : vector<8x8xf32>
    %109 = math.exp %108 : vector<8x8xf32>
    %cst_42 = arith.constant dense<0.000000e+00> : vector<8xf32>
    %110 = vector.multi_reduction <add>, %109, %cst_42 [1] : vector<8x8xf32> to vector<8xf32>
    %111 = vector.shape_cast %110 : vector<8xf32> to vector<8x1xf32>
    %112 = tpu.reciprocal %111 {approx = true} : vector<8x1xf32> -> vector<8x1xf32>
    %113 = vector.broadcast %112 : vector<8x1xf32> to vector<8x8xf32>
    %114 = arith.mulf %109, %113 : vector<8x8xf32>
    %115 = arith.truncf %114 : vector<8x8xf32> to vector<8x8xbf16>
    %cst_43 = arith.constant dense<0.000000e+00> : vector<8x8xf32>
    %116 = tpu.matmul %115, %100, %cst_43 {dimension_numbers = #tpu.dot_dimension_numbers<[1], [0], [0], [1], [0, 0, 1, 1], [], []>} : vector<8x8xbf16>, vector<8x8xbf16>, vector<8x8xf32> -> vector<8x8xf32>
    %c16 = arith.constant 16 : index
    %c0_44 = arith.constant 0 : index
    %117 = vector.load %arg9[%c16, %c0_44] : memref<32x32xf32, #tpu.memory_space<vmem>>, vector<8x32xf32>
    %118 = arith.truncf %117 : vector<8x32xf32> to vector<8x32xbf16>
    %119 = arith.truncf %116 : vector<8x8xf32> to vector<8x8xbf16>
    %cst_45 = arith.constant dense<0.000000e+00> : vector<8x32xf32>
    %120 = tpu.matmul %119, %118, %cst_45 {dimension_numbers = #tpu.dot_dimension_numbers<[1], [0], [0], [1], [0, 0, 1, 1], [], []>} : vector<8x8xbf16>, vector<8x32xbf16>, vector<8x32xf32> -> vector<8x32xf32>
    %121 = arith.addf %94, %120 : vector<8x32xf32>
    %122 = vector.extract_strided_slice %29 {offsets = [0, 24], sizes = [8, 8], strides = [1, 1]} : vector<8x32xf32> to vector<8x8xf32>
    %123 = arith.truncf %122 : vector<8x8xf32> to vector<8x8xbf16>
    %124 = vector.extract_strided_slice %36 {offsets = [0, 24], sizes = [8, 8], strides = [1, 1]} : vector<8x32xf32> to vector<8x8xf32>
    %125 = arith.truncf %124 : vector<8x8xf32> to vector<8x8xbf16>
    %126 = vector.extract_strided_slice %37 {offsets = [0, 24], sizes = [8, 8], strides = [1, 1]} : vector<8x32xf32> to vector<8x8xf32>
    %127 = arith.truncf %126 : vector<8x8xf32> to vector<8x8xbf16>
    %cst_46 = arith.constant dense<0.000000e+00> : vector<8x8xf32>
    %128 = tpu.matmul %123, %125, %cst_46 {dimension_numbers = #tpu.dot_dimension_numbers<[1], [1], [0], [0], [0, 0, 1, 0], [], []>} : vector<8x8xbf16>, vector<8x8xbf16>, vector<8x8xf32> -> vector<8x8xf32>
    %cst_47 = arith.constant 0.353553385 : f32
    %129 = vector.broadcast %cst_47 : f32 to vector<8x8xf32>
    %130 = arith.mulf %128, %129 : vector<8x8xf32>
    %131 = arith.addf %130, %39 : vector<8x8xf32>
    %cst_48 = arith.constant dense<0xFF800000> : vector<8xf32>
    %132 = vector.multi_reduction <maximumf>, %131, %cst_48 [1] : vector<8x8xf32> to vector<8xf32>
    %133 = vector.shape_cast %132 : vector<8xf32> to vector<8x1xf32>
    %134 = vector.broadcast %133 : vector<8x1xf32> to vector<8x8xf32>
    %135 = arith.subf %131, %134 : vector<8x8xf32>
    %136 = math.exp %135 : vector<8x8xf32>
    %cst_49 = arith.constant dense<0.000000e+00> : vector<8xf32>
    %137 = vector.multi_reduction <add>, %136, %cst_49 [1] : vector<8x8xf32> to vector<8xf32>
    %138 = vector.shape_cast %137 : vector<8xf32> to vector<8x1xf32>
    %139 = tpu.reciprocal %138 {approx = true} : vector<8x1xf32> -> vector<8x1xf32>
    %140 = vector.broadcast %139 : vector<8x1xf32> to vector<8x8xf32>
    %141 = arith.mulf %136, %140 : vector<8x8xf32>
    %142 = arith.truncf %141 : vector<8x8xf32> to vector<8x8xbf16>
    %cst_50 = arith.constant dense<0.000000e+00> : vector<8x8xf32>
    %143 = tpu.matmul %142, %127, %cst_50 {dimension_numbers = #tpu.dot_dimension_numbers<[1], [0], [0], [1], [0, 0, 1, 1], [], []>} : vector<8x8xbf16>, vector<8x8xbf16>, vector<8x8xf32> -> vector<8x8xf32>
    %c24 = arith.constant 24 : index
    %c0_51 = arith.constant 0 : index
    %144 = vector.load %arg9[%c24, %c0_51] : memref<32x32xf32, #tpu.memory_space<vmem>>, vector<8x32xf32>
    %145 = arith.truncf %144 : vector<8x32xf32> to vector<8x32xbf16>
    %146 = arith.truncf %143 : vector<8x8xf32> to vector<8x8xbf16>
    %cst_52 = arith.constant dense<0.000000e+00> : vector<8x32xf32>
    %147 = tpu.matmul %146, %145, %cst_52 {dimension_numbers = #tpu.dot_dimension_numbers<[1], [0], [0], [1], [0, 0, 1, 1], [], []>} : vector<8x8xbf16>, vector<8x32xbf16>, vector<8x32xf32> -> vector<8x32xf32>
    %148 = arith.addf %121, %147 : vector<8x32xf32>
    %149 = arith.addf %1, %148 : vector<8x32xf32>
    %c0_53 = arith.constant 0 : index
    %c0_54 = arith.constant 0 : index
    %150 = vector.load %arg10[%c0_53, %c0_54] : memref<1x32xf32, #tpu.memory_space<vmem>>, vector<1x32xf32>
    %151 = vector.broadcast %150 : vector<1x32xf32> to vector<8x32xf32>
    %152 = arith.addf %149, %151 : vector<8x32xf32>
    %c0_55 = arith.constant 0 : index
    %c0_56 = arith.constant 0 : index
    %c0_57 = arith.constant 0 : index
    %153 = vector.load %arg12[%c0_55, %c0_56, %c0_57] : memref<1x8x32xf32, #tpu.memory_space<vmem>>, vector<1x8x32xf32>
    %154 = vector.shape_cast %153 : vector<1x8x32xf32> to vector<8x32xf32>
    %155 = vector.shape_cast %152 : vector<8x32xf32> to vector<1x8x32xf32>
    tpu.vector_store %arg12[%c0_55, %c0_56, %c0_57], %155 {strides = array<i32>} : memref<1x8x32xf32, #tpu.memory_space<vmem>>, vector<1x8x32xf32>,
    return
  }
  func.func @transform_0(%arg0: i32) -> (i32, i32, i32) {
    %c0_i32 = arith.constant 0 : i32
    %c0_i32_0 = arith.constant 0 : i32
    %c0_i32_1 = arith.constant 0 : i32
    return %arg0, %c0_i32, %c0_i32_0 : i32, i32, i32
  }
  func.func @transform_1(%arg0: i32) -> (i32, i32, i32) {
    %c0_i32 = arith.constant 0 : i32
    %c0_i32_0 = arith.constant 0 : i32
    %c0_i32_1 = arith.constant 0 : i32
    return %arg0, %c0_i32, %c0_i32_0 : i32, i32, i32
  }
  func.func @transform_2(%arg0: i32) -> (i32, i32) {
    %c0_i32 = arith.constant 0 : i32
    %c0_i32_0 = arith.constant 0 : i32
    %c0_i32_1 = arith.constant 0 : i32
    return %c0_i32, %c0_i32_0 : i32, i32
  }
  func.func @transform_3(%arg0: i32) -> (i32, i32) {
    %c0_i32 = arith.constant 0 : i32
    %c0_i32_0 = arith.constant 0 : i32
    %c0_i32_1 = arith.constant 0 : i32
    return %c0_i32, %c0_i32_0 : i32, i32
  }
  func.func @transform_4(%arg0: i32) -> (i32, i32) {
    %c0_i32 = arith.constant 0 : i32
    %c0_i32_0 = arith.constant 0 : i32
    %c0_i32_1 = arith.constant 0 : i32
    return %c0_i32, %c0_i32_0 : i32, i32
  }
  func.func @transform_5(%arg0: i32) -> (i32, i32) {
    %c0_i32 = arith.constant 0 : i32
    %c0_i32_0 = arith.constant 0 : i32
    %c0_i32_1 = arith.constant 0 : i32
    return %c0_i32, %c0_i32_0 : i32, i32
  }
  func.func @transform_6(%arg0: i32) -> (i32, i32) {
    %c0_i32 = arith.constant 0 : i32
    %c0_i32_0 = arith.constant 0 : i32
    %c0_i32_1 = arith.constant 0 : i32
    return %c0_i32, %c0_i32_0 : i32, i32
  }
  func.func @transform_7(%arg0: i32) -> (i32, i32) {
    %c0_i32 = arith.constant 0 : i32
    %c0_i32_0 = arith.constant 0 : i32
    %c0_i32_1 = arith.constant 0 : i32
    return %c0_i32, %c0_i32_0 : i32, i32
  }
  func.func @transform_8(%arg0: i32) -> (i32, i32) {
    %c0_i32 = arith.constant 0 : i32
    %c0_i32_0 = arith.constant 0 : i32
    %c0_i32_1 = arith.constant 0 : i32
    return %c0_i32, %c0_i32_0 : i32, i32
  }
  func.func @transform_9(%arg0: i32) -> (i32, i32) {
    %c0_i32 = arith.constant 0 : i32
    %c0_i32_0 = arith.constant 0 : i32
    %c0_i32_1 = arith.constant 0 : i32
    return %c0_i32, %c0_i32_0 : i32, i32
  }
  func.func @transform_10(%arg0: i32) -> (i32, i32, i32) {
    %c0_i32 = arith.constant 0 : i32
    %c0_i32_0 = arith.constant 0 : i32
    %c0_i32_1 = arith.constant 0 : i32
    %c0_i32_2 = arith.constant 0 : i32
    return %c0_i32, %c0_i32_0, %c0_i32_1 : i32, i32, i32
  }
  func.func @transform_11(%arg0: i32) -> (i32, i32, i32) {
    %c0_i32 = arith.constant 0 : i32
    %c0_i32_0 = arith.constant 0 : i32
    %c0_i32_1 = arith.constant 0 : i32
    return %arg0, %c0_i32, %c0_i32_0 : i32, i32, i32
  }
}

module attributes {stable_mosaic.version = 11 : i64} {
  func.func @_ffn_sublayer_kernel(%arg0: i32, %arg1: memref<1x8x32xf32, #tpu.memory_space<vmem>>, %arg2: memref<1x32xf32, #tpu.memory_space<vmem>>, %arg3: memref<1x32xf32, #tpu.memory_space<vmem>>, %arg4: memref<32x64xbf16, #tpu.memory_space<vmem>>, %arg5: memref<1x64xf32, #tpu.memory_space<vmem>>, %arg6: memref<64x32xbf16, #tpu.memory_space<vmem>>, %arg7: memref<1x32xf32, #tpu.memory_space<vmem>>, %arg8: memref<1x8x32xf32, #tpu.memory_space<vmem>>) attributes {dimension_semantics = [#tpu.dimension_semantics<parallel>], iteration_bounds = array<i64: 2>, scalar_prefetch = 0 : i64, scratch_operands = 0 : i64, tpu.core_type = #tpu.core_type<tc>, window_params = [{transform_indices = @transform_0, window_bounds = array<i64: 1, 8, 32>}, {pipeline_mode = #tpu.pipeline_mode<synchronous>, transform_indices = @transform_1, window_bounds = array<i64: 1, 32>}, {pipeline_mode = #tpu.pipeline_mode<synchronous>, transform_indices = @transform_2, window_bounds = array<i64: 1, 32>}, {pipeline_mode = #tpu.pipeline_mode<synchronous>, transform_indices = @transform_3, window_bounds = array<i64: 32, 64>}, {pipeline_mode = #tpu.pipeline_mode<synchronous>, transform_indices = @transform_4, window_bounds = array<i64: 1, 64>}, {pipeline_mode = #tpu.pipeline_mode<synchronous>, transform_indices = @transform_5, window_bounds = array<i64: 64, 32>}, {pipeline_mode = #tpu.pipeline_mode<synchronous>, transform_indices = @transform_6, window_bounds = array<i64: 1, 32>}, {transform_indices = @transform_7, window_bounds = array<i64: 1, 8, 32>}]} {
    %c0 = arith.constant 0 : index
    %c0_0 = arith.constant 0 : index
    %c0_1 = arith.constant 0 : index
    %0 = vector.load %arg1[%c0, %c0_0, %c0_1] : memref<1x8x32xf32, #tpu.memory_space<vmem>>, vector<1x8x32xf32>
    %1 = vector.shape_cast %0 : vector<1x8x32xf32> to vector<8x32xf32>
    %cst = arith.constant dense<0.000000e+00> : vector<8xf32>
    %2 = vector.multi_reduction <add>, %1, %cst [1] : vector<8x32xf32> to vector<8xf32>
    %3 = vector.shape_cast %2 : vector<8xf32> to vector<8x1xf32>
    %cst_2 = arith.constant 3.200000e+01 : f32
    %4 = vector.broadcast %cst_2 : f32 to vector<8x1xf32>
    %5 = arith.divf %3, %4 : vector<8x1xf32>
    %6 = vector.broadcast %5 : vector<8x1xf32> to vector<8x32xf32>
    %7 = arith.subf %1, %6 : vector<8x32xf32>
    %8 = arith.mulf %7, %7 : vector<8x32xf32>
    %cst_3 = arith.constant dense<0.000000e+00> : vector<8xf32>
    %9 = vector.multi_reduction <add>, %8, %cst_3 [1] : vector<8x32xf32> to vector<8xf32>
    %10 = vector.shape_cast %9 : vector<8xf32> to vector<8x1xf32>
    %cst_4 = arith.constant 3.200000e+01 : f32
    %11 = vector.broadcast %cst_4 : f32 to vector<8x1xf32>
    %12 = arith.divf %10, %11 : vector<8x1xf32>
    %cst_5 = arith.constant 9.99999974E-6 : f32
    %13 = vector.broadcast %cst_5 : f32 to vector<8x1xf32>
    %14 = arith.addf %12, %13 : vector<8x1xf32>
    %15 = math.rsqrt %14 : vector<8x1xf32>
    %16 = vector.broadcast %15 : vector<8x1xf32> to vector<8x32xf32>
    %17 = arith.mulf %7, %16 : vector<8x32xf32>
    %c0_6 = arith.constant 0 : index
    %c0_7 = arith.constant 0 : index
    %18 = vector.load %arg2[%c0_6, %c0_7] : memref<1x32xf32, #tpu.memory_space<vmem>>, vector<1x32xf32>
    %19 = vector.broadcast %18 : vector<1x32xf32> to vector<8x32xf32>
    %20 = arith.mulf %17, %19 : vector<8x32xf32>
    %c0_8 = arith.constant 0 : index
    %c0_9 = arith.constant 0 : index
    %21 = vector.load %arg3[%c0_8, %c0_9] : memref<1x32xf32, #tpu.memory_space<vmem>>, vector<1x32xf32>
    %22 = vector.broadcast %21 : vector<1x32xf32> to vector<8x32xf32>
    %23 = arith.addf %20, %22 : vector<8x32xf32>
    %24 = arith.truncf %23 : vector<8x32xf32> to vector<8x32xbf16>
    %c0_10 = arith.constant 0 : index
    %c0_11 = arith.constant 0 : index
    %25 = vector.load %arg4[%c0_10, %c0_11] : memref<32x64xbf16, #tpu.memory_space<vmem>>, vector<32x64xbf16>
    %cst_12 = arith.constant dense<0.000000e+00> : vector<8x64xf32>
    %26 = tpu.matmul %24, %25, %cst_12 {dimension_numbers = #tpu.dot_dimension_numbers<[1], [0], [0], [1], [0, 0, 1, 1], [], []>} : vector<8x32xbf16>, vector<32x64xbf16>, vector<8x64xf32> -> vector<8x64xf32>
    %c0_13 = arith.constant 0 : index
    %c0_14 = arith.constant 0 : index
    %27 = vector.load %arg5[%c0_13, %c0_14] : memref<1x64xf32, #tpu.memory_space<vmem>>, vector<1x64xf32>
    %28 = vector.broadcast %27 : vector<1x64xf32> to vector<8x64xf32>
    %29 = arith.addf %26, %28 : vector<8x64xf32>
    %cst_15 = arith.constant 0.000000e+00 : f32
    %30 = vector.broadcast %cst_15 : f32 to vector<8x64xf32>
    %31 = arith.maximumf %29, %30 : vector<8x64xf32>
    %32 = arith.truncf %31 : vector<8x64xf32> to vector<8x64xbf16>
    %c0_16 = arith.constant 0 : index
    %c0_17 = arith.constant 0 : index
    %33 = vector.load %arg6[%c0_16, %c0_17] : memref<64x32xbf16, #tpu.memory_space<vmem>>, vector<64x32xbf16>
    %cst_18 = arith.constant dense<0.000000e+00> : vector<8x32xf32>
    %34 = tpu.matmul %32, %33, %cst_18 {dimension_numbers = #tpu.dot_dimension_numbers<[1], [0], [0], [1], [0, 0, 1, 1], [], []>} : vector<8x64xbf16>, vector<64x32xbf16>, vector<8x32xf32> -> vector<8x32xf32>
    %c0_19 = arith.constant 0 : index
    %c0_20 = arith.constant 0 : index
    %35 = vector.load %arg7[%c0_19, %c0_20] : memref<1x32xf32, #tpu.memory_space<vmem>>, vector<1x32xf32>
    %36 = vector.broadcast %35 : vector<1x32xf32> to vector<8x32xf32>
    %37 = arith.addf %34, %36 : vector<8x32xf32>
    %38 = arith.addf %1, %37 : vector<8x32xf32>
    %c0_21 = arith.constant 0 : index
    %c0_22 = arith.constant 0 : index
    %c0_23 = arith.constant 0 : index
    %39 = vector.load %arg8[%c0_21, %c0_22, %c0_23] : memref<1x8x32xf32, #tpu.memory_space<vmem>>, vector<1x8x32xf32>
    %40 = vector.shape_cast %39 : vector<1x8x32xf32> to vector<8x32xf32>
    %41 = vector.shape_cast %38 : vector<8x32xf32> to vector<1x8x32xf32>
    tpu.vector_store %arg8[%c0_21, %c0_22, %c0_23], %41 {strides = array<i32>} : memref<1x8x32xf32, #tpu.memory_space<vmem>>, vector<1x8x32xf32>,
    return
  }
  func.func @transform_0(%arg0: i32) -> (i32, i32, i32) {
    %c0_i32 = arith.constant 0 : i32
    %c0_i32_0 = arith.constant 0 : i32
    %c0_i32_1 = arith.constant 0 : i32
    return %arg0, %c0_i32, %c0_i32_0 : i32, i32, i32
  }
  func.func @transform_1(%arg0: i32) -> (i32, i32) {
    %c0_i32 = arith.constant 0 : i32
    %c0_i32_0 = arith.constant 0 : i32
    %c0_i32_1 = arith.constant 0 : i32
    return %c0_i32, %c0_i32_0 : i32, i32
  }
  func.func @transform_2(%arg0: i32) -> (i32, i32) {
    %c0_i32 = arith.constant 0 : i32
    %c0_i32_0 = arith.constant 0 : i32
    %c0_i32_1 = arith.constant 0 : i32
    return %c0_i32, %c0_i32_0 : i32, i32
  }
  func.func @transform_3(%arg0: i32) -> (i32, i32) {
    %c0_i32 = arith.constant 0 : i32
    %c0_i32_0 = arith.constant 0 : i32
    %c0_i32_1 = arith.constant 0 : i32
    return %c0_i32, %c0_i32_0 : i32, i32
  }
  func.func @transform_4(%arg0: i32) -> (i32, i32) {
    %c0_i32 = arith.constant 0 : i32
    %c0_i32_0 = arith.constant 0 : i32
    %c0_i32_1 = arith.constant 0 : i32
    return %c0_i32, %c0_i32_0 : i32, i32
  }
  func.func @transform_5(%arg0: i32) -> (i32, i32) {
    %c0_i32 = arith.constant 0 : i32
    %c0_i32_0 = arith.constant 0 : i32
    %c0_i32_1 = arith.constant 0 : i32
    return %c0_i32, %c0_i32_0 : i32, i32
  }
  func.func @transform_6(%arg0: i32) -> (i32, i32) {
    %c0_i32 = arith.constant 0 : i32
    %c0_i32_0 = arith.constant 0 : i32
    %c0_i32_1 = arith.constant 0 : i32
    return %c0_i32, %c0_i32_0 : i32, i32
  }
  func.func @transform_7(%arg0: i32) -> (i32, i32, i32) {
    %c0_i32 = arith.constant 0 : i32
    %c0_i32_0 = arith.constant 0 : i32
    %c0_i32_1 = arith.constant 0 : i32
    return %arg0, %c0_i32, %c0_i32_0 : i32, i32, i32
  }
}

module attributes {stable_mosaic.version = 11 : i64} {
  func.func @_layernorm_kernel(%arg0: i32, %arg1: memref<1x8x32xf32, #tpu.memory_space<vmem>>, %arg2: memref<1x32xf32, #tpu.memory_space<vmem>>, %arg3: memref<1x32xf32, #tpu.memory_space<vmem>>, %arg4: memref<1x8x32xf32, #tpu.memory_space<vmem>>) attributes {dimension_semantics = [#tpu.dimension_semantics<parallel>], iteration_bounds = array<i64: 2>, scalar_prefetch = 0 : i64, scratch_operands = 0 : i64, tpu.core_type = #tpu.core_type<tc>, window_params = [{transform_indices = @transform_0, window_bounds = array<i64: 1, 8, 32>}, {pipeline_mode = #tpu.pipeline_mode<synchronous>, transform_indices = @transform_1, window_bounds = array<i64: 1, 32>}, {pipeline_mode = #tpu.pipeline_mode<synchronous>, transform_indices = @transform_2, window_bounds = array<i64: 1, 32>}, {transform_indices = @transform_3, window_bounds = array<i64: 1, 8, 32>}]} {
    %c0 = arith.constant 0 : index
    %c0_0 = arith.constant 0 : index
    %c0_1 = arith.constant 0 : index
    %0 = vector.load %arg1[%c0, %c0_0, %c0_1] : memref<1x8x32xf32, #tpu.memory_space<vmem>>, vector<1x8x32xf32>
    %1 = vector.shape_cast %0 : vector<1x8x32xf32> to vector<8x32xf32>
    %cst = arith.constant dense<0.000000e+00> : vector<8xf32>
    %2 = vector.multi_reduction <add>, %1, %cst [1] : vector<8x32xf32> to vector<8xf32>
    %3 = vector.shape_cast %2 : vector<8xf32> to vector<8x1xf32>
    %cst_2 = arith.constant 3.200000e+01 : f32
    %4 = vector.broadcast %cst_2 : f32 to vector<8x1xf32>
    %5 = arith.divf %3, %4 : vector<8x1xf32>
    %6 = vector.broadcast %5 : vector<8x1xf32> to vector<8x32xf32>
    %7 = arith.subf %1, %6 : vector<8x32xf32>
    %8 = arith.mulf %7, %7 : vector<8x32xf32>
    %cst_3 = arith.constant dense<0.000000e+00> : vector<8xf32>
    %9 = vector.multi_reduction <add>, %8, %cst_3 [1] : vector<8x32xf32> to vector<8xf32>
    %10 = vector.shape_cast %9 : vector<8xf32> to vector<8x1xf32>
    %cst_4 = arith.constant 3.200000e+01 : f32
    %11 = vector.broadcast %cst_4 : f32 to vector<8x1xf32>
    %12 = arith.divf %10, %11 : vector<8x1xf32>
    %cst_5 = arith.constant 9.99999974E-6 : f32
    %13 = vector.broadcast %cst_5 : f32 to vector<8x1xf32>
    %14 = arith.addf %12, %13 : vector<8x1xf32>
    %15 = math.rsqrt %14 : vector<8x1xf32>
    %16 = vector.broadcast %15 : vector<8x1xf32> to vector<8x32xf32>
    %17 = arith.mulf %7, %16 : vector<8x32xf32>
    %c0_6 = arith.constant 0 : index
    %c0_7 = arith.constant 0 : index
    %18 = vector.load %arg2[%c0_6, %c0_7] : memref<1x32xf32, #tpu.memory_space<vmem>>, vector<1x32xf32>
    %19 = vector.broadcast %18 : vector<1x32xf32> to vector<8x32xf32>
    %20 = arith.mulf %17, %19 : vector<8x32xf32>
    %c0_8 = arith.constant 0 : index
    %c0_9 = arith.constant 0 : index
    %21 = vector.load %arg3[%c0_8, %c0_9] : memref<1x32xf32, #tpu.memory_space<vmem>>, vector<1x32xf32>
    %22 = vector.broadcast %21 : vector<1x32xf32> to vector<8x32xf32>
    %23 = arith.addf %20, %22 : vector<8x32xf32>
    %c0_10 = arith.constant 0 : index
    %c0_11 = arith.constant 0 : index
    %c0_12 = arith.constant 0 : index
    %24 = vector.load %arg4[%c0_10, %c0_11, %c0_12] : memref<1x8x32xf32, #tpu.memory_space<vmem>>, vector<1x8x32xf32>
    %25 = vector.shape_cast %24 : vector<1x8x32xf32> to vector<8x32xf32>
    %26 = vector.shape_cast %23 : vector<8x32xf32> to vector<1x8x32xf32>
    tpu.vector_store %arg4[%c0_10, %c0_11, %c0_12], %26 {strides = array<i32>} : memref<1x8x32xf32, #tpu.memory_space<vmem>>, vector<1x8x32xf32>,
    return
  }
  func.func @transform_0(%arg0: i32) -> (i32, i32, i32) {
    %c0_i32 = arith.constant 0 : i32
    %c0_i32_0 = arith.constant 0 : i32
    %c0_i32_1 = arith.constant 0 : i32
    return %arg0, %c0_i32, %c0_i32_0 : i32, i32, i32
  }
  func.func @transform_1(%arg0: i32) -> (i32, i32) {
    %c0_i32 = arith.constant 0 : i32
    %c0_i32_0 = arith.constant 0 : i32
    %c0_i32_1 = arith.constant 0 : i32
    return %c0_i32, %c0_i32_0 : i32, i32
  }
  func.func @transform_2(%arg0: i32) -> (i32, i32) {
    %c0_i32 = arith.constant 0 : i32
    %c0_i32_0 = arith.constant 0 : i32
    %c0_i32_1 = arith.constant 0 : i32
    return %c0_i32, %c0_i32_0 : i32, i32
  }
  func.func @transform_3(%arg0: i32) -> (i32, i32, i32) {
    %c0_i32 = arith.constant 0 : i32
    %c0_i32_0 = arith.constant 0 : i32
    %c0_i32_1 = arith.constant 0 : i32
    return %arg0, %c0_i32, %c0_i32_0 : i32, i32, i32
  }
}

module attributes {stable_mosaic.version = 11 : i64} {
  func.func @_attn_sublayer_kernel(%arg0: i32, %arg1: memref<1x8x32xf32, #tpu.memory_space<vmem>>, %arg2: memref<1x8x32xf32, #tpu.memory_space<vmem>>, %arg3: memref<1x32xf32, #tpu.memory_space<vmem>>, %arg4: memref<1x32xf32, #tpu.memory_space<vmem>>, %arg5: memref<32x32xbf16, #tpu.memory_space<vmem>>, %arg6: memref<1x32xf32, #tpu.memory_space<vmem>>, %arg7: memref<32x64xbf16, #tpu.memory_space<vmem>>, %arg8: memref<1x64xf32, #tpu.memory_space<vmem>>, %arg9: memref<32x32xf32, #tpu.memory_space<vmem>>, %arg10: memref<1x32xf32, #tpu.memory_space<vmem>>, %arg11: memref<1x1x8xf32, #tpu.memory_space<vmem>>, %arg12: memref<1x8x32xf32, #tpu.memory_space<vmem>>) attributes {dimension_semantics = [#tpu.dimension_semantics<parallel>], iteration_bounds = array<i64: 2>, scalar_prefetch = 0 : i64, scratch_operands = 0 : i64, tpu.core_type = #tpu.core_type<tc>, window_params = [{transform_indices = @transform_0, window_bounds = array<i64: 1, 8, 32>}, {transform_indices = @transform_1, window_bounds = array<i64: 1, 8, 32>}, {pipeline_mode = #tpu.pipeline_mode<synchronous>, transform_indices = @transform_2, window_bounds = array<i64: 1, 32>}, {pipeline_mode = #tpu.pipeline_mode<synchronous>, transform_indices = @transform_3, window_bounds = array<i64: 1, 32>}, {pipeline_mode = #tpu.pipeline_mode<synchronous>, transform_indices = @transform_4, window_bounds = array<i64: 32, 32>}, {pipeline_mode = #tpu.pipeline_mode<synchronous>, transform_indices = @transform_5, window_bounds = array<i64: 1, 32>}, {pipeline_mode = #tpu.pipeline_mode<synchronous>, transform_indices = @transform_6, window_bounds = array<i64: 32, 64>}, {pipeline_mode = #tpu.pipeline_mode<synchronous>, transform_indices = @transform_7, window_bounds = array<i64: 1, 64>}, {pipeline_mode = #tpu.pipeline_mode<synchronous>, transform_indices = @transform_8, window_bounds = array<i64: 32, 32>}, {pipeline_mode = #tpu.pipeline_mode<synchronous>, transform_indices = @transform_9, window_bounds = array<i64: 1, 32>}, {transform_indices = @transform_10, window_bounds = array<i64: 1, 1, 8>}, {transform_indices = @transform_11, window_bounds = array<i64: 1, 8, 32>}]} {
    %c0 = arith.constant 0 : index
    %c0_0 = arith.constant 0 : index
    %c0_1 = arith.constant 0 : index
    %0 = vector.load %arg1[%c0, %c0_0, %c0_1] : memref<1x8x32xf32, #tpu.memory_space<vmem>>, vector<1x8x32xf32>
    %1 = vector.shape_cast %0 : vector<1x8x32xf32> to vector<8x32xf32>
    %c0_2 = arith.constant 0 : index
    %c0_3 = arith.constant 0 : index
    %2 = vector.load %arg3[%c0_2, %c0_3] : memref<1x32xf32, #tpu.memory_space<vmem>>, vector<1x32xf32>
    %c0_4 = arith.constant 0 : index
    %c0_5 = arith.constant 0 : index
    %3 = vector.load %arg4[%c0_4, %c0_5] : memref<1x32xf32, #tpu.memory_space<vmem>>, vector<1x32xf32>
    %cst = arith.constant dense<0.000000e+00> : vector<8xf32>
    %4 = vector.multi_reduction <add>, %1, %cst [1] : vector<8x32xf32> to vector<8xf32>
    %5 = vector.shape_cast %4 : vector<8xf32> to vector<8x1xf32>
    %cst_6 = arith.constant 3.200000e+01 : f32
    %6 = vector.broadcast %cst_6 : f32 to vector<8x1xf32>
    %7 = arith.divf %5, %6 : vector<8x1xf32>
    %8 = vector.broadcast %7 : vector<8x1xf32> to vector<8x32xf32>
    %9 = arith.subf %1, %8 : vector<8x32xf32>
    %10 = arith.mulf %9, %9 : vector<8x32xf32>
    %cst_7 = arith.constant dense<0.000000e+00> : vector<8xf32>
    %11 = vector.multi_reduction <add>, %10, %cst_7 [1] : vector<8x32xf32> to vector<8xf32>
    %12 = vector.shape_cast %11 : vector<8xf32> to vector<8x1xf32>
    %cst_8 = arith.constant 3.200000e+01 : f32
    %13 = vector.broadcast %cst_8 : f32 to vector<8x1xf32>
    %14 = arith.divf %12, %13 : vector<8x1xf32>
    %cst_9 = arith.constant 9.99999974E-6 : f32
    %15 = vector.broadcast %cst_9 : f32 to vector<8x1xf32>
    %16 = arith.addf %14, %15 : vector<8x1xf32>
    %17 = math.rsqrt %16 : vector<8x1xf32>
    %18 = vector.broadcast %17 : vector<8x1xf32> to vector<8x32xf32>
    %19 = arith.mulf %9, %18 : vector<8x32xf32>
    %20 = vector.broadcast %2 : vector<1x32xf32> to vector<8x32xf32>
    %21 = arith.mulf %19, %20 : vector<8x32xf32>
    %22 = vector.broadcast %3 : vector<1x32xf32> to vector<8x32xf32>
    %23 = arith.addf %21, %22 : vector<8x32xf32>
    %24 = arith.truncf %23 : vector<8x32xf32> to vector<8x32xbf16>
    %c0_10 = arith.constant 0 : index
    %c0_11 = arith.constant 0 : index
    %25 = vector.load %arg5[%c0_10, %c0_11] : memref<32x32xbf16, #tpu.memory_space<vmem>>, vector<32x32xbf16>
    %cst_12 = arith.constant dense<0.000000e+00> : vector<8x32xf32>
    %26 = tpu.matmul %24, %25, %cst_12 {dimension_numbers = #tpu.dot_dimension_numbers<[1], [0], [0], [1], [0, 0, 1, 1], [], []>} : vector<8x32xbf16>, vector<32x32xbf16>, vector<8x32xf32> -> vector<8x32xf32>
    %c0_13 = arith.constant 0 : index
    %c0_14 = arith.constant 0 : index
    %27 = vector.load %arg6[%c0_13, %c0_14] : memref<1x32xf32, #tpu.memory_space<vmem>>, vector<1x32xf32>
    %28 = vector.broadcast %27 : vector<1x32xf32> to vector<8x32xf32>
    %29 = arith.addf %26, %28 : vector<8x32xf32>
    %30 = arith.truncf %23 : vector<8x32xf32> to vector<8x32xbf16>
    %c0_15 = arith.constant 0 : index
    %c0_16 = arith.constant 0 : index
    %31 = vector.load %arg7[%c0_15, %c0_16] : memref<32x64xbf16, #tpu.memory_space<vmem>>, vector<32x64xbf16>
    %cst_17 = arith.constant dense<0.000000e+00> : vector<8x64xf32>
    %32 = tpu.matmul %30, %31, %cst_17 {dimension_numbers = #tpu.dot_dimension_numbers<[1], [0], [0], [1], [0, 0, 1, 1], [], []>} : vector<8x32xbf16>, vector<32x64xbf16>, vector<8x64xf32> -> vector<8x64xf32>
    %c0_18 = arith.constant 0 : index
    %c0_19 = arith.constant 0 : index
    %33 = vector.load %arg8[%c0_18, %c0_19] : memref<1x64xf32, #tpu.memory_space<vmem>>, vector<1x64xf32>
    %34 = vector.broadcast %33 : vector<1x64xf32> to vector<8x64xf32>
    %35 = arith.addf %32, %34 : vector<8x64xf32>
    %36 = vector.extract_strided_slice %35 {offsets = [0, 0], sizes = [8, 32], strides = [1, 1]} : vector<8x64xf32> to vector<8x32xf32>
    %37 = vector.extract_strided_slice %35 {offsets = [0, 32], sizes = [8, 32], strides = [1, 1]} : vector<8x64xf32> to vector<8x32xf32>
    %c0_20 = arith.constant 0 : index
    %c0_21 = arith.constant 0 : index
    %c0_22 = arith.constant 0 : index
    %38 = vector.load %arg11[%c0_20, %c0_21, %c0_22] : memref<1x1x8xf32, #tpu.memory_space<vmem>>, vector<1x1x8xf32>
    %39 = vector.shape_cast %38 : vector<1x1x8xf32> to vector<1x8xf32>
    %cst_23 = arith.constant 0.000000e+00 : f32
    %40 = vector.broadcast %cst_23 : f32 to vector<8x32xf32>
    %41 = vector.extract_strided_slice %29 {offsets = [0, 0], sizes = [8, 8], strides = [1, 1]} : vector<8x32xf32> to vector<8x8xf32>
    %42 = arith.truncf %41 : vector<8x8xf32> to vector<8x8xbf16>
    %43 = vector.extract_strided_slice %36 {offsets = [0, 0], sizes = [8, 8], strides = [1, 1]} : vector<8x32xf32> to vector<8x8xf32>
    %44 = arith.truncf %43 : vector<8x8xf32> to vector<8x8xbf16>
    %45 = vector.extract_strided_slice %37 {offsets = [0, 0], sizes = [8, 8], strides = [1, 1]} : vector<8x32xf32> to vector<8x8xf32>
    %46 = arith.truncf %45 : vector<8x8xf32> to vector<8x8xbf16>
    %cst_24 = arith.constant dense<0.000000e+00> : vector<8x8xf32>
    %47 = tpu.matmul %42, %44, %cst_24 {dimension_numbers = #tpu.dot_dimension_numbers<[1], [1], [0], [0], [0, 0, 1, 0], [], []>} : vector<8x8xbf16>, vector<8x8xbf16>, vector<8x8xf32> -> vector<8x8xf32>
    %cst_25 = arith.constant 0.353553385 : f32
    %48 = vector.broadcast %cst_25 : f32 to vector<8x8xf32>
    %49 = arith.mulf %47, %48 : vector<8x8xf32>
    %50 = vector.broadcast %39 : vector<1x8xf32> to vector<8x8xf32>
    %51 = arith.addf %49, %50 : vector<8x8xf32>
    %cst_26 = arith.constant dense<0xFF800000> : vector<8xf32>
    %52 = vector.multi_reduction <maximumf>, %51, %cst_26 [1] : vector<8x8xf32> to vector<8xf32>
    %53 = vector.shape_cast %52 : vector<8xf32> to vector<8x1xf32>
    %54 = vector.broadcast %53 : vector<8x1xf32> to vector<8x8xf32>
    %55 = arith.subf %51, %54 : vector<8x8xf32>
    %56 = math.exp %55 : vector<8x8xf32>
    %cst_27 = arith.constant dense<0.000000e+00> : vector<8xf32>
    %57 = vector.multi_reduction <add>, %56, %cst_27 [1] : vector<8x8xf32> to vector<8xf32>
    %58 = vector.shape_cast %57 : vector<8xf32> to vector<8x1xf32>
    %59 = tpu.reciprocal %58 {approx = true} : vector<8x1xf32> -> vector<8x1xf32>
    %60 = vector.broadcast %59 : vector<8x1xf32> to vector<8x8xf32>
    %61 = arith.mulf %56, %60 : vector<8x8xf32>
    %62 = arith.truncf %61 : vector<8x8xf32> to vector<8x8xbf16>
    %cst_28 = arith.constant dense<0.000000e+00> : vector<8x8xf32>
    %63 = tpu.matmul %62, %46, %cst_28 {dimension_numbers = #tpu.dot_dimension_numbers<[1], [0], [0], [1], [0, 0, 1, 1], [], []>} : vector<8x8xbf16>, vector<8x8xbf16>, vector<8x8xf32> -> vector<8x8xf32>
    %c0_29 = arith.constant 0 : index
    %c0_30 = arith.constant 0 : index
    %64 = vector.load %arg9[%c0_29, %c0_30] : memref<32x32xf32, #tpu.memory_space<vmem>>, vector<8x32xf32>
    %65 = arith.truncf %64 : vector<8x32xf32> to vector<8x32xbf16>
    %66 = arith.truncf %63 : vector<8x8xf32> to vector<8x8xbf16>
    %cst_31 = arith.constant dense<0.000000e+00> : vector<8x32xf32>
    %67 = tpu.matmul %66, %65, %cst_31 {dimension_numbers = #tpu.dot_dimension_numbers<[1], [0], [0], [1], [0, 0, 1, 1], [], []>} : vector<8x8xbf16>, vector<8x32xbf16>, vector<8x32xf32> -> vector<8x32xf32>
    %68 = arith.addf %40, %67 : vector<8x32xf32>
    %69 = vector.extract_strided_slice %29 {offsets = [0, 8], sizes = [8, 8], strides = [1, 1]} : vector<8x32xf32> to vector<8x8xf32>
    %70 = arith.truncf %69 : vector<8x8xf32> to vector<8x8xbf16>
    %71 = vector.extract_strided_slice %36 {offsets = [0, 8], sizes = [8, 8], strides = [1, 1]} : vector<8x32xf32> to vector<8x8xf32>
    %72 = arith.truncf %71 : vector<8x8xf32> to vector<8x8xbf16>
    %73 = vector.extract_strided_slice %37 {offsets = [0, 8], sizes = [8, 8], strides = [1, 1]} : vector<8x32xf32> to vector<8x8xf32>
    %74 = arith.truncf %73 : vector<8x8xf32> to vector<8x8xbf16>
    %cst_32 = arith.constant dense<0.000000e+00> : vector<8x8xf32>
    %75 = tpu.matmul %70, %72, %cst_32 {dimension_numbers = #tpu.dot_dimension_numbers<[1], [1], [0], [0], [0, 0, 1, 0], [], []>} : vector<8x8xbf16>, vector<8x8xbf16>, vector<8x8xf32> -> vector<8x8xf32>
    %cst_33 = arith.constant 0.353553385 : f32
    %76 = vector.broadcast %cst_33 : f32 to vector<8x8xf32>
    %77 = arith.mulf %75, %76 : vector<8x8xf32>
    %78 = vector.broadcast %39 : vector<1x8xf32> to vector<8x8xf32>
    %79 = arith.addf %77, %78 : vector<8x8xf32>
    %cst_34 = arith.constant dense<0xFF800000> : vector<8xf32>
    %80 = vector.multi_reduction <maximumf>, %79, %cst_34 [1] : vector<8x8xf32> to vector<8xf32>
    %81 = vector.shape_cast %80 : vector<8xf32> to vector<8x1xf32>
    %82 = vector.broadcast %81 : vector<8x1xf32> to vector<8x8xf32>
    %83 = arith.subf %79, %82 : vector<8x8xf32>
    %84 = math.exp %83 : vector<8x8xf32>
    %cst_35 = arith.constant dense<0.000000e+00> : vector<8xf32>
    %85 = vector.multi_reduction <add>, %84, %cst_35 [1] : vector<8x8xf32> to vector<8xf32>
    %86 = vector.shape_cast %85 : vector<8xf32> to vector<8x1xf32>
    %87 = tpu.reciprocal %86 {approx = true} : vector<8x1xf32> -> vector<8x1xf32>
    %88 = vector.broadcast %87 : vector<8x1xf32> to vector<8x8xf32>
    %89 = arith.mulf %84, %88 : vector<8x8xf32>
    %90 = arith.truncf %89 : vector<8x8xf32> to vector<8x8xbf16>
    %cst_36 = arith.constant dense<0.000000e+00> : vector<8x8xf32>
    %91 = tpu.matmul %90, %74, %cst_36 {dimension_numbers = #tpu.dot_dimension_numbers<[1], [0], [0], [1], [0, 0, 1, 1], [], []>} : vector<8x8xbf16>, vector<8x8xbf16>, vector<8x8xf32> -> vector<8x8xf32>
    %c8 = arith.constant 8 : index
    %c0_37 = arith.constant 0 : index
    %92 = vector.load %arg9[%c8, %c0_37] : memref<32x32xf32, #tpu.memory_space<vmem>>, vector<8x32xf32>
    %93 = arith.truncf %92 : vector<8x32xf32> to vector<8x32xbf16>
    %94 = arith.truncf %91 : vector<8x8xf32> to vector<8x8xbf16>
    %cst_38 = arith.constant dense<0.000000e+00> : vector<8x32xf32>
    %95 = tpu.matmul %94, %93, %cst_38 {dimension_numbers = #tpu.dot_dimension_numbers<[1], [0], [0], [1], [0, 0, 1, 1], [], []>} : vector<8x8xbf16>, vector<8x32xbf16>, vector<8x32xf32> -> vector<8x32xf32>
    %96 = arith.addf %68, %95 : vector<8x32xf32>
    %97 = vector.extract_strided_slice %29 {offsets = [0, 16], sizes = [8, 8], strides = [1, 1]} : vector<8x32xf32> to vector<8x8xf32>
    %98 = arith.truncf %97 : vector<8x8xf32> to vector<8x8xbf16>
    %99 = vector.extract_strided_slice %36 {offsets = [0, 16], sizes = [8, 8], strides = [1, 1]} : vector<8x32xf32> to vector<8x8xf32>
    %100 = arith.truncf %99 : vector<8x8xf32> to vector<8x8xbf16>
    %101 = vector.extract_strided_slice %37 {offsets = [0, 16], sizes = [8, 8], strides = [1, 1]} : vector<8x32xf32> to vector<8x8xf32>
    %102 = arith.truncf %101 : vector<8x8xf32> to vector<8x8xbf16>
    %cst_39 = arith.constant dense<0.000000e+00> : vector<8x8xf32>
    %103 = tpu.matmul %98, %100, %cst_39 {dimension_numbers = #tpu.dot_dimension_numbers<[1], [1], [0], [0], [0, 0, 1, 0], [], []>} : vector<8x8xbf16>, vector<8x8xbf16>, vector<8x8xf32> -> vector<8x8xf32>
    %cst_40 = arith.constant 0.353553385 : f32
    %104 = vector.broadcast %cst_40 : f32 to vector<8x8xf32>
    %105 = arith.mulf %103, %104 : vector<8x8xf32>
    %106 = vector.broadcast %39 : vector<1x8xf32> to vector<8x8xf32>
    %107 = arith.addf %105, %106 : vector<8x8xf32>
    %cst_41 = arith.constant dense<0xFF800000> : vector<8xf32>
    %108 = vector.multi_reduction <maximumf>, %107, %cst_41 [1] : vector<8x8xf32> to vector<8xf32>
    %109 = vector.shape_cast %108 : vector<8xf32> to vector<8x1xf32>
    %110 = vector.broadcast %109 : vector<8x1xf32> to vector<8x8xf32>
    %111 = arith.subf %107, %110 : vector<8x8xf32>
    %112 = math.exp %111 : vector<8x8xf32>
    %cst_42 = arith.constant dense<0.000000e+00> : vector<8xf32>
    %113 = vector.multi_reduction <add>, %112, %cst_42 [1] : vector<8x8xf32> to vector<8xf32>
    %114 = vector.shape_cast %113 : vector<8xf32> to vector<8x1xf32>
    %115 = tpu.reciprocal %114 {approx = true} : vector<8x1xf32> -> vector<8x1xf32>
    %116 = vector.broadcast %115 : vector<8x1xf32> to vector<8x8xf32>
    %117 = arith.mulf %112, %116 : vector<8x8xf32>
    %118 = arith.truncf %117 : vector<8x8xf32> to vector<8x8xbf16>
    %cst_43 = arith.constant dense<0.000000e+00> : vector<8x8xf32>
    %119 = tpu.matmul %118, %102, %cst_43 {dimension_numbers = #tpu.dot_dimension_numbers<[1], [0], [0], [1], [0, 0, 1, 1], [], []>} : vector<8x8xbf16>, vector<8x8xbf16>, vector<8x8xf32> -> vector<8x8xf32>
    %c16 = arith.constant 16 : index
    %c0_44 = arith.constant 0 : index
    %120 = vector.load %arg9[%c16, %c0_44] : memref<32x32xf32, #tpu.memory_space<vmem>>, vector<8x32xf32>
    %121 = arith.truncf %120 : vector<8x32xf32> to vector<8x32xbf16>
    %122 = arith.truncf %119 : vector<8x8xf32> to vector<8x8xbf16>
    %cst_45 = arith.constant dense<0.000000e+00> : vector<8x32xf32>
    %123 = tpu.matmul %122, %121, %cst_45 {dimension_numbers = #tpu.dot_dimension_numbers<[1], [0], [0], [1], [0, 0, 1, 1], [], []>} : vector<8x8xbf16>, vector<8x32xbf16>, vector<8x32xf32> -> vector<8x32xf32>
    %124 = arith.addf %96, %123 : vector<8x32xf32>
    %125 = vector.extract_strided_slice %29 {offsets = [0, 24], sizes = [8, 8], strides = [1, 1]} : vector<8x32xf32> to vector<8x8xf32>
    %126 = arith.truncf %125 : vector<8x8xf32> to vector<8x8xbf16>
    %127 = vector.extract_strided_slice %36 {offsets = [0, 24], sizes = [8, 8], strides = [1, 1]} : vector<8x32xf32> to vector<8x8xf32>
    %128 = arith.truncf %127 : vector<8x8xf32> to vector<8x8xbf16>
    %129 = vector.extract_strided_slice %37 {offsets = [0, 24], sizes = [8, 8], strides = [1, 1]} : vector<8x32xf32> to vector<8x8xf32>
    %130 = arith.truncf %129 : vector<8x8xf32> to vector<8x8xbf16>
    %cst_46 = arith.constant dense<0.000000e+00> : vector<8x8xf32>
    %131 = tpu.matmul %126, %128, %cst_46 {dimension_numbers = #tpu.dot_dimension_numbers<[1], [1], [0], [0], [0, 0, 1, 0], [], []>} : vector<8x8xbf16>, vector<8x8xbf16>, vector<8x8xf32> -> vector<8x8xf32>
    %cst_47 = arith.constant 0.353553385 : f32
    %132 = vector.broadcast %cst_47 : f32 to vector<8x8xf32>
    %133 = arith.mulf %131, %132 : vector<8x8xf32>
    %134 = vector.broadcast %39 : vector<1x8xf32> to vector<8x8xf32>
    %135 = arith.addf %133, %134 : vector<8x8xf32>
    %cst_48 = arith.constant dense<0xFF800000> : vector<8xf32>
    %136 = vector.multi_reduction <maximumf>, %135, %cst_48 [1] : vector<8x8xf32> to vector<8xf32>
    %137 = vector.shape_cast %136 : vector<8xf32> to vector<8x1xf32>
    %138 = vector.broadcast %137 : vector<8x1xf32> to vector<8x8xf32>
    %139 = arith.subf %135, %138 : vector<8x8xf32>
    %140 = math.exp %139 : vector<8x8xf32>
    %cst_49 = arith.constant dense<0.000000e+00> : vector<8xf32>
    %141 = vector.multi_reduction <add>, %140, %cst_49 [1] : vector<8x8xf32> to vector<8xf32>
    %142 = vector.shape_cast %141 : vector<8xf32> to vector<8x1xf32>
    %143 = tpu.reciprocal %142 {approx = true} : vector<8x1xf32> -> vector<8x1xf32>
    %144 = vector.broadcast %143 : vector<8x1xf32> to vector<8x8xf32>
    %145 = arith.mulf %140, %144 : vector<8x8xf32>
    %146 = arith.truncf %145 : vector<8x8xf32> to vector<8x8xbf16>
    %cst_50 = arith.constant dense<0.000000e+00> : vector<8x8xf32>
    %147 = tpu.matmul %146, %130, %cst_50 {dimension_numbers = #tpu.dot_dimension_numbers<[1], [0], [0], [1], [0, 0, 1, 1], [], []>} : vector<8x8xbf16>, vector<8x8xbf16>, vector<8x8xf32> -> vector<8x8xf32>
    %c24 = arith.constant 24 : index
    %c0_51 = arith.constant 0 : index
    %148 = vector.load %arg9[%c24, %c0_51] : memref<32x32xf32, #tpu.memory_space<vmem>>, vector<8x32xf32>
    %149 = arith.truncf %148 : vector<8x32xf32> to vector<8x32xbf16>
    %150 = arith.truncf %147 : vector<8x8xf32> to vector<8x8xbf16>
    %cst_52 = arith.constant dense<0.000000e+00> : vector<8x32xf32>
    %151 = tpu.matmul %150, %149, %cst_52 {dimension_numbers = #tpu.dot_dimension_numbers<[1], [0], [0], [1], [0, 0, 1, 1], [], []>} : vector<8x8xbf16>, vector<8x32xbf16>, vector<8x32xf32> -> vector<8x32xf32>
    %152 = arith.addf %124, %151 : vector<8x32xf32>
    %153 = arith.addf %1, %152 : vector<8x32xf32>
    %c0_53 = arith.constant 0 : index
    %c0_54 = arith.constant 0 : index
    %154 = vector.load %arg10[%c0_53, %c0_54] : memref<1x32xf32, #tpu.memory_space<vmem>>, vector<1x32xf32>
    %155 = vector.broadcast %154 : vector<1x32xf32> to vector<8x32xf32>
    %156 = arith.addf %153, %155 : vector<8x32xf32>
    %c0_55 = arith.constant 0 : index
    %c0_56 = arith.constant 0 : index
    %c0_57 = arith.constant 0 : index
    %157 = vector.load %arg12[%c0_55, %c0_56, %c0_57] : memref<1x8x32xf32, #tpu.memory_space<vmem>>, vector<1x8x32xf32>
    %158 = vector.shape_cast %157 : vector<1x8x32xf32> to vector<8x32xf32>
    %159 = vector.shape_cast %156 : vector<8x32xf32> to vector<1x8x32xf32>
    tpu.vector_store %arg12[%c0_55, %c0_56, %c0_57], %159 {strides = array<i32>} : memref<1x8x32xf32, #tpu.memory_space<vmem>>, vector<1x8x32xf32>,
    return
  }
  func.func @transform_0(%arg0: i32) -> (i32, i32, i32) {
    %c0_i32 = arith.constant 0 : i32
    %c0_i32_0 = arith.constant 0 : i32
    %c0_i32_1 = arith.constant 0 : i32
    return %arg0, %c0_i32, %c0_i32_0 : i32, i32, i32
  }
  func.func @transform_1(%arg0: i32) -> (i32, i32, i32) {
    %c0_i32 = arith.constant 0 : i32
    %c0_i32_0 = arith.constant 0 : i32
    %c0_i32_1 = arith.constant 0 : i32
    return %arg0, %c0_i32, %c0_i32_0 : i32, i32, i32
  }
  func.func @transform_2(%arg0: i32) -> (i32, i32) {
    %c0_i32 = arith.constant 0 : i32
    %c0_i32_0 = arith.constant 0 : i32
    %c0_i32_1 = arith.constant 0 : i32
    return %c0_i32, %c0_i32_0 : i32, i32
  }
  func.func @transform_3(%arg0: i32) -> (i32, i32) {
    %c0_i32 = arith.constant 0 : i32
    %c0_i32_0 = arith.constant 0 : i32
    %c0_i32_1 = arith.constant 0 : i32
    return %c0_i32, %c0_i32_0 : i32, i32
  }
  func.func @transform_4(%arg0: i32) -> (i32, i32) {
    %c0_i32 = arith.constant 0 : i32
    %c0_i32_0 = arith.constant 0 : i32
    %c0_i32_1 = arith.constant 0 : i32
    return %c0_i32, %c0_i32_0 : i32, i32
  }
  func.func @transform_5(%arg0: i32) -> (i32, i32) {
    %c0_i32 = arith.constant 0 : i32
    %c0_i32_0 = arith.constant 0 : i32
    %c0_i32_1 = arith.constant 0 : i32
    return %c0_i32, %c0_i32_0 : i32, i32
  }
  func.func @transform_6(%arg0: i32) -> (i32, i32) {
    %c0_i32 = arith.constant 0 : i32
    %c0_i32_0 = arith.constant 0 : i32
    %c0_i32_1 = arith.constant 0 : i32
    return %c0_i32, %c0_i32_0 : i32, i32
  }
  func.func @transform_7(%arg0: i32) -> (i32, i32) {
    %c0_i32 = arith.constant 0 : i32
    %c0_i32_0 = arith.constant 0 : i32
    %c0_i32_1 = arith.constant 0 : i32
    return %c0_i32, %c0_i32_0 : i32, i32
  }
  func.func @transform_8(%arg0: i32) -> (i32, i32) {
    %c0_i32 = arith.constant 0 : i32
    %c0_i32_0 = arith.constant 0 : i32
    %c0_i32_1 = arith.constant 0 : i32
    return %c0_i32, %c0_i32_0 : i32, i32
  }
  func.func @transform_9(%arg0: i32) -> (i32, i32) {
    %c0_i32 = arith.constant 0 : i32
    %c0_i32_0 = arith.constant 0 : i32
    %c0_i32_1 = arith.constant 0 : i32
    return %c0_i32, %c0_i32_0 : i32, i32
  }
  func.func @transform_10(%arg0: i32) -> (i32, i32, i32) {
    %c0_i32 = arith.constant 0 : i32
    %c0_i32_0 = arith.constant 0 : i32
    %c0_i32_1 = arith.constant 0 : i32
    return %arg0, %c0_i32, %c0_i32_0 : i32, i32, i32
  }
  func.func @transform_11(%arg0: i32) -> (i32, i32, i32) {
    %c0_i32 = arith.constant 0 : i32
    %c0_i32_0 = arith.constant 0 : i32
    %c0_i32_1 = arith.constant 0 : i32
    return %arg0, %c0_i32, %c0_i32_0 : i32, i32, i32
  }
}

module attributes {stable_mosaic.version = 11 : i64} {
  func.func @_ffn_sublayer_kernel(%arg0: i32, %arg1: memref<1x8x32xf32, #tpu.memory_space<vmem>>, %arg2: memref<1x32xf32, #tpu.memory_space<vmem>>, %arg3: memref<1x32xf32, #tpu.memory_space<vmem>>, %arg4: memref<32x64xbf16, #tpu.memory_space<vmem>>, %arg5: memref<1x64xf32, #tpu.memory_space<vmem>>, %arg6: memref<64x32xbf16, #tpu.memory_space<vmem>>, %arg7: memref<1x32xf32, #tpu.memory_space<vmem>>, %arg8: memref<1x8x32xf32, #tpu.memory_space<vmem>>) attributes {dimension_semantics = [#tpu.dimension_semantics<parallel>], iteration_bounds = array<i64: 2>, scalar_prefetch = 0 : i64, scratch_operands = 0 : i64, tpu.core_type = #tpu.core_type<tc>, window_params = [{transform_indices = @transform_0, window_bounds = array<i64: 1, 8, 32>}, {pipeline_mode = #tpu.pipeline_mode<synchronous>, transform_indices = @transform_1, window_bounds = array<i64: 1, 32>}, {pipeline_mode = #tpu.pipeline_mode<synchronous>, transform_indices = @transform_2, window_bounds = array<i64: 1, 32>}, {pipeline_mode = #tpu.pipeline_mode<synchronous>, transform_indices = @transform_3, window_bounds = array<i64: 32, 64>}, {pipeline_mode = #tpu.pipeline_mode<synchronous>, transform_indices = @transform_4, window_bounds = array<i64: 1, 64>}, {pipeline_mode = #tpu.pipeline_mode<synchronous>, transform_indices = @transform_5, window_bounds = array<i64: 64, 32>}, {pipeline_mode = #tpu.pipeline_mode<synchronous>, transform_indices = @transform_6, window_bounds = array<i64: 1, 32>}, {transform_indices = @transform_7, window_bounds = array<i64: 1, 8, 32>}]} {
    %c0 = arith.constant 0 : index
    %c0_0 = arith.constant 0 : index
    %c0_1 = arith.constant 0 : index
    %0 = vector.load %arg1[%c0, %c0_0, %c0_1] : memref<1x8x32xf32, #tpu.memory_space<vmem>>, vector<1x8x32xf32>
    %1 = vector.shape_cast %0 : vector<1x8x32xf32> to vector<8x32xf32>
    %cst = arith.constant dense<0.000000e+00> : vector<8xf32>
    %2 = vector.multi_reduction <add>, %1, %cst [1] : vector<8x32xf32> to vector<8xf32>
    %3 = vector.shape_cast %2 : vector<8xf32> to vector<8x1xf32>
    %cst_2 = arith.constant 3.200000e+01 : f32
    %4 = vector.broadcast %cst_2 : f32 to vector<8x1xf32>
    %5 = arith.divf %3, %4 : vector<8x1xf32>
    %6 = vector.broadcast %5 : vector<8x1xf32> to vector<8x32xf32>
    %7 = arith.subf %1, %6 : vector<8x32xf32>
    %8 = arith.mulf %7, %7 : vector<8x32xf32>
    %cst_3 = arith.constant dense<0.000000e+00> : vector<8xf32>
    %9 = vector.multi_reduction <add>, %8, %cst_3 [1] : vector<8x32xf32> to vector<8xf32>
    %10 = vector.shape_cast %9 : vector<8xf32> to vector<8x1xf32>
    %cst_4 = arith.constant 3.200000e+01 : f32
    %11 = vector.broadcast %cst_4 : f32 to vector<8x1xf32>
    %12 = arith.divf %10, %11 : vector<8x1xf32>
    %cst_5 = arith.constant 9.99999974E-6 : f32
    %13 = vector.broadcast %cst_5 : f32 to vector<8x1xf32>
    %14 = arith.addf %12, %13 : vector<8x1xf32>
    %15 = math.rsqrt %14 : vector<8x1xf32>
    %16 = vector.broadcast %15 : vector<8x1xf32> to vector<8x32xf32>
    %17 = arith.mulf %7, %16 : vector<8x32xf32>
    %c0_6 = arith.constant 0 : index
    %c0_7 = arith.constant 0 : index
    %18 = vector.load %arg2[%c0_6, %c0_7] : memref<1x32xf32, #tpu.memory_space<vmem>>, vector<1x32xf32>
    %19 = vector.broadcast %18 : vector<1x32xf32> to vector<8x32xf32>
    %20 = arith.mulf %17, %19 : vector<8x32xf32>
    %c0_8 = arith.constant 0 : index
    %c0_9 = arith.constant 0 : index
    %21 = vector.load %arg3[%c0_8, %c0_9] : memref<1x32xf32, #tpu.memory_space<vmem>>, vector<1x32xf32>
    %22 = vector.broadcast %21 : vector<1x32xf32> to vector<8x32xf32>
    %23 = arith.addf %20, %22 : vector<8x32xf32>
    %24 = arith.truncf %23 : vector<8x32xf32> to vector<8x32xbf16>
    %c0_10 = arith.constant 0 : index
    %c0_11 = arith.constant 0 : index
    %25 = vector.load %arg4[%c0_10, %c0_11] : memref<32x64xbf16, #tpu.memory_space<vmem>>, vector<32x64xbf16>
    %cst_12 = arith.constant dense<0.000000e+00> : vector<8x64xf32>
    %26 = tpu.matmul %24, %25, %cst_12 {dimension_numbers = #tpu.dot_dimension_numbers<[1], [0], [0], [1], [0, 0, 1, 1], [], []>} : vector<8x32xbf16>, vector<32x64xbf16>, vector<8x64xf32> -> vector<8x64xf32>
    %c0_13 = arith.constant 0 : index
    %c0_14 = arith.constant 0 : index
    %27 = vector.load %arg5[%c0_13, %c0_14] : memref<1x64xf32, #tpu.memory_space<vmem>>, vector<1x64xf32>
    %28 = vector.broadcast %27 : vector<1x64xf32> to vector<8x64xf32>
    %29 = arith.addf %26, %28 : vector<8x64xf32>
    %cst_15 = arith.constant 0.000000e+00 : f32
    %30 = vector.broadcast %cst_15 : f32 to vector<8x64xf32>
    %31 = arith.maximumf %29, %30 : vector<8x64xf32>
    %32 = arith.truncf %31 : vector<8x64xf32> to vector<8x64xbf16>
    %c0_16 = arith.constant 0 : index
    %c0_17 = arith.constant 0 : index
    %33 = vector.load %arg6[%c0_16, %c0_17] : memref<64x32xbf16, #tpu.memory_space<vmem>>, vector<64x32xbf16>
    %cst_18 = arith.constant dense<0.000000e+00> : vector<8x32xf32>
    %34 = tpu.matmul %32, %33, %cst_18 {dimension_numbers = #tpu.dot_dimension_numbers<[1], [0], [0], [1], [0, 0, 1, 1], [], []>} : vector<8x64xbf16>, vector<64x32xbf16>, vector<8x32xf32> -> vector<8x32xf32>
    %c0_19 = arith.constant 0 : index
    %c0_20 = arith.constant 0 : index
    %35 = vector.load %arg7[%c0_19, %c0_20] : memref<1x32xf32, #tpu.memory_space<vmem>>, vector<1x32xf32>
    %36 = vector.broadcast %35 : vector<1x32xf32> to vector<8x32xf32>
    %37 = arith.addf %34, %36 : vector<8x32xf32>
    %38 = arith.addf %1, %37 : vector<8x32xf32>
    %c0_21 = arith.constant 0 : index
    %c0_22 = arith.constant 0 : index
    %c0_23 = arith.constant 0 : index
    %39 = vector.load %arg8[%c0_21, %c0_22, %c0_23] : memref<1x8x32xf32, #tpu.memory_space<vmem>>, vector<1x8x32xf32>
    %40 = vector.shape_cast %39 : vector<1x8x32xf32> to vector<8x32xf32>
    %41 = vector.shape_cast %38 : vector<8x32xf32> to vector<1x8x32xf32>
    tpu.vector_store %arg8[%c0_21, %c0_22, %c0_23], %41 {strides = array<i32>} : memref<1x8x32xf32, #tpu.memory_space<vmem>>, vector<1x8x32xf32>,
    return
  }
  func.func @transform_0(%arg0: i32) -> (i32, i32, i32) {
    %c0_i32 = arith.constant 0 : i32
    %c0_i32_0 = arith.constant 0 : i32
    %c0_i32_1 = arith.constant 0 : i32
    return %arg0, %c0_i32, %c0_i32_0 : i32, i32, i32
  }
  func.func @transform_1(%arg0: i32) -> (i32, i32) {
    %c0_i32 = arith.constant 0 : i32
    %c0_i32_0 = arith.constant 0 : i32
    %c0_i32_1 = arith.constant 0 : i32
    return %c0_i32, %c0_i32_0 : i32, i32
  }
  func.func @transform_2(%arg0: i32) -> (i32, i32) {
    %c0_i32 = arith.constant 0 : i32
    %c0_i32_0 = arith.constant 0 : i32
    %c0_i32_1 = arith.constant 0 : i32
    return %c0_i32, %c0_i32_0 : i32, i32
  }
  func.func @transform_3(%arg0: i32) -> (i32, i32) {
    %c0_i32 = arith.constant 0 : i32
    %c0_i32_0 = arith.constant 0 : i32
    %c0_i32_1 = arith.constant 0 : i32
    return %c0_i32, %c0_i32_0 : i32, i32
  }
  func.func @transform_4(%arg0: i32) -> (i32, i32) {
    %c0_i32 = arith.constant 0 : i32
    %c0_i32_0 = arith.constant 0 : i32
    %c0_i32_1 = arith.constant 0 : i32
    return %c0_i32, %c0_i32_0 : i32, i32
  }
  func.func @transform_5(%arg0: i32) -> (i32, i32) {
    %c0_i32 = arith.constant 0 : i32
    %c0_i32_0 = arith.constant 0 : i32
    %c0_i32_1 = arith.constant 0 : i32
    return %c0_i32, %c0_i32_0 : i32, i32
  }
  func.func @transform_6(%arg0: i32) -> (i32, i32) {
    %c0_i32 = arith.constant 0 : i32
    %c0_i32_0 = arith.constant 0 : i32
    %c0_i32_1 = arith.constant 0 : i32
    return %c0_i32, %c0_i32_0 : i32, i32
  }
  func.func @transform_7(%arg0: i32) -> (i32, i32, i32) {
    %c0_i32 = arith.constant 0 : i32
    %c0_i32_0 = arith.constant 0 : i32
    %c0_i32_1 = arith.constant 0 : i32
    return %arg0, %c0_i32, %c0_i32_0 : i32, i32, i32
  }
}

module attributes {stable_mosaic.version = 11 : i64} {
  func.func @_attn_sublayer_kernel(%arg0: i32, %arg1: memref<1x8x32xf32, #tpu.memory_space<vmem>>, %arg2: memref<1x8x32xf32, #tpu.memory_space<vmem>>, %arg3: memref<1x32xf32, #tpu.memory_space<vmem>>, %arg4: memref<1x32xf32, #tpu.memory_space<vmem>>, %arg5: memref<32x32xbf16, #tpu.memory_space<vmem>>, %arg6: memref<1x32xf32, #tpu.memory_space<vmem>>, %arg7: memref<32x64xbf16, #tpu.memory_space<vmem>>, %arg8: memref<1x64xf32, #tpu.memory_space<vmem>>, %arg9: memref<32x32xf32, #tpu.memory_space<vmem>>, %arg10: memref<1x32xf32, #tpu.memory_space<vmem>>, %arg11: memref<1x1x8xf32, #tpu.memory_space<vmem>>, %arg12: memref<1x8x32xf32, #tpu.memory_space<vmem>>) attributes {dimension_semantics = [#tpu.dimension_semantics<parallel>], iteration_bounds = array<i64: 2>, scalar_prefetch = 0 : i64, scratch_operands = 0 : i64, tpu.core_type = #tpu.core_type<tc>, window_params = [{transform_indices = @transform_0, window_bounds = array<i64: 1, 8, 32>}, {transform_indices = @transform_1, window_bounds = array<i64: 1, 8, 32>}, {pipeline_mode = #tpu.pipeline_mode<synchronous>, transform_indices = @transform_2, window_bounds = array<i64: 1, 32>}, {pipeline_mode = #tpu.pipeline_mode<synchronous>, transform_indices = @transform_3, window_bounds = array<i64: 1, 32>}, {pipeline_mode = #tpu.pipeline_mode<synchronous>, transform_indices = @transform_4, window_bounds = array<i64: 32, 32>}, {pipeline_mode = #tpu.pipeline_mode<synchronous>, transform_indices = @transform_5, window_bounds = array<i64: 1, 32>}, {pipeline_mode = #tpu.pipeline_mode<synchronous>, transform_indices = @transform_6, window_bounds = array<i64: 32, 64>}, {pipeline_mode = #tpu.pipeline_mode<synchronous>, transform_indices = @transform_7, window_bounds = array<i64: 1, 64>}, {pipeline_mode = #tpu.pipeline_mode<synchronous>, transform_indices = @transform_8, window_bounds = array<i64: 32, 32>}, {pipeline_mode = #tpu.pipeline_mode<synchronous>, transform_indices = @transform_9, window_bounds = array<i64: 1, 32>}, {transform_indices = @transform_10, window_bounds = array<i64: 1, 1, 8>}, {transform_indices = @transform_11, window_bounds = array<i64: 1, 8, 32>}]} {
    %c0 = arith.constant 0 : index
    %c0_0 = arith.constant 0 : index
    %c0_1 = arith.constant 0 : index
    %0 = vector.load %arg1[%c0, %c0_0, %c0_1] : memref<1x8x32xf32, #tpu.memory_space<vmem>>, vector<1x8x32xf32>
    %1 = vector.shape_cast %0 : vector<1x8x32xf32> to vector<8x32xf32>
    %c0_2 = arith.constant 0 : index
    %c0_3 = arith.constant 0 : index
    %2 = vector.load %arg3[%c0_2, %c0_3] : memref<1x32xf32, #tpu.memory_space<vmem>>, vector<1x32xf32>
    %c0_4 = arith.constant 0 : index
    %c0_5 = arith.constant 0 : index
    %3 = vector.load %arg4[%c0_4, %c0_5] : memref<1x32xf32, #tpu.memory_space<vmem>>, vector<1x32xf32>
    %cst = arith.constant dense<0.000000e+00> : vector<8xf32>
    %4 = vector.multi_reduction <add>, %1, %cst [1] : vector<8x32xf32> to vector<8xf32>
    %5 = vector.shape_cast %4 : vector<8xf32> to vector<8x1xf32>
    %cst_6 = arith.constant 3.200000e+01 : f32
    %6 = vector.broadcast %cst_6 : f32 to vector<8x1xf32>
    %7 = arith.divf %5, %6 : vector<8x1xf32>
    %8 = vector.broadcast %7 : vector<8x1xf32> to vector<8x32xf32>
    %9 = arith.subf %1, %8 : vector<8x32xf32>
    %10 = arith.mulf %9, %9 : vector<8x32xf32>
    %cst_7 = arith.constant dense<0.000000e+00> : vector<8xf32>
    %11 = vector.multi_reduction <add>, %10, %cst_7 [1] : vector<8x32xf32> to vector<8xf32>
    %12 = vector.shape_cast %11 : vector<8xf32> to vector<8x1xf32>
    %cst_8 = arith.constant 3.200000e+01 : f32
    %13 = vector.broadcast %cst_8 : f32 to vector<8x1xf32>
    %14 = arith.divf %12, %13 : vector<8x1xf32>
    %cst_9 = arith.constant 9.99999974E-6 : f32
    %15 = vector.broadcast %cst_9 : f32 to vector<8x1xf32>
    %16 = arith.addf %14, %15 : vector<8x1xf32>
    %17 = math.rsqrt %16 : vector<8x1xf32>
    %18 = vector.broadcast %17 : vector<8x1xf32> to vector<8x32xf32>
    %19 = arith.mulf %9, %18 : vector<8x32xf32>
    %20 = vector.broadcast %2 : vector<1x32xf32> to vector<8x32xf32>
    %21 = arith.mulf %19, %20 : vector<8x32xf32>
    %22 = vector.broadcast %3 : vector<1x32xf32> to vector<8x32xf32>
    %23 = arith.addf %21, %22 : vector<8x32xf32>
    %24 = arith.truncf %23 : vector<8x32xf32> to vector<8x32xbf16>
    %c0_10 = arith.constant 0 : index
    %c0_11 = arith.constant 0 : index
    %25 = vector.load %arg5[%c0_10, %c0_11] : memref<32x32xbf16, #tpu.memory_space<vmem>>, vector<32x32xbf16>
    %cst_12 = arith.constant dense<0.000000e+00> : vector<8x32xf32>
    %26 = tpu.matmul %24, %25, %cst_12 {dimension_numbers = #tpu.dot_dimension_numbers<[1], [0], [0], [1], [0, 0, 1, 1], [], []>} : vector<8x32xbf16>, vector<32x32xbf16>, vector<8x32xf32> -> vector<8x32xf32>
    %c0_13 = arith.constant 0 : index
    %c0_14 = arith.constant 0 : index
    %27 = vector.load %arg6[%c0_13, %c0_14] : memref<1x32xf32, #tpu.memory_space<vmem>>, vector<1x32xf32>
    %28 = vector.broadcast %27 : vector<1x32xf32> to vector<8x32xf32>
    %29 = arith.addf %26, %28 : vector<8x32xf32>
    %c0_15 = arith.constant 0 : index
    %c0_16 = arith.constant 0 : index
    %c0_17 = arith.constant 0 : index
    %30 = vector.load %arg2[%c0_15, %c0_16, %c0_17] : memref<1x8x32xf32, #tpu.memory_space<vmem>>, vector<1x8x32xf32>
    %31 = vector.shape_cast %30 : vector<1x8x32xf32> to vector<8x32xf32>
    %32 = arith.truncf %31 : vector<8x32xf32> to vector<8x32xbf16>
    %c0_18 = arith.constant 0 : index
    %c0_19 = arith.constant 0 : index
    %33 = vector.load %arg7[%c0_18, %c0_19] : memref<32x64xbf16, #tpu.memory_space<vmem>>, vector<32x64xbf16>
    %cst_20 = arith.constant dense<0.000000e+00> : vector<8x64xf32>
    %34 = tpu.matmul %32, %33, %cst_20 {dimension_numbers = #tpu.dot_dimension_numbers<[1], [0], [0], [1], [0, 0, 1, 1], [], []>} : vector<8x32xbf16>, vector<32x64xbf16>, vector<8x64xf32> -> vector<8x64xf32>
    %c0_21 = arith.constant 0 : index
    %c0_22 = arith.constant 0 : index
    %35 = vector.load %arg8[%c0_21, %c0_22] : memref<1x64xf32, #tpu.memory_space<vmem>>, vector<1x64xf32>
    %36 = vector.broadcast %35 : vector<1x64xf32> to vector<8x64xf32>
    %37 = arith.addf %34, %36 : vector<8x64xf32>
    %38 = vector.extract_strided_slice %37 {offsets = [0, 0], sizes = [8, 32], strides = [1, 1]} : vector<8x64xf32> to vector<8x32xf32>
    %39 = vector.extract_strided_slice %37 {offsets = [0, 32], sizes = [8, 32], strides = [1, 1]} : vector<8x64xf32> to vector<8x32xf32>
    %c0_23 = arith.constant 0 : index
    %c0_24 = arith.constant 0 : index
    %c0_25 = arith.constant 0 : index
    %40 = vector.load %arg11[%c0_23, %c0_24, %c0_25] : memref<1x1x8xf32, #tpu.memory_space<vmem>>, vector<1x1x8xf32>
    %41 = vector.shape_cast %40 : vector<1x1x8xf32> to vector<1x8xf32>
    %cst_26 = arith.constant 0.000000e+00 : f32
    %42 = vector.broadcast %cst_26 : f32 to vector<8x32xf32>
    %43 = vector.extract_strided_slice %29 {offsets = [0, 0], sizes = [8, 8], strides = [1, 1]} : vector<8x32xf32> to vector<8x8xf32>
    %44 = arith.truncf %43 : vector<8x8xf32> to vector<8x8xbf16>
    %45 = vector.extract_strided_slice %38 {offsets = [0, 0], sizes = [8, 8], strides = [1, 1]} : vector<8x32xf32> to vector<8x8xf32>
    %46 = arith.truncf %45 : vector<8x8xf32> to vector<8x8xbf16>
    %47 = vector.extract_strided_slice %39 {offsets = [0, 0], sizes = [8, 8], strides = [1, 1]} : vector<8x32xf32> to vector<8x8xf32>
    %48 = arith.truncf %47 : vector<8x8xf32> to vector<8x8xbf16>
    %cst_27 = arith.constant dense<0.000000e+00> : vector<8x8xf32>
    %49 = tpu.matmul %44, %46, %cst_27 {dimension_numbers = #tpu.dot_dimension_numbers<[1], [1], [0], [0], [0, 0, 1, 0], [], []>} : vector<8x8xbf16>, vector<8x8xbf16>, vector<8x8xf32> -> vector<8x8xf32>
    %cst_28 = arith.constant 0.353553385 : f32
    %50 = vector.broadcast %cst_28 : f32 to vector<8x8xf32>
    %51 = arith.mulf %49, %50 : vector<8x8xf32>
    %52 = vector.broadcast %41 : vector<1x8xf32> to vector<8x8xf32>
    %53 = arith.addf %51, %52 : vector<8x8xf32>
    %cst_29 = arith.constant dense<0xFF800000> : vector<8xf32>
    %54 = vector.multi_reduction <maximumf>, %53, %cst_29 [1] : vector<8x8xf32> to vector<8xf32>
    %55 = vector.shape_cast %54 : vector<8xf32> to vector<8x1xf32>
    %56 = vector.broadcast %55 : vector<8x1xf32> to vector<8x8xf32>
    %57 = arith.subf %53, %56 : vector<8x8xf32>
    %58 = math.exp %57 : vector<8x8xf32>
    %cst_30 = arith.constant dense<0.000000e+00> : vector<8xf32>
    %59 = vector.multi_reduction <add>, %58, %cst_30 [1] : vector<8x8xf32> to vector<8xf32>
    %60 = vector.shape_cast %59 : vector<8xf32> to vector<8x1xf32>
    %61 = tpu.reciprocal %60 {approx = true} : vector<8x1xf32> -> vector<8x1xf32>
    %62 = vector.broadcast %61 : vector<8x1xf32> to vector<8x8xf32>
    %63 = arith.mulf %58, %62 : vector<8x8xf32>
    %64 = arith.truncf %63 : vector<8x8xf32> to vector<8x8xbf16>
    %cst_31 = arith.constant dense<0.000000e+00> : vector<8x8xf32>
    %65 = tpu.matmul %64, %48, %cst_31 {dimension_numbers = #tpu.dot_dimension_numbers<[1], [0], [0], [1], [0, 0, 1, 1], [], []>} : vector<8x8xbf16>, vector<8x8xbf16>, vector<8x8xf32> -> vector<8x8xf32>
    %c0_32 = arith.constant 0 : index
    %c0_33 = arith.constant 0 : index
    %66 = vector.load %arg9[%c0_32, %c0_33] : memref<32x32xf32, #tpu.memory_space<vmem>>, vector<8x32xf32>
    %67 = arith.truncf %66 : vector<8x32xf32> to vector<8x32xbf16>
    %68 = arith.truncf %65 : vector<8x8xf32> to vector<8x8xbf16>
    %cst_34 = arith.constant dense<0.000000e+00> : vector<8x32xf32>
    %69 = tpu.matmul %68, %67, %cst_34 {dimension_numbers = #tpu.dot_dimension_numbers<[1], [0], [0], [1], [0, 0, 1, 1], [], []>} : vector<8x8xbf16>, vector<8x32xbf16>, vector<8x32xf32> -> vector<8x32xf32>
    %70 = arith.addf %42, %69 : vector<8x32xf32>
    %71 = vector.extract_strided_slice %29 {offsets = [0, 8], sizes = [8, 8], strides = [1, 1]} : vector<8x32xf32> to vector<8x8xf32>
    %72 = arith.truncf %71 : vector<8x8xf32> to vector<8x8xbf16>
    %73 = vector.extract_strided_slice %38 {offsets = [0, 8], sizes = [8, 8], strides = [1, 1]} : vector<8x32xf32> to vector<8x8xf32>
    %74 = arith.truncf %73 : vector<8x8xf32> to vector<8x8xbf16>
    %75 = vector.extract_strided_slice %39 {offsets = [0, 8], sizes = [8, 8], strides = [1, 1]} : vector<8x32xf32> to vector<8x8xf32>
    %76 = arith.truncf %75 : vector<8x8xf32> to vector<8x8xbf16>
    %cst_35 = arith.constant dense<0.000000e+00> : vector<8x8xf32>
    %77 = tpu.matmul %72, %74, %cst_35 {dimension_numbers = #tpu.dot_dimension_numbers<[1], [1], [0], [0], [0, 0, 1, 0], [], []>} : vector<8x8xbf16>, vector<8x8xbf16>, vector<8x8xf32> -> vector<8x8xf32>
    %cst_36 = arith.constant 0.353553385 : f32
    %78 = vector.broadcast %cst_36 : f32 to vector<8x8xf32>
    %79 = arith.mulf %77, %78 : vector<8x8xf32>
    %80 = vector.broadcast %41 : vector<1x8xf32> to vector<8x8xf32>
    %81 = arith.addf %79, %80 : vector<8x8xf32>
    %cst_37 = arith.constant dense<0xFF800000> : vector<8xf32>
    %82 = vector.multi_reduction <maximumf>, %81, %cst_37 [1] : vector<8x8xf32> to vector<8xf32>
    %83 = vector.shape_cast %82 : vector<8xf32> to vector<8x1xf32>
    %84 = vector.broadcast %83 : vector<8x1xf32> to vector<8x8xf32>
    %85 = arith.subf %81, %84 : vector<8x8xf32>
    %86 = math.exp %85 : vector<8x8xf32>
    %cst_38 = arith.constant dense<0.000000e+00> : vector<8xf32>
    %87 = vector.multi_reduction <add>, %86, %cst_38 [1] : vector<8x8xf32> to vector<8xf32>
    %88 = vector.shape_cast %87 : vector<8xf32> to vector<8x1xf32>
    %89 = tpu.reciprocal %88 {approx = true} : vector<8x1xf32> -> vector<8x1xf32>
    %90 = vector.broadcast %89 : vector<8x1xf32> to vector<8x8xf32>
    %91 = arith.mulf %86, %90 : vector<8x8xf32>
    %92 = arith.truncf %91 : vector<8x8xf32> to vector<8x8xbf16>
    %cst_39 = arith.constant dense<0.000000e+00> : vector<8x8xf32>
    %93 = tpu.matmul %92, %76, %cst_39 {dimension_numbers = #tpu.dot_dimension_numbers<[1], [0], [0], [1], [0, 0, 1, 1], [], []>} : vector<8x8xbf16>, vector<8x8xbf16>, vector<8x8xf32> -> vector<8x8xf32>
    %c8 = arith.constant 8 : index
    %c0_40 = arith.constant 0 : index
    %94 = vector.load %arg9[%c8, %c0_40] : memref<32x32xf32, #tpu.memory_space<vmem>>, vector<8x32xf32>
    %95 = arith.truncf %94 : vector<8x32xf32> to vector<8x32xbf16>
    %96 = arith.truncf %93 : vector<8x8xf32> to vector<8x8xbf16>
    %cst_41 = arith.constant dense<0.000000e+00> : vector<8x32xf32>
    %97 = tpu.matmul %96, %95, %cst_41 {dimension_numbers = #tpu.dot_dimension_numbers<[1], [0], [0], [1], [0, 0, 1, 1], [], []>} : vector<8x8xbf16>, vector<8x32xbf16>, vector<8x32xf32> -> vector<8x32xf32>
    %98 = arith.addf %70, %97 : vector<8x32xf32>
    %99 = vector.extract_strided_slice %29 {offsets = [0, 16], sizes = [8, 8], strides = [1, 1]} : vector<8x32xf32> to vector<8x8xf32>
    %100 = arith.truncf %99 : vector<8x8xf32> to vector<8x8xbf16>
    %101 = vector.extract_strided_slice %38 {offsets = [0, 16], sizes = [8, 8], strides = [1, 1]} : vector<8x32xf32> to vector<8x8xf32>
    %102 = arith.truncf %101 : vector<8x8xf32> to vector<8x8xbf16>
    %103 = vector.extract_strided_slice %39 {offsets = [0, 16], sizes = [8, 8], strides = [1, 1]} : vector<8x32xf32> to vector<8x8xf32>
    %104 = arith.truncf %103 : vector<8x8xf32> to vector<8x8xbf16>
    %cst_42 = arith.constant dense<0.000000e+00> : vector<8x8xf32>
    %105 = tpu.matmul %100, %102, %cst_42 {dimension_numbers = #tpu.dot_dimension_numbers<[1], [1], [0], [0], [0, 0, 1, 0], [], []>} : vector<8x8xbf16>, vector<8x8xbf16>, vector<8x8xf32> -> vector<8x8xf32>
    %cst_43 = arith.constant 0.353553385 : f32
    %106 = vector.broadcast %cst_43 : f32 to vector<8x8xf32>
    %107 = arith.mulf %105, %106 : vector<8x8xf32>
    %108 = vector.broadcast %41 : vector<1x8xf32> to vector<8x8xf32>
    %109 = arith.addf %107, %108 : vector<8x8xf32>
    %cst_44 = arith.constant dense<0xFF800000> : vector<8xf32>
    %110 = vector.multi_reduction <maximumf>, %109, %cst_44 [1] : vector<8x8xf32> to vector<8xf32>
    %111 = vector.shape_cast %110 : vector<8xf32> to vector<8x1xf32>
    %112 = vector.broadcast %111 : vector<8x1xf32> to vector<8x8xf32>
    %113 = arith.subf %109, %112 : vector<8x8xf32>
    %114 = math.exp %113 : vector<8x8xf32>
    %cst_45 = arith.constant dense<0.000000e+00> : vector<8xf32>
    %115 = vector.multi_reduction <add>, %114, %cst_45 [1] : vector<8x8xf32> to vector<8xf32>
    %116 = vector.shape_cast %115 : vector<8xf32> to vector<8x1xf32>
    %117 = tpu.reciprocal %116 {approx = true} : vector<8x1xf32> -> vector<8x1xf32>
    %118 = vector.broadcast %117 : vector<8x1xf32> to vector<8x8xf32>
    %119 = arith.mulf %114, %118 : vector<8x8xf32>
    %120 = arith.truncf %119 : vector<8x8xf32> to vector<8x8xbf16>
    %cst_46 = arith.constant dense<0.000000e+00> : vector<8x8xf32>
    %121 = tpu.matmul %120, %104, %cst_46 {dimension_numbers = #tpu.dot_dimension_numbers<[1], [0], [0], [1], [0, 0, 1, 1], [], []>} : vector<8x8xbf16>, vector<8x8xbf16>, vector<8x8xf32> -> vector<8x8xf32>
    %c16 = arith.constant 16 : index
    %c0_47 = arith.constant 0 : index
    %122 = vector.load %arg9[%c16, %c0_47] : memref<32x32xf32, #tpu.memory_space<vmem>>, vector<8x32xf32>
    %123 = arith.truncf %122 : vector<8x32xf32> to vector<8x32xbf16>
    %124 = arith.truncf %121 : vector<8x8xf32> to vector<8x8xbf16>
    %cst_48 = arith.constant dense<0.000000e+00> : vector<8x32xf32>
    %125 = tpu.matmul %124, %123, %cst_48 {dimension_numbers = #tpu.dot_dimension_numbers<[1], [0], [0], [1], [0, 0, 1, 1], [], []>} : vector<8x8xbf16>, vector<8x32xbf16>, vector<8x32xf32> -> vector<8x32xf32>
    %126 = arith.addf %98, %125 : vector<8x32xf32>
    %127 = vector.extract_strided_slice %29 {offsets = [0, 24], sizes = [8, 8], strides = [1, 1]} : vector<8x32xf32> to vector<8x8xf32>
    %128 = arith.truncf %127 : vector<8x8xf32> to vector<8x8xbf16>
    %129 = vector.extract_strided_slice %38 {offsets = [0, 24], sizes = [8, 8], strides = [1, 1]} : vector<8x32xf32> to vector<8x8xf32>
    %130 = arith.truncf %129 : vector<8x8xf32> to vector<8x8xbf16>
    %131 = vector.extract_strided_slice %39 {offsets = [0, 24], sizes = [8, 8], strides = [1, 1]} : vector<8x32xf32> to vector<8x8xf32>
    %132 = arith.truncf %131 : vector<8x8xf32> to vector<8x8xbf16>
    %cst_49 = arith.constant dense<0.000000e+00> : vector<8x8xf32>
    %133 = tpu.matmul %128, %130, %cst_49 {dimension_numbers = #tpu.dot_dimension_numbers<[1], [1], [0], [0], [0, 0, 1, 0], [], []>} : vector<8x8xbf16>, vector<8x8xbf16>, vector<8x8xf32> -> vector<8x8xf32>
    %cst_50 = arith.constant 0.353553385 : f32
    %134 = vector.broadcast %cst_50 : f32 to vector<8x8xf32>
    %135 = arith.mulf %133, %134 : vector<8x8xf32>
    %136 = vector.broadcast %41 : vector<1x8xf32> to vector<8x8xf32>
    %137 = arith.addf %135, %136 : vector<8x8xf32>
    %cst_51 = arith.constant dense<0xFF800000> : vector<8xf32>
    %138 = vector.multi_reduction <maximumf>, %137, %cst_51 [1] : vector<8x8xf32> to vector<8xf32>
    %139 = vector.shape_cast %138 : vector<8xf32> to vector<8x1xf32>
    %140 = vector.broadcast %139 : vector<8x1xf32> to vector<8x8xf32>
    %141 = arith.subf %137, %140 : vector<8x8xf32>
    %142 = math.exp %141 : vector<8x8xf32>
    %cst_52 = arith.constant dense<0.000000e+00> : vector<8xf32>
    %143 = vector.multi_reduction <add>, %142, %cst_52 [1] : vector<8x8xf32> to vector<8xf32>
    %144 = vector.shape_cast %143 : vector<8xf32> to vector<8x1xf32>
    %145 = tpu.reciprocal %144 {approx = true} : vector<8x1xf32> -> vector<8x1xf32>
    %146 = vector.broadcast %145 : vector<8x1xf32> to vector<8x8xf32>
    %147 = arith.mulf %142, %146 : vector<8x8xf32>
    %148 = arith.truncf %147 : vector<8x8xf32> to vector<8x8xbf16>
    %cst_53 = arith.constant dense<0.000000e+00> : vector<8x8xf32>
    %149 = tpu.matmul %148, %132, %cst_53 {dimension_numbers = #tpu.dot_dimension_numbers<[1], [0], [0], [1], [0, 0, 1, 1], [], []>} : vector<8x8xbf16>, vector<8x8xbf16>, vector<8x8xf32> -> vector<8x8xf32>
    %c24 = arith.constant 24 : index
    %c0_54 = arith.constant 0 : index
    %150 = vector.load %arg9[%c24, %c0_54] : memref<32x32xf32, #tpu.memory_space<vmem>>, vector<8x32xf32>
    %151 = arith.truncf %150 : vector<8x32xf32> to vector<8x32xbf16>
    %152 = arith.truncf %149 : vector<8x8xf32> to vector<8x8xbf16>
    %cst_55 = arith.constant dense<0.000000e+00> : vector<8x32xf32>
    %153 = tpu.matmul %152, %151, %cst_55 {dimension_numbers = #tpu.dot_dimension_numbers<[1], [0], [0], [1], [0, 0, 1, 1], [], []>} : vector<8x8xbf16>, vector<8x32xbf16>, vector<8x32xf32> -> vector<8x32xf32>
    %154 = arith.addf %126, %153 : vector<8x32xf32>
    %155 = arith.addf %1, %154 : vector<8x32xf32>
    %c0_56 = arith.constant 0 : index
    %c0_57 = arith.constant 0 : index
    %156 = vector.load %arg10[%c0_56, %c0_57] : memref<1x32xf32, #tpu.memory_space<vmem>>, vector<1x32xf32>
    %157 = vector.broadcast %156 : vector<1x32xf32> to vector<8x32xf32>
    %158 = arith.addf %155, %157 : vector<8x32xf32>
    %c0_58 = arith.constant 0 : index
    %c0_59 = arith.constant 0 : index
    %c0_60 = arith.constant 0 : index
    %159 = vector.load %arg12[%c0_58, %c0_59, %c0_60] : memref<1x8x32xf32, #tpu.memory_space<vmem>>, vector<1x8x32xf32>
    %160 = vector.shape_cast %159 : vector<1x8x32xf32> to vector<8x32xf32>
    %161 = vector.shape_cast %158 : vector<8x32xf32> to vector<1x8x32xf32>
    tpu.vector_store %arg12[%c0_58, %c0_59, %c0_60], %161 {strides = array<i32>} : memref<1x8x32xf32, #tpu.memory_space<vmem>>, vector<1x8x32xf32>,
    return
  }
  func.func @transform_0(%arg0: i32) -> (i32, i32, i32) {
    %c0_i32 = arith.constant 0 : i32
    %c0_i32_0 = arith.constant 0 : i32
    %c0_i32_1 = arith.constant 0 : i32
    return %arg0, %c0_i32, %c0_i32_0 : i32, i32, i32
  }
  func.func @transform_1(%arg0: i32) -> (i32, i32, i32) {
    %c0_i32 = arith.constant 0 : i32
    %c0_i32_0 = arith.constant 0 : i32
    %c0_i32_1 = arith.constant 0 : i32
    return %arg0, %c0_i32, %c0_i32_0 : i32, i32, i32
  }
  func.func @transform_2(%arg0: i32) -> (i32, i32) {
    %c0_i32 = arith.constant 0 : i32
    %c0_i32_0 = arith.constant 0 : i32
    %c0_i32_1 = arith.constant 0 : i32
    return %c0_i32, %c0_i32_0 : i32, i32
  }
  func.func @transform_3(%arg0: i32) -> (i32, i32) {
    %c0_i32 = arith.constant 0 : i32
    %c0_i32_0 = arith.constant 0 : i32
    %c0_i32_1 = arith.constant 0 : i32
    return %c0_i32, %c0_i32_0 : i32, i32
  }
  func.func @transform_4(%arg0: i32) -> (i32, i32) {
    %c0_i32 = arith.constant 0 : i32
    %c0_i32_0 = arith.constant 0 : i32
    %c0_i32_1 = arith.constant 0 : i32
    return %c0_i32, %c0_i32_0 : i32, i32
  }
  func.func @transform_5(%arg0: i32) -> (i32, i32) {
    %c0_i32 = arith.constant 0 : i32
    %c0_i32_0 = arith.constant 0 : i32
    %c0_i32_1 = arith.constant 0 : i32
    return %c0_i32, %c0_i32_0 : i32, i32
  }
  func.func @transform_6(%arg0: i32) -> (i32, i32) {
    %c0_i32 = arith.constant 0 : i32
    %c0_i32_0 = arith.constant 0 : i32
    %c0_i32_1 = arith.constant 0 : i32
    return %c0_i32, %c0_i32_0 : i32, i32
  }
  func.func @transform_7(%arg0: i32) -> (i32, i32) {
    %c0_i32 = arith.constant 0 : i32
    %c0_i32_0 = arith.constant 0 : i32
    %c0_i32_1 = arith.constant 0 : i32
    return %c0_i32, %c0_i32_0 : i32, i32
  }
  func.func @transform_8(%arg0: i32) -> (i32, i32) {
    %c0_i32 = arith.constant 0 : i32
    %c0_i32_0 = arith.constant 0 : i32
    %c0_i32_1 = arith.constant 0 : i32
    return %c0_i32, %c0_i32_0 : i32, i32
  }
  func.func @transform_9(%arg0: i32) -> (i32, i32) {
    %c0_i32 = arith.constant 0 : i32
    %c0_i32_0 = arith.constant 0 : i32
    %c0_i32_1 = arith.constant 0 : i32
    return %c0_i32, %c0_i32_0 : i32, i32
  }
  func.func @transform_10(%arg0: i32) -> (i32, i32, i32) {
    %c0_i32 = arith.constant 0 : i32
    %c0_i32_0 = arith.constant 0 : i32
    %c0_i32_1 = arith.constant 0 : i32
    return %arg0, %c0_i32, %c0_i32_0 : i32, i32, i32
  }
  func.func @transform_11(%arg0: i32) -> (i32, i32, i32) {
    %c0_i32 = arith.constant 0 : i32
    %c0_i32_0 = arith.constant 0 : i32
    %c0_i32_1 = arith.constant 0 : i32
    return %arg0, %c0_i32, %c0_i32_0 : i32, i32, i32
  }
}

module attributes {stable_mosaic.version = 11 : i64} {
  func.func @_attn_sublayer_kernel(%arg0: i32, %arg1: memref<1x8x32xf32, #tpu.memory_space<vmem>>, %arg2: memref<1x8x32xf32, #tpu.memory_space<vmem>>, %arg3: memref<1x32xf32, #tpu.memory_space<vmem>>, %arg4: memref<1x32xf32, #tpu.memory_space<vmem>>, %arg5: memref<32x32xbf16, #tpu.memory_space<vmem>>, %arg6: memref<1x32xf32, #tpu.memory_space<vmem>>, %arg7: memref<32x64xbf16, #tpu.memory_space<vmem>>, %arg8: memref<1x64xf32, #tpu.memory_space<vmem>>, %arg9: memref<32x32xf32, #tpu.memory_space<vmem>>, %arg10: memref<1x32xf32, #tpu.memory_space<vmem>>, %arg11: memref<1x1x8xf32, #tpu.memory_space<vmem>>, %arg12: memref<1x8x32xf32, #tpu.memory_space<vmem>>) attributes {dimension_semantics = [#tpu.dimension_semantics<parallel>], iteration_bounds = array<i64: 2>, scalar_prefetch = 0 : i64, scratch_operands = 0 : i64, tpu.core_type = #tpu.core_type<tc>, window_params = [{transform_indices = @transform_0, window_bounds = array<i64: 1, 8, 32>}, {transform_indices = @transform_1, window_bounds = array<i64: 1, 8, 32>}, {pipeline_mode = #tpu.pipeline_mode<synchronous>, transform_indices = @transform_2, window_bounds = array<i64: 1, 32>}, {pipeline_mode = #tpu.pipeline_mode<synchronous>, transform_indices = @transform_3, window_bounds = array<i64: 1, 32>}, {pipeline_mode = #tpu.pipeline_mode<synchronous>, transform_indices = @transform_4, window_bounds = array<i64: 32, 32>}, {pipeline_mode = #tpu.pipeline_mode<synchronous>, transform_indices = @transform_5, window_bounds = array<i64: 1, 32>}, {pipeline_mode = #tpu.pipeline_mode<synchronous>, transform_indices = @transform_6, window_bounds = array<i64: 32, 64>}, {pipeline_mode = #tpu.pipeline_mode<synchronous>, transform_indices = @transform_7, window_bounds = array<i64: 1, 64>}, {pipeline_mode = #tpu.pipeline_mode<synchronous>, transform_indices = @transform_8, window_bounds = array<i64: 32, 32>}, {pipeline_mode = #tpu.pipeline_mode<synchronous>, transform_indices = @transform_9, window_bounds = array<i64: 1, 32>}, {transform_indices = @transform_10, window_bounds = array<i64: 1, 1, 8>}, {transform_indices = @transform_11, window_bounds = array<i64: 1, 8, 32>}]} {
    %c0 = arith.constant 0 : index
    %c0_0 = arith.constant 0 : index
    %c0_1 = arith.constant 0 : index
    %0 = vector.load %arg1[%c0, %c0_0, %c0_1] : memref<1x8x32xf32, #tpu.memory_space<vmem>>, vector<1x8x32xf32>
    %1 = vector.shape_cast %0 : vector<1x8x32xf32> to vector<8x32xf32>
    %c0_2 = arith.constant 0 : index
    %c0_3 = arith.constant 0 : index
    %2 = vector.load %arg3[%c0_2, %c0_3] : memref<1x32xf32, #tpu.memory_space<vmem>>, vector<1x32xf32>
    %c0_4 = arith.constant 0 : index
    %c0_5 = arith.constant 0 : index
    %3 = vector.load %arg4[%c0_4, %c0_5] : memref<1x32xf32, #tpu.memory_space<vmem>>, vector<1x32xf32>
    %cst = arith.constant dense<0.000000e+00> : vector<8xf32>
    %4 = vector.multi_reduction <add>, %1, %cst [1] : vector<8x32xf32> to vector<8xf32>
    %5 = vector.shape_cast %4 : vector<8xf32> to vector<8x1xf32>
    %cst_6 = arith.constant 3.200000e+01 : f32
    %6 = vector.broadcast %cst_6 : f32 to vector<8x1xf32>
    %7 = arith.divf %5, %6 : vector<8x1xf32>
    %8 = vector.broadcast %7 : vector<8x1xf32> to vector<8x32xf32>
    %9 = arith.subf %1, %8 : vector<8x32xf32>
    %10 = arith.mulf %9, %9 : vector<8x32xf32>
    %cst_7 = arith.constant dense<0.000000e+00> : vector<8xf32>
    %11 = vector.multi_reduction <add>, %10, %cst_7 [1] : vector<8x32xf32> to vector<8xf32>
    %12 = vector.shape_cast %11 : vector<8xf32> to vector<8x1xf32>
    %cst_8 = arith.constant 3.200000e+01 : f32
    %13 = vector.broadcast %cst_8 : f32 to vector<8x1xf32>
    %14 = arith.divf %12, %13 : vector<8x1xf32>
    %cst_9 = arith.constant 9.99999974E-6 : f32
    %15 = vector.broadcast %cst_9 : f32 to vector<8x1xf32>
    %16 = arith.addf %14, %15 : vector<8x1xf32>
    %17 = math.rsqrt %16 : vector<8x1xf32>
    %18 = vector.broadcast %17 : vector<8x1xf32> to vector<8x32xf32>
    %19 = arith.mulf %9, %18 : vector<8x32xf32>
    %20 = vector.broadcast %2 : vector<1x32xf32> to vector<8x32xf32>
    %21 = arith.mulf %19, %20 : vector<8x32xf32>
    %22 = vector.broadcast %3 : vector<1x32xf32> to vector<8x32xf32>
    %23 = arith.addf %21, %22 : vector<8x32xf32>
    %24 = arith.truncf %23 : vector<8x32xf32> to vector<8x32xbf16>
    %c0_10 = arith.constant 0 : index
    %c0_11 = arith.constant 0 : index
    %25 = vector.load %arg5[%c0_10, %c0_11] : memref<32x32xbf16, #tpu.memory_space<vmem>>, vector<32x32xbf16>
    %cst_12 = arith.constant dense<0.000000e+00> : vector<8x32xf32>
    %26 = tpu.matmul %24, %25, %cst_12 {dimension_numbers = #tpu.dot_dimension_numbers<[1], [0], [0], [1], [0, 0, 1, 1], [], []>} : vector<8x32xbf16>, vector<32x32xbf16>, vector<8x32xf32> -> vector<8x32xf32>
    %c0_13 = arith.constant 0 : index
    %c0_14 = arith.constant 0 : index
    %27 = vector.load %arg6[%c0_13, %c0_14] : memref<1x32xf32, #tpu.memory_space<vmem>>, vector<1x32xf32>
    %28 = vector.broadcast %27 : vector<1x32xf32> to vector<8x32xf32>
    %29 = arith.addf %26, %28 : vector<8x32xf32>
    %30 = arith.truncf %23 : vector<8x32xf32> to vector<8x32xbf16>
    %c0_15 = arith.constant 0 : index
    %c0_16 = arith.constant 0 : index
    %31 = vector.load %arg7[%c0_15, %c0_16] : memref<32x64xbf16, #tpu.memory_space<vmem>>, vector<32x64xbf16>
    %cst_17 = arith.constant dense<0.000000e+00> : vector<8x64xf32>
    %32 = tpu.matmul %30, %31, %cst_17 {dimension_numbers = #tpu.dot_dimension_numbers<[1], [0], [0], [1], [0, 0, 1, 1], [], []>} : vector<8x32xbf16>, vector<32x64xbf16>, vector<8x64xf32> -> vector<8x64xf32>
    %c0_18 = arith.constant 0 : index
    %c0_19 = arith.constant 0 : index
    %33 = vector.load %arg8[%c0_18, %c0_19] : memref<1x64xf32, #tpu.memory_space<vmem>>, vector<1x64xf32>
    %34 = vector.broadcast %33 : vector<1x64xf32> to vector<8x64xf32>
    %35 = arith.addf %32, %34 : vector<8x64xf32>
    %36 = vector.extract_strided_slice %35 {offsets = [0, 0], sizes = [8, 32], strides = [1, 1]} : vector<8x64xf32> to vector<8x32xf32>
    %37 = vector.extract_strided_slice %35 {offsets = [0, 32], sizes = [8, 32], strides = [1, 1]} : vector<8x64xf32> to vector<8x32xf32>
    %c0_20 = arith.constant 0 : index
    %c0_21 = arith.constant 0 : index
    %c0_22 = arith.constant 0 : index
    %38 = vector.load %arg11[%c0_20, %c0_21, %c0_22] : memref<1x1x8xf32, #tpu.memory_space<vmem>>, vector<1x1x8xf32>
    %39 = vector.shape_cast %38 : vector<1x1x8xf32> to vector<1x8xf32>
    %cst_23 = arith.constant 0.000000e+00 : f32
    %40 = vector.broadcast %cst_23 : f32 to vector<8x32xf32>
    %41 = vector.extract_strided_slice %29 {offsets = [0, 0], sizes = [8, 8], strides = [1, 1]} : vector<8x32xf32> to vector<8x8xf32>
    %42 = arith.truncf %41 : vector<8x8xf32> to vector<8x8xbf16>
    %43 = vector.extract_strided_slice %36 {offsets = [0, 0], sizes = [8, 8], strides = [1, 1]} : vector<8x32xf32> to vector<8x8xf32>
    %44 = arith.truncf %43 : vector<8x8xf32> to vector<8x8xbf16>
    %45 = vector.extract_strided_slice %37 {offsets = [0, 0], sizes = [8, 8], strides = [1, 1]} : vector<8x32xf32> to vector<8x8xf32>
    %46 = arith.truncf %45 : vector<8x8xf32> to vector<8x8xbf16>
    %cst_24 = arith.constant dense<0.000000e+00> : vector<8x8xf32>
    %47 = tpu.matmul %42, %44, %cst_24 {dimension_numbers = #tpu.dot_dimension_numbers<[1], [1], [0], [0], [0, 0, 1, 0], [], []>} : vector<8x8xbf16>, vector<8x8xbf16>, vector<8x8xf32> -> vector<8x8xf32>
    %cst_25 = arith.constant 0.353553385 : f32
    %48 = vector.broadcast %cst_25 : f32 to vector<8x8xf32>
    %49 = arith.mulf %47, %48 : vector<8x8xf32>
    %50 = vector.broadcast %39 : vector<1x8xf32> to vector<8x8xf32>
    %51 = arith.addf %49, %50 : vector<8x8xf32>
    %cst_26 = arith.constant dense<0xFF800000> : vector<8xf32>
    %52 = vector.multi_reduction <maximumf>, %51, %cst_26 [1] : vector<8x8xf32> to vector<8xf32>
    %53 = vector.shape_cast %52 : vector<8xf32> to vector<8x1xf32>
    %54 = vector.broadcast %53 : vector<8x1xf32> to vector<8x8xf32>
    %55 = arith.subf %51, %54 : vector<8x8xf32>
    %56 = math.exp %55 : vector<8x8xf32>
    %cst_27 = arith.constant dense<0.000000e+00> : vector<8xf32>
    %57 = vector.multi_reduction <add>, %56, %cst_27 [1] : vector<8x8xf32> to vector<8xf32>
    %58 = vector.shape_cast %57 : vector<8xf32> to vector<8x1xf32>
    %59 = tpu.reciprocal %58 {approx = true} : vector<8x1xf32> -> vector<8x1xf32>
    %60 = vector.broadcast %59 : vector<8x1xf32> to vector<8x8xf32>
    %61 = arith.mulf %56, %60 : vector<8x8xf32>
    %62 = arith.truncf %61 : vector<8x8xf32> to vector<8x8xbf16>
    %cst_28 = arith.constant dense<0.000000e+00> : vector<8x8xf32>
    %63 = tpu.matmul %62, %46, %cst_28 {dimension_numbers = #tpu.dot_dimension_numbers<[1], [0], [0], [1], [0, 0, 1, 1], [], []>} : vector<8x8xbf16>, vector<8x8xbf16>, vector<8x8xf32> -> vector<8x8xf32>
    %c0_29 = arith.constant 0 : index
    %c0_30 = arith.constant 0 : index
    %64 = vector.load %arg9[%c0_29, %c0_30] : memref<32x32xf32, #tpu.memory_space<vmem>>, vector<8x32xf32>
    %65 = arith.truncf %64 : vector<8x32xf32> to vector<8x32xbf16>
    %66 = arith.truncf %63 : vector<8x8xf32> to vector<8x8xbf16>
    %cst_31 = arith.constant dense<0.000000e+00> : vector<8x32xf32>
    %67 = tpu.matmul %66, %65, %cst_31 {dimension_numbers = #tpu.dot_dimension_numbers<[1], [0], [0], [1], [0, 0, 1, 1], [], []>} : vector<8x8xbf16>, vector<8x32xbf16>, vector<8x32xf32> -> vector<8x32xf32>
    %68 = arith.addf %40, %67 : vector<8x32xf32>
    %69 = vector.extract_strided_slice %29 {offsets = [0, 8], sizes = [8, 8], strides = [1, 1]} : vector<8x32xf32> to vector<8x8xf32>
    %70 = arith.truncf %69 : vector<8x8xf32> to vector<8x8xbf16>
    %71 = vector.extract_strided_slice %36 {offsets = [0, 8], sizes = [8, 8], strides = [1, 1]} : vector<8x32xf32> to vector<8x8xf32>
    %72 = arith.truncf %71 : vector<8x8xf32> to vector<8x8xbf16>
    %73 = vector.extract_strided_slice %37 {offsets = [0, 8], sizes = [8, 8], strides = [1, 1]} : vector<8x32xf32> to vector<8x8xf32>
    %74 = arith.truncf %73 : vector<8x8xf32> to vector<8x8xbf16>
    %cst_32 = arith.constant dense<0.000000e+00> : vector<8x8xf32>
    %75 = tpu.matmul %70, %72, %cst_32 {dimension_numbers = #tpu.dot_dimension_numbers<[1], [1], [0], [0], [0, 0, 1, 0], [], []>} : vector<8x8xbf16>, vector<8x8xbf16>, vector<8x8xf32> -> vector<8x8xf32>
    %cst_33 = arith.constant 0.353553385 : f32
    %76 = vector.broadcast %cst_33 : f32 to vector<8x8xf32>
    %77 = arith.mulf %75, %76 : vector<8x8xf32>
    %78 = vector.broadcast %39 : vector<1x8xf32> to vector<8x8xf32>
    %79 = arith.addf %77, %78 : vector<8x8xf32>
    %cst_34 = arith.constant dense<0xFF800000> : vector<8xf32>
    %80 = vector.multi_reduction <maximumf>, %79, %cst_34 [1] : vector<8x8xf32> to vector<8xf32>
    %81 = vector.shape_cast %80 : vector<8xf32> to vector<8x1xf32>
    %82 = vector.broadcast %81 : vector<8x1xf32> to vector<8x8xf32>
    %83 = arith.subf %79, %82 : vector<8x8xf32>
    %84 = math.exp %83 : vector<8x8xf32>
    %cst_35 = arith.constant dense<0.000000e+00> : vector<8xf32>
    %85 = vector.multi_reduction <add>, %84, %cst_35 [1] : vector<8x8xf32> to vector<8xf32>
    %86 = vector.shape_cast %85 : vector<8xf32> to vector<8x1xf32>
    %87 = tpu.reciprocal %86 {approx = true} : vector<8x1xf32> -> vector<8x1xf32>
    %88 = vector.broadcast %87 : vector<8x1xf32> to vector<8x8xf32>
    %89 = arith.mulf %84, %88 : vector<8x8xf32>
    %90 = arith.truncf %89 : vector<8x8xf32> to vector<8x8xbf16>
    %cst_36 = arith.constant dense<0.000000e+00> : vector<8x8xf32>
    %91 = tpu.matmul %90, %74, %cst_36 {dimension_numbers = #tpu.dot_dimension_numbers<[1], [0], [0], [1], [0, 0, 1, 1], [], []>} : vector<8x8xbf16>, vector<8x8xbf16>, vector<8x8xf32> -> vector<8x8xf32>
    %c8 = arith.constant 8 : index
    %c0_37 = arith.constant 0 : index
    %92 = vector.load %arg9[%c8, %c0_37] : memref<32x32xf32, #tpu.memory_space<vmem>>, vector<8x32xf32>
    %93 = arith.truncf %92 : vector<8x32xf32> to vector<8x32xbf16>
    %94 = arith.truncf %91 : vector<8x8xf32> to vector<8x8xbf16>
    %cst_38 = arith.constant dense<0.000000e+00> : vector<8x32xf32>
    %95 = tpu.matmul %94, %93, %cst_38 {dimension_numbers = #tpu.dot_dimension_numbers<[1], [0], [0], [1], [0, 0, 1, 1], [], []>} : vector<8x8xbf16>, vector<8x32xbf16>, vector<8x32xf32> -> vector<8x32xf32>
    %96 = arith.addf %68, %95 : vector<8x32xf32>
    %97 = vector.extract_strided_slice %29 {offsets = [0, 16], sizes = [8, 8], strides = [1, 1]} : vector<8x32xf32> to vector<8x8xf32>
    %98 = arith.truncf %97 : vector<8x8xf32> to vector<8x8xbf16>
    %99 = vector.extract_strided_slice %36 {offsets = [0, 16], sizes = [8, 8], strides = [1, 1]} : vector<8x32xf32> to vector<8x8xf32>
    %100 = arith.truncf %99 : vector<8x8xf32> to vector<8x8xbf16>
    %101 = vector.extract_strided_slice %37 {offsets = [0, 16], sizes = [8, 8], strides = [1, 1]} : vector<8x32xf32> to vector<8x8xf32>
    %102 = arith.truncf %101 : vector<8x8xf32> to vector<8x8xbf16>
    %cst_39 = arith.constant dense<0.000000e+00> : vector<8x8xf32>
    %103 = tpu.matmul %98, %100, %cst_39 {dimension_numbers = #tpu.dot_dimension_numbers<[1], [1], [0], [0], [0, 0, 1, 0], [], []>} : vector<8x8xbf16>, vector<8x8xbf16>, vector<8x8xf32> -> vector<8x8xf32>
    %cst_40 = arith.constant 0.353553385 : f32
    %104 = vector.broadcast %cst_40 : f32 to vector<8x8xf32>
    %105 = arith.mulf %103, %104 : vector<8x8xf32>
    %106 = vector.broadcast %39 : vector<1x8xf32> to vector<8x8xf32>
    %107 = arith.addf %105, %106 : vector<8x8xf32>
    %cst_41 = arith.constant dense<0xFF800000> : vector<8xf32>
    %108 = vector.multi_reduction <maximumf>, %107, %cst_41 [1] : vector<8x8xf32> to vector<8xf32>
    %109 = vector.shape_cast %108 : vector<8xf32> to vector<8x1xf32>
    %110 = vector.broadcast %109 : vector<8x1xf32> to vector<8x8xf32>
    %111 = arith.subf %107, %110 : vector<8x8xf32>
    %112 = math.exp %111 : vector<8x8xf32>
    %cst_42 = arith.constant dense<0.000000e+00> : vector<8xf32>
    %113 = vector.multi_reduction <add>, %112, %cst_42 [1] : vector<8x8xf32> to vector<8xf32>
    %114 = vector.shape_cast %113 : vector<8xf32> to vector<8x1xf32>
    %115 = tpu.reciprocal %114 {approx = true} : vector<8x1xf32> -> vector<8x1xf32>
    %116 = vector.broadcast %115 : vector<8x1xf32> to vector<8x8xf32>
    %117 = arith.mulf %112, %116 : vector<8x8xf32>
    %118 = arith.truncf %117 : vector<8x8xf32> to vector<8x8xbf16>
    %cst_43 = arith.constant dense<0.000000e+00> : vector<8x8xf32>
    %119 = tpu.matmul %118, %102, %cst_43 {dimension_numbers = #tpu.dot_dimension_numbers<[1], [0], [0], [1], [0, 0, 1, 1], [], []>} : vector<8x8xbf16>, vector<8x8xbf16>, vector<8x8xf32> -> vector<8x8xf32>
    %c16 = arith.constant 16 : index
    %c0_44 = arith.constant 0 : index
    %120 = vector.load %arg9[%c16, %c0_44] : memref<32x32xf32, #tpu.memory_space<vmem>>, vector<8x32xf32>
    %121 = arith.truncf %120 : vector<8x32xf32> to vector<8x32xbf16>
    %122 = arith.truncf %119 : vector<8x8xf32> to vector<8x8xbf16>
    %cst_45 = arith.constant dense<0.000000e+00> : vector<8x32xf32>
    %123 = tpu.matmul %122, %121, %cst_45 {dimension_numbers = #tpu.dot_dimension_numbers<[1], [0], [0], [1], [0, 0, 1, 1], [], []>} : vector<8x8xbf16>, vector<8x32xbf16>, vector<8x32xf32> -> vector<8x32xf32>
    %124 = arith.addf %96, %123 : vector<8x32xf32>
    %125 = vector.extract_strided_slice %29 {offsets = [0, 24], sizes = [8, 8], strides = [1, 1]} : vector<8x32xf32> to vector<8x8xf32>
    %126 = arith.truncf %125 : vector<8x8xf32> to vector<8x8xbf16>
    %127 = vector.extract_strided_slice %36 {offsets = [0, 24], sizes = [8, 8], strides = [1, 1]} : vector<8x32xf32> to vector<8x8xf32>
    %128 = arith.truncf %127 : vector<8x8xf32> to vector<8x8xbf16>
    %129 = vector.extract_strided_slice %37 {offsets = [0, 24], sizes = [8, 8], strides = [1, 1]} : vector<8x32xf32> to vector<8x8xf32>
    %130 = arith.truncf %129 : vector<8x8xf32> to vector<8x8xbf16>
    %cst_46 = arith.constant dense<0.000000e+00> : vector<8x8xf32>
    %131 = tpu.matmul %126, %128, %cst_46 {dimension_numbers = #tpu.dot_dimension_numbers<[1], [1], [0], [0], [0, 0, 1, 0], [], []>} : vector<8x8xbf16>, vector<8x8xbf16>, vector<8x8xf32> -> vector<8x8xf32>
    %cst_47 = arith.constant 0.353553385 : f32
    %132 = vector.broadcast %cst_47 : f32 to vector<8x8xf32>
    %133 = arith.mulf %131, %132 : vector<8x8xf32>
    %134 = vector.broadcast %39 : vector<1x8xf32> to vector<8x8xf32>
    %135 = arith.addf %133, %134 : vector<8x8xf32>
    %cst_48 = arith.constant dense<0xFF800000> : vector<8xf32>
    %136 = vector.multi_reduction <maximumf>, %135, %cst_48 [1] : vector<8x8xf32> to vector<8xf32>
    %137 = vector.shape_cast %136 : vector<8xf32> to vector<8x1xf32>
    %138 = vector.broadcast %137 : vector<8x1xf32> to vector<8x8xf32>
    %139 = arith.subf %135, %138 : vector<8x8xf32>
    %140 = math.exp %139 : vector<8x8xf32>
    %cst_49 = arith.constant dense<0.000000e+00> : vector<8xf32>
    %141 = vector.multi_reduction <add>, %140, %cst_49 [1] : vector<8x8xf32> to vector<8xf32>
    %142 = vector.shape_cast %141 : vector<8xf32> to vector<8x1xf32>
    %143 = tpu.reciprocal %142 {approx = true} : vector<8x1xf32> -> vector<8x1xf32>
    %144 = vector.broadcast %143 : vector<8x1xf32> to vector<8x8xf32>
    %145 = arith.mulf %140, %144 : vector<8x8xf32>
    %146 = arith.truncf %145 : vector<8x8xf32> to vector<8x8xbf16>
    %cst_50 = arith.constant dense<0.000000e+00> : vector<8x8xf32>
    %147 = tpu.matmul %146, %130, %cst_50 {dimension_numbers = #tpu.dot_dimension_numbers<[1], [0], [0], [1], [0, 0, 1, 1], [], []>} : vector<8x8xbf16>, vector<8x8xbf16>, vector<8x8xf32> -> vector<8x8xf32>
    %c24 = arith.constant 24 : index
    %c0_51 = arith.constant 0 : index
    %148 = vector.load %arg9[%c24, %c0_51] : memref<32x32xf32, #tpu.memory_space<vmem>>, vector<8x32xf32>
    %149 = arith.truncf %148 : vector<8x32xf32> to vector<8x32xbf16>
    %150 = arith.truncf %147 : vector<8x8xf32> to vector<8x8xbf16>
    %cst_52 = arith.constant dense<0.000000e+00> : vector<8x32xf32>
    %151 = tpu.matmul %150, %149, %cst_52 {dimension_numbers = #tpu.dot_dimension_numbers<[1], [0], [0], [1], [0, 0, 1, 1], [], []>} : vector<8x8xbf16>, vector<8x32xbf16>, vector<8x32xf32> -> vector<8x32xf32>
    %152 = arith.addf %124, %151 : vector<8x32xf32>
    %153 = arith.addf %1, %152 : vector<8x32xf32>
    %c0_53 = arith.constant 0 : index
    %c0_54 = arith.constant 0 : index
    %154 = vector.load %arg10[%c0_53, %c0_54] : memref<1x32xf32, #tpu.memory_space<vmem>>, vector<1x32xf32>
    %155 = vector.broadcast %154 : vector<1x32xf32> to vector<8x32xf32>
    %156 = arith.addf %153, %155 : vector<8x32xf32>
    %c0_55 = arith.constant 0 : index
    %c0_56 = arith.constant 0 : index
    %c0_57 = arith.constant 0 : index
    %157 = vector.load %arg12[%c0_55, %c0_56, %c0_57] : memref<1x8x32xf32, #tpu.memory_space<vmem>>, vector<1x8x32xf32>
    %158 = vector.shape_cast %157 : vector<1x8x32xf32> to vector<8x32xf32>
    %159 = vector.shape_cast %156 : vector<8x32xf32> to vector<1x8x32xf32>
    tpu.vector_store %arg12[%c0_55, %c0_56, %c0_57], %159 {strides = array<i32>} : memref<1x8x32xf32, #tpu.memory_space<vmem>>, vector<1x8x32xf32>,
    return
  }
  func.func @transform_0(%arg0: i32) -> (i32, i32, i32) {
    %c0_i32 = arith.constant 0 : i32
    %c0_i32_0 = arith.constant 0 : i32
    %c0_i32_1 = arith.constant 0 : i32
    return %arg0, %c0_i32, %c0_i32_0 : i32, i32, i32
  }
  func.func @transform_1(%arg0: i32) -> (i32, i32, i32) {
    %c0_i32 = arith.constant 0 : i32
    %c0_i32_0 = arith.constant 0 : i32
    %c0_i32_1 = arith.constant 0 : i32
    return %arg0, %c0_i32, %c0_i32_0 : i32, i32, i32
  }
  func.func @transform_2(%arg0: i32) -> (i32, i32) {
    %c0_i32 = arith.constant 0 : i32
    %c0_i32_0 = arith.constant 0 : i32
    %c0_i32_1 = arith.constant 0 : i32
    return %c0_i32, %c0_i32_0 : i32, i32
  }
  func.func @transform_3(%arg0: i32) -> (i32, i32) {
    %c0_i32 = arith.constant 0 : i32
    %c0_i32_0 = arith.constant 0 : i32
    %c0_i32_1 = arith.constant 0 : i32
    return %c0_i32, %c0_i32_0 : i32, i32
  }
  func.func @transform_4(%arg0: i32) -> (i32, i32) {
    %c0_i32 = arith.constant 0 : i32
    %c0_i32_0 = arith.constant 0 : i32
    %c0_i32_1 = arith.constant 0 : i32
    return %c0_i32, %c0_i32_0 : i32, i32
  }
  func.func @transform_5(%arg0: i32) -> (i32, i32) {
    %c0_i32 = arith.constant 0 : i32
    %c0_i32_0 = arith.constant 0 : i32
    %c0_i32_1 = arith.constant 0 : i32
    return %c0_i32, %c0_i32_0 : i32, i32
  }
  func.func @transform_6(%arg0: i32) -> (i32, i32) {
    %c0_i32 = arith.constant 0 : i32
    %c0_i32_0 = arith.constant 0 : i32
    %c0_i32_1 = arith.constant 0 : i32
    return %c0_i32, %c0_i32_0 : i32, i32
  }
  func.func @transform_7(%arg0: i32) -> (i32, i32) {
    %c0_i32 = arith.constant 0 : i32
    %c0_i32_0 = arith.constant 0 : i32
    %c0_i32_1 = arith.constant 0 : i32
    return %c0_i32, %c0_i32_0 : i32, i32
  }
  func.func @transform_8(%arg0: i32) -> (i32, i32) {
    %c0_i32 = arith.constant 0 : i32
    %c0_i32_0 = arith.constant 0 : i32
    %c0_i32_1 = arith.constant 0 : i32
    return %c0_i32, %c0_i32_0 : i32, i32
  }
  func.func @transform_9(%arg0: i32) -> (i32, i32) {
    %c0_i32 = arith.constant 0 : i32
    %c0_i32_0 = arith.constant 0 : i32
    %c0_i32_1 = arith.constant 0 : i32
    return %c0_i32, %c0_i32_0 : i32, i32
  }
  func.func @transform_10(%arg0: i32) -> (i32, i32, i32) {
    %c0_i32 = arith.constant 0 : i32
    %c0_i32_0 = arith.constant 0 : i32
    %c0_i32_1 = arith.constant 0 : i32
    return %arg0, %c0_i32, %c0_i32_0 : i32, i32, i32
  }
  func.func @transform_11(%arg0: i32) -> (i32, i32, i32) {
    %c0_i32 = arith.constant 0 : i32
    %c0_i32_0 = arith.constant 0 : i32
    %c0_i32_1 = arith.constant 0 : i32
    return %arg0, %c0_i32, %c0_i32_0 : i32, i32, i32
  }
}

module attributes {stable_mosaic.version = 11 : i64} {
  func.func @_ffn_sublayer_kernel(%arg0: i32, %arg1: memref<1x8x32xf32, #tpu.memory_space<vmem>>, %arg2: memref<1x32xf32, #tpu.memory_space<vmem>>, %arg3: memref<1x32xf32, #tpu.memory_space<vmem>>, %arg4: memref<32x64xbf16, #tpu.memory_space<vmem>>, %arg5: memref<1x64xf32, #tpu.memory_space<vmem>>, %arg6: memref<64x32xbf16, #tpu.memory_space<vmem>>, %arg7: memref<1x32xf32, #tpu.memory_space<vmem>>, %arg8: memref<1x8x32xf32, #tpu.memory_space<vmem>>) attributes {dimension_semantics = [#tpu.dimension_semantics<parallel>], iteration_bounds = array<i64: 2>, scalar_prefetch = 0 : i64, scratch_operands = 0 : i64, tpu.core_type = #tpu.core_type<tc>, window_params = [{transform_indices = @transform_0, window_bounds = array<i64: 1, 8, 32>}, {pipeline_mode = #tpu.pipeline_mode<synchronous>, transform_indices = @transform_1, window_bounds = array<i64: 1, 32>}, {pipeline_mode = #tpu.pipeline_mode<synchronous>, transform_indices = @transform_2, window_bounds = array<i64: 1, 32>}, {pipeline_mode = #tpu.pipeline_mode<synchronous>, transform_indices = @transform_3, window_bounds = array<i64: 32, 64>}, {pipeline_mode = #tpu.pipeline_mode<synchronous>, transform_indices = @transform_4, window_bounds = array<i64: 1, 64>}, {pipeline_mode = #tpu.pipeline_mode<synchronous>, transform_indices = @transform_5, window_bounds = array<i64: 64, 32>}, {pipeline_mode = #tpu.pipeline_mode<synchronous>, transform_indices = @transform_6, window_bounds = array<i64: 1, 32>}, {transform_indices = @transform_7, window_bounds = array<i64: 1, 8, 32>}]} {
    %c0 = arith.constant 0 : index
    %c0_0 = arith.constant 0 : index
    %c0_1 = arith.constant 0 : index
    %0 = vector.load %arg1[%c0, %c0_0, %c0_1] : memref<1x8x32xf32, #tpu.memory_space<vmem>>, vector<1x8x32xf32>
    %1 = vector.shape_cast %0 : vector<1x8x32xf32> to vector<8x32xf32>
    %cst = arith.constant dense<0.000000e+00> : vector<8xf32>
    %2 = vector.multi_reduction <add>, %1, %cst [1] : vector<8x32xf32> to vector<8xf32>
    %3 = vector.shape_cast %2 : vector<8xf32> to vector<8x1xf32>
    %cst_2 = arith.constant 3.200000e+01 : f32
    %4 = vector.broadcast %cst_2 : f32 to vector<8x1xf32>
    %5 = arith.divf %3, %4 : vector<8x1xf32>
    %6 = vector.broadcast %5 : vector<8x1xf32> to vector<8x32xf32>
    %7 = arith.subf %1, %6 : vector<8x32xf32>
    %8 = arith.mulf %7, %7 : vector<8x32xf32>
    %cst_3 = arith.constant dense<0.000000e+00> : vector<8xf32>
    %9 = vector.multi_reduction <add>, %8, %cst_3 [1] : vector<8x32xf32> to vector<8xf32>
    %10 = vector.shape_cast %9 : vector<8xf32> to vector<8x1xf32>
    %cst_4 = arith.constant 3.200000e+01 : f32
    %11 = vector.broadcast %cst_4 : f32 to vector<8x1xf32>
    %12 = arith.divf %10, %11 : vector<8x1xf32>
    %cst_5 = arith.constant 9.99999974E-6 : f32
    %13 = vector.broadcast %cst_5 : f32 to vector<8x1xf32>
    %14 = arith.addf %12, %13 : vector<8x1xf32>
    %15 = math.rsqrt %14 : vector<8x1xf32>
    %16 = vector.broadcast %15 : vector<8x1xf32> to vector<8x32xf32>
    %17 = arith.mulf %7, %16 : vector<8x32xf32>
    %c0_6 = arith.constant 0 : index
    %c0_7 = arith.constant 0 : index
    %18 = vector.load %arg2[%c0_6, %c0_7] : memref<1x32xf32, #tpu.memory_space<vmem>>, vector<1x32xf32>
    %19 = vector.broadcast %18 : vector<1x32xf32> to vector<8x32xf32>
    %20 = arith.mulf %17, %19 : vector<8x32xf32>
    %c0_8 = arith.constant 0 : index
    %c0_9 = arith.constant 0 : index
    %21 = vector.load %arg3[%c0_8, %c0_9] : memref<1x32xf32, #tpu.memory_space<vmem>>, vector<1x32xf32>
    %22 = vector.broadcast %21 : vector<1x32xf32> to vector<8x32xf32>
    %23 = arith.addf %20, %22 : vector<8x32xf32>
    %24 = arith.truncf %23 : vector<8x32xf32> to vector<8x32xbf16>
    %c0_10 = arith.constant 0 : index
    %c0_11 = arith.constant 0 : index
    %25 = vector.load %arg4[%c0_10, %c0_11] : memref<32x64xbf16, #tpu.memory_space<vmem>>, vector<32x64xbf16>
    %cst_12 = arith.constant dense<0.000000e+00> : vector<8x64xf32>
    %26 = tpu.matmul %24, %25, %cst_12 {dimension_numbers = #tpu.dot_dimension_numbers<[1], [0], [0], [1], [0, 0, 1, 1], [], []>} : vector<8x32xbf16>, vector<32x64xbf16>, vector<8x64xf32> -> vector<8x64xf32>
    %c0_13 = arith.constant 0 : index
    %c0_14 = arith.constant 0 : index
    %27 = vector.load %arg5[%c0_13, %c0_14] : memref<1x64xf32, #tpu.memory_space<vmem>>, vector<1x64xf32>
    %28 = vector.broadcast %27 : vector<1x64xf32> to vector<8x64xf32>
    %29 = arith.addf %26, %28 : vector<8x64xf32>
    %cst_15 = arith.constant 0.000000e+00 : f32
    %30 = vector.broadcast %cst_15 : f32 to vector<8x64xf32>
    %31 = arith.maximumf %29, %30 : vector<8x64xf32>
    %32 = arith.truncf %31 : vector<8x64xf32> to vector<8x64xbf16>
    %c0_16 = arith.constant 0 : index
    %c0_17 = arith.constant 0 : index
    %33 = vector.load %arg6[%c0_16, %c0_17] : memref<64x32xbf16, #tpu.memory_space<vmem>>, vector<64x32xbf16>
    %cst_18 = arith.constant dense<0.000000e+00> : vector<8x32xf32>
    %34 = tpu.matmul %32, %33, %cst_18 {dimension_numbers = #tpu.dot_dimension_numbers<[1], [0], [0], [1], [0, 0, 1, 1], [], []>} : vector<8x64xbf16>, vector<64x32xbf16>, vector<8x32xf32> -> vector<8x32xf32>
    %c0_19 = arith.constant 0 : index
    %c0_20 = arith.constant 0 : index
    %35 = vector.load %arg7[%c0_19, %c0_20] : memref<1x32xf32, #tpu.memory_space<vmem>>, vector<1x32xf32>
    %36 = vector.broadcast %35 : vector<1x32xf32> to vector<8x32xf32>
    %37 = arith.addf %34, %36 : vector<8x32xf32>
    %38 = arith.addf %1, %37 : vector<8x32xf32>
    %c0_21 = arith.constant 0 : index
    %c0_22 = arith.constant 0 : index
    %c0_23 = arith.constant 0 : index
    %39 = vector.load %arg8[%c0_21, %c0_22, %c0_23] : memref<1x8x32xf32, #tpu.memory_space<vmem>>, vector<1x8x32xf32>
    %40 = vector.shape_cast %39 : vector<1x8x32xf32> to vector<8x32xf32>
    %41 = vector.shape_cast %38 : vector<8x32xf32> to vector<1x8x32xf32>
    tpu.vector_store %arg8[%c0_21, %c0_22, %c0_23], %41 {strides = array<i32>} : memref<1x8x32xf32, #tpu.memory_space<vmem>>, vector<1x8x32xf32>,
    return
  }
  func.func @transform_0(%arg0: i32) -> (i32, i32, i32) {
    %c0_i32 = arith.constant 0 : i32
    %c0_i32_0 = arith.constant 0 : i32
    %c0_i32_1 = arith.constant 0 : i32
    return %arg0, %c0_i32, %c0_i32_0 : i32, i32, i32
  }
  func.func @transform_1(%arg0: i32) -> (i32, i32) {
    %c0_i32 = arith.constant 0 : i32
    %c0_i32_0 = arith.constant 0 : i32
    %c0_i32_1 = arith.constant 0 : i32
    return %c0_i32, %c0_i32_0 : i32, i32
  }
  func.func @transform_2(%arg0: i32) -> (i32, i32) {
    %c0_i32 = arith.constant 0 : i32
    %c0_i32_0 = arith.constant 0 : i32
    %c0_i32_1 = arith.constant 0 : i32
    return %c0_i32, %c0_i32_0 : i32, i32
  }
  func.func @transform_3(%arg0: i32) -> (i32, i32) {
    %c0_i32 = arith.constant 0 : i32
    %c0_i32_0 = arith.constant 0 : i32
    %c0_i32_1 = arith.constant 0 : i32
    return %c0_i32, %c0_i32_0 : i32, i32
  }
  func.func @transform_4(%arg0: i32) -> (i32, i32) {
    %c0_i32 = arith.constant 0 : i32
    %c0_i32_0 = arith.constant 0 : i32
    %c0_i32_1 = arith.constant 0 : i32
    return %c0_i32, %c0_i32_0 : i32, i32
  }
  func.func @transform_5(%arg0: i32) -> (i32, i32) {
    %c0_i32 = arith.constant 0 : i32
    %c0_i32_0 = arith.constant 0 : i32
    %c0_i32_1 = arith.constant 0 : i32
    return %c0_i32, %c0_i32_0 : i32, i32
  }
  func.func @transform_6(%arg0: i32) -> (i32, i32) {
    %c0_i32 = arith.constant 0 : i32
    %c0_i32_0 = arith.constant 0 : i32
    %c0_i32_1 = arith.constant 0 : i32
    return %c0_i32, %c0_i32_0 : i32, i32
  }
  func.func @transform_7(%arg0: i32) -> (i32, i32, i32) {
    %c0_i32 = arith.constant 0 : i32
    %c0_i32_0 = arith.constant 0 : i32
    %c0_i32_1 = arith.constant 0 : i32
    return %arg0, %c0_i32, %c0_i32_0 : i32, i32, i32
  }
}

module attributes {stable_mosaic.version = 11 : i64} {
  func.func @_layernorm_kernel(%arg0: i32, %arg1: memref<1x8x32xf32, #tpu.memory_space<vmem>>, %arg2: memref<1x32xf32, #tpu.memory_space<vmem>>, %arg3: memref<1x32xf32, #tpu.memory_space<vmem>>, %arg4: memref<1x8x32xf32, #tpu.memory_space<vmem>>) attributes {dimension_semantics = [#tpu.dimension_semantics<parallel>], iteration_bounds = array<i64: 2>, scalar_prefetch = 0 : i64, scratch_operands = 0 : i64, tpu.core_type = #tpu.core_type<tc>, window_params = [{transform_indices = @transform_0, window_bounds = array<i64: 1, 8, 32>}, {pipeline_mode = #tpu.pipeline_mode<synchronous>, transform_indices = @transform_1, window_bounds = array<i64: 1, 32>}, {pipeline_mode = #tpu.pipeline_mode<synchronous>, transform_indices = @transform_2, window_bounds = array<i64: 1, 32>}, {transform_indices = @transform_3, window_bounds = array<i64: 1, 8, 32>}]} {
    %c0 = arith.constant 0 : index
    %c0_0 = arith.constant 0 : index
    %c0_1 = arith.constant 0 : index
    %0 = vector.load %arg1[%c0, %c0_0, %c0_1] : memref<1x8x32xf32, #tpu.memory_space<vmem>>, vector<1x8x32xf32>
    %1 = vector.shape_cast %0 : vector<1x8x32xf32> to vector<8x32xf32>
    %cst = arith.constant dense<0.000000e+00> : vector<8xf32>
    %2 = vector.multi_reduction <add>, %1, %cst [1] : vector<8x32xf32> to vector<8xf32>
    %3 = vector.shape_cast %2 : vector<8xf32> to vector<8x1xf32>
    %cst_2 = arith.constant 3.200000e+01 : f32
    %4 = vector.broadcast %cst_2 : f32 to vector<8x1xf32>
    %5 = arith.divf %3, %4 : vector<8x1xf32>
    %6 = vector.broadcast %5 : vector<8x1xf32> to vector<8x32xf32>
    %7 = arith.subf %1, %6 : vector<8x32xf32>
    %8 = arith.mulf %7, %7 : vector<8x32xf32>
    %cst_3 = arith.constant dense<0.000000e+00> : vector<8xf32>
    %9 = vector.multi_reduction <add>, %8, %cst_3 [1] : vector<8x32xf32> to vector<8xf32>
    %10 = vector.shape_cast %9 : vector<8xf32> to vector<8x1xf32>
    %cst_4 = arith.constant 3.200000e+01 : f32
    %11 = vector.broadcast %cst_4 : f32 to vector<8x1xf32>
    %12 = arith.divf %10, %11 : vector<8x1xf32>
    %cst_5 = arith.constant 9.99999974E-6 : f32
    %13 = vector.broadcast %cst_5 : f32 to vector<8x1xf32>
    %14 = arith.addf %12, %13 : vector<8x1xf32>
    %15 = math.rsqrt %14 : vector<8x1xf32>
    %16 = vector.broadcast %15 : vector<8x1xf32> to vector<8x32xf32>
    %17 = arith.mulf %7, %16 : vector<8x32xf32>
    %c0_6 = arith.constant 0 : index
    %c0_7 = arith.constant 0 : index
    %18 = vector.load %arg2[%c0_6, %c0_7] : memref<1x32xf32, #tpu.memory_space<vmem>>, vector<1x32xf32>
    %19 = vector.broadcast %18 : vector<1x32xf32> to vector<8x32xf32>
    %20 = arith.mulf %17, %19 : vector<8x32xf32>
    %c0_8 = arith.constant 0 : index
    %c0_9 = arith.constant 0 : index
    %21 = vector.load %arg3[%c0_8, %c0_9] : memref<1x32xf32, #tpu.memory_space<vmem>>, vector<1x32xf32>
    %22 = vector.broadcast %21 : vector<1x32xf32> to vector<8x32xf32>
    %23 = arith.addf %20, %22 : vector<8x32xf32>
    %c0_10 = arith.constant 0 : index
    %c0_11 = arith.constant 0 : index
    %c0_12 = arith.constant 0 : index
    %24 = vector.load %arg4[%c0_10, %c0_11, %c0_12] : memref<1x8x32xf32, #tpu.memory_space<vmem>>, vector<1x8x32xf32>
    %25 = vector.shape_cast %24 : vector<1x8x32xf32> to vector<8x32xf32>
    %26 = vector.shape_cast %23 : vector<8x32xf32> to vector<1x8x32xf32>
    tpu.vector_store %arg4[%c0_10, %c0_11, %c0_12], %26 {strides = array<i32>} : memref<1x8x32xf32, #tpu.memory_space<vmem>>, vector<1x8x32xf32>,
    return
  }
  func.func @transform_0(%arg0: i32) -> (i32, i32, i32) {
    %c0_i32 = arith.constant 0 : i32
    %c0_i32_0 = arith.constant 0 : i32
    %c0_i32_1 = arith.constant 0 : i32
    return %arg0, %c0_i32, %c0_i32_0 : i32, i32, i32
  }
  func.func @transform_1(%arg0: i32) -> (i32, i32) {
    %c0_i32 = arith.constant 0 : i32
    %c0_i32_0 = arith.constant 0 : i32
    %c0_i32_1 = arith.constant 0 : i32
    return %c0_i32, %c0_i32_0 : i32, i32
  }
  func.func @transform_2(%arg0: i32) -> (i32, i32) {
    %c0_i32 = arith.constant 0 : i32
    %c0_i32_0 = arith.constant 0 : i32
    %c0_i32_1 = arith.constant 0 : i32
    return %c0_i32, %c0_i32_0 : i32, i32
  }
  func.func @transform_3(%arg0: i32) -> (i32, i32, i32) {
    %c0_i32 = arith.constant 0 : i32
    %c0_i32_0 = arith.constant 0 : i32
    %c0_i32_1 = arith.constant 0 : i32
    return %arg0, %c0_i32, %c0_i32_0 : i32, i32, i32
  }
}

module attributes {stable_mosaic.version = 11 : i64} {
  func.func @_attn_sublayer_kernel(%arg0: i32, %arg1: memref<1x8x32xf32, #tpu.memory_space<vmem>>, %arg2: memref<1x8x32xf32, #tpu.memory_space<vmem>>, %arg3: memref<1x32xf32, #tpu.memory_space<vmem>>, %arg4: memref<1x32xf32, #tpu.memory_space<vmem>>, %arg5: memref<32x32xbf16, #tpu.memory_space<vmem>>, %arg6: memref<1x32xf32, #tpu.memory_space<vmem>>, %arg7: memref<32x64xbf16, #tpu.memory_space<vmem>>, %arg8: memref<1x64xf32, #tpu.memory_space<vmem>>, %arg9: memref<32x32xf32, #tpu.memory_space<vmem>>, %arg10: memref<1x32xf32, #tpu.memory_space<vmem>>, %arg11: memref<1x1x8xf32, #tpu.memory_space<vmem>>, %arg12: memref<1x8x32xf32, #tpu.memory_space<vmem>>) attributes {dimension_semantics = [#tpu.dimension_semantics<parallel>], iteration_bounds = array<i64: 2>, scalar_prefetch = 0 : i64, scratch_operands = 0 : i64, tpu.core_type = #tpu.core_type<tc>, window_params = [{transform_indices = @transform_0, window_bounds = array<i64: 1, 8, 32>}, {transform_indices = @transform_1, window_bounds = array<i64: 1, 8, 32>}, {pipeline_mode = #tpu.pipeline_mode<synchronous>, transform_indices = @transform_2, window_bounds = array<i64: 1, 32>}, {pipeline_mode = #tpu.pipeline_mode<synchronous>, transform_indices = @transform_3, window_bounds = array<i64: 1, 32>}, {pipeline_mode = #tpu.pipeline_mode<synchronous>, transform_indices = @transform_4, window_bounds = array<i64: 32, 32>}, {pipeline_mode = #tpu.pipeline_mode<synchronous>, transform_indices = @transform_5, window_bounds = array<i64: 1, 32>}, {pipeline_mode = #tpu.pipeline_mode<synchronous>, transform_indices = @transform_6, window_bounds = array<i64: 32, 64>}, {pipeline_mode = #tpu.pipeline_mode<synchronous>, transform_indices = @transform_7, window_bounds = array<i64: 1, 64>}, {pipeline_mode = #tpu.pipeline_mode<synchronous>, transform_indices = @transform_8, window_bounds = array<i64: 32, 32>}, {pipeline_mode = #tpu.pipeline_mode<synchronous>, transform_indices = @transform_9, window_bounds = array<i64: 1, 32>}, {transform_indices = @transform_10, window_bounds = array<i64: 1, 1, 8>}, {transform_indices = @transform_11, window_bounds = array<i64: 1, 8, 32>}]} {
    %c0 = arith.constant 0 : index
    %c0_0 = arith.constant 0 : index
    %c0_1 = arith.constant 0 : index
    %0 = vector.load %arg1[%c0, %c0_0, %c0_1] : memref<1x8x32xf32, #tpu.memory_space<vmem>>, vector<1x8x32xf32>
    %1 = vector.shape_cast %0 : vector<1x8x32xf32> to vector<8x32xf32>
    %c0_2 = arith.constant 0 : index
    %c0_3 = arith.constant 0 : index
    %2 = vector.load %arg3[%c0_2, %c0_3] : memref<1x32xf32, #tpu.memory_space<vmem>>, vector<1x32xf32>
    %c0_4 = arith.constant 0 : index
    %c0_5 = arith.constant 0 : index
    %3 = vector.load %arg4[%c0_4, %c0_5] : memref<1x32xf32, #tpu.memory_space<vmem>>, vector<1x32xf32>
    %cst = arith.constant dense<0.000000e+00> : vector<8xf32>
    %4 = vector.multi_reduction <add>, %1, %cst [1] : vector<8x32xf32> to vector<8xf32>
    %5 = vector.shape_cast %4 : vector<8xf32> to vector<8x1xf32>
    %cst_6 = arith.constant 3.200000e+01 : f32
    %6 = vector.broadcast %cst_6 : f32 to vector<8x1xf32>
    %7 = arith.divf %5, %6 : vector<8x1xf32>
    %8 = vector.broadcast %7 : vector<8x1xf32> to vector<8x32xf32>
    %9 = arith.subf %1, %8 : vector<8x32xf32>
    %10 = arith.mulf %9, %9 : vector<8x32xf32>
    %cst_7 = arith.constant dense<0.000000e+00> : vector<8xf32>
    %11 = vector.multi_reduction <add>, %10, %cst_7 [1] : vector<8x32xf32> to vector<8xf32>
    %12 = vector.shape_cast %11 : vector<8xf32> to vector<8x1xf32>
    %cst_8 = arith.constant 3.200000e+01 : f32
    %13 = vector.broadcast %cst_8 : f32 to vector<8x1xf32>
    %14 = arith.divf %12, %13 : vector<8x1xf32>
    %cst_9 = arith.constant 9.99999974E-6 : f32
    %15 = vector.broadcast %cst_9 : f32 to vector<8x1xf32>
    %16 = arith.addf %14, %15 : vector<8x1xf32>
    %17 = math.rsqrt %16 : vector<8x1xf32>
    %18 = vector.broadcast %17 : vector<8x1xf32> to vector<8x32xf32>
    %19 = arith.mulf %9, %18 : vector<8x32xf32>
    %20 = vector.broadcast %2 : vector<1x32xf32> to vector<8x32xf32>
    %21 = arith.mulf %19, %20 : vector<8x32xf32>
    %22 = vector.broadcast %3 : vector<1x32xf32> to vector<8x32xf32>
    %23 = arith.addf %21, %22 : vector<8x32xf32>
    %24 = arith.truncf %23 : vector<8x32xf32> to vector<8x32xbf16>
    %c0_10 = arith.constant 0 : index
    %c0_11 = arith.constant 0 : index
    %25 = vector.load %arg5[%c0_10, %c0_11] : memref<32x32xbf16, #tpu.memory_space<vmem>>, vector<32x32xbf16>
    %cst_12 = arith.constant dense<0.000000e+00> : vector<8x32xf32>
    %26 = tpu.matmul %24, %25, %cst_12 {dimension_numbers = #tpu.dot_dimension_numbers<[1], [0], [0], [1], [0, 0, 1, 1], [], []>} : vector<8x32xbf16>, vector<32x32xbf16>, vector<8x32xf32> -> vector<8x32xf32>
    %c0_13 = arith.constant 0 : index
    %c0_14 = arith.constant 0 : index
    %27 = vector.load %arg6[%c0_13, %c0_14] : memref<1x32xf32, #tpu.memory_space<vmem>>, vector<1x32xf32>
    %28 = vector.broadcast %27 : vector<1x32xf32> to vector<8x32xf32>
    %29 = arith.addf %26, %28 : vector<8x32xf32>
    %c0_15 = arith.constant 0 : index
    %c0_16 = arith.constant 0 : index
    %c0_17 = arith.constant 0 : index
    %30 = vector.load %arg2[%c0_15, %c0_16, %c0_17] : memref<1x8x32xf32, #tpu.memory_space<vmem>>, vector<1x8x32xf32>
    %31 = vector.shape_cast %30 : vector<1x8x32xf32> to vector<8x32xf32>
    %32 = arith.truncf %31 : vector<8x32xf32> to vector<8x32xbf16>
    %c0_18 = arith.constant 0 : index
    %c0_19 = arith.constant 0 : index
    %33 = vector.load %arg7[%c0_18, %c0_19] : memref<32x64xbf16, #tpu.memory_space<vmem>>, vector<32x64xbf16>
    %cst_20 = arith.constant dense<0.000000e+00> : vector<8x64xf32>
    %34 = tpu.matmul %32, %33, %cst_20 {dimension_numbers = #tpu.dot_dimension_numbers<[1], [0], [0], [1], [0, 0, 1, 1], [], []>} : vector<8x32xbf16>, vector<32x64xbf16>, vector<8x64xf32> -> vector<8x64xf32>
    %c0_21 = arith.constant 0 : index
    %c0_22 = arith.constant 0 : index
    %35 = vector.load %arg8[%c0_21, %c0_22] : memref<1x64xf32, #tpu.memory_space<vmem>>, vector<1x64xf32>
    %36 = vector.broadcast %35 : vector<1x64xf32> to vector<8x64xf32>
    %37 = arith.addf %34, %36 : vector<8x64xf32>
    %38 = vector.extract_strided_slice %37 {offsets = [0, 0], sizes = [8, 32], strides = [1, 1]} : vector<8x64xf32> to vector<8x32xf32>
    %39 = vector.extract_strided_slice %37 {offsets = [0, 32], sizes = [8, 32], strides = [1, 1]} : vector<8x64xf32> to vector<8x32xf32>
    %c0_23 = arith.constant 0 : index
    %c0_24 = arith.constant 0 : index
    %c0_25 = arith.constant 0 : index
    %40 = vector.load %arg11[%c0_23, %c0_24, %c0_25] : memref<1x1x8xf32, #tpu.memory_space<vmem>>, vector<1x1x8xf32>
    %41 = vector.shape_cast %40 : vector<1x1x8xf32> to vector<1x8xf32>
    %cst_26 = arith.constant 0.000000e+00 : f32
    %42 = vector.broadcast %cst_26 : f32 to vector<8x32xf32>
    %43 = vector.extract_strided_slice %29 {offsets = [0, 0], sizes = [8, 8], strides = [1, 1]} : vector<8x32xf32> to vector<8x8xf32>
    %44 = arith.truncf %43 : vector<8x8xf32> to vector<8x8xbf16>
    %45 = vector.extract_strided_slice %38 {offsets = [0, 0], sizes = [8, 8], strides = [1, 1]} : vector<8x32xf32> to vector<8x8xf32>
    %46 = arith.truncf %45 : vector<8x8xf32> to vector<8x8xbf16>
    %47 = vector.extract_strided_slice %39 {offsets = [0, 0], sizes = [8, 8], strides = [1, 1]} : vector<8x32xf32> to vector<8x8xf32>
    %48 = arith.truncf %47 : vector<8x8xf32> to vector<8x8xbf16>
    %cst_27 = arith.constant dense<0.000000e+00> : vector<8x8xf32>
    %49 = tpu.matmul %44, %46, %cst_27 {dimension_numbers = #tpu.dot_dimension_numbers<[1], [1], [0], [0], [0, 0, 1, 0], [], []>} : vector<8x8xbf16>, vector<8x8xbf16>, vector<8x8xf32> -> vector<8x8xf32>
    %cst_28 = arith.constant 0.353553385 : f32
    %50 = vector.broadcast %cst_28 : f32 to vector<8x8xf32>
    %51 = arith.mulf %49, %50 : vector<8x8xf32>
    %52 = vector.broadcast %41 : vector<1x8xf32> to vector<8x8xf32>
    %53 = arith.addf %51, %52 : vector<8x8xf32>
    %cst_29 = arith.constant dense<0xFF800000> : vector<8xf32>
    %54 = vector.multi_reduction <maximumf>, %53, %cst_29 [1] : vector<8x8xf32> to vector<8xf32>
    %55 = vector.shape_cast %54 : vector<8xf32> to vector<8x1xf32>
    %56 = vector.broadcast %55 : vector<8x1xf32> to vector<8x8xf32>
    %57 = arith.subf %53, %56 : vector<8x8xf32>
    %58 = math.exp %57 : vector<8x8xf32>
    %cst_30 = arith.constant dense<0.000000e+00> : vector<8xf32>
    %59 = vector.multi_reduction <add>, %58, %cst_30 [1] : vector<8x8xf32> to vector<8xf32>
    %60 = vector.shape_cast %59 : vector<8xf32> to vector<8x1xf32>
    %61 = tpu.reciprocal %60 {approx = true} : vector<8x1xf32> -> vector<8x1xf32>
    %62 = vector.broadcast %61 : vector<8x1xf32> to vector<8x8xf32>
    %63 = arith.mulf %58, %62 : vector<8x8xf32>
    %64 = arith.truncf %63 : vector<8x8xf32> to vector<8x8xbf16>
    %cst_31 = arith.constant dense<0.000000e+00> : vector<8x8xf32>
    %65 = tpu.matmul %64, %48, %cst_31 {dimension_numbers = #tpu.dot_dimension_numbers<[1], [0], [0], [1], [0, 0, 1, 1], [], []>} : vector<8x8xbf16>, vector<8x8xbf16>, vector<8x8xf32> -> vector<8x8xf32>
    %c0_32 = arith.constant 0 : index
    %c0_33 = arith.constant 0 : index
    %66 = vector.load %arg9[%c0_32, %c0_33] : memref<32x32xf32, #tpu.memory_space<vmem>>, vector<8x32xf32>
    %67 = arith.truncf %66 : vector<8x32xf32> to vector<8x32xbf16>
    %68 = arith.truncf %65 : vector<8x8xf32> to vector<8x8xbf16>
    %cst_34 = arith.constant dense<0.000000e+00> : vector<8x32xf32>
    %69 = tpu.matmul %68, %67, %cst_34 {dimension_numbers = #tpu.dot_dimension_numbers<[1], [0], [0], [1], [0, 0, 1, 1], [], []>} : vector<8x8xbf16>, vector<8x32xbf16>, vector<8x32xf32> -> vector<8x32xf32>
    %70 = arith.addf %42, %69 : vector<8x32xf32>
    %71 = vector.extract_strided_slice %29 {offsets = [0, 8], sizes = [8, 8], strides = [1, 1]} : vector<8x32xf32> to vector<8x8xf32>
    %72 = arith.truncf %71 : vector<8x8xf32> to vector<8x8xbf16>
    %73 = vector.extract_strided_slice %38 {offsets = [0, 8], sizes = [8, 8], strides = [1, 1]} : vector<8x32xf32> to vector<8x8xf32>
    %74 = arith.truncf %73 : vector<8x8xf32> to vector<8x8xbf16>
    %75 = vector.extract_strided_slice %39 {offsets = [0, 8], sizes = [8, 8], strides = [1, 1]} : vector<8x32xf32> to vector<8x8xf32>
    %76 = arith.truncf %75 : vector<8x8xf32> to vector<8x8xbf16>
    %cst_35 = arith.constant dense<0.000000e+00> : vector<8x8xf32>
    %77 = tpu.matmul %72, %74, %cst_35 {dimension_numbers = #tpu.dot_dimension_numbers<[1], [1], [0], [0], [0, 0, 1, 0], [], []>} : vector<8x8xbf16>, vector<8x8xbf16>, vector<8x8xf32> -> vector<8x8xf32>
    %cst_36 = arith.constant 0.353553385 : f32
    %78 = vector.broadcast %cst_36 : f32 to vector<8x8xf32>
    %79 = arith.mulf %77, %78 : vector<8x8xf32>
    %80 = vector.broadcast %41 : vector<1x8xf32> to vector<8x8xf32>
    %81 = arith.addf %79, %80 : vector<8x8xf32>
    %cst_37 = arith.constant dense<0xFF800000> : vector<8xf32>
    %82 = vector.multi_reduction <maximumf>, %81, %cst_37 [1] : vector<8x8xf32> to vector<8xf32>
    %83 = vector.shape_cast %82 : vector<8xf32> to vector<8x1xf32>
    %84 = vector.broadcast %83 : vector<8x1xf32> to vector<8x8xf32>
    %85 = arith.subf %81, %84 : vector<8x8xf32>
    %86 = math.exp %85 : vector<8x8xf32>
    %cst_38 = arith.constant dense<0.000000e+00> : vector<8xf32>
    %87 = vector.multi_reduction <add>, %86, %cst_38 [1] : vector<8x8xf32> to vector<8xf32>
    %88 = vector.shape_cast %87 : vector<8xf32> to vector<8x1xf32>
    %89 = tpu.reciprocal %88 {approx = true} : vector<8x1xf32> -> vector<8x1xf32>
    %90 = vector.broadcast %89 : vector<8x1xf32> to vector<8x8xf32>
    %91 = arith.mulf %86, %90 : vector<8x8xf32>
    %92 = arith.truncf %91 : vector<8x8xf32> to vector<8x8xbf16>
    %cst_39 = arith.constant dense<0.000000e+00> : vector<8x8xf32>
    %93 = tpu.matmul %92, %76, %cst_39 {dimension_numbers = #tpu.dot_dimension_numbers<[1], [0], [0], [1], [0, 0, 1, 1], [], []>} : vector<8x8xbf16>, vector<8x8xbf16>, vector<8x8xf32> -> vector<8x8xf32>
    %c8 = arith.constant 8 : index
    %c0_40 = arith.constant 0 : index
    %94 = vector.load %arg9[%c8, %c0_40] : memref<32x32xf32, #tpu.memory_space<vmem>>, vector<8x32xf32>
    %95 = arith.truncf %94 : vector<8x32xf32> to vector<8x32xbf16>
    %96 = arith.truncf %93 : vector<8x8xf32> to vector<8x8xbf16>
    %cst_41 = arith.constant dense<0.000000e+00> : vector<8x32xf32>
    %97 = tpu.matmul %96, %95, %cst_41 {dimension_numbers = #tpu.dot_dimension_numbers<[1], [0], [0], [1], [0, 0, 1, 1], [], []>} : vector<8x8xbf16>, vector<8x32xbf16>, vector<8x32xf32> -> vector<8x32xf32>
    %98 = arith.addf %70, %97 : vector<8x32xf32>
    %99 = vector.extract_strided_slice %29 {offsets = [0, 16], sizes = [8, 8], strides = [1, 1]} : vector<8x32xf32> to vector<8x8xf32>
    %100 = arith.truncf %99 : vector<8x8xf32> to vector<8x8xbf16>
    %101 = vector.extract_strided_slice %38 {offsets = [0, 16], sizes = [8, 8], strides = [1, 1]} : vector<8x32xf32> to vector<8x8xf32>
    %102 = arith.truncf %101 : vector<8x8xf32> to vector<8x8xbf16>
    %103 = vector.extract_strided_slice %39 {offsets = [0, 16], sizes = [8, 8], strides = [1, 1]} : vector<8x32xf32> to vector<8x8xf32>
    %104 = arith.truncf %103 : vector<8x8xf32> to vector<8x8xbf16>
    %cst_42 = arith.constant dense<0.000000e+00> : vector<8x8xf32>
    %105 = tpu.matmul %100, %102, %cst_42 {dimension_numbers = #tpu.dot_dimension_numbers<[1], [1], [0], [0], [0, 0, 1, 0], [], []>} : vector<8x8xbf16>, vector<8x8xbf16>, vector<8x8xf32> -> vector<8x8xf32>
    %cst_43 = arith.constant 0.353553385 : f32
    %106 = vector.broadcast %cst_43 : f32 to vector<8x8xf32>
    %107 = arith.mulf %105, %106 : vector<8x8xf32>
    %108 = vector.broadcast %41 : vector<1x8xf32> to vector<8x8xf32>
    %109 = arith.addf %107, %108 : vector<8x8xf32>
    %cst_44 = arith.constant dense<0xFF800000> : vector<8xf32>
    %110 = vector.multi_reduction <maximumf>, %109, %cst_44 [1] : vector<8x8xf32> to vector<8xf32>
    %111 = vector.shape_cast %110 : vector<8xf32> to vector<8x1xf32>
    %112 = vector.broadcast %111 : vector<8x1xf32> to vector<8x8xf32>
    %113 = arith.subf %109, %112 : vector<8x8xf32>
    %114 = math.exp %113 : vector<8x8xf32>
    %cst_45 = arith.constant dense<0.000000e+00> : vector<8xf32>
    %115 = vector.multi_reduction <add>, %114, %cst_45 [1] : vector<8x8xf32> to vector<8xf32>
    %116 = vector.shape_cast %115 : vector<8xf32> to vector<8x1xf32>
    %117 = tpu.reciprocal %116 {approx = true} : vector<8x1xf32> -> vector<8x1xf32>
    %118 = vector.broadcast %117 : vector<8x1xf32> to vector<8x8xf32>
    %119 = arith.mulf %114, %118 : vector<8x8xf32>
    %120 = arith.truncf %119 : vector<8x8xf32> to vector<8x8xbf16>
    %cst_46 = arith.constant dense<0.000000e+00> : vector<8x8xf32>
    %121 = tpu.matmul %120, %104, %cst_46 {dimension_numbers = #tpu.dot_dimension_numbers<[1], [0], [0], [1], [0, 0, 1, 1], [], []>} : vector<8x8xbf16>, vector<8x8xbf16>, vector<8x8xf32> -> vector<8x8xf32>
    %c16 = arith.constant 16 : index
    %c0_47 = arith.constant 0 : index
    %122 = vector.load %arg9[%c16, %c0_47] : memref<32x32xf32, #tpu.memory_space<vmem>>, vector<8x32xf32>
    %123 = arith.truncf %122 : vector<8x32xf32> to vector<8x32xbf16>
    %124 = arith.truncf %121 : vector<8x8xf32> to vector<8x8xbf16>
    %cst_48 = arith.constant dense<0.000000e+00> : vector<8x32xf32>
    %125 = tpu.matmul %124, %123, %cst_48 {dimension_numbers = #tpu.dot_dimension_numbers<[1], [0], [0], [1], [0, 0, 1, 1], [], []>} : vector<8x8xbf16>, vector<8x32xbf16>, vector<8x32xf32> -> vector<8x32xf32>
    %126 = arith.addf %98, %125 : vector<8x32xf32>
    %127 = vector.extract_strided_slice %29 {offsets = [0, 24], sizes = [8, 8], strides = [1, 1]} : vector<8x32xf32> to vector<8x8xf32>
    %128 = arith.truncf %127 : vector<8x8xf32> to vector<8x8xbf16>
    %129 = vector.extract_strided_slice %38 {offsets = [0, 24], sizes = [8, 8], strides = [1, 1]} : vector<8x32xf32> to vector<8x8xf32>
    %130 = arith.truncf %129 : vector<8x8xf32> to vector<8x8xbf16>
    %131 = vector.extract_strided_slice %39 {offsets = [0, 24], sizes = [8, 8], strides = [1, 1]} : vector<8x32xf32> to vector<8x8xf32>
    %132 = arith.truncf %131 : vector<8x8xf32> to vector<8x8xbf16>
    %cst_49 = arith.constant dense<0.000000e+00> : vector<8x8xf32>
    %133 = tpu.matmul %128, %130, %cst_49 {dimension_numbers = #tpu.dot_dimension_numbers<[1], [1], [0], [0], [0, 0, 1, 0], [], []>} : vector<8x8xbf16>, vector<8x8xbf16>, vector<8x8xf32> -> vector<8x8xf32>
    %cst_50 = arith.constant 0.353553385 : f32
    %134 = vector.broadcast %cst_50 : f32 to vector<8x8xf32>
    %135 = arith.mulf %133, %134 : vector<8x8xf32>
    %136 = vector.broadcast %41 : vector<1x8xf32> to vector<8x8xf32>
    %137 = arith.addf %135, %136 : vector<8x8xf32>
    %cst_51 = arith.constant dense<0xFF800000> : vector<8xf32>
    %138 = vector.multi_reduction <maximumf>, %137, %cst_51 [1] : vector<8x8xf32> to vector<8xf32>
    %139 = vector.shape_cast %138 : vector<8xf32> to vector<8x1xf32>
    %140 = vector.broadcast %139 : vector<8x1xf32> to vector<8x8xf32>
    %141 = arith.subf %137, %140 : vector<8x8xf32>
    %142 = math.exp %141 : vector<8x8xf32>
    %cst_52 = arith.constant dense<0.000000e+00> : vector<8xf32>
    %143 = vector.multi_reduction <add>, %142, %cst_52 [1] : vector<8x8xf32> to vector<8xf32>
    %144 = vector.shape_cast %143 : vector<8xf32> to vector<8x1xf32>
    %145 = tpu.reciprocal %144 {approx = true} : vector<8x1xf32> -> vector<8x1xf32>
    %146 = vector.broadcast %145 : vector<8x1xf32> to vector<8x8xf32>
    %147 = arith.mulf %142, %146 : vector<8x8xf32>
    %148 = arith.truncf %147 : vector<8x8xf32> to vector<8x8xbf16>
    %cst_53 = arith.constant dense<0.000000e+00> : vector<8x8xf32>
    %149 = tpu.matmul %148, %132, %cst_53 {dimension_numbers = #tpu.dot_dimension_numbers<[1], [0], [0], [1], [0, 0, 1, 1], [], []>} : vector<8x8xbf16>, vector<8x8xbf16>, vector<8x8xf32> -> vector<8x8xf32>
    %c24 = arith.constant 24 : index
    %c0_54 = arith.constant 0 : index
    %150 = vector.load %arg9[%c24, %c0_54] : memref<32x32xf32, #tpu.memory_space<vmem>>, vector<8x32xf32>
    %151 = arith.truncf %150 : vector<8x32xf32> to vector<8x32xbf16>
    %152 = arith.truncf %149 : vector<8x8xf32> to vector<8x8xbf16>
    %cst_55 = arith.constant dense<0.000000e+00> : vector<8x32xf32>
    %153 = tpu.matmul %152, %151, %cst_55 {dimension_numbers = #tpu.dot_dimension_numbers<[1], [0], [0], [1], [0, 0, 1, 1], [], []>} : vector<8x8xbf16>, vector<8x32xbf16>, vector<8x32xf32> -> vector<8x32xf32>
    %154 = arith.addf %126, %153 : vector<8x32xf32>
    %155 = arith.addf %1, %154 : vector<8x32xf32>
    %c0_56 = arith.constant 0 : index
    %c0_57 = arith.constant 0 : index
    %156 = vector.load %arg10[%c0_56, %c0_57] : memref<1x32xf32, #tpu.memory_space<vmem>>, vector<1x32xf32>
    %157 = vector.broadcast %156 : vector<1x32xf32> to vector<8x32xf32>
    %158 = arith.addf %155, %157 : vector<8x32xf32>
    %c0_58 = arith.constant 0 : index
    %c0_59 = arith.constant 0 : index
    %c0_60 = arith.constant 0 : index
    %159 = vector.load %arg12[%c0_58, %c0_59, %c0_60] : memref<1x8x32xf32, #tpu.memory_space<vmem>>, vector<1x8x32xf32>
    %160 = vector.shape_cast %159 : vector<1x8x32xf32> to vector<8x32xf32>
    %161 = vector.shape_cast %158 : vector<8x32xf32> to vector<1x8x32xf32>
    tpu.vector_store %arg12[%c0_58, %c0_59, %c0_60], %161 {strides = array<i32>} : memref<1x8x32xf32, #tpu.memory_space<vmem>>, vector<1x8x32xf32>,
    return
  }
  func.func @transform_0(%arg0: i32) -> (i32, i32, i32) {
    %c0_i32 = arith.constant 0 : i32
    %c0_i32_0 = arith.constant 0 : i32
    %c0_i32_1 = arith.constant 0 : i32
    return %arg0, %c0_i32, %c0_i32_0 : i32, i32, i32
  }
  func.func @transform_1(%arg0: i32) -> (i32, i32, i32) {
    %c0_i32 = arith.constant 0 : i32
    %c0_i32_0 = arith.constant 0 : i32
    %c0_i32_1 = arith.constant 0 : i32
    return %arg0, %c0_i32, %c0_i32_0 : i32, i32, i32
  }
  func.func @transform_2(%arg0: i32) -> (i32, i32) {
    %c0_i32 = arith.constant 0 : i32
    %c0_i32_0 = arith.constant 0 : i32
    %c0_i32_1 = arith.constant 0 : i32
    return %c0_i32, %c0_i32_0 : i32, i32
  }
  func.func @transform_3(%arg0: i32) -> (i32, i32) {
    %c0_i32 = arith.constant 0 : i32
    %c0_i32_0 = arith.constant 0 : i32
    %c0_i32_1 = arith.constant 0 : i32
    return %c0_i32, %c0_i32_0 : i32, i32
  }
  func.func @transform_4(%arg0: i32) -> (i32, i32) {
    %c0_i32 = arith.constant 0 : i32
    %c0_i32_0 = arith.constant 0 : i32
    %c0_i32_1 = arith.constant 0 : i32
    return %c0_i32, %c0_i32_0 : i32, i32
  }
  func.func @transform_5(%arg0: i32) -> (i32, i32) {
    %c0_i32 = arith.constant 0 : i32
    %c0_i32_0 = arith.constant 0 : i32
    %c0_i32_1 = arith.constant 0 : i32
    return %c0_i32, %c0_i32_0 : i32, i32
  }
  func.func @transform_6(%arg0: i32) -> (i32, i32) {
    %c0_i32 = arith.constant 0 : i32
    %c0_i32_0 = arith.constant 0 : i32
    %c0_i32_1 = arith.constant 0 : i32
    return %c0_i32, %c0_i32_0 : i32, i32
  }
  func.func @transform_7(%arg0: i32) -> (i32, i32) {
    %c0_i32 = arith.constant 0 : i32
    %c0_i32_0 = arith.constant 0 : i32
    %c0_i32_1 = arith.constant 0 : i32
    return %c0_i32, %c0_i32_0 : i32, i32
  }
  func.func @transform_8(%arg0: i32) -> (i32, i32) {
    %c0_i32 = arith.constant 0 : i32
    %c0_i32_0 = arith.constant 0 : i32
    %c0_i32_1 = arith.constant 0 : i32
    return %c0_i32, %c0_i32_0 : i32, i32
  }
  func.func @transform_9(%arg0: i32) -> (i32, i32) {
    %c0_i32 = arith.constant 0 : i32
    %c0_i32_0 = arith.constant 0 : i32
    %c0_i32_1 = arith.constant 0 : i32
    return %c0_i32, %c0_i32_0 : i32, i32
  }
  func.func @transform_10(%arg0: i32) -> (i32, i32, i32) {
    %c0_i32 = arith.constant 0 : i32
    %c0_i32_0 = arith.constant 0 : i32
    %c0_i32_1 = arith.constant 0 : i32
    return %arg0, %c0_i32, %c0_i32_0 : i32, i32, i32
  }
  func.func @transform_11(%arg0: i32) -> (i32, i32, i32) {
    %c0_i32 = arith.constant 0 : i32
    %c0_i32_0 = arith.constant 0 : i32
    %c0_i32_1 = arith.constant 0 : i32
    return %arg0, %c0_i32, %c0_i32_0 : i32, i32, i32
  }
}

module attributes {stable_mosaic.version = 11 : i64} {
  func.func @_gen_ce_kernel(%arg0: i32, %arg1: memref<1x8x32xf32, #tpu.memory_space<vmem>>, %arg2: memref<1x32xf32, #tpu.memory_space<vmem>>, %arg3: memref<1x32xf32, #tpu.memory_space<vmem>>, %arg4: memref<32x128xbf16, #tpu.memory_space<vmem>>, %arg5: memref<1x128xf32, #tpu.memory_space<vmem>>, %arg6: memref<1x8x1xi32, #tpu.memory_space<vmem>>, %arg7: memref<1x8x128xf32, #tpu.memory_space<vmem>>, %arg8: memref<1x1xf32, #tpu.memory_space<vmem>>) attributes {dimension_semantics = [#tpu.dimension_semantics<arbitrary>], iteration_bounds = array<i64: 2>, scalar_prefetch = 0 : i64, scratch_operands = 0 : i64, tpu.core_type = #tpu.core_type<tc>, window_params = [{transform_indices = @transform_0, window_bounds = array<i64: 1, 8, 32>}, {pipeline_mode = #tpu.pipeline_mode<synchronous>, transform_indices = @transform_1, window_bounds = array<i64: 1, 32>}, {pipeline_mode = #tpu.pipeline_mode<synchronous>, transform_indices = @transform_2, window_bounds = array<i64: 1, 32>}, {pipeline_mode = #tpu.pipeline_mode<synchronous>, transform_indices = @transform_3, window_bounds = array<i64: 32, 128>}, {pipeline_mode = #tpu.pipeline_mode<synchronous>, transform_indices = @transform_4, window_bounds = array<i64: 1, 128>}, {transform_indices = @transform_5, window_bounds = array<i64: 1, 8, 1>}, {transform_indices = @transform_6, window_bounds = array<i64: 1, 8, 128>}, {pipeline_mode = #tpu.pipeline_mode<synchronous>, transform_indices = @transform_7, window_bounds = array<i64: 1, 1>}]} {
    %c0 = arith.constant 0 : index
    %c0_0 = arith.constant 0 : index
    %c0_1 = arith.constant 0 : index
    %0 = vector.load %arg1[%c0, %c0_0, %c0_1] : memref<1x8x32xf32, #tpu.memory_space<vmem>>, vector<1x8x32xf32>
    %1 = vector.shape_cast %0 : vector<1x8x32xf32> to vector<8x32xf32>
    %cst = arith.constant dense<0.000000e+00> : vector<8xf32>
    %2 = vector.multi_reduction <add>, %1, %cst [1] : vector<8x32xf32> to vector<8xf32>
    %3 = vector.shape_cast %2 : vector<8xf32> to vector<8x1xf32>
    %cst_2 = arith.constant 3.200000e+01 : f32
    %4 = vector.broadcast %cst_2 : f32 to vector<8x1xf32>
    %5 = arith.divf %3, %4 : vector<8x1xf32>
    %6 = vector.broadcast %5 : vector<8x1xf32> to vector<8x32xf32>
    %7 = arith.subf %1, %6 : vector<8x32xf32>
    %8 = arith.mulf %7, %7 : vector<8x32xf32>
    %cst_3 = arith.constant dense<0.000000e+00> : vector<8xf32>
    %9 = vector.multi_reduction <add>, %8, %cst_3 [1] : vector<8x32xf32> to vector<8xf32>
    %10 = vector.shape_cast %9 : vector<8xf32> to vector<8x1xf32>
    %cst_4 = arith.constant 3.200000e+01 : f32
    %11 = vector.broadcast %cst_4 : f32 to vector<8x1xf32>
    %12 = arith.divf %10, %11 : vector<8x1xf32>
    %cst_5 = arith.constant 9.99999974E-6 : f32
    %13 = vector.broadcast %cst_5 : f32 to vector<8x1xf32>
    %14 = arith.addf %12, %13 : vector<8x1xf32>
    %15 = math.rsqrt %14 : vector<8x1xf32>
    %16 = vector.broadcast %15 : vector<8x1xf32> to vector<8x32xf32>
    %17 = arith.mulf %7, %16 : vector<8x32xf32>
    %c0_6 = arith.constant 0 : index
    %c0_7 = arith.constant 0 : index
    %18 = vector.load %arg2[%c0_6, %c0_7] : memref<1x32xf32, #tpu.memory_space<vmem>>, vector<1x32xf32>
    %19 = vector.broadcast %18 : vector<1x32xf32> to vector<8x32xf32>
    %20 = arith.mulf %17, %19 : vector<8x32xf32>
    %c0_8 = arith.constant 0 : index
    %c0_9 = arith.constant 0 : index
    %21 = vector.load %arg3[%c0_8, %c0_9] : memref<1x32xf32, #tpu.memory_space<vmem>>, vector<1x32xf32>
    %22 = vector.broadcast %21 : vector<1x32xf32> to vector<8x32xf32>
    %23 = arith.addf %20, %22 : vector<8x32xf32>
    %24 = arith.truncf %23 : vector<8x32xf32> to vector<8x32xbf16>
    %c0_10 = arith.constant 0 : index
    %c0_11 = arith.constant 0 : index
    %25 = vector.load %arg4[%c0_10, %c0_11] : memref<32x128xbf16, #tpu.memory_space<vmem>>, vector<32x128xbf16>
    %cst_12 = arith.constant dense<0.000000e+00> : vector<8x128xf32>
    %26 = tpu.matmul %24, %25, %cst_12 {dimension_numbers = #tpu.dot_dimension_numbers<[1], [0], [0], [1], [0, 0, 1, 1], [], []>} : vector<8x32xbf16>, vector<32x128xbf16>, vector<8x128xf32> -> vector<8x128xf32>
    %c0_13 = arith.constant 0 : index
    %c0_14 = arith.constant 0 : index
    %27 = vector.load %arg5[%c0_13, %c0_14] : memref<1x128xf32, #tpu.memory_space<vmem>>, vector<1x128xf32>
    %28 = vector.broadcast %27 : vector<1x128xf32> to vector<8x128xf32>
    %29 = arith.addf %26, %28 : vector<8x128xf32>
    %c0_15 = arith.constant 0 : index
    %c0_16 = arith.constant 0 : index
    %c0_17 = arith.constant 0 : index
    %30 = vector.load %arg7[%c0_15, %c0_16, %c0_17] : memref<1x8x128xf32, #tpu.memory_space<vmem>>, vector<1x8x128xf32>
    %31 = vector.shape_cast %30 : vector<1x8x128xf32> to vector<8x128xf32>
    %32 = vector.shape_cast %29 : vector<8x128xf32> to vector<1x8x128xf32>
    tpu.vector_store %arg7[%c0_15, %c0_16, %c0_17], %32 {strides = array<i32>} : memref<1x8x128xf32, #tpu.memory_space<vmem>>, vector<1x8x128xf32>,
    %c0_18 = arith.constant 0 : index
    %c0_19 = arith.constant 0 : index
    %c0_20 = arith.constant 0 : index
    %33 = vector.load %arg6[%c0_18, %c0_19, %c0_20] : memref<1x8x1xi32, #tpu.memory_space<vmem>>, vector<1x8x1xi32>
    %34 = vector.shape_cast %33 : vector<1x8x1xi32> to vector<8x1xi32>
    %cst_21 = arith.constant dense<0xFF800000> : vector<8xf32>
    %35 = vector.multi_reduction <maximumf>, %29, %cst_21 [1] : vector<8x128xf32> to vector<8xf32>
    %36 = vector.shape_cast %35 : vector<8xf32> to vector<8x1xf32>
    %37 = vector.broadcast %36 : vector<8x1xf32> to vector<8x128xf32>
    %38 = arith.subf %29, %37 : vector<8x128xf32>
    %39 = math.exp %38 : vector<8x128xf32>
    %cst_22 = arith.constant dense<0.000000e+00> : vector<8xf32>
    %40 = vector.multi_reduction <add>, %39, %cst_22 [1] : vector<8x128xf32> to vector<8xf32>
    %41 = vector.shape_cast %40 : vector<8xf32> to vector<8x1xf32>
    %42 = math.log %41 : vector<8x1xf32>
    %43 = arith.addf %42, %36 : vector<8x1xf32>
    %44 = tpu.iota {dimensions = array<i32: 1>} : vector<8x128xi32>
    %45 = vector.broadcast %34 : vector<8x1xi32> to vector<8x128xi32>
    %46 = arith.cmpi eq, %44, %45 : vector<8x128xi32>
    %cst_23 = arith.constant 0.000000e+00 : f32
    %47 = vector.broadcast %cst_23 : f32 to vector<8x128xf32>
    %48 = arith.select %46, %29, %47 : vector<8x128xi1>, vector<8x128xf32>
    %cst_24 = arith.constant dense<0.000000e+00> : vector<8xf32>
    %49 = vector.multi_reduction <add>, %48, %cst_24 [1] : vector<8x128xf32> to vector<8xf32>
    %50 = vector.shape_cast %49 : vector<8xf32> to vector<8x1xf32>
    %51 = arith.subf %43, %50 : vector<8x1xf32>
    %cst_25 = arith.constant dense<0.000000e+00> : vector<1xf32>
    %52 = vector.multi_reduction <add>, %51, %cst_25 [0] : vector<8x1xf32> to vector<1xf32>
    %53 = vector.shape_cast %52 : vector<1xf32> to vector<1x1xf32>
    %c0_i32 = arith.constant 0 : i32
    %54 = arith.cmpi eq, %arg0, %c0_i32 : i32
    %55 = arith.extui %54 : i1 to i32
    %c0_i32_26 = arith.constant 0 : i32
    %56 = arith.cmpi ne, %55, %c0_i32_26 : i32
    scf.if %56 {
      %cst_32 = arith.constant 0.000000e+00 : f32
      %62 = vector.broadcast %cst_32 : f32 to vector<1x1xf32>
      %c0_33 = arith.constant 0 : index
      %c0_34 = arith.constant 0 : index
      %63 = vector.load %arg8[%c0_33, %c0_34] : memref<1x1xf32, #tpu.memory_space<vmem>>, vector<1x1xf32>
      tpu.vector_store %arg8[%c0_33, %c0_34], %62 {strides = array<i32>} : memref<1x1xf32, #tpu.memory_space<vmem>>, vector<1x1xf32>,
    } else {
    }
    %c0_27 = arith.constant 0 : index
    %c0_28 = arith.constant 0 : index
    %57 = vector.load %arg8[%c0_27, %c0_28] : memref<1x1xf32, #tpu.memory_space<vmem>>, vector<1x1xf32>
    %cst_29 = arith.constant 6.250000e-02 : f32
    %58 = vector.broadcast %cst_29 : f32 to vector<1x1xf32>
    %59 = arith.mulf %53, %58 : vector<1x1xf32>
    %60 = arith.addf %57, %59 : vector<1x1xf32>
    %c0_30 = arith.constant 0 : index
    %c0_31 = arith.constant 0 : index
    %61 = vector.load %arg8[%c0_30, %c0_31] : memref<1x1xf32, #tpu.memory_space<vmem>>, vector<1x1xf32>
    tpu.vector_store %arg8[%c0_30, %c0_31], %60 {strides = array<i32>} : memref<1x1xf32, #tpu.memory_space<vmem>>, vector<1x1xf32>,
    return
  }
  func.func @transform_0(%arg0: i32) -> (i32, i32, i32) {
    %c0_i32 = arith.constant 0 : i32
    %c0_i32_0 = arith.constant 0 : i32
    %c0_i32_1 = arith.constant 0 : i32
    return %arg0, %c0_i32, %c0_i32_0 : i32, i32, i32
  }
  func.func @transform_1(%arg0: i32) -> (i32, i32) {
    %c0_i32 = arith.constant 0 : i32
    %c0_i32_0 = arith.constant 0 : i32
    %c0_i32_1 = arith.constant 0 : i32
    return %c0_i32, %c0_i32_0 : i32, i32
  }
  func.func @transform_2(%arg0: i32) -> (i32, i32) {
    %c0_i32 = arith.constant 0 : i32
    %c0_i32_0 = arith.constant 0 : i32
    %c0_i32_1 = arith.constant 0 : i32
    return %c0_i32, %c0_i32_0 : i32, i32
  }
  func.func @transform_3(%arg0: i32) -> (i32, i32) {
    %c0_i32 = arith.constant 0 : i32
    %c0_i32_0 = arith.constant 0 : i32
    %c0_i32_1 = arith.constant 0 : i32
    return %c0_i32, %c0_i32_0 : i32, i32
  }
  func.func @transform_4(%arg0: i32) -> (i32, i32) {
    %c0_i32 = arith.constant 0 : i32
    %c0_i32_0 = arith.constant 0 : i32
    %c0_i32_1 = arith.constant 0 : i32
    return %c0_i32, %c0_i32_0 : i32, i32
  }
  func.func @transform_5(%arg0: i32) -> (i32, i32, i32) {
    %c0_i32 = arith.constant 0 : i32
    %c0_i32_0 = arith.constant 0 : i32
    %c0_i32_1 = arith.constant 0 : i32
    return %arg0, %c0_i32, %c0_i32_0 : i32, i32, i32
  }
  func.func @transform_6(%arg0: i32) -> (i32, i32, i32) {
    %c0_i32 = arith.constant 0 : i32
    %c0_i32_0 = arith.constant 0 : i32
    %c0_i32_1 = arith.constant 0 : i32
    return %arg0, %c0_i32, %c0_i32_0 : i32, i32, i32
  }
  func.func @transform_7(%arg0: i32) -> (i32, i32) {
    %c0_i32 = arith.constant 0 : i32
    %c0_i32_0 = arith.constant 0 : i32
    %c0_i32_1 = arith.constant 0 : i32
    return %c0_i32, %c0_i32_0 : i32, i32
  }
}

module attributes {stable_mosaic.version = 11 : i64} {
  func.func @_attn_sublayer_kernel(%arg0: i32, %arg1: memref<1x8x32xf32, #tpu.memory_space<vmem>>, %arg2: memref<1x8x32xf32, #tpu.memory_space<vmem>>, %arg3: memref<1x32xf32, #tpu.memory_space<vmem>>, %arg4: memref<1x32xf32, #tpu.memory_space<vmem>>, %arg5: memref<32x32xbf16, #tpu.memory_space<vmem>>, %arg6: memref<1x32xf32, #tpu.memory_space<vmem>>, %arg7: memref<32x64xbf16, #tpu.memory_space<vmem>>, %arg8: memref<1x64xf32, #tpu.memory_space<vmem>>, %arg9: memref<32x32xf32, #tpu.memory_space<vmem>>, %arg10: memref<1x32xf32, #tpu.memory_space<vmem>>, %arg11: memref<1x8x8xf32, #tpu.memory_space<vmem>>, %arg12: memref<1x8x32xf32, #tpu.memory_space<vmem>>) attributes {dimension_semantics = [#tpu.dimension_semantics<parallel>], iteration_bounds = array<i64: 2>, scalar_prefetch = 0 : i64, scratch_operands = 0 : i64, tpu.core_type = #tpu.core_type<tc>, window_params = [{transform_indices = @transform_0, window_bounds = array<i64: 1, 8, 32>}, {transform_indices = @transform_1, window_bounds = array<i64: 1, 8, 32>}, {pipeline_mode = #tpu.pipeline_mode<synchronous>, transform_indices = @transform_2, window_bounds = array<i64: 1, 32>}, {pipeline_mode = #tpu.pipeline_mode<synchronous>, transform_indices = @transform_3, window_bounds = array<i64: 1, 32>}, {pipeline_mode = #tpu.pipeline_mode<synchronous>, transform_indices = @transform_4, window_bounds = array<i64: 32, 32>}, {pipeline_mode = #tpu.pipeline_mode<synchronous>, transform_indices = @transform_5, window_bounds = array<i64: 1, 32>}, {pipeline_mode = #tpu.pipeline_mode<synchronous>, transform_indices = @transform_6, window_bounds = array<i64: 32, 64>}, {pipeline_mode = #tpu.pipeline_mode<synchronous>, transform_indices = @transform_7, window_bounds = array<i64: 1, 64>}, {pipeline_mode = #tpu.pipeline_mode<synchronous>, transform_indices = @transform_8, window_bounds = array<i64: 32, 32>}, {pipeline_mode = #tpu.pipeline_mode<synchronous>, transform_indices = @transform_9, window_bounds = array<i64: 1, 32>}, {pipeline_mode = #tpu.pipeline_mode<synchronous>, transform_indices = @transform_10, window_bounds = array<i64: 1, 8, 8>}, {transform_indices = @transform_11, window_bounds = array<i64: 1, 8, 32>}]} {
    %c0 = arith.constant 0 : index
    %c0_0 = arith.constant 0 : index
    %c0_1 = arith.constant 0 : index
    %0 = vector.load %arg1[%c0, %c0_0, %c0_1] : memref<1x8x32xf32, #tpu.memory_space<vmem>>, vector<1x8x32xf32>
    %1 = vector.shape_cast %0 : vector<1x8x32xf32> to vector<8x32xf32>
    %c0_2 = arith.constant 0 : index
    %c0_3 = arith.constant 0 : index
    %2 = vector.load %arg3[%c0_2, %c0_3] : memref<1x32xf32, #tpu.memory_space<vmem>>, vector<1x32xf32>
    %c0_4 = arith.constant 0 : index
    %c0_5 = arith.constant 0 : index
    %3 = vector.load %arg4[%c0_4, %c0_5] : memref<1x32xf32, #tpu.memory_space<vmem>>, vector<1x32xf32>
    %cst = arith.constant dense<0.000000e+00> : vector<8xf32>
    %4 = vector.multi_reduction <add>, %1, %cst [1] : vector<8x32xf32> to vector<8xf32>
    %5 = vector.shape_cast %4 : vector<8xf32> to vector<8x1xf32>
    %cst_6 = arith.constant 3.200000e+01 : f32
    %6 = vector.broadcast %cst_6 : f32 to vector<8x1xf32>
    %7 = arith.divf %5, %6 : vector<8x1xf32>
    %8 = vector.broadcast %7 : vector<8x1xf32> to vector<8x32xf32>
    %9 = arith.subf %1, %8 : vector<8x32xf32>
    %10 = arith.mulf %9, %9 : vector<8x32xf32>
    %cst_7 = arith.constant dense<0.000000e+00> : vector<8xf32>
    %11 = vector.multi_reduction <add>, %10, %cst_7 [1] : vector<8x32xf32> to vector<8xf32>
    %12 = vector.shape_cast %11 : vector<8xf32> to vector<8x1xf32>
    %cst_8 = arith.constant 3.200000e+01 : f32
    %13 = vector.broadcast %cst_8 : f32 to vector<8x1xf32>
    %14 = arith.divf %12, %13 : vector<8x1xf32>
    %cst_9 = arith.constant 9.99999974E-6 : f32
    %15 = vector.broadcast %cst_9 : f32 to vector<8x1xf32>
    %16 = arith.addf %14, %15 : vector<8x1xf32>
    %17 = math.rsqrt %16 : vector<8x1xf32>
    %18 = vector.broadcast %17 : vector<8x1xf32> to vector<8x32xf32>
    %19 = arith.mulf %9, %18 : vector<8x32xf32>
    %20 = vector.broadcast %2 : vector<1x32xf32> to vector<8x32xf32>
    %21 = arith.mulf %19, %20 : vector<8x32xf32>
    %22 = vector.broadcast %3 : vector<1x32xf32> to vector<8x32xf32>
    %23 = arith.addf %21, %22 : vector<8x32xf32>
    %24 = arith.truncf %23 : vector<8x32xf32> to vector<8x32xbf16>
    %c0_10 = arith.constant 0 : index
    %c0_11 = arith.constant 0 : index
    %25 = vector.load %arg5[%c0_10, %c0_11] : memref<32x32xbf16, #tpu.memory_space<vmem>>, vector<32x32xbf16>
    %cst_12 = arith.constant dense<0.000000e+00> : vector<8x32xf32>
    %26 = tpu.matmul %24, %25, %cst_12 {dimension_numbers = #tpu.dot_dimension_numbers<[1], [0], [0], [1], [0, 0, 1, 1], [], []>} : vector<8x32xbf16>, vector<32x32xbf16>, vector<8x32xf32> -> vector<8x32xf32>
    %c0_13 = arith.constant 0 : index
    %c0_14 = arith.constant 0 : index
    %27 = vector.load %arg6[%c0_13, %c0_14] : memref<1x32xf32, #tpu.memory_space<vmem>>, vector<1x32xf32>
    %28 = vector.broadcast %27 : vector<1x32xf32> to vector<8x32xf32>
    %29 = arith.addf %26, %28 : vector<8x32xf32>
    %30 = arith.truncf %23 : vector<8x32xf32> to vector<8x32xbf16>
    %c0_15 = arith.constant 0 : index
    %c0_16 = arith.constant 0 : index
    %31 = vector.load %arg7[%c0_15, %c0_16] : memref<32x64xbf16, #tpu.memory_space<vmem>>, vector<32x64xbf16>
    %cst_17 = arith.constant dense<0.000000e+00> : vector<8x64xf32>
    %32 = tpu.matmul %30, %31, %cst_17 {dimension_numbers = #tpu.dot_dimension_numbers<[1], [0], [0], [1], [0, 0, 1, 1], [], []>} : vector<8x32xbf16>, vector<32x64xbf16>, vector<8x64xf32> -> vector<8x64xf32>
    %c0_18 = arith.constant 0 : index
    %c0_19 = arith.constant 0 : index
    %33 = vector.load %arg8[%c0_18, %c0_19] : memref<1x64xf32, #tpu.memory_space<vmem>>, vector<1x64xf32>
    %34 = vector.broadcast %33 : vector<1x64xf32> to vector<8x64xf32>
    %35 = arith.addf %32, %34 : vector<8x64xf32>
    %36 = vector.extract_strided_slice %35 {offsets = [0, 0], sizes = [8, 32], strides = [1, 1]} : vector<8x64xf32> to vector<8x32xf32>
    %37 = vector.extract_strided_slice %35 {offsets = [0, 32], sizes = [8, 32], strides = [1, 1]} : vector<8x64xf32> to vector<8x32xf32>
    %c0_20 = arith.constant 0 : index
    %c0_21 = arith.constant 0 : index
    %c0_22 = arith.constant 0 : index
    %38 = vector.load %arg11[%c0_20, %c0_21, %c0_22] : memref<1x8x8xf32, #tpu.memory_space<vmem>>, vector<1x8x8xf32>
    %39 = vector.shape_cast %38 : vector<1x8x8xf32> to vector<8x8xf32>
    %cst_23 = arith.constant 0.000000e+00 : f32
    %40 = vector.broadcast %cst_23 : f32 to vector<8x32xf32>
    %41 = vector.extract_strided_slice %29 {offsets = [0, 0], sizes = [8, 8], strides = [1, 1]} : vector<8x32xf32> to vector<8x8xf32>
    %42 = arith.truncf %41 : vector<8x8xf32> to vector<8x8xbf16>
    %43 = vector.extract_strided_slice %36 {offsets = [0, 0], sizes = [8, 8], strides = [1, 1]} : vector<8x32xf32> to vector<8x8xf32>
    %44 = arith.truncf %43 : vector<8x8xf32> to vector<8x8xbf16>
    %45 = vector.extract_strided_slice %37 {offsets = [0, 0], sizes = [8, 8], strides = [1, 1]} : vector<8x32xf32> to vector<8x8xf32>
    %46 = arith.truncf %45 : vector<8x8xf32> to vector<8x8xbf16>
    %cst_24 = arith.constant dense<0.000000e+00> : vector<8x8xf32>
    %47 = tpu.matmul %42, %44, %cst_24 {dimension_numbers = #tpu.dot_dimension_numbers<[1], [1], [0], [0], [0, 0, 1, 0], [], []>} : vector<8x8xbf16>, vector<8x8xbf16>, vector<8x8xf32> -> vector<8x8xf32>
    %cst_25 = arith.constant 0.353553385 : f32
    %48 = vector.broadcast %cst_25 : f32 to vector<8x8xf32>
    %49 = arith.mulf %47, %48 : vector<8x8xf32>
    %50 = arith.addf %49, %39 : vector<8x8xf32>
    %cst_26 = arith.constant dense<0xFF800000> : vector<8xf32>
    %51 = vector.multi_reduction <maximumf>, %50, %cst_26 [1] : vector<8x8xf32> to vector<8xf32>
    %52 = vector.shape_cast %51 : vector<8xf32> to vector<8x1xf32>
    %53 = vector.broadcast %52 : vector<8x1xf32> to vector<8x8xf32>
    %54 = arith.subf %50, %53 : vector<8x8xf32>
    %55 = math.exp %54 : vector<8x8xf32>
    %cst_27 = arith.constant dense<0.000000e+00> : vector<8xf32>
    %56 = vector.multi_reduction <add>, %55, %cst_27 [1] : vector<8x8xf32> to vector<8xf32>
    %57 = vector.shape_cast %56 : vector<8xf32> to vector<8x1xf32>
    %58 = tpu.reciprocal %57 {approx = true} : vector<8x1xf32> -> vector<8x1xf32>
    %59 = vector.broadcast %58 : vector<8x1xf32> to vector<8x8xf32>
    %60 = arith.mulf %55, %59 : vector<8x8xf32>
    %61 = arith.truncf %60 : vector<8x8xf32> to vector<8x8xbf16>
    %cst_28 = arith.constant dense<0.000000e+00> : vector<8x8xf32>
    %62 = tpu.matmul %61, %46, %cst_28 {dimension_numbers = #tpu.dot_dimension_numbers<[1], [0], [0], [1], [0, 0, 1, 1], [], []>} : vector<8x8xbf16>, vector<8x8xbf16>, vector<8x8xf32> -> vector<8x8xf32>
    %c0_29 = arith.constant 0 : index
    %c0_30 = arith.constant 0 : index
    %63 = vector.load %arg9[%c0_29, %c0_30] : memref<32x32xf32, #tpu.memory_space<vmem>>, vector<8x32xf32>
    %64 = arith.truncf %63 : vector<8x32xf32> to vector<8x32xbf16>
    %65 = arith.truncf %62 : vector<8x8xf32> to vector<8x8xbf16>
    %cst_31 = arith.constant dense<0.000000e+00> : vector<8x32xf32>
    %66 = tpu.matmul %65, %64, %cst_31 {dimension_numbers = #tpu.dot_dimension_numbers<[1], [0], [0], [1], [0, 0, 1, 1], [], []>} : vector<8x8xbf16>, vector<8x32xbf16>, vector<8x32xf32> -> vector<8x32xf32>
    %67 = arith.addf %40, %66 : vector<8x32xf32>
    %68 = vector.extract_strided_slice %29 {offsets = [0, 8], sizes = [8, 8], strides = [1, 1]} : vector<8x32xf32> to vector<8x8xf32>
    %69 = arith.truncf %68 : vector<8x8xf32> to vector<8x8xbf16>
    %70 = vector.extract_strided_slice %36 {offsets = [0, 8], sizes = [8, 8], strides = [1, 1]} : vector<8x32xf32> to vector<8x8xf32>
    %71 = arith.truncf %70 : vector<8x8xf32> to vector<8x8xbf16>
    %72 = vector.extract_strided_slice %37 {offsets = [0, 8], sizes = [8, 8], strides = [1, 1]} : vector<8x32xf32> to vector<8x8xf32>
    %73 = arith.truncf %72 : vector<8x8xf32> to vector<8x8xbf16>
    %cst_32 = arith.constant dense<0.000000e+00> : vector<8x8xf32>
    %74 = tpu.matmul %69, %71, %cst_32 {dimension_numbers = #tpu.dot_dimension_numbers<[1], [1], [0], [0], [0, 0, 1, 0], [], []>} : vector<8x8xbf16>, vector<8x8xbf16>, vector<8x8xf32> -> vector<8x8xf32>
    %cst_33 = arith.constant 0.353553385 : f32
    %75 = vector.broadcast %cst_33 : f32 to vector<8x8xf32>
    %76 = arith.mulf %74, %75 : vector<8x8xf32>
    %77 = arith.addf %76, %39 : vector<8x8xf32>
    %cst_34 = arith.constant dense<0xFF800000> : vector<8xf32>
    %78 = vector.multi_reduction <maximumf>, %77, %cst_34 [1] : vector<8x8xf32> to vector<8xf32>
    %79 = vector.shape_cast %78 : vector<8xf32> to vector<8x1xf32>
    %80 = vector.broadcast %79 : vector<8x1xf32> to vector<8x8xf32>
    %81 = arith.subf %77, %80 : vector<8x8xf32>
    %82 = math.exp %81 : vector<8x8xf32>
    %cst_35 = arith.constant dense<0.000000e+00> : vector<8xf32>
    %83 = vector.multi_reduction <add>, %82, %cst_35 [1] : vector<8x8xf32> to vector<8xf32>
    %84 = vector.shape_cast %83 : vector<8xf32> to vector<8x1xf32>
    %85 = tpu.reciprocal %84 {approx = true} : vector<8x1xf32> -> vector<8x1xf32>
    %86 = vector.broadcast %85 : vector<8x1xf32> to vector<8x8xf32>
    %87 = arith.mulf %82, %86 : vector<8x8xf32>
    %88 = arith.truncf %87 : vector<8x8xf32> to vector<8x8xbf16>
    %cst_36 = arith.constant dense<0.000000e+00> : vector<8x8xf32>
    %89 = tpu.matmul %88, %73, %cst_36 {dimension_numbers = #tpu.dot_dimension_numbers<[1], [0], [0], [1], [0, 0, 1, 1], [], []>} : vector<8x8xbf16>, vector<8x8xbf16>, vector<8x8xf32> -> vector<8x8xf32>
    %c8 = arith.constant 8 : index
    %c0_37 = arith.constant 0 : index
    %90 = vector.load %arg9[%c8, %c0_37] : memref<32x32xf32, #tpu.memory_space<vmem>>, vector<8x32xf32>
    %91 = arith.truncf %90 : vector<8x32xf32> to vector<8x32xbf16>
    %92 = arith.truncf %89 : vector<8x8xf32> to vector<8x8xbf16>
    %cst_38 = arith.constant dense<0.000000e+00> : vector<8x32xf32>
    %93 = tpu.matmul %92, %91, %cst_38 {dimension_numbers = #tpu.dot_dimension_numbers<[1], [0], [0], [1], [0, 0, 1, 1], [], []>} : vector<8x8xbf16>, vector<8x32xbf16>, vector<8x32xf32> -> vector<8x32xf32>
    %94 = arith.addf %67, %93 : vector<8x32xf32>
    %95 = vector.extract_strided_slice %29 {offsets = [0, 16], sizes = [8, 8], strides = [1, 1]} : vector<8x32xf32> to vector<8x8xf32>
    %96 = arith.truncf %95 : vector<8x8xf32> to vector<8x8xbf16>
    %97 = vector.extract_strided_slice %36 {offsets = [0, 16], sizes = [8, 8], strides = [1, 1]} : vector<8x32xf32> to vector<8x8xf32>
    %98 = arith.truncf %97 : vector<8x8xf32> to vector<8x8xbf16>
    %99 = vector.extract_strided_slice %37 {offsets = [0, 16], sizes = [8, 8], strides = [1, 1]} : vector<8x32xf32> to vector<8x8xf32>
    %100 = arith.truncf %99 : vector<8x8xf32> to vector<8x8xbf16>
    %cst_39 = arith.constant dense<0.000000e+00> : vector<8x8xf32>
    %101 = tpu.matmul %96, %98, %cst_39 {dimension_numbers = #tpu.dot_dimension_numbers<[1], [1], [0], [0], [0, 0, 1, 0], [], []>} : vector<8x8xbf16>, vector<8x8xbf16>, vector<8x8xf32> -> vector<8x8xf32>
    %cst_40 = arith.constant 0.353553385 : f32
    %102 = vector.broadcast %cst_40 : f32 to vector<8x8xf32>
    %103 = arith.mulf %101, %102 : vector<8x8xf32>
    %104 = arith.addf %103, %39 : vector<8x8xf32>
    %cst_41 = arith.constant dense<0xFF800000> : vector<8xf32>
    %105 = vector.multi_reduction <maximumf>, %104, %cst_41 [1] : vector<8x8xf32> to vector<8xf32>
    %106 = vector.shape_cast %105 : vector<8xf32> to vector<8x1xf32>
    %107 = vector.broadcast %106 : vector<8x1xf32> to vector<8x8xf32>
    %108 = arith.subf %104, %107 : vector<8x8xf32>
    %109 = math.exp %108 : vector<8x8xf32>
    %cst_42 = arith.constant dense<0.000000e+00> : vector<8xf32>
    %110 = vector.multi_reduction <add>, %109, %cst_42 [1] : vector<8x8xf32> to vector<8xf32>
    %111 = vector.shape_cast %110 : vector<8xf32> to vector<8x1xf32>
    %112 = tpu.reciprocal %111 {approx = true} : vector<8x1xf32> -> vector<8x1xf32>
    %113 = vector.broadcast %112 : vector<8x1xf32> to vector<8x8xf32>
    %114 = arith.mulf %109, %113 : vector<8x8xf32>
    %115 = arith.truncf %114 : vector<8x8xf32> to vector<8x8xbf16>
    %cst_43 = arith.constant dense<0.000000e+00> : vector<8x8xf32>
    %116 = tpu.matmul %115, %100, %cst_43 {dimension_numbers = #tpu.dot_dimension_numbers<[1], [0], [0], [1], [0, 0, 1, 1], [], []>} : vector<8x8xbf16>, vector<8x8xbf16>, vector<8x8xf32> -> vector<8x8xf32>
    %c16 = arith.constant 16 : index
    %c0_44 = arith.constant 0 : index
    %117 = vector.load %arg9[%c16, %c0_44] : memref<32x32xf32, #tpu.memory_space<vmem>>, vector<8x32xf32>
    %118 = arith.truncf %117 : vector<8x32xf32> to vector<8x32xbf16>
    %119 = arith.truncf %116 : vector<8x8xf32> to vector<8x8xbf16>
    %cst_45 = arith.constant dense<0.000000e+00> : vector<8x32xf32>
    %120 = tpu.matmul %119, %118, %cst_45 {dimension_numbers = #tpu.dot_dimension_numbers<[1], [0], [0], [1], [0, 0, 1, 1], [], []>} : vector<8x8xbf16>, vector<8x32xbf16>, vector<8x32xf32> -> vector<8x32xf32>
    %121 = arith.addf %94, %120 : vector<8x32xf32>
    %122 = vector.extract_strided_slice %29 {offsets = [0, 24], sizes = [8, 8], strides = [1, 1]} : vector<8x32xf32> to vector<8x8xf32>
    %123 = arith.truncf %122 : vector<8x8xf32> to vector<8x8xbf16>
    %124 = vector.extract_strided_slice %36 {offsets = [0, 24], sizes = [8, 8], strides = [1, 1]} : vector<8x32xf32> to vector<8x8xf32>
    %125 = arith.truncf %124 : vector<8x8xf32> to vector<8x8xbf16>
    %126 = vector.extract_strided_slice %37 {offsets = [0, 24], sizes = [8, 8], strides = [1, 1]} : vector<8x32xf32> to vector<8x8xf32>
    %127 = arith.truncf %126 : vector<8x8xf32> to vector<8x8xbf16>
    %cst_46 = arith.constant dense<0.000000e+00> : vector<8x8xf32>
    %128 = tpu.matmul %123, %125, %cst_46 {dimension_numbers = #tpu.dot_dimension_numbers<[1], [1], [0], [0], [0, 0, 1, 0], [], []>} : vector<8x8xbf16>, vector<8x8xbf16>, vector<8x8xf32> -> vector<8x8xf32>
    %cst_47 = arith.constant 0.353553385 : f32
    %129 = vector.broadcast %cst_47 : f32 to vector<8x8xf32>
    %130 = arith.mulf %128, %129 : vector<8x8xf32>
    %131 = arith.addf %130, %39 : vector<8x8xf32>
    %cst_48 = arith.constant dense<0xFF800000> : vector<8xf32>
    %132 = vector.multi_reduction <maximumf>, %131, %cst_48 [1] : vector<8x8xf32> to vector<8xf32>
    %133 = vector.shape_cast %132 : vector<8xf32> to vector<8x1xf32>
    %134 = vector.broadcast %133 : vector<8x1xf32> to vector<8x8xf32>
    %135 = arith.subf %131, %134 : vector<8x8xf32>
    %136 = math.exp %135 : vector<8x8xf32>
    %cst_49 = arith.constant dense<0.000000e+00> : vector<8xf32>
    %137 = vector.multi_reduction <add>, %136, %cst_49 [1] : vector<8x8xf32> to vector<8xf32>
    %138 = vector.shape_cast %137 : vector<8xf32> to vector<8x1xf32>
    %139 = tpu.reciprocal %138 {approx = true} : vector<8x1xf32> -> vector<8x1xf32>
    %140 = vector.broadcast %139 : vector<8x1xf32> to vector<8x8xf32>
    %141 = arith.mulf %136, %140 : vector<8x8xf32>
    %142 = arith.truncf %141 : vector<8x8xf32> to vector<8x8xbf16>
    %cst_50 = arith.constant dense<0.000000e+00> : vector<8x8xf32>
    %143 = tpu.matmul %142, %127, %cst_50 {dimension_numbers = #tpu.dot_dimension_numbers<[1], [0], [0], [1], [0, 0, 1, 1], [], []>} : vector<8x8xbf16>, vector<8x8xbf16>, vector<8x8xf32> -> vector<8x8xf32>
    %c24 = arith.constant 24 : index
    %c0_51 = arith.constant 0 : index
    %144 = vector.load %arg9[%c24, %c0_51] : memref<32x32xf32, #tpu.memory_space<vmem>>, vector<8x32xf32>
    %145 = arith.truncf %144 : vector<8x32xf32> to vector<8x32xbf16>
    %146 = arith.truncf %143 : vector<8x8xf32> to vector<8x8xbf16>
    %cst_52 = arith.constant dense<0.000000e+00> : vector<8x32xf32>
    %147 = tpu.matmul %146, %145, %cst_52 {dimension_numbers = #tpu.dot_dimension_numbers<[1], [0], [0], [1], [0, 0, 1, 1], [], []>} : vector<8x8xbf16>, vector<8x32xbf16>, vector<8x32xf32> -> vector<8x32xf32>
    %148 = arith.addf %121, %147 : vector<8x32xf32>
    %149 = arith.addf %1, %148 : vector<8x32xf32>
    %c0_53 = arith.constant 0 : index
    %c0_54 = arith.constant 0 : index
    %150 = vector.load %arg10[%c0_53, %c0_54] : memref<1x32xf32, #tpu.memory_space<vmem>>, vector<1x32xf32>
    %151 = vector.broadcast %150 : vector<1x32xf32> to vector<8x32xf32>
    %152 = arith.addf %149, %151 : vector<8x32xf32>
    %c0_55 = arith.constant 0 : index
    %c0_56 = arith.constant 0 : index
    %c0_57 = arith.constant 0 : index
    %153 = vector.load %arg12[%c0_55, %c0_56, %c0_57] : memref<1x8x32xf32, #tpu.memory_space<vmem>>, vector<1x8x32xf32>
    %154 = vector.shape_cast %153 : vector<1x8x32xf32> to vector<8x32xf32>
    %155 = vector.shape_cast %152 : vector<8x32xf32> to vector<1x8x32xf32>
    tpu.vector_store %arg12[%c0_55, %c0_56, %c0_57], %155 {strides = array<i32>} : memref<1x8x32xf32, #tpu.memory_space<vmem>>, vector<1x8x32xf32>,
    return
  }
  func.func @transform_0(%arg0: i32) -> (i32, i32, i32) {
    %c0_i32 = arith.constant 0 : i32
    %c0_i32_0 = arith.constant 0 : i32
    %c0_i32_1 = arith.constant 0 : i32
    return %arg0, %c0_i32, %c0_i32_0 : i32, i32, i32
  }
  func.func @transform_1(%arg0: i32) -> (i32, i32, i32) {
    %c0_i32 = arith.constant 0 : i32
    %c0_i32_0 = arith.constant 0 : i32
    %c0_i32_1 = arith.constant 0 : i32
    return %arg0, %c0_i32, %c0_i32_0 : i32, i32, i32
  }
  func.func @transform_2(%arg0: i32) -> (i32, i32) {
    %c0_i32 = arith.constant 0 : i32
    %c0_i32_0 = arith.constant 0 : i32
    %c0_i32_1 = arith.constant 0 : i32
    return %c0_i32, %c0_i32_0 : i32, i32
  }
  func.func @transform_3(%arg0: i32) -> (i32, i32) {
    %c0_i32 = arith.constant 0 : i32
    %c0_i32_0 = arith.constant 0 : i32
    %c0_i32_1 = arith.constant 0 : i32
    return %c0_i32, %c0_i32_0 : i32, i32
  }
  func.func @transform_4(%arg0: i32) -> (i32, i32) {
    %c0_i32 = arith.constant 0 : i32
    %c0_i32_0 = arith.constant 0 : i32
    %c0_i32_1 = arith.constant 0 : i32
    return %c0_i32, %c0_i32_0 : i32, i32
  }
  func.func @transform_5(%arg0: i32) -> (i32, i32) {
    %c0_i32 = arith.constant 0 : i32
    %c0_i32_0 = arith.constant 0 : i32
    %c0_i32_1 = arith.constant 0 : i32
    return %c0_i32, %c0_i32_0 : i32, i32
  }
  func.func @transform_6(%arg0: i32) -> (i32, i32) {
    %c0_i32 = arith.constant 0 : i32
    %c0_i32_0 = arith.constant 0 : i32
    %c0_i32_1 = arith.constant 0 : i32
    return %c0_i32, %c0_i32_0 : i32, i32
  }
  func.func @transform_7(%arg0: i32) -> (i32, i32) {
    %c0_i32 = arith.constant 0 : i32
    %c0_i32_0 = arith.constant 0 : i32
    %c0_i32_1 = arith.constant 0 : i32
    return %c0_i32, %c0_i32_0 : i32, i32
  }
  func.func @transform_8(%arg0: i32) -> (i32, i32) {
    %c0_i32 = arith.constant 0 : i32
    %c0_i32_0 = arith.constant 0 : i32
    %c0_i32_1 = arith.constant 0 : i32
    return %c0_i32, %c0_i32_0 : i32, i32
  }
  func.func @transform_9(%arg0: i32) -> (i32, i32) {
    %c0_i32 = arith.constant 0 : i32
    %c0_i32_0 = arith.constant 0 : i32
    %c0_i32_1 = arith.constant 0 : i32
    return %c0_i32, %c0_i32_0 : i32, i32
  }
  func.func @transform_10(%arg0: i32) -> (i32, i32, i32) {
    %c0_i32 = arith.constant 0 : i32
    %c0_i32_0 = arith.constant 0 : i32
    %c0_i32_1 = arith.constant 0 : i32
    %c0_i32_2 = arith.constant 0 : i32
    return %c0_i32, %c0_i32_0, %c0_i32_1 : i32, i32, i32
  }
  func.func @transform_11(%arg0: i32) -> (i32, i32, i32) {
    %c0_i32 = arith.constant 0 : i32
    %c0_i32_0 = arith.constant 0 : i32
    %c0_i32_1 = arith.constant 0 : i32
    return %arg0, %c0_i32, %c0_i32_0 : i32, i32, i32
  }
}

</mosaic_0001>

<bundles_post_ra>
// kernel: _lambda_.28
= control target key start
LH: loop header
LB: loop body
LE: loop exit
PB: predicated region body
PF: predicated region fallthrough
CT: control target
= control target key end

     0   :  { %s314_s12 = smov 0   ;;  %s347_s0 = inlined_call_operand.vmem [shape: f32[2,8,32], index: 0, kind: input, shape index: {}]   ;;  %s348_s1 = inlined_call_operand.vmem [shape: f32[1,32], index: 1, kind: input, shape index: {}]   ;;  %s349_s2 = inlined_call_operand.vmem [shape: f32[1,32], index: 2, kind: input, shape index: {}]   ;;  %s350_s3 = inlined_call_operand.vmem [shape: f32[2,8,32], index: 3, kind: output, shape index: {}]  }
   0x1 LB: > { %s261_s13 = sadd.s32 4294967295, %s291_s12   ;;  %p265_p0 = scmp.ge.s32.totalorder %s291_s12, 1  ;;  %s291_s12 = sphi %s314_s12, %s13_s12  }
   0x2   : > { %p136_p1 = scmp.lt.s32.totalorder %s291_s12, 3 }
   0x4   : > { %p137_p2 = pnand %p265_p0, %p136_p1 }
   0x5   : > { %p158_p3 = scmp.lt.s32.totalorder (!%p137_p2), %s261_s13, 1 }
   0x6   : > { %140 = sbr.rel (%p137_p2) target bundleno = 284 (0x11c), region = 32 }
   0xb   : > { %s352_s13 = smov (!%p158_p3, %s261_s13), 1  ;;  %vm167_vm0 = vcmask 261120   ;;  %v293_v2 = vmov 32.0   ;;  %v279_v23 = vld [vmem:[%s348_s1] ss:$0 sm:$0xff] }
   0xc   : > { %s266_s14 = sshll.u32 %s352_s13, 3  ;;  %281 = vrcp.f32 %v293_v2  ;;  %v280_v25 = vld [vmem:[%s349_s2] ss:$0 sm:$0xff] }
   0xd   : > { %s161_s17 = scalar_lea.vmem %s347_s0, %s266_s14  ;;  %s165_s24 = scalar_lea.vmem %s350_s3, %s266_s14 }
   0xe   : > { %v166_v0 = vld [vmem:[%s161_s17] sm:$0xff] }
   0xf   : > { %v168_v1 = vsel %vm167_vm0, %v166_v0, 0.0 }
  0x10   : > { %169 = vadd.xlane.f32.xlu0 %v168_v1 }
  0x12   : > { %v282_v3 = vpop.eup %281 }
  0x13   : > { %v172_v4 = vmul.f32 32.0, %v282_v3  ;;  %vm176_vm1 = vweird.f32 %v282_v3 }
  0x15   : > { %v173_v5 = vsub.f32 1.0, %v172_v4 }
  0x17   : > { %v174_v6 = vmul.f32 %v282_v3, %v173_v5 }
  0x19   : > { %v175_v7 = vadd.f32 %v282_v3, %v174_v6 }
  0x1b   : > { %v177_v8 = vsel %vm176_vm1, %v282_v3, %v175_v7 }
  0x83   : > { %v170_v9 = vpop.xlane.xlu0 %169 }
  0x84   : > { %v178_v10 = vmul.f32 %v177_v8, %v170_v9 }
  0x86   : > { %v179_v11 = vsub.f32 %v166_v0, %v178_v10 }
  0x88   : > { %v180_v12 = vmul.f32 %v179_v11, %v179_v11 }
  0x8a   : > { %v181_v13 = vsel %vm167_vm0, %v180_v12, 0.0 }
  0x8b   : > { %182 = vadd.xlane.f32.xlu0 %v181_v13 }
  0xfe   : > { %v183_v14 = vpop.xlane.xlu0 %182 }
  0xff   : > { %v184_v15 = vmul.f32 %v183_v14, %v177_v8 }
 0x101   : > { %v185_v16 = vadd.f32 1e-05, %v184_v15 }
 0x103   : > { %283 = vrsqrt.f32 %v185_v16  ;;  %vm192_vm3 = vweird.f32 %v185_v16 }
 0x109   : > { %v284_v17 = vpop.eup %283 }
 0x10a   : > { %v187_v18 = vmul.f32 %v284_v17, %v185_v16  ;;  %vm193_vm2 = vweird.f32 %v284_v17 }
 0x10b   : > { %vm194_vm4 = vmor %vm192_vm3, %vm193_vm2 }
 0x10c   : > { %v188_v19 = vmul.f32 %v284_v17, %v187_v18 }
 0x10e   : > { %v189_v20 = vmul.f32 0.5, %v188_v19 }
 0x110   : > { %v190_v21 = vsub.f32 1.5, %v189_v20 }
 0x112   : > { %v191_v22 = vmul.f32 %v284_v17, %v190_v21 }
 0x114   : > { %v195_v24 = vsel %vm194_vm4, %v284_v17, %v191_v22 }
 0x115   : > { %v196_v26 = vmul.f32 %v195_v24, %v179_v11 }
 0x117   : > { %v201_v27 = vmul.f32 %v279_v23, %v196_v26 }
 0x119   : > { %v206_v28 = vadd.f32 %v280_v25, %v201_v27 }
 0x11b   : > { %207 = vst.msk [vmem:[%s165_s24] sm:$0xff] %vm167_vm0, %v206_v28 }
 0x11c PF: > { %s13_s12 = sadd.s32 1, %s291_s12  }
 0x11d   : > { %p10_p4 = scmp.ge.s32.totalorder %s13_s12, 4  }
 0x11f   :  { %12 = sbr.rel (!%p10_p4) target bundleno = 1 (0x1), region = 62 }

// kernel: _lambda_.25
= control target key start
LH: loop header
LB: loop body
LE: loop exit
PB: predicated region body
PF: predicated region fallthrough
CT: control target
= control target key end

     0   :  { %s570_s24 = smov 0   ;;  %s633_s0 = inlined_call_operand.vmem [shape: f32[2,8,32], index: 0, kind: input, shape index: {}]   ;;  %s634_s1 = inlined_call_operand.vmem [shape: f32[1,32], index: 1, kind: input, shape index: {}]   ;;  %s635_s2 = inlined_call_operand.vmem [shape: f32[1,32], index: 2, kind: input, shape index: {}]   ;;  %s636_s3 = inlined_call_operand.vmem [shape: bf16[32,64], index: 3, kind: input, shape index: {}]   ;;  %s637_s4 = inlined_call_operand.vmem [shape: f32[1,64], index: 4, kind: input, shape index: {}]   ;;  %s638_s5 = inlined_call_operand.vmem [shape: bf16[64,32], index: 5, kind: input, shape index: {}]   ;;  %s639_s6 = inlined_call_operand.vmem [shape: f32[1,32], index: 6, kind: input, shape index: {}]   ;;  %s640_s7 = inlined_call_operand.vmem [shape: f32[2,8,32], index: 7, kind: output, shape index: {}]  }
   0x1 LB: > { %s463_s25 = sadd.s32 4294967295, %s527_s24   ;;  %p467_p0 = scmp.ge.s32.totalorder %s527_s24, 1  ;;  %s527_s24 = sphi %s570_s24, %s17_s24  }
   0x2   : > { %p236_p1 = scmp.lt.s32.totalorder %s527_s24, 3 }
   0x4   : > { %p237_p2 = pnand %p467_p0, %p236_p1 }
   0x5   : > { %p266_p3 = scmp.lt.s32.totalorder (!%p237_p2), %s463_s25, 1 }
   0x6   : > { %240 = sbr.rel (%p237_p2) target bundleno = 551 (0x227), region = 48 }
   0xb   : > { %s642_s25 = smov (!%p266_p3, %s463_s25), 1  ;;  %vm276_vm0 = vcmask 261120   ;;  %v529_v2 = vmov 32.0   ;;  %v499_v14 = vld [vmem:[%s636_s3 + $0x8] sm:$0xff]  ;;  %v498_v15 = vld [vmem:[%s636_s3] sm:$0xff]  ;;  %v503_v16 = vld [vmem:[%s638_s5 + $0x18] sm:$0xff] }
   0xc   : > { %s468_s26 = sshll.u32 %s642_s25, 3  ;;  %517 = vrcp.f32 %v529_v2  ;;  %346 = vmatpush.bf16.msra.mxu0 %v499_v14  ;;  %399 = vmatpush.bf16.msra.mxu1 %v503_v16  ;;  %v502_v19 = vld [vmem:[%s638_s5 + $0x10] sm:$0xff]  ;;  %v513_v27 = vld [vmem:[%s634_s1] ss:$0 sm:$0xff]  ;;  %v501_v34 = vld [vmem:[%s638_s5 + $0x8] sm:$0xff]  ;;  %vm391_vm5 = vcmask 523264  }
   0xd   : > { %s269_s29 = scalar_lea.vmem %s633_s0, %s468_s26  ;;  %v514_v30 = vld [vmem:[%s635_s2] ss:$0 sm:$0xff]  ;;  %s273_s9 = scalar_lea.vmem %s640_s7, %s468_s26 }
   0xe   : > { %v586_v0 = vld [vmem:[%s269_s29] sm:$0xff] }
   0xf   : > { %v277_v1 = vsel %vm276_vm0, %v586_v0, 0.0  ;;  %v500_v35 = vld [vmem:[%s638_s5] sm:$0xff] }
  0x10   : > { %278 = vadd.xlane.f32.xlu0 %v277_v1  ;;  %347 = vmatpush.bf16.msra.mxu0 %v498_v15  ;;  %v515_v36 = vld [vmem:[%s637_s4] ss:$0 sm:$0xff] }
  0x11   : > { %400 = vmatpush.bf16.msra.mxu1 %v502_v19  ;;  %v516_v42 = vld [vmem:[%s639_s6] ss:$0 sm:$0xff] }
  0x12   : > { %v518_v3 = vpop.eup %517 }
  0x13   : > { %v281_v4 = vmul.f32 32.0, %v518_v3  ;;  %vm285_vm1 = vweird.f32 %v518_v3 }
  0x15   : > { %v282_v5 = vsub.f32 1.0, %v281_v4  ;;  %401 = vmatpush.bf16.msra.mxu1 %v501_v34 }
  0x17   : > { %v283_v6 = vmul.f32 %v518_v3, %v282_v5 }
  0x19   : > { %v284_v7 = vadd.f32 %v518_v3, %v283_v6  ;;  %402 = vmatpush.bf16.msra.mxu1 %v500_v35 }
  0x1b   : > { %v286_v8 = vsel %vm285_vm1, %v518_v3, %v284_v7 }
  0x83   : > { %v279_v9 = vpop.xlane.xlu0 %278 }
  0x84   : > { %v287_v10 = vmul.f32 %v286_v8, %v279_v9 }
  0x86   : > { %v288_v11 = vsub.f32 %v586_v0, %v287_v10 }
  0x88   : > { %v289_v12 = vmul.f32 %v288_v11, %v288_v11 }
  0x8a   : > { %v290_v13 = vsel %vm276_vm0, %v289_v12, 0.0 }
  0x8b   : > { %291 = vadd.xlane.f32.xlu0 %v290_v13 }
  0xfe   : > { %v292_v17 = vpop.xlane.xlu0 %291 }
  0xff   : > { %v293_v18 = vmul.f32 %v292_v17, %v286_v8 }
 0x101   : > { %v294_v20 = vadd.f32 1e-05, %v293_v18 }
 0x103   : > { %519 = vrsqrt.f32 %v294_v20  ;;  %vm301_vm3 = vweird.f32 %v294_v20 }
 0x109   : > { %v520_v21 = vpop.eup %519 }
 0x10a   : > { %v296_v22 = vmul.f32 %v520_v21, %v294_v20  ;;  %vm302_vm2 = vweird.f32 %v520_v21 }
 0x10b   : > { %vm303_vm4 = vmor %vm301_vm3, %vm302_vm2 }
 0x10c   : > { %v297_v23 = vmul.f32 %v520_v21, %v296_v22 }
 0x10e   : > { %v298_v24 = vmul.f32 0.5, %v297_v23 }
 0x110   : > { %v299_v25 = vsub.f32 1.5, %v298_v24 }
 0x112   : > { %v300_v26 = vmul.f32 %v520_v21, %v299_v25 }
 0x114   : > { %v304_v28 = vsel %vm303_vm4, %v520_v21, %v300_v26 }
 0x115   : > { %v305_v29 = vmul.f32 %v304_v28, %v288_v11 }
 0x117   : > { %v310_v31 = vmul.f32 %v513_v27, %v305_v29 }
 0x119   : > { %v315_v32 = vadd.f32 %v514_v30, %v310_v31 }
 0x11b   : > { %v316_v33 = vpack.c.bf16 %v315_v32, %v315_v32 }
 0x11d   : > { %478 = vmatmul.msk.bf16.vlgmr.msra.gmra.mxu0 %vm276_vm0, %v316_v33 }
 0x19a   : > { %v349_v37 = vpop.f32.mrf.mxu0 }
 0x19b   : > { %v350_v38 = vadd.f32 %v515_v36, %v349_v37 }
 0x19d   : > { %v353_v39 = vmax.f32 %v350_v38, 0.0 }
 0x19f   : > { %v354_v40 = vpack.c.bf16 %v353_v39, %v353_v39 }
 0x1a1   : > { %495 = vmatmul.msk.bf16.vlgmr.msra.gmra.mxu1 %vm391_vm5, %v354_v40 }
 0x1a2   : > { %v351_v41 = vpop.f32.mrf.mxu0 }
 0x21e   : > { %v404_v43 = vpop.f32.mrf.mxu1 }
 0x21f   : > { %v405_v44 = vadd.f32 %v516_v42, %v404_v43 }
 0x221   : > { %v408_v45 = vadd.f32 %v405_v44, %v586_v0 }
 0x223   : > { %409 = vst.msk [vmem:[%s273_s9] sm:$0xff] %vm276_vm0, %v408_v45 }
 0x226   : > { %v406_v46 = vpop.f32.mrf.mxu1 }
 0x227 PF: > { %s17_s24 = sadd.s32 1, %s527_s24  }
 0x228   : > { %p14_p4 = scmp.ge.s32.totalorder %s17_s24, 4  }
 0x22a   :  { %16 = sbr.rel (!%p14_p4) target bundleno = 1 (0x1), region = 78 }

// kernel: _lambda_.29
= control target key start
LH: loop header
LB: loop body
LE: loop exit
PB: predicated region body
PF: predicated region fallthrough
CT: control target
= control target key end

     0   :  { %s1068_s16 = smov 0   ;;  %s1195_s0 = inlined_call_operand.vmem [shape: f32[2,8,32], index: 0, kind: input, shape index: {}, may-alias: {0,1}]   ;;  %s1196_s1 = inlined_call_operand.vmem [shape: f32[2,8,32], index: 1, kind: input, shape index: {}, may-alias: {0,1}]   ;;  %s1197_s2 = inlined_call_operand.vmem [shape: f32[1,32], index: 2, kind: input, shape index: {}]   ;;  %s1198_s3 = inlined_call_operand.vmem [shape: f32[1,32], index: 3, kind: input, shape index: {}]   ;;  %s1199_s4 = inlined_call_operand.vmem [shape: bf16[32,32], index: 4, kind: input, shape index: {}]   ;;  %s1200_s5 = inlined_call_operand.vmem [shape: f32[1,32], index: 5, kind: input, shape index: {}]   ;;  %s1201_s6 = inlined_call_operand.vmem [shape: bf16[32,64], index: 6, kind: input, shape index: {}]   ;;  %s1202_s7 = inlined_call_operand.vmem [shape: f32[1,64], index: 7, kind: input, shape index: {}]   ;;  %s1203_s8 = inlined_call_operand.vmem [shape: f32[32,32], index: 8, kind: input, shape index: {}]   ;;  %s1204_s9 = inlined_call_operand.vmem [shape: f32[1,32], index: 9, kind: input, shape index: {}]   ;;  %s1205_s10 = inlined_call_operand.vmem [shape: f32[1,8,8], index: 10, kind: input, shape index: {}]   ;;  %s1206_s11 = inlined_call_operand.vmem [shape: f32[2,8,32], index: 11, kind: output, shape index: {}]  }
   0x1 LB: > { %s908_s17 = sadd.s32 4294967295, %s998_s16   ;;  %p912_p0 = scmp.ge.s32.totalorder %s998_s16, 1  ;;  %s998_s16 = sphi %s1068_s16, %s21_s16  }
   0x2   : > { %p345_p1 = scmp.lt.s32.totalorder %s998_s16, 3 }
   0x4   : > { %p346_p2 = pnand %p912_p0, %p345_p1 }
   0x5   : > { %p387_p3 = scmp.lt.s32.totalorder (!%p346_p2), %s908_s17, 1  ;;  %s1002_s22 = smov (!%p346_p2), 120  }
   0x6   : > { %349 = sbr.rel (%p346_p2) target bundleno = 1642 (0x66a), region = 64  ;;  %s1003_s23 = smov (!%p346_p2), 112  }
   0x7   : > { %s1004_s24 = smov (!%p346_p2), 104   ;;  %s1005_s1 = smov (!%p346_p2), 88  }
   0x8   : > { %s1006_s29 = smov (!%p346_p2), 80   ;;  %s1007_s30 = smov (!%p346_p2), 72  }
   0xb   : > { %s1208_s17 = smov (!%p387_p3, %s908_s17), 1  ;;  %vm403_vm0 = vcmask 261120   ;;  %v1000_v2 = vmov 32.0   ;;  %v948_v14 = vld [vmem:[%s1199_s4 + $0x8] sm:$0xff]  ;;  %v947_v16 = vld [vmem:[%s1199_s4] sm:$0xff]  ;;  %vm514_vm5 = vcmask 64512  }
   0xc   : > { %s913_s18 = sshll.u32 %s1208_s17, 3  ;;  %972 = vrcp.f32 %v1000_v2  ;;  %v950_v15 = vld [vmem:[%s1201_s6 + $0x8] sm:$0xff]  ;;  %471 = vmatpush.bf16.msra.mxu0 %v948_v14  ;;  %v949_v17 = vld [vmem:[%s1201_s6] sm:$0xff]  ;;  %vm554_vm6 = vcmask 1043456  }
   0xd   : > { %s390_s21 = scalar_lea.vmem %s1195_s0, %s913_s18  ;;  %504 = vmatpush.bf16.msra.mxu1 %v950_v15  ;;  %v967_v27 = vld [vmem:[%s1197_s2] ss:$0 sm:$0xff]  ;;  %s398_s25 = scalar_lea.vmem %s1206_s11, %s913_s18 }
   0xe   : > { %v1084_v0 = vld [vmem:[%s390_s21] sm:$0xff]  ;;  %s1001_s21 = smov 96  }
   0xf   : > { %v404_v1 = vsel %vm403_vm0, %v1084_v0, 0.0  ;;  %v968_v30 = vld [vmem:[%s1198_s3] ss:$0 sm:$0xff] }
  0x10   : > { %405 = vadd.xlane.f32.xlu0 %v404_v1  ;;  %472 = vmatpush.bf16.msra.mxu0 %v947_v16  ;;  %v969_v34 = vld [vmem:[%s1200_s5] ss:$0 sm:$0xff] }
  0x11   : > { %505 = vmatpush.bf16.msra.mxu1 %v949_v17  ;;  %v970_v35 = vld [vmem:[%s1202_s7] ss:$0 sm:$0xff] }
  0x12   : > { %v973_v3 = vpop.eup %972  ;;  %v1129_v50 = vld [vmem:[%s1205_s10] sm:$0xff] }
  0x13   : > { %v408_v4 = vmul.f32 32.0, %v973_v3  ;;  %vm412_vm1 = vweird.f32 %v973_v3  ;;  %v571_v60 = vld [vmem:[%s1203_s8] sm:$0xff] }
  0x14   : > { %v572_v61 = vpack.c.bf16 %v571_v60, %v571_v60 }
  0x15   : > { %v409_v5 = vsub.f32 1.0, %v408_v4 }
  0x16   : > { %v659_v62 = vsel %vm554_vm6, %v572_v61, 0 }
  0x17   : > { %v410_v6 = vmul.f32 %v973_v3, %v409_v5 }
  0x19   : > { %v411_v7 = vadd.f32 %v973_v3, %v410_v6 }
  0x1b   : > { %v413_v8 = vsel %vm412_vm1, %v973_v3, %v411_v7 }
  0x83   : > { %v406_v9 = vpop.xlane.xlu0 %405 }
  0x84   : > { %v414_v10 = vmul.f32 %v413_v8, %v406_v9 }
  0x86   : > { %v415_v11 = vsub.f32 %v1084_v0, %v414_v10 }
  0x88   : > { %v416_v12 = vmul.f32 %v415_v11, %v415_v11 }
  0x8a   : > { %v417_v13 = vsel %vm403_vm0, %v416_v12, 0.0 }
  0x8b   : > { %418 = vadd.xlane.f32.xlu0 %v417_v13 }
  0xfe   : > { %v419_v18 = vpop.xlane.xlu0 %418 }
  0xff   : > { %v420_v19 = vmul.f32 %v419_v18, %v413_v8 }
 0x101   : > { %v421_v20 = vadd.f32 1e-05, %v420_v19 }
 0x103   : > { %974 = vrsqrt.f32 %v421_v20  ;;  %vm428_vm3 = vweird.f32 %v421_v20 }
 0x109   : > { %v975_v21 = vpop.eup %974 }
 0x10a   : > { %v423_v22 = vmul.f32 %v975_v21, %v421_v20  ;;  %vm429_vm2 = vweird.f32 %v975_v21 }
 0x10b   : > { %vm430_vm4 = vmor %vm428_vm3, %vm429_vm2 }
 0x10c   : > { %v424_v23 = vmul.f32 %v975_v21, %v423_v22 }
 0x10e   : > { %v425_v24 = vmul.f32 0.5, %v424_v23 }
 0x110   : > { %v426_v25 = vsub.f32 1.5, %v425_v24 }
 0x112   : > { %v427_v26 = vmul.f32 %v975_v21, %v426_v25 }
 0x114   : > { %v431_v28 = vsel %vm430_vm4, %v975_v21, %v427_v26 }
 0x115   : > { %v432_v29 = vmul.f32 %v431_v28, %v415_v11 }
 0x117   : > { %v436_v31 = vmul.f32 %v967_v27, %v432_v29 }
 0x119   : > { %v440_v32 = vadd.f32 %v968_v30, %v436_v31 }
 0x11b   : > { %v441_v33 = vpack.c.bf16 %v440_v32, %v440_v32 }
 0x11d   : > { %923 = vmatmul.msk.bf16.vlgmr.msra.gmra.mxu0 %vm403_vm0, %v441_v33  ;;  %932 = vmatmul.msk.bf16.vlgmr.msra.gmra.mxu1 %vm403_vm0, %v441_v33 }
 0x19a   : > { %v474_v36 = vpop.f32.mrf.mxu0  ;;  %v507_v37 = vpop.f32.mrf.mxu1 }
 0x19b   : > { %v475_v38 = vadd.f32 %v969_v34, %v474_v36  ;;  %v508_v39 = vadd.f32 %v970_v35, %v507_v37 }
 0x19d   : > { %v512_v40 = vpack.c.bf16 %v475_v38, %v475_v38  ;;  %v1116_v41 = vpack.c.bf16 %v508_v39, %v508_v39 }
 0x19f   : > { %549 = vrot.lane.b32.xlu2 %v1116_v41, %s1001_s21  ;;  %575 = vrot.lane.b32.xlu0 %v512_v40, %s1002_s22  ;;  %v519_v42 = vsel %vm514_vm5, %v1116_v41, 0 }
 0x1a0   : > { %528 = vmatpush.bf16.xpose.msra.mxu2 %v519_v42 }
 0x1a2   : > { %v476_v43 = vpop.f32.mrf.mxu0  ;;  %v509_v44 = vpop.f32.mrf.mxu1 }
 0x1a7   : > { %577 = vrot.lane.b32.xlu2 %v1116_v41, %s1002_s22  ;;  %933 = vmatmul.msk.bf16.vlgmr.msra.gmra.mxu2 %vm514_vm5, %v512_v40 }
 0x1a8   : > { %668 = vmatpush.bf16.msrb.mxu2 %v659_v62  ;;  %v732_v62 = vld [vmem:[%s1203_s8 + $0x10] sm:$0xff] }
 0x1af   : > { %676 = vrot.lane.b32.xlu2 %v1116_v41, %s1003_s23 }
 0x1b7   : > { %755 = vrot.lane.b32.xlu2 %v512_v40, %s1004_s24 }
 0x1bf   : > { %674 = vrot.lane.b32.xlu2 %v512_v40, %s1003_s23 }
 0x1f9   : > { %v550_v45 = vpop.permute.xlu2 %549 }
 0x1fa   : > { %v556_v46 = vsel %vm554_vm6, %v550_v45, 0 }
 0x1fb   : > { %565 = vmatpush.bf16.msra.mxu3 %v556_v46 }
 0x201   : > { %v578_v47 = vpop.permute.xlu2 %577 }
 0x202   : > { %v583_v48 = vsel %vm514_vm5, %v578_v47, 0 }
 0x203   : > { %592 = vmatpush.bf16.xpose.msrb.mxu3 %v583_v48 }
 0x209   : > { %v677_v3 = vpop.permute.xlu2 %676 }
 0x20a   : > { %v682_v5 = vsel %vm514_vm5, %v677_v3, 0 }
 0x211   : > { %v576_v8 = vpop.permute.xlu0 %575  ;;  %v756_v9 = vpop.permute.xlu2 %755 }
 0x219   : > { %v675_v10 = vpop.permute.xlu2 %674 }
 0x22a   : > { %v530_v49 = vpop.f32.mrf.mxu2 }
 0x22b   : > { %v534_v51 = vmul.f32 0.35355338, %v530_v49 }
 0x22d   : > { %v535_v52 = vadd.f32 %v534_v51, %v1129_v50 }
 0x22f   : > { %v536_v53 = vsel %vm514_vm5, %v535_v52, -inf }
 0x230   : > { %537 = vmax.xlane.f32.xlu1 %v536_v53 }
 0x232   : > { %v532_v54 = vpop.f32.mrf.mxu2 }
 0x2a3   : > { %v538_v55 = vpop.xlane.xlu1 %537 }
 0x2a4   : > { %v539_v56 = vsub.f32 %v535_v52, %v538_v55 }
 0x2a6   : > { %v540_v57 = vmul.f32 1.442695, %v539_v56 }
 0x2a8   : > { %976 = vpow2.f32 %v540_v57 }
 0x2ae   : > { %v977_v58 = vpop.eup %976 }
 0x2af   : > { %v542_v59 = vsel %vm514_vm5, %v977_v58, 0.0 }
 0x2b0   : > { %543 = vadd.xlane.f32.xlu1 %v542_v59  ;;  %v633_v59 = vld [vmem:[%s1203_s8 + $0x8] sm:$0xff] }
 0x2b1   : > { %v634_v60 = vpack.c.bf16 %v633_v59, %v633_v59 }
 0x2b3   : > { %v640_v61 = vsel %vm554_vm6, %v634_v60, 0 }
 0x2b4   : > { %649 = vmatpush.bf16.msrb.mxu1 %v640_v61 }
 0x2c9   : > { %757 = vrot.lane.b32.xlu1 %v1116_v41, %s1004_s24 }
 0x323   : > { %v544_v63 = vpop.xlane.xlu1 %543 }
 0x324   : > { %978 = vrcp.f32 %v544_v63  ;;  %v733_v63 = vpack.c.bf16 %v732_v62, %v732_v62 }
 0x32a   : > { %v979_v1 = vpop.eup %978 }
 0x32b   : > { %v546_v2 = vmul.f32 %v979_v1, %v977_v58  ;;  %v739_v1 = vsel %vm554_vm6, %v733_v63, 0 }
 0x32c   : > { %748 = vmatpush.bf16.msra.mxu1 %v739_v1 }
 0x32d   : > { %v547_v4 = vpack.c.bf16 %v546_v2, %v546_v2 }
 0x32f   : > { %934 = vmatmul.msk.bf16.vlgmr.msra.gmra.mxu3 %vm514_vm5, %v547_v4 }
 0x330   : > { %691 = vmatpush.bf16.xpose.msra.mxu3 %v682_v5 }
 0x33b   : > { %v758_v6 = vpop.permute.xlu1 %757 }
 0x33c   : > { %v763_v7 = vsel %vm514_vm5, %v758_v6, 0 }
 0x33d   : > { %772 = vmatpush.bf16.xpose.msra.mxu2 %v763_v7 }
 0x33f   : > { %935 = vmatmul.msk.bf16.vlgmr.msrb.gmra.mxu3 %vm514_vm5, %v576_v8 }
 0x34f   : > { %939 = vmatmul.msk.bf16.vlgmr.msra.gmra.mxu3 %vm514_vm5, %v675_v10 }
 0x3b2   : > { %v567_v11 = vpop.f32.mrf.mxu3 }
 0x3b3   : > { %v573_v12 = vpack.c.bf16 %v567_v11, %v567_v11 }
 0x3b5   : > { %938 = vmatmul.msk.bf16.vlgmr.msrb.gmra.mxu2 %vm514_vm5, %v573_v12 }
 0x3ba   : > { %v569_v13 = vpop.f32.mrf.mxu3 }
 0x3bb   : > { %v813_v13 = vld [vmem:[%s1203_s8 + $0x18] sm:$0xff] }
 0x3c2   : > { %v594_v14 = vpop.f32.mrf.mxu3 }
 0x3c3   : > { %v598_v15 = vmul.f32 0.35355338, %v594_v14  ;;  %v814_v14 = vpack.c.bf16 %v813_v13, %v813_v13 }
 0x3c5   : > { %942 = vmatmul.msk.bf16.vlgmr.msra.gmra.mxu2 %vm514_vm5, %v756_v9  ;;  %v599_v16 = vadd.f32 %v598_v15, %v1129_v50  ;;  %v820_v15 = vsel %vm554_vm6, %v814_v14, 0 }
 0x3c7   : > { %v600_v17 = vsel %vm514_vm5, %v599_v16, -inf }
 0x3c8   : > { %601 = vmax.xlane.f32.xlu0 %v600_v17 }
 0x3ca   : > { %v596_v18 = vpop.f32.mrf.mxu3 }
 0x3d2   : > { %v693_v19 = vpop.f32.mrf.mxu3 }
 0x3d3   : > { %v697_v20 = vmul.f32 0.35355338, %v693_v19 }
 0x3d5   : > { %v698_v21 = vadd.f32 %v697_v20, %v1129_v50 }
 0x3d7   : > { %v699_v22 = vsel %vm514_vm5, %v698_v21, -inf }
 0x3d8   : > { %700 = vmax.xlane.f32.xlu1 %v699_v22 }
 0x3da   : > { %v695_v23 = vpop.f32.mrf.mxu3 }
 0x438   : > { %v1150_v24 = vpop.f32.mrf.mxu2 }
 0x43b   : > { %v602_v25 = vpop.xlane.xlu0 %601 }
 0x43c   : > { %v603_v26 = vsub.f32 %v599_v16, %v602_v25 }
 0x43e   : > { %v604_v27 = vmul.f32 1.442695, %v603_v26 }
 0x440   : > { %980 = vpow2.f32 %v604_v27  ;;  %v672_v28 = vpop.f32.mrf.mxu2 }
 0x441   : > { %v971_v28 = vld [vmem:[%s1204_s9] ss:$0 sm:$0xff] }
 0x446   : > { %v981_v29 = vpop.eup %980 }
 0x447   : > { %v606_v30 = vsel %vm514_vm5, %v981_v29, 0.0 }
 0x448   : > { %607 = vadd.xlane.f32.xlu0 %v606_v30  ;;  %v774_v31 = vpop.f32.mrf.mxu2 }
 0x449   : > { %v778_v32 = vmul.f32 0.35355338, %v774_v31 }
 0x44b   : > { %v701_v33 = vpop.xlane.xlu1 %700  ;;  %v779_v34 = vadd.f32 %v778_v32, %v1129_v50 }
 0x44c   : > { %v702_v35 = vsub.f32 %v698_v21, %v701_v33 }
 0x44d   : > { %v780_v36 = vsel %vm514_vm5, %v779_v34, -inf }
 0x44e   : > { %v703_v37 = vmul.f32 1.442695, %v702_v35  ;;  %781 = vmax.xlane.f32.xlu2 %v780_v36 }
 0x450   : > { %982 = vpow2.f32 %v703_v37  ;;  %v776_v38 = vpop.f32.mrf.mxu2 }
 0x456   : > { %v983_v39 = vpop.eup %982 }
 0x457   : > { %v705_v40 = vsel %vm514_vm5, %v983_v39, 0.0 }
 0x458   : > { %706 = vadd.xlane.f32.xlu0 %v705_v40 }
 0x466   : > { %612 = vrot.lane.b32.xlu2 %v1116_v41, %s1005_s1 }
 0x46c   : > { %711 = vrot.lane.b32.xlu0 %v1116_v41, %s1006_s29 }
 0x4bb   : > { %v608_v42 = vpop.xlane.xlu0 %607 }
 0x4bc   : > { %984 = vrcp.f32 %v608_v42 }
 0x4c1   : > { %v782_v43 = vpop.xlane.xlu2 %781 }
 0x4c2   : > { %v783_v44 = vsub.f32 %v779_v34, %v782_v43  ;;  %v985_v46 = vpop.eup %984 }
 0x4c3   : > { %v610_v47 = vmul.f32 %v985_v46, %v981_v29 }
 0x4c4   : > { %v784_v45 = vmul.f32 1.442695, %v783_v44 }
 0x4c5   : > { %v611_v51 = vpack.c.bf16 %v610_v47, %v610_v47 }
 0x4c6   : > { %986 = vpow2.f32 %v784_v45 }
 0x4c9   : > { %v613_v48 = vpop.permute.xlu2 %612 }
 0x4ca   : > { %v618_v49 = vsel %vm554_vm6, %v613_v48, 0 }
 0x4cb   : > { %627 = vmatpush.bf16.msrb.mxu0 %v618_v49  ;;  %v707_v53 = vpop.xlane.xlu0 %706 }
 0x4cc   : > { %v987_v50 = vpop.eup %986  ;;  %988 = vrcp.f32 %v707_v53 }
 0x4cd   : > { %v786_v52 = vsel %vm514_vm5, %v987_v50, 0.0 }
 0x4ce   : > { %787 = vadd.xlane.f32.xlu1 %v786_v52  ;;  %936 = vmatmul.msk.bf16.vlgmr.msrb.gmra.mxu0 %vm514_vm5, %v611_v51 }
 0x4d2   : > { %v989_v54 = vpop.eup %988 }
 0x4d3   : > { %v709_v55 = vmul.f32 %v989_v54, %v983_v39 }
 0x4d5   : > { %v710_v58 = vpack.c.bf16 %v709_v55, %v709_v55 }
 0x4de   : > { %v712_v56 = vpop.permute.xlu0 %711 }
 0x4df   : > { %v717_v57 = vsel %vm554_vm6, %v712_v56, 0 }
 0x4e0   : > { %726 = vmatpush.bf16.msra.mxu0 %v717_v57 }
 0x4e3   : > { %940 = vmatmul.msk.bf16.vlgmr.msra.gmra.mxu0 %vm514_vm5, %v710_v58 }
 0x4e4   : > { %829 = vmatpush.bf16.msrb.mxu0 %v820_v15 }
 0x4e7   : > { %792 = vrot.lane.b32.xlu1 %v1116_v41, %s1007_s30 }
 0x541   : > { %v788_v3 = vpop.xlane.xlu1 %787 }
 0x542   : > { %990 = vrcp.f32 %v788_v3 }
 0x548   : > { %v991_v5 = vpop.eup %990 }
 0x549   : > { %v790_v6 = vmul.f32 %v991_v5, %v987_v50 }
 0x54b   : > { %v629_v2 = vpop.f32.mrf.mxu0  ;;  %v791_v9 = vpack.c.bf16 %v790_v6, %v790_v6 }
 0x54c   : > { %v635_v4 = vpack.c.bf16 %v629_v2, %v629_v2 }
 0x54e   : > { %937 = vmatmul.msk.bf16.vlgmr.msrb.gmra.mxu1 %vm514_vm5, %v635_v4 }
 0x553   : > { %v631_v41 = vpop.f32.mrf.mxu0 }
 0x559   : > { %v793_v7 = vpop.permute.xlu1 %792 }
 0x55a   : > { %v798_v8 = vsel %vm554_vm6, %v793_v7, 0 }
 0x55b   : > { %807 = vmatpush.bf16.msrb.mxu3 %v798_v8 }
 0x55e   : > { %943 = vmatmul.msk.bf16.vlgmr.msrb.gmra.mxu3 %vm514_vm5, %v791_v9 }
 0x560   : > { %v728_v10 = vpop.f32.mrf.mxu0 }
 0x561   : > { %v734_v11 = vpack.c.bf16 %v728_v10, %v728_v10 }
 0x563   : > { %941 = vmatmul.msk.bf16.vlgmr.msra.gmra.mxu1 %vm514_vm5, %v734_v11 }
 0x568   : > { %v730_v12 = vpop.f32.mrf.mxu0 }
 0x5cb   : > { %v651_v16 = vpop.f32.mrf.mxu1 }
 0x5cc   : > { %v671_v18 = vadd.f32 %v1150_v24, %v651_v16 }
 0x5d3   : > { %v653_v17 = vpop.f32.mrf.mxu1 }
 0x5e0   : > { %v750_v19 = vpop.f32.mrf.mxu1 }
 0x5e1   : > { %v754_v20 = vadd.f32 %v750_v19, %v671_v18  ;;  %v809_v21 = vpop.f32.mrf.mxu3 }
 0x5e2   : > { %v815_v22 = vpack.c.bf16 %v809_v21, %v809_v21 }
 0x5e4   : > { %944 = vmatmul.msk.bf16.vlgmr.msrb.gmra.mxu0 %vm514_vm5, %v815_v22 }
 0x5e8   : > { %v752_v23 = vpop.f32.mrf.mxu1 }
 0x5e9   : > { %v811_v25 = vpop.f32.mrf.mxu3 }
 0x661   : > { %v831_v26 = vpop.f32.mrf.mxu0 }
 0x662   : > { %v835_v27 = vadd.f32 %v831_v26, %v754_v20 }
 0x664   : > { %v836_v29 = vadd.f32 %v835_v27, %v1084_v0 }
 0x666   : > { %v841_v24 = vadd.f32 %v971_v28, %v836_v29 }
 0x668   : > { %842 = vst.msk [vmem:[%s398_s25] sm:$0xff] %vm403_vm0, %v841_v24 }
 0x669   : > { %v833_v30 = vpop.f32.mrf.mxu0 }
 0x66a PF: > { %s21_s16 = sadd.s32 1, %s998_s16  }
 0x66b   : > { %p18_p4 = scmp.ge.s32.totalorder %s21_s16, 4  }
 0x66d   :  { %20 = sbr.rel (!%p18_p4) target bundleno = 1 (0x1), region = 97 }

// kernel: _lambda_.24
= control target key start
LH: loop header
LB: loop body
LE: loop exit
PB: predicated region body
PF: predicated region fallthrough
CT: control target
= control target key end

     0   :  { %s1095_s16 = smov 0   ;;  %s1228_s0 = inlined_call_operand.vmem [shape: f32[2,8,32], index: 0, kind: input, shape index: {}, may-alias: {0,1}]   ;;  %s1229_s1 = inlined_call_operand.vmem [shape: f32[2,8,32], index: 1, kind: input, shape index: {}, may-alias: {0,1}]   ;;  %s1230_s2 = inlined_call_operand.vmem [shape: f32[1,32], index: 2, kind: input, shape index: {}]   ;;  %s1231_s3 = inlined_call_operand.vmem [shape: f32[1,32], index: 3, kind: input, shape index: {}]   ;;  %s1232_s4 = inlined_call_operand.vmem [shape: bf16[32,32], index: 4, kind: input, shape index: {}]   ;;  %s1233_s5 = inlined_call_operand.vmem [shape: f32[1,32], index: 5, kind: input, shape index: {}]   ;;  %s1234_s6 = inlined_call_operand.vmem [shape: bf16[32,64], index: 6, kind: input, shape index: {}]   ;;  %s1235_s7 = inlined_call_operand.vmem [shape: f32[1,64], index: 7, kind: input, shape index: {}]   ;;  %s1236_s8 = inlined_call_operand.vmem [shape: f32[32,32], index: 8, kind: input, shape index: {}]   ;;  %s1237_s9 = inlined_call_operand.vmem [shape: f32[1,32], index: 9, kind: input, shape index: {}]   ;;  %s1238_s10 = inlined_call_operand.vmem [shape: f32[2,1,8], index: 10, kind: input, shape index: {}]   ;;  %s1239_s11 = inlined_call_operand.vmem [shape: f32[2,8,32], index: 11, kind: output, shape index: {}]  }
   0x1 LB: > { %s934_s17 = sadd.s32 4294967295, %s1025_s16   ;;  %p938_p0 = scmp.ge.s32.totalorder %s1025_s16, 1  ;;  %s1025_s16 = sphi %s1095_s16, %s21_s16  }
   0x2   : > { %p353_p1 = scmp.lt.s32.totalorder %s1025_s16, 3 }
   0x4   : > { %p354_p2 = pnand %p938_p0, %p353_p1 }
   0x5   : > { %p398_p3 = scmp.lt.s32.totalorder (!%p354_p2), %s934_s17, 1  ;;  %s1028_s25 = smov (!%p354_p2), 96  }
   0x6   : > { %357 = sbr.rel (%p354_p2) target bundleno = 1642 (0x66a), region = 64  ;;  %s1029_s26 = smov (!%p354_p2), 120  }
   0x7   : > { %s1030_s27 = smov (!%p354_p2), 112   ;;  %s1031_s28 = smov (!%p354_p2), 104  }
   0x8   : > { %s1032_s12 = smov (!%p354_p2), 88   ;;  %s1033_s13 = smov (!%p354_p2), 80  }
   0x9   : > { %s1034_s14 = smov (!%p354_p2), 72  }
   0xb   : > { %s1241_s17 = smov (!%p398_p3, %s934_s17), 1  ;;  %vm417_vm0 = vcmask 261120   ;;  %v1027_v2 = vmov 32.0   ;;  %v974_v14 = vld [vmem:[%s1232_s4 + $0x8] sm:$0xff]  ;;  %v973_v16 = vld [vmem:[%s1232_s4] sm:$0xff]  ;;  %vm528_vm5 = vcmask 64512  }
   0xc   : > { %s939_s18 = sshll.u32 %s1241_s17, 3  ;;  %s408_s21 = scalar_lea.vmem %s1238_s10, %s1241_s17  ;;  %999 = vrcp.f32 %v1027_v2  ;;  %v976_v15 = vld [vmem:[%s1234_s6 + $0x8] sm:$0xff]  ;;  %485 = vmatpush.bf16.msra.mxu0 %v974_v14  ;;  %v975_v17 = vld [vmem:[%s1234_s6] sm:$0xff]  ;;  %vm571_vm6 = vcmask 1043456  }
   0xd   : > { %s401_s24 = scalar_lea.vmem %s1228_s0, %s939_s18  ;;  %518 = vmatpush.bf16.msra.mxu1 %v976_v15  ;;  %v994_v27 = vld [vmem:[%s1230_s2] ss:$0 sm:$0xff]  ;;  %s412_s1 = scalar_lea.vmem %s1239_s11, %s939_s18 }
   0xe   : > { %v1115_v0 = vld [vmem:[%s401_s24] sm:$0xff] }
   0xf   : > { %v418_v1 = vsel %vm417_vm0, %v1115_v0, 0.0  ;;  %v995_v30 = vld [vmem:[%s1231_s3] ss:$0 sm:$0xff] }
  0x10   : > { %419 = vadd.xlane.f32.xlu0 %v418_v1  ;;  %486 = vmatpush.bf16.msra.mxu0 %v973_v16  ;;  %v996_v34 = vld [vmem:[%s1233_s5] ss:$0 sm:$0xff] }
  0x11   : > { %519 = vmatpush.bf16.msra.mxu1 %v975_v17  ;;  %v997_v35 = vld [vmem:[%s1235_s7] ss:$0 sm:$0xff] }
  0x12   : > { %v1000_v3 = vpop.eup %999  ;;  %v1162_v49 = vld [vmem:[%s408_s21] ss:$0 sm:$0xff] }
  0x13   : > { %v422_v4 = vmul.f32 32.0, %v1000_v3  ;;  %vm426_vm1 = vweird.f32 %v1000_v3  ;;  %v588_v60 = vld [vmem:[%s1236_s8] sm:$0xff] }
  0x14   : > { %v589_v61 = vpack.c.bf16 %v588_v60, %v588_v60 }
  0x15   : > { %v423_v5 = vsub.f32 1.0, %v422_v4 }
  0x16   : > { %v676_v62 = vsel %vm571_vm6, %v589_v61, 0 }
  0x17   : > { %v424_v6 = vmul.f32 %v1000_v3, %v423_v5 }
  0x19   : > { %v425_v7 = vadd.f32 %v1000_v3, %v424_v6 }
  0x1b   : > { %v427_v8 = vsel %vm426_vm1, %v1000_v3, %v425_v7 }
  0x83   : > { %v420_v9 = vpop.xlane.xlu0 %419 }
  0x84   : > { %v428_v10 = vmul.f32 %v427_v8, %v420_v9 }
  0x86   : > { %v429_v11 = vsub.f32 %v1115_v0, %v428_v10 }
  0x88   : > { %v430_v12 = vmul.f32 %v429_v11, %v429_v11 }
  0x8a   : > { %v431_v13 = vsel %vm417_vm0, %v430_v12, 0.0 }
  0x8b   : > { %432 = vadd.xlane.f32.xlu0 %v431_v13 }
  0xfe   : > { %v433_v18 = vpop.xlane.xlu0 %432 }
  0xff   : > { %v434_v19 = vmul.f32 %v433_v18, %v427_v8 }
 0x101   : > { %v435_v20 = vadd.f32 1e-05, %v434_v19 }
 0x103   : > { %1001 = vrsqrt.f32 %v435_v20  ;;  %vm442_vm3 = vweird.f32 %v435_v20 }
 0x109   : > { %v1002_v21 = vpop.eup %1001 }
 0x10a   : > { %v437_v22 = vmul.f32 %v1002_v21, %v435_v20  ;;  %vm443_vm2 = vweird.f32 %v1002_v21 }
 0x10b   : > { %vm444_vm4 = vmor %vm442_vm3, %vm443_vm2 }
 0x10c   : > { %v438_v23 = vmul.f32 %v1002_v21, %v437_v22 }
 0x10e   : > { %v439_v24 = vmul.f32 0.5, %v438_v23 }
 0x110   : > { %v440_v25 = vsub.f32 1.5, %v439_v24 }
 0x112   : > { %v441_v26 = vmul.f32 %v1002_v21, %v440_v25 }
 0x114   : > { %v445_v28 = vsel %vm444_vm4, %v1002_v21, %v441_v26 }
 0x115   : > { %v446_v29 = vmul.f32 %v445_v28, %v429_v11 }
 0x117   : > { %v450_v31 = vmul.f32 %v994_v27, %v446_v29 }
 0x119   : > { %v454_v32 = vadd.f32 %v995_v30, %v450_v31 }
 0x11b   : > { %v455_v33 = vpack.c.bf16 %v454_v32, %v454_v32 }
 0x11d   : > { %949 = vmatmul.msk.bf16.vlgmr.msra.gmra.mxu0 %vm417_vm0, %v455_v33  ;;  %958 = vmatmul.msk.bf16.vlgmr.msra.gmra.mxu1 %vm417_vm0, %v455_v33 }
 0x19a   : > { %v488_v36 = vpop.f32.mrf.mxu0  ;;  %v521_v37 = vpop.f32.mrf.mxu1 }
 0x19b   : > { %v489_v38 = vadd.f32 %v996_v34, %v488_v36  ;;  %v522_v39 = vadd.f32 %v997_v35, %v521_v37 }
 0x19d   : > { %v526_v40 = vpack.c.bf16 %v489_v38, %v489_v38  ;;  %v1147_v41 = vpack.c.bf16 %v522_v39, %v522_v39 }
 0x19f   : > { %566 = vrot.lane.b32.xlu2 %v1147_v41, %s1028_s25  ;;  %592 = vrot.lane.b32.xlu0 %v526_v40, %s1029_s26  ;;  %v533_v42 = vsel %vm528_vm5, %v1147_v41, 0 }
 0x1a0   : > { %542 = vmatpush.bf16.xpose.msra.mxu2 %v533_v42 }
 0x1a2   : > { %v490_v43 = vpop.f32.mrf.mxu0  ;;  %v523_v44 = vpop.f32.mrf.mxu1 }
 0x1a7   : > { %594 = vrot.lane.b32.xlu2 %v1147_v41, %s1029_s26  ;;  %959 = vmatmul.msk.bf16.vlgmr.msra.gmra.mxu2 %vm528_vm5, %v526_v40 }
 0x1a8   : > { %685 = vmatpush.bf16.msrb.mxu2 %v676_v62  ;;  %v749_v62 = vld [vmem:[%s1236_s8 + $0x10] sm:$0xff] }
 0x1af   : > { %693 = vrot.lane.b32.xlu2 %v1147_v41, %s1030_s27 }
 0x1b7   : > { %772 = vrot.lane.b32.xlu2 %v526_v40, %s1031_s28 }
 0x1bf   : > { %691 = vrot.lane.b32.xlu2 %v526_v40, %s1030_s27 }
 0x1f9   : > { %v567_v45 = vpop.permute.xlu2 %566 }
 0x1fa   : > { %v573_v46 = vsel %vm571_vm6, %v567_v45, 0 }
 0x1fb   : > { %582 = vmatpush.bf16.msra.mxu3 %v573_v46 }
 0x201   : > { %v595_v47 = vpop.permute.xlu2 %594 }
 0x202   : > { %v600_v48 = vsel %vm528_vm5, %v595_v47, 0 }
 0x203   : > { %609 = vmatpush.bf16.xpose.msrb.mxu3 %v600_v48 }
 0x209   : > { %v694_v3 = vpop.permute.xlu2 %693 }
 0x20a   : > { %v699_v5 = vsel %vm528_vm5, %v694_v3, 0 }
 0x211   : > { %v593_v8 = vpop.permute.xlu0 %592  ;;  %v773_v9 = vpop.permute.xlu2 %772 }
 0x219   : > { %v692_v10 = vpop.permute.xlu2 %691 }
 0x22a   : > { %v544_v50 = vpop.f32.mrf.mxu2 }
 0x22b   : > { %v548_v51 = vmul.f32 0.35355338, %v544_v50 }
 0x22d   : > { %v552_v52 = vadd.f32 %v1162_v49, %v548_v51 }
 0x22f   : > { %v553_v53 = vsel %vm528_vm5, %v552_v52, -inf }
 0x230   : > { %554 = vmax.xlane.f32.xlu1 %v553_v53 }
 0x232   : > { %v546_v54 = vpop.f32.mrf.mxu2 }
 0x2a3   : > { %v555_v55 = vpop.xlane.xlu1 %554 }
 0x2a4   : > { %v556_v56 = vsub.f32 %v552_v52, %v555_v55 }
 0x2a6   : > { %v557_v57 = vmul.f32 1.442695, %v556_v56 }
 0x2a8   : > { %1003 = vpow2.f32 %v557_v57 }
 0x2ae   : > { %v1004_v58 = vpop.eup %1003 }
 0x2af   : > { %v559_v59 = vsel %vm528_vm5, %v1004_v58, 0.0 }
 0x2b0   : > { %560 = vadd.xlane.f32.xlu1 %v559_v59  ;;  %v650_v59 = vld [vmem:[%s1236_s8 + $0x8] sm:$0xff] }
 0x2b1   : > { %v651_v60 = vpack.c.bf16 %v650_v59, %v650_v59 }
 0x2b3   : > { %v657_v61 = vsel %vm571_vm6, %v651_v60, 0 }
 0x2b4   : > { %666 = vmatpush.bf16.msrb.mxu1 %v657_v61 }
 0x2c9   : > { %774 = vrot.lane.b32.xlu1 %v1147_v41, %s1031_s28 }
 0x323   : > { %v561_v63 = vpop.xlane.xlu1 %560 }
 0x324   : > { %1005 = vrcp.f32 %v561_v63  ;;  %v750_v63 = vpack.c.bf16 %v749_v62, %v749_v62 }
 0x32a   : > { %v1006_v1 = vpop.eup %1005 }
 0x32b   : > { %v563_v2 = vmul.f32 %v1006_v1, %v1004_v58  ;;  %v756_v1 = vsel %vm571_vm6, %v750_v63, 0 }
 0x32c   : > { %765 = vmatpush.bf16.msra.mxu1 %v756_v1 }
 0x32d   : > { %v564_v4 = vpack.c.bf16 %v563_v2, %v563_v2 }
 0x32f   : > { %960 = vmatmul.msk.bf16.vlgmr.msra.gmra.mxu3 %vm528_vm5, %v564_v4 }
 0x330   : > { %708 = vmatpush.bf16.xpose.msra.mxu3 %v699_v5 }
 0x33b   : > { %v775_v6 = vpop.permute.xlu1 %774 }
 0x33c   : > { %v780_v7 = vsel %vm528_vm5, %v775_v6, 0 }
 0x33d   : > { %789 = vmatpush.bf16.xpose.msra.mxu2 %v780_v7 }
 0x33f   : > { %961 = vmatmul.msk.bf16.vlgmr.msrb.gmra.mxu3 %vm528_vm5, %v593_v8 }
 0x34f   : > { %965 = vmatmul.msk.bf16.vlgmr.msra.gmra.mxu3 %vm528_vm5, %v692_v10 }
 0x3b2   : > { %v584_v11 = vpop.f32.mrf.mxu3 }
 0x3b3   : > { %v590_v12 = vpack.c.bf16 %v584_v11, %v584_v11 }
 0x3b5   : > { %964 = vmatmul.msk.bf16.vlgmr.msrb.gmra.mxu2 %vm528_vm5, %v590_v12 }
 0x3ba   : > { %v586_v13 = vpop.f32.mrf.mxu3 }
 0x3bb   : > { %v830_v13 = vld [vmem:[%s1236_s8 + $0x18] sm:$0xff] }
 0x3c2   : > { %v611_v14 = vpop.f32.mrf.mxu3 }
 0x3c3   : > { %v615_v15 = vmul.f32 0.35355338, %v611_v14  ;;  %v831_v14 = vpack.c.bf16 %v830_v13, %v830_v13 }
 0x3c5   : > { %968 = vmatmul.msk.bf16.vlgmr.msra.gmra.mxu2 %vm528_vm5, %v773_v9  ;;  %v616_v16 = vadd.f32 %v1162_v49, %v615_v15  ;;  %v837_v15 = vsel %vm571_vm6, %v831_v14, 0 }
 0x3c7   : > { %v617_v17 = vsel %vm528_vm5, %v616_v16, -inf }
 0x3c8   : > { %618 = vmax.xlane.f32.xlu0 %v617_v17 }
 0x3ca   : > { %v613_v18 = vpop.f32.mrf.mxu3 }
 0x3d2   : > { %v710_v19 = vpop.f32.mrf.mxu3 }
 0x3d3   : > { %v714_v20 = vmul.f32 0.35355338, %v710_v19 }
 0x3d5   : > { %v715_v21 = vadd.f32 %v1162_v49, %v714_v20 }
 0x3d7   : > { %v716_v22 = vsel %vm528_vm5, %v715_v21, -inf }
 0x3d8   : > { %717 = vmax.xlane.f32.xlu1 %v716_v22 }
 0x3da   : > { %v712_v23 = vpop.f32.mrf.mxu3 }
 0x438   : > { %v1183_v24 = vpop.f32.mrf.mxu2 }
 0x43b   : > { %v619_v25 = vpop.xlane.xlu0 %618 }
 0x43c   : > { %v620_v26 = vsub.f32 %v616_v16, %v619_v25 }
 0x43e   : > { %v621_v27 = vmul.f32 1.442695, %v620_v26 }
 0x440   : > { %1007 = vpow2.f32 %v621_v27  ;;  %v689_v28 = vpop.f32.mrf.mxu2 }
 0x441   : > { %v998_v28 = vld [vmem:[%s1237_s9] ss:$0 sm:$0xff] }
 0x446   : > { %v1008_v29 = vpop.eup %1007 }
 0x447   : > { %v623_v30 = vsel %vm528_vm5, %v1008_v29, 0.0 }
 0x448   : > { %624 = vadd.xlane.f32.xlu0 %v623_v30  ;;  %v791_v31 = vpop.f32.mrf.mxu2 }
 0x449   : > { %v795_v32 = vmul.f32 0.35355338, %v791_v31 }
 0x44b   : > { %v718_v33 = vpop.xlane.xlu1 %717  ;;  %v796_v34 = vadd.f32 %v1162_v49, %v795_v32 }
 0x44c   : > { %v719_v35 = vsub.f32 %v715_v21, %v718_v33 }
 0x44d   : > { %v797_v36 = vsel %vm528_vm5, %v796_v34, -inf }
 0x44e   : > { %v720_v37 = vmul.f32 1.442695, %v719_v35  ;;  %798 = vmax.xlane.f32.xlu2 %v797_v36 }
 0x450   : > { %1009 = vpow2.f32 %v720_v37  ;;  %v793_v38 = vpop.f32.mrf.mxu2 }
 0x456   : > { %v1010_v39 = vpop.eup %1009 }
 0x457   : > { %v722_v40 = vsel %vm528_vm5, %v1010_v39, 0.0 }
 0x458   : > { %723 = vadd.xlane.f32.xlu0 %v722_v40 }
 0x466   : > { %629 = vrot.lane.b32.xlu2 %v1147_v41, %s1032_s12 }
 0x46c   : > { %728 = vrot.lane.b32.xlu0 %v1147_v41, %s1033_s13 }
 0x4bb   : > { %v625_v42 = vpop.xlane.xlu0 %624 }
 0x4bc   : > { %1011 = vrcp.f32 %v625_v42 }
 0x4c1   : > { %v799_v43 = vpop.xlane.xlu2 %798 }
 0x4c2   : > { %v800_v44 = vsub.f32 %v796_v34, %v799_v43  ;;  %v1012_v46 = vpop.eup %1011 }
 0x4c3   : > { %v627_v47 = vmul.f32 %v1012_v46, %v1008_v29 }
 0x4c4   : > { %v801_v45 = vmul.f32 1.442695, %v800_v44 }
 0x4c5   : > { %v628_v51 = vpack.c.bf16 %v627_v47, %v627_v47 }
 0x4c6   : > { %1013 = vpow2.f32 %v801_v45 }
 0x4c9   : > { %v630_v48 = vpop.permute.xlu2 %629 }
 0x4ca   : > { %v635_v49 = vsel %vm571_vm6, %v630_v48, 0 }
 0x4cb   : > { %644 = vmatpush.bf16.msrb.mxu0 %v635_v49  ;;  %v724_v53 = vpop.xlane.xlu0 %723 }
 0x4cc   : > { %v1014_v50 = vpop.eup %1013  ;;  %1015 = vrcp.f32 %v724_v53 }
 0x4cd   : > { %v803_v52 = vsel %vm528_vm5, %v1014_v50, 0.0 }
 0x4ce   : > { %804 = vadd.xlane.f32.xlu1 %v803_v52  ;;  %962 = vmatmul.msk.bf16.vlgmr.msrb.gmra.mxu0 %vm528_vm5, %v628_v51 }
 0x4d2   : > { %v1016_v54 = vpop.eup %1015 }
 0x4d3   : > { %v726_v55 = vmul.f32 %v1016_v54, %v1010_v39 }
 0x4d5   : > { %v727_v58 = vpack.c.bf16 %v726_v55, %v726_v55 }
 0x4de   : > { %v729_v56 = vpop.permute.xlu0 %728 }
 0x4df   : > { %v734_v57 = vsel %vm571_vm6, %v729_v56, 0 }
 0x4e0   : > { %743 = vmatpush.bf16.msra.mxu0 %v734_v57 }
 0x4e3   : > { %966 = vmatmul.msk.bf16.vlgmr.msra.gmra.mxu0 %vm528_vm5, %v727_v58 }
 0x4e4   : > { %846 = vmatpush.bf16.msrb.mxu0 %v837_v15 }
 0x4e7   : > { %809 = vrot.lane.b32.xlu1 %v1147_v41, %s1034_s14 }
 0x541   : > { %v805_v3 = vpop.xlane.xlu1 %804 }
 0x542   : > { %1017 = vrcp.f32 %v805_v3 }
 0x548   : > { %v1018_v5 = vpop.eup %1017 }
 0x549   : > { %v807_v6 = vmul.f32 %v1018_v5, %v1014_v50 }
 0x54b   : > { %v646_v2 = vpop.f32.mrf.mxu0  ;;  %v808_v9 = vpack.c.bf16 %v807_v6, %v807_v6 }
 0x54c   : > { %v652_v4 = vpack.c.bf16 %v646_v2, %v646_v2 }
 0x54e   : > { %963 = vmatmul.msk.bf16.vlgmr.msrb.gmra.mxu1 %vm528_vm5, %v652_v4 }
 0x553   : > { %v648_v41 = vpop.f32.mrf.mxu0 }
 0x559   : > { %v810_v7 = vpop.permute.xlu1 %809 }
 0x55a   : > { %v815_v8 = vsel %vm571_vm6, %v810_v7, 0 }
 0x55b   : > { %824 = vmatpush.bf16.msrb.mxu3 %v815_v8 }
 0x55e   : > { %969 = vmatmul.msk.bf16.vlgmr.msrb.gmra.mxu3 %vm528_vm5, %v808_v9 }
 0x560   : > { %v745_v10 = vpop.f32.mrf.mxu0 }
 0x561   : > { %v751_v11 = vpack.c.bf16 %v745_v10, %v745_v10 }
 0x563   : > { %967 = vmatmul.msk.bf16.vlgmr.msra.gmra.mxu1 %vm528_vm5, %v751_v11 }
 0x568   : > { %v747_v12 = vpop.f32.mrf.mxu0 }
 0x5cb   : > { %v668_v16 = vpop.f32.mrf.mxu1 }
 0x5cc   : > { %v688_v18 = vadd.f32 %v1183_v24, %v668_v16 }
 0x5d3   : > { %v670_v17 = vpop.f32.mrf.mxu1 }
 0x5e0   : > { %v767_v19 = vpop.f32.mrf.mxu1 }
 0x5e1   : > { %v771_v20 = vadd.f32 %v767_v19, %v688_v18  ;;  %v826_v21 = vpop.f32.mrf.mxu3 }
 0x5e2   : > { %v832_v22 = vpack.c.bf16 %v826_v21, %v826_v21 }
 0x5e4   : > { %970 = vmatmul.msk.bf16.vlgmr.msrb.gmra.mxu0 %vm528_vm5, %v832_v22 }
 0x5e8   : > { %v769_v23 = vpop.f32.mrf.mxu1 }
 0x5e9   : > { %v828_v25 = vpop.f32.mrf.mxu3 }
 0x661   : > { %v848_v26 = vpop.f32.mrf.mxu0 }
 0x662   : > { %v852_v27 = vadd.f32 %v848_v26, %v771_v20 }
 0x664   : > { %v853_v29 = vadd.f32 %v852_v27, %v1115_v0 }
 0x666   : > { %v858_v24 = vadd.f32 %v998_v28, %v853_v29 }
 0x668   : > { %859 = vst.msk [vmem:[%s412_s1] sm:$0xff] %vm417_vm0, %v858_v24 }
 0x669   : > { %v850_v30 = vpop.f32.mrf.mxu0 }
 0x66a PF: > { %s21_s16 = sadd.s32 1, %s1025_s16  }
 0x66b   : > { %p18_p4 = scmp.ge.s32.totalorder %s21_s16, 4  }
 0x66d   :  { %20 = sbr.rel (!%p18_p4) target bundleno = 1 (0x1), region = 100 }

// kernel: _lambda_.20
= control target key start
LH: loop header
LB: loop body
LE: loop exit
PB: predicated region body
PF: predicated region fallthrough
CT: control target
= control target key end

     0   :  { %12 = vsyncpa [#allocation3], 0  ;;  %s645_s24 = smov 0   ;;  %s708_s0 = inlined_call_operand.vmem [shape: f32[2,8,32], index: 0, kind: input, shape index: {}]   ;;  %s709_s1 = inlined_call_operand.vmem [shape: f32[1,32], index: 1, kind: input, shape index: {}]   ;;  %s710_s2 = inlined_call_operand.vmem [shape: f32[1,32], index: 2, kind: input, shape index: {}]   ;;  %s711_s3 = inlined_call_operand.vmem [shape: bf16[32,64], index: 3, kind: input, shape index: {}]   ;;  %s712_s4 = inlined_call_operand.vmem [shape: f32[1,64], index: 4, kind: input, shape index: {}]   ;;  %s713_s5 = inlined_call_operand.vmem [shape: bf16[64,32], index: 5, kind: input, shape index: {}]   ;;  %s714_s6 = inlined_call_operand.hbm [shape: f32[1,32], index: 6, kind: input, shape index: {}]   ;;  %s715_s7 = inlined_call_operand.vmem [shape: f32[2,8,32], index: 7, kind: output, shape index: {}]  }
   0x1 LB: > { %s490_s25 = sadd.s32 4294967295, %s601_s24   ;;  %p492_p0 = scmp.ge.s32.totalorder %s601_s24, 1  ;;  %s601_s24 = sphi %s645_s24, %s18_s24  }
   0x2   : > { %p201_p1 = scmp.lt.s32.totalorder %s601_s24, 3  ;;  %s228_s28 = sshll.u32 %s714_s6, 4  ;;  %s229_s28 = int_to_ptr.hbm [resolvable:$true] %s228_s28 }
   0x3   : > { %p541_p3 = scmp.eq.s32.totalorder %s490_s25, 0  ;;  %s603_s29 = smov [#allocation2]  }
   0x4   : > { %p202_p2 = pnand %p492_p0, %p201_p1  ;;  %s230_s30 = sshll.u32 %s603_s29, 4  ;;  %s231_s30 = int_to_ptr.vmem [resolvable:$true] %s230_s30 }
   0x6   : > { %p537_p4 = pneg %p202_p2  ;;  %250 = sbr.rel (%p202_p2) target bundleno = 554 (0x22a), region = 48 }
   0x8   : > { %p538_p5 = pnand %p541_p3, %p537_p4 }
   0xa   : > { %540 = dma.hbm_to_vmem [thread:$0]  (!%p538_p5), %s229_s28, 16, %s231_s30, [#allocation3]  }
   0xb   : > { %596 = dma.done.wait (%p541_p3), [#allocation3], 16  }
   0xc   : > { %598 = vsyncadd (%p541_p3), [#allocation3], 4294967280  ;;  %p281_p6 = scmp.lt.s32.totalorder %s490_s25, 1  ;;  %vm291_vm0 = vcmask 261120   ;;  %v604_v2 = vmov 32.0   ;;  %v528_v14 = vld [vmem:[%s711_s3 + $0x8] sm:$0xff] }
   0xd   : > { %557 = vrcp.f32 %v604_v2  ;;  %361 = vmatpush.bf16.msra.mxu0 %v528_v14  ;;  %v527_v15 = vld [vmem:[%s711_s3] sm:$0xff]  ;;  %v532_v16 = vld [vmem:[%s713_s5 + $0x18] sm:$0xff]  ;;  %v531_v19 = vld [vmem:[%s713_s5 + $0x10] sm:$0xff]  ;;  %vm406_vm5 = vcmask 523264  }
   0xe   : > { %s717_s25 = smov (!%p281_p6, %s490_s25), 1  ;;  %414 = vmatpush.bf16.msra.mxu1 %v532_v16  ;;  %v553_v27 = vld [vmem:[%s709_s1] ss:$0 sm:$0xff]  ;;  %v530_v34 = vld [vmem:[%s713_s5 + $0x8] sm:$0xff] }
   0xf   : > { %s497_s8 = sshll.u32 %s717_s25, 3  ;;  %v554_v30 = vld [vmem:[%s710_s2] ss:$0 sm:$0xff] }
  0x10   : > { %s284_s11 = scalar_lea.vmem %s708_s0, %s497_s8  ;;  %v529_v35 = vld [vmem:[%s713_s5] sm:$0xff]  ;;  %s288_s12 = scalar_lea.vmem %s715_s7, %s497_s8 }
  0x11   : > { %v664_v0 = vld [vmem:[%s284_s11] sm:$0xff]  ;;  %362 = vmatpush.bf16.msra.mxu0 %v527_v15 }
  0x12   : > { %v292_v1 = vsel %vm291_vm0, %v664_v0, 0.0  ;;  %415 = vmatpush.bf16.msra.mxu1 %v531_v19  ;;  %v555_v36 = vld [vmem:[%s712_s4] ss:$0 sm:$0xff] }
  0x13   : > { %293 = vadd.xlane.f32.xlu0 %v292_v1  ;;  %v558_v3 = vpop.eup %557  ;;  %v556_v42 = vld [vmem:[#allocation2] ss:$0 sm:$0xff] }
  0x14   : > { %v296_v4 = vmul.f32 32.0, %v558_v3  ;;  %vm300_vm1 = vweird.f32 %v558_v3 }
  0x16   : > { %v297_v5 = vsub.f32 1.0, %v296_v4  ;;  %416 = vmatpush.bf16.msra.mxu1 %v530_v34 }
  0x18   : > { %v298_v6 = vmul.f32 %v558_v3, %v297_v5 }
  0x1a   : > { %v299_v7 = vadd.f32 %v558_v3, %v298_v6  ;;  %417 = vmatpush.bf16.msra.mxu1 %v529_v35 }
  0x1c   : > { %v301_v8 = vsel %vm300_vm1, %v558_v3, %v299_v7 }
  0x86   : > { %v294_v9 = vpop.xlane.xlu0 %293 }
  0x87   : > { %v302_v10 = vmul.f32 %v301_v8, %v294_v9 }
  0x89   : > { %v303_v11 = vsub.f32 %v664_v0, %v302_v10 }
  0x8b   : > { %v304_v12 = vmul.f32 %v303_v11, %v303_v11 }
  0x8d   : > { %v305_v13 = vsel %vm291_vm0, %v304_v12, 0.0 }
  0x8e   : > { %306 = vadd.xlane.f32.xlu0 %v305_v13 }
 0x101   : > { %v307_v17 = vpop.xlane.xlu0 %306 }
 0x102   : > { %v308_v18 = vmul.f32 %v307_v17, %v301_v8 }
 0x104   : > { %v309_v20 = vadd.f32 1e-05, %v308_v18 }
 0x106   : > { %559 = vrsqrt.f32 %v309_v20  ;;  %vm316_vm3 = vweird.f32 %v309_v20 }
 0x10c   : > { %v560_v21 = vpop.eup %559 }
 0x10d   : > { %v311_v22 = vmul.f32 %v560_v21, %v309_v20  ;;  %vm317_vm2 = vweird.f32 %v560_v21 }
 0x10e   : > { %vm318_vm4 = vmor %vm316_vm3, %vm317_vm2 }
 0x10f   : > { %v312_v23 = vmul.f32 %v560_v21, %v311_v22 }
 0x111   : > { %v313_v24 = vmul.f32 0.5, %v312_v23 }
 0x113   : > { %v314_v25 = vsub.f32 1.5, %v313_v24 }
 0x115   : > { %v315_v26 = vmul.f32 %v560_v21, %v314_v25 }
 0x117   : > { %v319_v28 = vsel %vm318_vm4, %v560_v21, %v315_v26 }
 0x118   : > { %v320_v29 = vmul.f32 %v319_v28, %v303_v11 }
 0x11a   : > { %v325_v31 = vmul.f32 %v553_v27, %v320_v29 }
 0x11c   : > { %v330_v32 = vadd.f32 %v554_v30, %v325_v31 }
 0x11e   : > { %v331_v33 = vpack.c.bf16 %v330_v32, %v330_v32 }
 0x120   : > { %507 = vmatmul.msk.bf16.vlgmr.msra.gmra.mxu0 %vm291_vm0, %v331_v33 }
 0x19d   : > { %v364_v37 = vpop.f32.mrf.mxu0 }
 0x19e   : > { %v365_v38 = vadd.f32 %v555_v36, %v364_v37 }
 0x1a0   : > { %v368_v39 = vmax.f32 %v365_v38, 0.0 }
 0x1a2   : > { %v369_v40 = vpack.c.bf16 %v368_v39, %v368_v39 }
 0x1a4   : > { %524 = vmatmul.msk.bf16.vlgmr.msra.gmra.mxu1 %vm406_vm5, %v369_v40 }
 0x1a5   : > { %v366_v41 = vpop.f32.mrf.mxu0 }
 0x221   : > { %v419_v43 = vpop.f32.mrf.mxu1 }
 0x222   : > { %v420_v44 = vadd.f32 %v556_v42, %v419_v43 }
 0x224   : > { %v423_v45 = vadd.f32 %v420_v44, %v664_v0 }
 0x226   : > { %424 = vst.msk [vmem:[%s288_s12] sm:$0xff] %vm291_vm0, %v423_v45 }
 0x229   : > { %v421_v46 = vpop.f32.mrf.mxu1 }
 0x22a PF: > { %s18_s24 = sadd.s32 1, %s601_s24  }
 0x22b   : > { %p15_p7 = scmp.ge.s32.totalorder %s18_s24, 4  }
 0x22d   :  { %17 = sbr.rel (!%p15_p7) target bundleno = 1 (0x1), region = 83 }
 0x232   :  { %444 = vsyncpa [#allocation3], 1 }
 0x233   :  { %446 = vsyncpa [#allocation3 + $0x1], 1 }

// kernel: _lambda_.30
= control target key start
LH: loop header
LB: loop body
LE: loop exit
PB: predicated region body
PF: predicated region fallthrough
CT: control target
= control target key end

     0   :  { %16 = vsyncpa [#allocation3], 0  ;;  %s1176_s17 = smov 0   ;;  %s1313_s0 = inlined_call_operand.vmem [shape: f32[2,8,32], index: 0, kind: input, shape index: {}]   ;;  %s1314_s1 = inlined_call_operand.vmem [shape: f32[2,8,32], index: 1, kind: input, shape index: {}]   ;;  %s1315_s2 = inlined_call_operand.vmem [shape: f32[1,32], index: 2, kind: input, shape index: {}]   ;;  %s1316_s3 = inlined_call_operand.vmem [shape: f32[1,32], index: 3, kind: input, shape index: {}]   ;;  %s1317_s4 = inlined_call_operand.vmem [shape: bf16[32,32], index: 4, kind: input, shape index: {}]   ;;  %s1318_s5 = inlined_call_operand.vmem [shape: f32[1,32], index: 5, kind: input, shape index: {}]   ;;  %s1319_s6 = inlined_call_operand.vmem [shape: bf16[32,64], index: 6, kind: input, shape index: {}]   ;;  %s1320_s7 = inlined_call_operand.vmem [shape: f32[1,64], index: 7, kind: input, shape index: {}]   ;;  %s1321_s8 = inlined_call_operand.vmem [shape: f32[32,32], index: 8, kind: input, shape index: {}]   ;;  %s1322_s9 = inlined_call_operand.hbm [shape: f32[1,32], index: 9, kind: input, shape index: {}]   ;;  %s1323_s10 = inlined_call_operand.vmem [shape: f32[2,1,8], index: 10, kind: input, shape index: {}]   ;;  %s1324_s11 = inlined_call_operand.vmem [shape: f32[2,8,32], index: 11, kind: output, shape index: {}]  }
   0x1 LB: > { %s966_s18 = sadd.s32 4294967295, %s1105_s17   ;;  %p968_p0 = scmp.ge.s32.totalorder %s1105_s17, 1  ;;  %s1105_s17 = sphi %s1176_s17, %s22_s17  }
   0x2   : > { %p299_p1 = scmp.lt.s32.totalorder %s1105_s17, 3  ;;  %s332_s21 = sshll.u32 %s1322_s9, 4  ;;  %s333_s21 = int_to_ptr.hbm [resolvable:$true] %s332_s21 }
   0x3   : > { %p1020_p3 = scmp.eq.s32.totalorder %s966_s18, 0  ;;  %s1107_s22 = smov [#allocation2]  }
   0x4   : > { %p300_p2 = pnand %p968_p0, %p299_p1  ;;  %s334_s23 = sshll.u32 %s1107_s22, 4  ;;  %s335_s23 = int_to_ptr.vmem [resolvable:$true] %s334_s23 }
   0x6   : > { %p1016_p4 = pneg %p300_p2  ;;  %367 = sbr.rel (%p300_p2) target bundleno = 1638 (0x666), region = 64 }
   0x8   : > { %p1017_p5 = pnand %p1020_p3, %p1016_p4 }
   0xa   : > { %1019 = dma.hbm_to_vmem [thread:$0]  (!%p1017_p5), %s333_s21, 16, %s335_s23, [#allocation3]  }
   0xb   : > { %1100 = dma.done.wait (%p1020_p3), [#allocation3], 16  }
   0xc   : > { %1102 = vsyncadd (%p1020_p3), [#allocation3], 4294967280  ;;  %p413_p6 = scmp.lt.s32.totalorder %s966_s18, 1  ;;  %vm432_vm0 = vcmask 261120   ;;  %v1108_v2 = vmov 32.0   ;;  %v1011_v3 = vld [vmem:[%s1319_s6 + $0x8] sm:$0xff] }
   0xd   : > { %1045 = vrcp.f32 %v1108_v2  ;;  %538 = vmatpush.bf16.msra.mxu1 %v1011_v3  ;;  %v1010_v15 = vld [vmem:[%s1319_s6] sm:$0xff]  ;;  %v1009_v18 = vld [vmem:[%s1317_s4 + $0x8] sm:$0xff]  ;;  %vm548_vm5 = vcmask 64512   ;;  %s1109_s14 = smov 96   ;;  %s1110_s15 = smov 120   ;;  %vm591_vm6 = vcmask 1043456  }
   0xe   : > { %s1326_s18 = smov (!%p413_p6, %s966_s18), 1  ;;  %500 = vmatpush.bf16.msra.mxu0 %v1009_v18  ;;  %v1008_v19 = vld [vmem:[%s1317_s4] sm:$0xff]  ;;  %s1112_s21 = smov 104  }
   0xf   : > { %s1190_s24 = sshll.u32 %s1326_s18, 3  ;;  %s423_s30 = scalar_lea.vmem %s1323_s10, %s1326_s18  ;;  %v1039_v29 = vld [vmem:[%s1315_s2] ss:$0 sm:$0xff] }
  0x10   : > { %s416_s27 = scalar_lea.vmem %s1313_s0, %s1190_s24  ;;  %s420_s16 = scalar_lea.vmem %s1314_s1, %s1190_s24  ;;  %v1040_v32 = vld [vmem:[%s1316_s3] ss:$0 sm:$0xff] }
  0x11   : > { %v1196_v0 = vld [vmem:[%s416_s27] sm:$0xff]  ;;  %539 = vmatpush.bf16.msra.mxu1 %v1010_v15  ;;  %s1113_s25 = smov 88   ;;  %s1114_s26 = smov 80  }
  0x12   : > { %v433_v1 = vsel %vm432_vm0, %v1196_v0, 0.0  ;;  %v507_v16 = vld [vmem:[%s420_s16] sm:$0xff]  ;;  %501 = vmatpush.bf16.msra.mxu0 %v1008_v19  ;;  %s1111_s16 = smov 112   ;;  %s1115_s27 = smov 72  }
  0x13   : > { %434 = vadd.xlane.f32.xlu0 %v433_v1  ;;  %v1046_v4 = vpop.eup %1045  ;;  %v508_v17 = vpack.c.bf16 %v507_v16, %v507_v16  ;;  %v1041_v36 = vld [vmem:[%s1320_s7] ss:$0 sm:$0xff]  ;;  %s427_s20 = scalar_lea.vmem %s1324_s11, %s1190_s24 }
  0x14   : > { %v437_v5 = vmul.f32 32.0, %v1046_v4  ;;  %vm441_vm1 = vweird.f32 %v1046_v4  ;;  %v1042_v42 = vld [vmem:[%s1318_s5] ss:$0 sm:$0xff] }
  0x15   : > { %993 = vmatmul.msk.bf16.vlgmr.msra.gmra.mxu1 %vm432_vm0, %v508_v17  ;;  %v1251_v51 = vld [vmem:[%s423_s30] ss:$0 sm:$0xff] }
  0x16   : > { %v438_v6 = vsub.f32 1.0, %v437_v5  ;;  %v608_v62 = vld [vmem:[%s1321_s8] sm:$0xff] }
  0x17   : > { %v609_v63 = vpack.c.bf16 %v608_v62, %v608_v62 }
  0x18   : > { %v439_v7 = vmul.f32 %v1046_v4, %v438_v6 }
  0x19   : > { %v696_v1 = vsel %vm591_vm6, %v609_v63, 0 }
  0x1a   : > { %v440_v8 = vadd.f32 %v1046_v4, %v439_v7 }
  0x1c   : > { %v442_v9 = vsel %vm441_vm1, %v1046_v4, %v440_v8 }
  0x86   : > { %v435_v10 = vpop.xlane.xlu0 %434 }
  0x87   : > { %v443_v11 = vmul.f32 %v442_v9, %v435_v10 }
  0x89   : > { %v444_v12 = vsub.f32 %v1196_v0, %v443_v11 }
  0x8b   : > { %v445_v13 = vmul.f32 %v444_v12, %v444_v12 }
  0x8d   : > { %v446_v14 = vsel %vm432_vm0, %v445_v13, 0.0 }
  0x8e   : > { %447 = vadd.xlane.f32.xlu0 %v446_v14 }
  0x92   : > { %v541_v37 = vpop.f32.mrf.mxu1 }
  0x93   : > { %v542_v38 = vadd.f32 %v1041_v36, %v541_v37 }
  0x95   : > { %v1233_v39 = vpack.c.bf16 %v542_v38, %v542_v38 }
  0x97   : > { %586 = vrot.lane.b32.xlu2 %v1233_v39, %s1109_s14  ;;  %v553_v40 = vsel %vm548_vm5, %v1233_v39, 0 }
  0x98   : > { %562 = vmatpush.bf16.xpose.msra.mxu2 %v553_v40 }
  0x9a   : > { %v543_v41 = vpop.f32.mrf.mxu1 }
  0x9f   : > { %614 = vrot.lane.b32.xlu2 %v1233_v39, %s1110_s15 }
  0xa0   : > { %705 = vmatpush.bf16.msrb.mxu2 %v696_v1  ;;  %v769_v1 = vld [vmem:[%s1321_s8 + $0x10] sm:$0xff] }
  0xa7   : > { %713 = vrot.lane.b32.xlu2 %v1233_v39, %s1111_s16 }
  0xf1   : > { %v587_v47 = vpop.permute.xlu2 %586 }
  0xf2   : > { %v593_v48 = vsel %vm591_vm6, %v587_v47, 0 }
  0xf3   : > { %602 = vmatpush.bf16.msra.mxu3 %v593_v48 }
  0xf9   : > { %v615_v49 = vpop.permute.xlu2 %614 }
  0xfa   : > { %v620_v50 = vsel %vm548_vm5, %v615_v49, 0 }
  0xfb   : > { %629 = vmatpush.bf16.xpose.msrb.mxu3 %v620_v50 }
 0x101   : > { %v448_v20 = vpop.xlane.xlu0 %447  ;;  %v714_v5 = vpop.permute.xlu2 %713 }
 0x102   : > { %v449_v21 = vmul.f32 %v448_v20, %v442_v9  ;;  %v719_v7 = vsel %vm548_vm5, %v714_v5, 0 }
 0x104   : > { %v450_v22 = vadd.f32 1e-05, %v449_v21 }
 0x106   : > { %1047 = vrsqrt.f32 %v450_v22  ;;  %vm457_vm3 = vweird.f32 %v450_v22 }
 0x10c   : > { %v1048_v23 = vpop.eup %1047 }
 0x10d   : > { %v452_v24 = vmul.f32 %v1048_v23, %v450_v22  ;;  %vm458_vm2 = vweird.f32 %v1048_v23 }
 0x10e   : > { %vm459_vm4 = vmor %vm457_vm3, %vm458_vm2 }
 0x10f   : > { %v453_v25 = vmul.f32 %v1048_v23, %v452_v24 }
 0x111   : > { %v454_v26 = vmul.f32 0.5, %v453_v25 }
 0x113   : > { %v455_v27 = vsub.f32 1.5, %v454_v26 }
 0x115   : > { %v456_v28 = vmul.f32 %v1048_v23, %v455_v27 }
 0x117   : > { %v460_v30 = vsel %vm459_vm4, %v1048_v23, %v456_v28 }
 0x118   : > { %v461_v31 = vmul.f32 %v460_v30, %v444_v12 }
 0x11a   : > { %v465_v33 = vmul.f32 %v1039_v29, %v461_v31 }
 0x11c   : > { %v469_v34 = vadd.f32 %v1040_v32, %v465_v33 }
 0x11e   : > { %v470_v35 = vpack.c.bf16 %v469_v34, %v469_v34 }
 0x120   : > { %984 = vmatmul.msk.bf16.vlgmr.msra.gmra.mxu0 %vm432_vm0, %v470_v35 }
 0x19d   : > { %v503_v43 = vpop.f32.mrf.mxu0 }
 0x19e   : > { %v504_v44 = vadd.f32 %v1042_v42, %v503_v43 }
 0x1a0   : > { %v546_v45 = vpack.c.bf16 %v504_v44, %v504_v44 }
 0x1a2   : > { %792 = vrot.lane.b32.xlu2 %v546_v45, %s1112_s21  ;;  %612 = vrot.lane.b32.xlu0 %v546_v45, %s1110_s15 }
 0x1a3   : > { %994 = vmatmul.msk.bf16.vlgmr.msra.gmra.mxu2 %vm548_vm5, %v546_v45 }
 0x1a5   : > { %v505_v46 = vpop.f32.mrf.mxu0 }
 0x1aa   : > { %711 = vrot.lane.b32.xlu2 %v546_v45, %s1111_s16 }
 0x1fc   : > { %v793_v11 = vpop.permute.xlu2 %792 }
 0x204   : > { %v712_v12 = vpop.permute.xlu2 %711 }
 0x214   : > { %v613_v10 = vpop.permute.xlu0 %612 }
 0x226   : > { %v564_v52 = vpop.f32.mrf.mxu2 }
 0x227   : > { %v568_v53 = vmul.f32 0.35355338, %v564_v52 }
 0x229   : > { %v572_v54 = vadd.f32 %v1251_v51, %v568_v53 }
 0x22b   : > { %v573_v55 = vsel %vm548_vm5, %v572_v54, -inf }
 0x22c   : > { %574 = vmax.xlane.f32.xlu1 %v573_v55 }
 0x22e   : > { %v566_v56 = vpop.f32.mrf.mxu2 }
 0x29f   : > { %v575_v57 = vpop.xlane.xlu1 %574 }
 0x2a0   : > { %v576_v58 = vsub.f32 %v572_v54, %v575_v57 }
 0x2a2   : > { %v577_v59 = vmul.f32 1.442695, %v576_v58 }
 0x2a4   : > { %1049 = vpow2.f32 %v577_v59 }
 0x2aa   : > { %v1050_v60 = vpop.eup %1049 }
 0x2ab   : > { %v579_v61 = vsel %vm548_vm5, %v1050_v60, 0.0 }
 0x2ac   : > { %580 = vadd.xlane.f32.xlu1 %v579_v61  ;;  %v670_v61 = vld [vmem:[%s1321_s8 + $0x8] sm:$0xff] }
 0x2ad   : > { %v671_v62 = vpack.c.bf16 %v670_v61, %v670_v61 }
 0x2af   : > { %v677_v63 = vsel %vm591_vm6, %v671_v62, 0 }
 0x2b0   : > { %686 = vmatpush.bf16.msrb.mxu1 %v677_v63 }
 0x2c5   : > { %794 = vrot.lane.b32.xlu1 %v1233_v39, %s1112_s21 }
 0x31f   : > { %v581_v2 = vpop.xlane.xlu1 %580 }
 0x320   : > { %1051 = vrcp.f32 %v581_v2  ;;  %v770_v2 = vpack.c.bf16 %v769_v1, %v769_v1 }
 0x326   : > { %v1052_v3 = vpop.eup %1051 }
 0x327   : > { %v583_v4 = vmul.f32 %v1052_v3, %v1050_v60  ;;  %v776_v3 = vsel %vm591_vm6, %v770_v2, 0 }
 0x328   : > { %785 = vmatpush.bf16.msra.mxu1 %v776_v3 }
 0x329   : > { %v584_v6 = vpack.c.bf16 %v583_v4, %v583_v4 }
 0x32b   : > { %995 = vmatmul.msk.bf16.vlgmr.msra.gmra.mxu3 %vm548_vm5, %v584_v6 }
 0x32c   : > { %728 = vmatpush.bf16.xpose.msra.mxu3 %v719_v7 }
 0x337   : > { %v795_v8 = vpop.permute.xlu1 %794 }
 0x338   : > { %v800_v9 = vsel %vm548_vm5, %v795_v8, 0 }
 0x339   : > { %809 = vmatpush.bf16.xpose.msra.mxu2 %v800_v9 }
 0x33b   : > { %996 = vmatmul.msk.bf16.vlgmr.msrb.gmra.mxu3 %vm548_vm5, %v613_v10 }
 0x34b   : > { %1000 = vmatmul.msk.bf16.vlgmr.msra.gmra.mxu3 %vm548_vm5, %v712_v12 }
 0x3ae   : > { %v604_v13 = vpop.f32.mrf.mxu3 }
 0x3af   : > { %v610_v14 = vpack.c.bf16 %v604_v13, %v604_v13 }
 0x3b1   : > { %999 = vmatmul.msk.bf16.vlgmr.msrb.gmra.mxu2 %vm548_vm5, %v610_v14 }
 0x3b6   : > { %v606_v15 = vpop.f32.mrf.mxu3 }
 0x3b7   : > { %v850_v15 = vld [vmem:[%s1321_s8 + $0x18] sm:$0xff] }
 0x3be   : > { %v631_v16 = vpop.f32.mrf.mxu3 }
 0x3bf   : > { %v635_v17 = vmul.f32 0.35355338, %v631_v16  ;;  %v851_v16 = vpack.c.bf16 %v850_v15, %v850_v15 }
 0x3c1   : > { %1003 = vmatmul.msk.bf16.vlgmr.msra.gmra.mxu2 %vm548_vm5, %v793_v11  ;;  %v636_v18 = vadd.f32 %v1251_v51, %v635_v17  ;;  %v857_v17 = vsel %vm591_vm6, %v851_v16, 0 }
 0x3c3   : > { %v637_v19 = vsel %vm548_vm5, %v636_v18, -inf }
 0x3c4   : > { %638 = vmax.xlane.f32.xlu0 %v637_v19 }
 0x3c6   : > { %v633_v20 = vpop.f32.mrf.mxu3 }
 0x3ce   : > { %v730_v21 = vpop.f32.mrf.mxu3 }
 0x3cf   : > { %v734_v22 = vmul.f32 0.35355338, %v730_v21 }
 0x3d1   : > { %v735_v23 = vadd.f32 %v1251_v51, %v734_v22 }
 0x3d3   : > { %v736_v24 = vsel %vm548_vm5, %v735_v23, -inf }
 0x3d4   : > { %737 = vmax.xlane.f32.xlu1 %v736_v24 }
 0x3d6   : > { %v732_v25 = vpop.f32.mrf.mxu3 }
 0x434   : > { %v1272_v26 = vpop.f32.mrf.mxu2 }
 0x437   : > { %v639_v27 = vpop.xlane.xlu0 %638 }
 0x438   : > { %v640_v28 = vsub.f32 %v636_v18, %v639_v27 }
 0x43a   : > { %v641_v29 = vmul.f32 1.442695, %v640_v28 }
 0x43c   : > { %1053 = vpow2.f32 %v641_v29  ;;  %v709_v30 = vpop.f32.mrf.mxu2 }
 0x43d   : > { %v1044_v30 = vld [vmem:[#allocation2] ss:$0 sm:$0xff] }
 0x442   : > { %v1054_v31 = vpop.eup %1053 }
 0x443   : > { %v643_v32 = vsel %vm548_vm5, %v1054_v31, 0.0 }
 0x444   : > { %644 = vadd.xlane.f32.xlu0 %v643_v32  ;;  %v811_v33 = vpop.f32.mrf.mxu2 }
 0x445   : > { %v815_v34 = vmul.f32 0.35355338, %v811_v33 }
 0x447   : > { %v738_v35 = vpop.xlane.xlu1 %737  ;;  %v816_v36 = vadd.f32 %v1251_v51, %v815_v34 }
 0x448   : > { %v739_v37 = vsub.f32 %v735_v23, %v738_v35 }
 0x449   : > { %v817_v38 = vsel %vm548_vm5, %v816_v36, -inf }
 0x44a   : > { %v740_v40 = vmul.f32 1.442695, %v739_v37  ;;  %818 = vmax.xlane.f32.xlu2 %v817_v38 }
 0x44c   : > { %1055 = vpow2.f32 %v740_v40  ;;  %v813_v41 = vpop.f32.mrf.mxu2 }
 0x452   : > { %v1056_v42 = vpop.eup %1055 }
 0x453   : > { %v742_v43 = vsel %vm548_vm5, %v1056_v42, 0.0 }
 0x454   : > { %743 = vadd.xlane.f32.xlu0 %v742_v43 }
 0x462   : > { %649 = vrot.lane.b32.xlu2 %v1233_v39, %s1113_s25 }
 0x468   : > { %748 = vrot.lane.b32.xlu0 %v1233_v39, %s1114_s26 }
 0x4b7   : > { %v645_v44 = vpop.xlane.xlu0 %644 }
 0x4b8   : > { %1057 = vrcp.f32 %v645_v44 }
 0x4bd   : > { %v819_v45 = vpop.xlane.xlu2 %818 }
 0x4be   : > { %v820_v46 = vsub.f32 %v816_v36, %v819_v45  ;;  %v1058_v48 = vpop.eup %1057 }
 0x4bf   : > { %v647_v49 = vmul.f32 %v1058_v48, %v1054_v31 }
 0x4c0   : > { %v821_v47 = vmul.f32 1.442695, %v820_v46 }
 0x4c1   : > { %v648_v53 = vpack.c.bf16 %v647_v49, %v647_v49 }
 0x4c2   : > { %1059 = vpow2.f32 %v821_v47 }
 0x4c5   : > { %v650_v50 = vpop.permute.xlu2 %649 }
 0x4c6   : > { %v655_v51 = vsel %vm591_vm6, %v650_v50, 0 }
 0x4c7   : > { %664 = vmatpush.bf16.msrb.mxu0 %v655_v51  ;;  %v744_v55 = vpop.xlane.xlu0 %743 }
 0x4c8   : > { %v1060_v52 = vpop.eup %1059  ;;  %1061 = vrcp.f32 %v744_v55 }
 0x4c9   : > { %v823_v54 = vsel %vm548_vm5, %v1060_v52, 0.0 }
 0x4ca   : > { %824 = vadd.xlane.f32.xlu1 %v823_v54  ;;  %997 = vmatmul.msk.bf16.vlgmr.msrb.gmra.mxu0 %vm548_vm5, %v648_v53 }
 0x4ce   : > { %v1062_v56 = vpop.eup %1061 }
 0x4cf   : > { %v746_v57 = vmul.f32 %v1062_v56, %v1056_v42 }
 0x4d1   : > { %v747_v60 = vpack.c.bf16 %v746_v57, %v746_v57 }
 0x4da   : > { %v749_v58 = vpop.permute.xlu0 %748 }
 0x4db   : > { %v754_v59 = vsel %vm591_vm6, %v749_v58, 0 }
 0x4dc   : > { %763 = vmatpush.bf16.msra.mxu0 %v754_v59 }
 0x4df   : > { %1001 = vmatmul.msk.bf16.vlgmr.msra.gmra.mxu0 %vm548_vm5, %v747_v60 }
 0x4e0   : > { %866 = vmatpush.bf16.msrb.mxu0 %v857_v17 }
 0x4e3   : > { %829 = vrot.lane.b32.xlu1 %v1233_v39, %s1115_s27 }
 0x53d   : > { %v825_v5 = vpop.xlane.xlu1 %824 }
 0x53e   : > { %1063 = vrcp.f32 %v825_v5 }
 0x544   : > { %v1064_v7 = vpop.eup %1063 }
 0x545   : > { %v827_v8 = vmul.f32 %v1064_v7, %v1060_v52 }
 0x547   : > { %v666_v4 = vpop.f32.mrf.mxu0  ;;  %v828_v11 = vpack.c.bf16 %v827_v8, %v827_v8 }
 0x548   : > { %v672_v6 = vpack.c.bf16 %v666_v4, %v666_v4 }
 0x54a   : > { %998 = vmatmul.msk.bf16.vlgmr.msrb.gmra.mxu1 %vm548_vm5, %v672_v6 }
 0x54f   : > { %v668_v39 = vpop.f32.mrf.mxu0 }
 0x555   : > { %v830_v9 = vpop.permute.xlu1 %829 }
 0x556   : > { %v835_v10 = vsel %vm591_vm6, %v830_v9, 0 }
 0x557   : > { %844 = vmatpush.bf16.msrb.mxu3 %v835_v10 }
 0x55a   : > { %1004 = vmatmul.msk.bf16.vlgmr.msrb.gmra.mxu3 %vm548_vm5, %v828_v11 }
 0x55c   : > { %v765_v12 = vpop.f32.mrf.mxu0 }
 0x55d   : > { %v771_v13 = vpack.c.bf16 %v765_v12, %v765_v12 }
 0x55f   : > { %1002 = vmatmul.msk.bf16.vlgmr.msra.gmra.mxu1 %vm548_vm5, %v771_v13 }
 0x564   : > { %v767_v14 = vpop.f32.mrf.mxu0 }
 0x5c7   : > { %v688_v18 = vpop.f32.mrf.mxu1 }
 0x5c8   : > { %v708_v20 = vadd.f32 %v1272_v26, %v688_v18 }
 0x5cf   : > { %v690_v19 = vpop.f32.mrf.mxu1 }
 0x5dc   : > { %v787_v21 = vpop.f32.mrf.mxu1 }
 0x5dd   : > { %v791_v22 = vadd.f32 %v787_v21, %v708_v20  ;;  %v846_v23 = vpop.f32.mrf.mxu3 }
 0x5de   : > { %v852_v24 = vpack.c.bf16 %v846_v23, %v846_v23 }
 0x5e0   : > { %1005 = vmatmul.msk.bf16.vlgmr.msrb.gmra.mxu0 %vm548_vm5, %v852_v24 }
 0x5e4   : > { %v789_v25 = vpop.f32.mrf.mxu1 }
 0x5e5   : > { %v848_v27 = vpop.f32.mrf.mxu3 }
 0x65d   : > { %v868_v28 = vpop.f32.mrf.mxu0 }
 0x65e   : > { %v872_v29 = vadd.f32 %v868_v28, %v791_v22 }
 0x660   : > { %v873_v31 = vadd.f32 %v872_v29, %v1196_v0 }
 0x662   : > { %v878_v32 = vadd.f32 %v1044_v30, %v873_v31 }
 0x664   : > { %879 = vst.msk [vmem:[%s427_s20] sm:$0xff] %vm432_vm0, %v878_v32 }
 0x665   : > { %v870_v26 = vpop.f32.mrf.mxu0 }
 0x666 PF: > { %s22_s17 = sadd.s32 1, %s1105_s17  }
 0x667   : > { %p19_p7 = scmp.ge.s32.totalorder %s22_s17, 4  }
 0x669   :  { %21 = sbr.rel (!%p19_p7) target bundleno = 1 (0x1), region = 105 }
 0x66e   :  { %899 = vsyncpa [#allocation3], 1 }
 0x66f   :  { %901 = vsyncpa [#allocation3 + $0x1], 1 }

// kernel: _lambda_.21
= control target key start
LH: loop header
LB: loop body
LE: loop exit
PB: predicated region body
PF: predicated region fallthrough
CT: control target
= control target key end

     0   :  { %16 = vsyncpa [#allocation3], 0  ;;  %s1552_s0 = inlined_call_operand.vmem [shape: f32[2,8,32], index: 0, kind: input, shape index: {}, may-alias: {0,1}]   ;;  %s1553_s1 = inlined_call_operand.vmem [shape: f32[2,8,32], index: 1, kind: input, shape index: {}, may-alias: {0,1}]   ;;  %s1554_s2 = inlined_call_operand.vmem [shape: f32[1,32], index: 2, kind: input, shape index: {}]   ;;  %s1555_s3 = inlined_call_operand.hbm [shape: f32[1,32], index: 3, kind: input, shape index: {}]   ;;  %s1556_s4 = inlined_call_operand.vmem [shape: bf16[32,32], index: 4, kind: input, shape index: {}]   ;;  %s1557_s5 = inlined_call_operand.hbm [shape: f32[1,32], index: 5, kind: input, shape index: {}]   ;;  %s1558_s6 = inlined_call_operand.vmem [shape: bf16[32,64], index: 6, kind: input, shape index: {}]   ;;  %s1559_s7 = inlined_call_operand.hbm [shape: f32[1,64], index: 7, kind: input, shape index: {}]   ;;  %s1560_s8 = inlined_call_operand.vmem [shape: f32[32,32], index: 8, kind: input, shape index: {}]   ;;  %s1561_s9 = inlined_call_operand.hbm [shape: f32[1,32], index: 9, kind: input, shape index: {}]   ;;  %s1562_s10 = inlined_call_operand.vmem [shape: f32[2,1,8], index: 10, kind: input, shape index: {}]   ;;  %s1563_s11 = inlined_call_operand.vmem [shape: f32[2,8,32], index: 11, kind: output, shape index: {}]  }
   0x1   :  { %17 = vsyncpa [#allocation5], 0 }
   0x2   :  { %18 = vsyncpa [#allocation8], 0  ;;  %s1380_s16 = smov 0  }
   0x3 LB: > { %s331_s19 = sshll.u32 %s1557_s5, 4  ;;  %s1389_s20 = sadd.s32 4294967295, %s1306_s16   ;;  %s1306_s16 = sphi %s1380_s16, %s24_s16   ;;  %s332_s19 = int_to_ptr.hbm [resolvable:$true] %s331_s19 }
   0x4   : > { %p1036_p0 = scmp.ge.s32.totalorder %s1306_s16, 1  ;;  %p301_p1 = scmp.lt.s32.totalorder %s1306_s16, 3 }
   0x5   : > { %p1114_p2 = scmp.eq.s32.totalorder %s1389_s20, 0  ;;  %s1308_s22 = smov [#allocation4]  }
   0x6   : > { %p1394_p3 = pnand %p1036_p0, %p301_p1  ;;  %s333_s23 = sshll.u32 %s1308_s22, 4  ;;  %s334_s23 = int_to_ptr.vmem [resolvable:$true] %s333_s23 }
   0x7   : > { %s316_s26 = sshll.u32 %s1555_s3, 4  ;;  %s346_s1 = sshll.u32 %s1559_s7, 4  ;;  %s317_s26 = int_to_ptr.hbm [resolvable:$true] %s316_s26  ;;  %s347_s1 = int_to_ptr.hbm [resolvable:$true] %s346_s1 }
   0x8   : > { %p1101_p4 = pneg %p1394_p3  ;;  %s1309_s30 = smov [#allocation2]  }
   0x9   : > { %s318_s12 = sshll.u32 %s1309_s30, 4  ;;  %s1310_s13 = smov [#allocation6]   ;;  %s319_s12 = int_to_ptr.vmem [resolvable:$true] %s318_s12 }
   0xa   : > { %p1408_p5 = pnand %p1114_p2, %p1101_p4  ;;  %s348_s14 = sshll.u32 %s1310_s13, 4  ;;  %s349_s14 = int_to_ptr.vmem [resolvable:$true] %s348_s14 }
   0xb   : > { %s361_s18 = sshll.u32 %s1561_s9, 4  ;;  %s1311_s22 = smov [#allocation7]   ;;  %s362_s18 = int_to_ptr.hbm [resolvable:$true] %s361_s18 }
   0xc   : > { %1107 = dma.hbm_to_vmem [thread:$0]  (!%p1408_p5), %s332_s19, 16, %s334_s23, [#allocation5]  }
   0xd   : > { %1104 = dma.hbm_to_vmem [thread:$0]  (!%p1408_p5), %s317_s26, 16, %s319_s12, [#allocation3]  }
   0xe   : > { %1110 = dma.hbm_to_vmem [thread:$0]  (!%p1408_p5), %s347_s1, 16, %s349_s14, [#allocation5]  }
   0xf   : > { %s363_s24 = sshll.u32 %s1311_s22, 4  ;;  %396 = sbr.rel (%p1394_p3) target bundleno = 1658 (0x67a), region = 64  ;;  %s364_s24 = int_to_ptr.vmem [resolvable:$true] %s363_s24 }
  0x10   : > { %1113 = dma.hbm_to_vmem [thread:$0]  (!%p1408_p5), %s362_s18, 16, %s364_s24, [#allocation8]  }
  0x14   : > { %1293 = dma.done.wait (%p1114_p2), [#allocation3], 16  }
  0x15   : > { %1295 = vsyncadd (%p1114_p2), [#allocation3], 4294967280 }
  0x16   : > { %1297 = dma.done.wait (%p1114_p2), [#allocation5], 32  }
  0x17   : > { %1299 = vsyncadd (%p1114_p2), [#allocation5], 4294967264 }
  0x18   : > { %1301 = dma.done.wait (%p1114_p2), [#allocation8], 16  }
  0x19   : > { %1303 = vsyncadd (%p1114_p2), [#allocation8], 4294967280  ;;  %p457_p6 = scmp.lt.s32.totalorder %s1389_s20, 1  ;;  %vm476_vm0 = vcmask 261120   ;;  %v1312_v2 = vmov 32.0   ;;  %v1082_v14 = vld [vmem:[%s1556_s4 + $0x8] sm:$0xff] }
  0x1a   : > { %1148 = vrcp.f32 %v1312_v2  ;;  %v1084_v15 = vld [vmem:[%s1558_s6 + $0x8] sm:$0xff]  ;;  %544 = vmatpush.bf16.msra.mxu0 %v1082_v14  ;;  %v1081_v16 = vld [vmem:[%s1556_s4] sm:$0xff]  ;;  %vm587_vm5 = vcmask 64512   ;;  %s1313_s24 = smov 96   ;;  %s1314_s21 = smov 120   ;;  %vm630_vm6 = vcmask 1043456  }
  0x1b   : > { %s1567_s20 = smov (!%p457_p6, %s1389_s20), 1  ;;  %577 = vmatpush.bf16.msra.mxu1 %v1084_v15  ;;  %v1083_v17 = vld [vmem:[%s1558_s6] sm:$0xff]  ;;  %s1315_s23 = smov 112  }
  0x1c   : > { %s1047_s19 = sshll.u32 %s1567_s20, 3  ;;  %s467_s28 = scalar_lea.vmem %s1562_s10, %s1567_s20  ;;  %v1143_v27 = vld [vmem:[%s1554_s2] ss:$0 sm:$0xff]  ;;  %v1145_v34 = vld [vmem:[#allocation4] ss:$0 sm:$0xff] }
  0x1d   : > { %s460_s25 = scalar_lea.vmem %s1552_s0, %s1047_s19  ;;  %v1144_v30 = vld [vmem:[#allocation2] ss:$0 sm:$0xff]  ;;  %v1146_v35 = vld [vmem:[#allocation6] ss:$0 sm:$0xff]  ;;  %s1317_s29 = smov 88  }
  0x1e   : > { %v1451_v0 = vld [vmem:[%s460_s25] sm:$0xff]  ;;  %545 = vmatpush.bf16.msra.mxu0 %v1081_v16  ;;  %s1316_s25 = smov 104   ;;  %s1318_s30 = smov 80  }
  0x1f   : > { %v477_v1 = vsel %vm476_vm0, %v1451_v0, 0.0  ;;  %578 = vmatpush.bf16.msra.mxu1 %v1083_v17  ;;  %v1489_v49 = vld [vmem:[%s467_s28] ss:$0 sm:$0xff]  ;;  %s1319_s12 = smov 72  }
  0x20   : > { %478 = vadd.xlane.f32.xlu0 %v477_v1  ;;  %v1149_v3 = vpop.eup %1148  ;;  %v647_v60 = vld [vmem:[%s1560_s8] sm:$0xff] }
  0x21   : > { %v481_v4 = vmul.f32 32.0, %v1149_v3  ;;  %vm485_vm1 = vweird.f32 %v1149_v3  ;;  %v648_v61 = vpack.c.bf16 %v647_v60, %v647_v60 }
  0x23   : > { %v482_v5 = vsub.f32 1.0, %v481_v4  ;;  %v735_v62 = vsel %vm630_vm6, %v648_v61, 0 }
  0x25   : > { %v483_v6 = vmul.f32 %v1149_v3, %v482_v5 }
  0x27   : > { %v484_v7 = vadd.f32 %v1149_v3, %v483_v6 }
  0x29   : > { %v486_v8 = vsel %vm485_vm1, %v1149_v3, %v484_v7 }
  0x93   : > { %v479_v9 = vpop.xlane.xlu0 %478 }
  0x94   : > { %v487_v10 = vmul.f32 %v486_v8, %v479_v9 }
  0x96   : > { %v488_v11 = vsub.f32 %v1451_v0, %v487_v10 }
  0x98   : > { %v489_v12 = vmul.f32 %v488_v11, %v488_v11 }
  0x9a   : > { %v490_v13 = vsel %vm476_vm0, %v489_v12, 0.0 }
  0x9b   : > { %491 = vadd.xlane.f32.xlu0 %v490_v13 }
 0x10e   : > { %v492_v18 = vpop.xlane.xlu0 %491 }
 0x10f   : > { %v493_v19 = vmul.f32 %v492_v18, %v486_v8 }
 0x111   : > { %v494_v20 = vadd.f32 1e-05, %v493_v19 }
 0x113   : > { %1150 = vrsqrt.f32 %v494_v20  ;;  %vm501_vm3 = vweird.f32 %v494_v20 }
 0x119   : > { %v1151_v21 = vpop.eup %1150 }
 0x11a   : > { %v496_v22 = vmul.f32 %v1151_v21, %v494_v20  ;;  %vm502_vm2 = vweird.f32 %v1151_v21 }
 0x11b   : > { %vm503_vm4 = vmor %vm501_vm3, %vm502_vm2 }
 0x11c   : > { %v497_v23 = vmul.f32 %v1151_v21, %v496_v22 }
 0x11e   : > { %v498_v24 = vmul.f32 0.5, %v497_v23 }
 0x120   : > { %v499_v25 = vsub.f32 1.5, %v498_v24 }
 0x122   : > { %v500_v26 = vmul.f32 %v1151_v21, %v499_v25 }
 0x124   : > { %v504_v28 = vsel %vm503_vm4, %v1151_v21, %v500_v26 }
 0x125   : > { %v505_v29 = vmul.f32 %v504_v28, %v488_v11 }
 0x127   : > { %v509_v31 = vmul.f32 %v1143_v27, %v505_v29 }
 0x129   : > { %v513_v32 = vadd.f32 %v1144_v30, %v509_v31 }
 0x12b   : > { %v514_v33 = vpack.c.bf16 %v513_v32, %v513_v32 }
 0x12d   : > { %1057 = vmatmul.msk.bf16.vlgmr.msra.gmra.mxu0 %vm476_vm0, %v514_v33  ;;  %1066 = vmatmul.msk.bf16.vlgmr.msra.gmra.mxu1 %vm476_vm0, %v514_v33 }
 0x1aa   : > { %v547_v36 = vpop.f32.mrf.mxu0  ;;  %v580_v37 = vpop.f32.mrf.mxu1 }
 0x1ab   : > { %v548_v38 = vadd.f32 %v1145_v34, %v547_v36  ;;  %v581_v39 = vadd.f32 %v1146_v35, %v580_v37 }
 0x1ad   : > { %v585_v40 = vpack.c.bf16 %v548_v38, %v548_v38  ;;  %v1474_v41 = vpack.c.bf16 %v581_v39, %v581_v39 }
 0x1af   : > { %625 = vrot.lane.b32.xlu2 %v1474_v41, %s1313_s24  ;;  %651 = vrot.lane.b32.xlu0 %v585_v40, %s1314_s21  ;;  %v592_v42 = vsel %vm587_vm5, %v1474_v41, 0 }
 0x1b0   : > { %601 = vmatpush.bf16.xpose.msra.mxu2 %v592_v42 }
 0x1b2   : > { %v549_v43 = vpop.f32.mrf.mxu0  ;;  %v582_v44 = vpop.f32.mrf.mxu1 }
 0x1b7   : > { %653 = vrot.lane.b32.xlu2 %v1474_v41, %s1314_s21  ;;  %1067 = vmatmul.msk.bf16.vlgmr.msra.gmra.mxu2 %vm587_vm5, %v585_v40 }
 0x1b8   : > { %744 = vmatpush.bf16.msrb.mxu2 %v735_v62  ;;  %v808_v62 = vld [vmem:[%s1560_s8 + $0x10] sm:$0xff] }
 0x1bf   : > { %752 = vrot.lane.b32.xlu2 %v1474_v41, %s1315_s23 }
 0x1c7   : > { %831 = vrot.lane.b32.xlu2 %v585_v40, %s1316_s25 }
 0x1cf   : > { %750 = vrot.lane.b32.xlu2 %v585_v40, %s1315_s23  ;;  %s471_s23 = scalar_lea.vmem %s1563_s11, %s1047_s19 }
 0x209   : > { %v626_v45 = vpop.permute.xlu2 %625 }
 0x20a   : > { %v632_v46 = vsel %vm630_vm6, %v626_v45, 0 }
 0x20b   : > { %641 = vmatpush.bf16.msra.mxu3 %v632_v46 }
 0x211   : > { %v654_v47 = vpop.permute.xlu2 %653 }
 0x212   : > { %v659_v48 = vsel %vm587_vm5, %v654_v47, 0 }
 0x213   : > { %668 = vmatpush.bf16.xpose.msrb.mxu3 %v659_v48 }
 0x219   : > { %v753_v3 = vpop.permute.xlu2 %752 }
 0x21a   : > { %v758_v5 = vsel %vm587_vm5, %v753_v3, 0 }
 0x221   : > { %v652_v8 = vpop.permute.xlu0 %651  ;;  %v832_v9 = vpop.permute.xlu2 %831 }
 0x229   : > { %v751_v10 = vpop.permute.xlu2 %750 }
 0x23a   : > { %v603_v50 = vpop.f32.mrf.mxu2 }
 0x23b   : > { %v607_v51 = vmul.f32 0.35355338, %v603_v50 }
 0x23d   : > { %v611_v52 = vadd.f32 %v1489_v49, %v607_v51 }
 0x23f   : > { %v612_v53 = vsel %vm587_vm5, %v611_v52, -inf }
 0x240   : > { %613 = vmax.xlane.f32.xlu1 %v612_v53 }
 0x242   : > { %v605_v54 = vpop.f32.mrf.mxu2 }
 0x2b3   : > { %v614_v55 = vpop.xlane.xlu1 %613 }
 0x2b4   : > { %v615_v56 = vsub.f32 %v611_v52, %v614_v55 }
 0x2b6   : > { %v616_v57 = vmul.f32 1.442695, %v615_v56 }
 0x2b8   : > { %1152 = vpow2.f32 %v616_v57 }
 0x2be   : > { %v1153_v58 = vpop.eup %1152 }
 0x2bf   : > { %v618_v59 = vsel %vm587_vm5, %v1153_v58, 0.0 }
 0x2c0   : > { %619 = vadd.xlane.f32.xlu1 %v618_v59  ;;  %v709_v59 = vld [vmem:[%s1560_s8 + $0x8] sm:$0xff] }
 0x2c1   : > { %v710_v60 = vpack.c.bf16 %v709_v59, %v709_v59 }
 0x2c3   : > { %v716_v61 = vsel %vm630_vm6, %v710_v60, 0 }
 0x2c4   : > { %725 = vmatpush.bf16.msrb.mxu1 %v716_v61 }
 0x2d9   : > { %833 = vrot.lane.b32.xlu1 %v1474_v41, %s1316_s25 }
 0x333   : > { %v620_v63 = vpop.xlane.xlu1 %619 }
 0x334   : > { %1154 = vrcp.f32 %v620_v63  ;;  %v809_v63 = vpack.c.bf16 %v808_v62, %v808_v62 }
 0x33a   : > { %v1155_v1 = vpop.eup %1154 }
 0x33b   : > { %v622_v2 = vmul.f32 %v1155_v1, %v1153_v58  ;;  %v815_v1 = vsel %vm630_vm6, %v809_v63, 0 }
 0x33c   : > { %824 = vmatpush.bf16.msra.mxu1 %v815_v1 }
 0x33d   : > { %v623_v4 = vpack.c.bf16 %v622_v2, %v622_v2 }
 0x33f   : > { %1068 = vmatmul.msk.bf16.vlgmr.msra.gmra.mxu3 %vm587_vm5, %v623_v4 }
 0x340   : > { %767 = vmatpush.bf16.xpose.msra.mxu3 %v758_v5 }
 0x34b   : > { %v834_v6 = vpop.permute.xlu1 %833 }
 0x34c   : > { %v839_v7 = vsel %vm587_vm5, %v834_v6, 0 }
 0x34d   : > { %848 = vmatpush.bf16.xpose.msra.mxu2 %v839_v7 }
 0x34f   : > { %1069 = vmatmul.msk.bf16.vlgmr.msrb.gmra.mxu3 %vm587_vm5, %v652_v8 }
 0x35f   : > { %1073 = vmatmul.msk.bf16.vlgmr.msra.gmra.mxu3 %vm587_vm5, %v751_v10 }
 0x3c2   : > { %v643_v11 = vpop.f32.mrf.mxu3 }
 0x3c3   : > { %v649_v12 = vpack.c.bf16 %v643_v11, %v643_v11 }
 0x3c5   : > { %1072 = vmatmul.msk.bf16.vlgmr.msrb.gmra.mxu2 %vm587_vm5, %v649_v12 }
 0x3ca   : > { %v645_v13 = vpop.f32.mrf.mxu3 }
 0x3cb   : > { %v889_v13 = vld [vmem:[%s1560_s8 + $0x18] sm:$0xff] }
 0x3d2   : > { %v670_v14 = vpop.f32.mrf.mxu3 }
 0x3d3   : > { %v674_v15 = vmul.f32 0.35355338, %v670_v14  ;;  %v890_v14 = vpack.c.bf16 %v889_v13, %v889_v13 }
 0x3d5   : > { %1076 = vmatmul.msk.bf16.vlgmr.msra.gmra.mxu2 %vm587_vm5, %v832_v9  ;;  %v675_v16 = vadd.f32 %v1489_v49, %v674_v15  ;;  %v896_v15 = vsel %vm630_vm6, %v890_v14, 0 }
 0x3d7   : > { %v676_v17 = vsel %vm587_vm5, %v675_v16, -inf }
 0x3d8   : > { %677 = vmax.xlane.f32.xlu0 %v676_v17 }
 0x3da   : > { %v672_v18 = vpop.f32.mrf.mxu3 }
 0x3e2   : > { %v769_v19 = vpop.f32.mrf.mxu3 }
 0x3e3   : > { %v773_v20 = vmul.f32 0.35355338, %v769_v19 }
 0x3e5   : > { %v774_v21 = vadd.f32 %v1489_v49, %v773_v20 }
 0x3e7   : > { %v775_v22 = vsel %vm587_vm5, %v774_v21, -inf }
 0x3e8   : > { %776 = vmax.xlane.f32.xlu1 %v775_v22 }
 0x3ea   : > { %v771_v23 = vpop.f32.mrf.mxu3 }
 0x448   : > { %v1510_v24 = vpop.f32.mrf.mxu2 }
 0x44b   : > { %v678_v25 = vpop.xlane.xlu0 %677 }
 0x44c   : > { %v679_v26 = vsub.f32 %v675_v16, %v678_v25 }
 0x44e   : > { %v680_v27 = vmul.f32 1.442695, %v679_v26 }
 0x450   : > { %1156 = vpow2.f32 %v680_v27  ;;  %v748_v28 = vpop.f32.mrf.mxu2 }
 0x451   : > { %v1147_v28 = vld [vmem:[#allocation7] ss:$0 sm:$0xff] }
 0x456   : > { %v1157_v29 = vpop.eup %1156 }
 0x457   : > { %v682_v30 = vsel %vm587_vm5, %v1157_v29, 0.0 }
 0x458   : > { %683 = vadd.xlane.f32.xlu0 %v682_v30  ;;  %v850_v31 = vpop.f32.mrf.mxu2 }
 0x459   : > { %v854_v32 = vmul.f32 0.35355338, %v850_v31 }
 0x45b   : > { %v777_v33 = vpop.xlane.xlu1 %776  ;;  %v855_v34 = vadd.f32 %v1489_v49, %v854_v32 }
 0x45c   : > { %v778_v35 = vsub.f32 %v774_v21, %v777_v33 }
 0x45d   : > { %v856_v36 = vsel %vm587_vm5, %v855_v34, -inf }
 0x45e   : > { %v779_v37 = vmul.f32 1.442695, %v778_v35  ;;  %857 = vmax.xlane.f32.xlu2 %v856_v36 }
 0x460   : > { %1158 = vpow2.f32 %v779_v37  ;;  %v852_v38 = vpop.f32.mrf.mxu2 }
 0x466   : > { %v1159_v39 = vpop.eup %1158 }
 0x467   : > { %v781_v40 = vsel %vm587_vm5, %v1159_v39, 0.0 }
 0x468   : > { %782 = vadd.xlane.f32.xlu0 %v781_v40 }
 0x476   : > { %688 = vrot.lane.b32.xlu2 %v1474_v41, %s1317_s29 }
 0x47c   : > { %787 = vrot.lane.b32.xlu0 %v1474_v41, %s1318_s30 }
 0x4cb   : > { %v684_v42 = vpop.xlane.xlu0 %683 }
 0x4cc   : > { %1160 = vrcp.f32 %v684_v42 }
 0x4d1   : > { %v858_v43 = vpop.xlane.xlu2 %857 }
 0x4d2   : > { %v859_v44 = vsub.f32 %v855_v34, %v858_v43  ;;  %v1161_v46 = vpop.eup %1160 }
 0x4d3   : > { %v686_v47 = vmul.f32 %v1161_v46, %v1157_v29 }
 0x4d4   : > { %v860_v45 = vmul.f32 1.442695, %v859_v44 }
 0x4d5   : > { %v687_v51 = vpack.c.bf16 %v686_v47, %v686_v47 }
 0x4d6   : > { %1162 = vpow2.f32 %v860_v45 }
 0x4d9   : > { %v689_v48 = vpop.permute.xlu2 %688 }
 0x4da   : > { %v694_v49 = vsel %vm630_vm6, %v689_v48, 0 }
 0x4db   : > { %703 = vmatpush.bf16.msrb.mxu0 %v694_v49  ;;  %v783_v53 = vpop.xlane.xlu0 %782 }
 0x4dc   : > { %v1163_v50 = vpop.eup %1162  ;;  %1164 = vrcp.f32 %v783_v53 }
 0x4dd   : > { %v862_v52 = vsel %vm587_vm5, %v1163_v50, 0.0 }
 0x4de   : > { %863 = vadd.xlane.f32.xlu1 %v862_v52  ;;  %1070 = vmatmul.msk.bf16.vlgmr.msrb.gmra.mxu0 %vm587_vm5, %v687_v51 }
 0x4e2   : > { %v1165_v54 = vpop.eup %1164 }
 0x4e3   : > { %v785_v55 = vmul.f32 %v1165_v54, %v1159_v39 }
 0x4e5   : > { %v786_v58 = vpack.c.bf16 %v785_v55, %v785_v55 }
 0x4ee   : > { %v788_v56 = vpop.permute.xlu0 %787 }
 0x4ef   : > { %v793_v57 = vsel %vm630_vm6, %v788_v56, 0 }
 0x4f0   : > { %802 = vmatpush.bf16.msra.mxu0 %v793_v57 }
 0x4f3   : > { %1074 = vmatmul.msk.bf16.vlgmr.msra.gmra.mxu0 %vm587_vm5, %v786_v58 }
 0x4f4   : > { %905 = vmatpush.bf16.msrb.mxu0 %v896_v15 }
 0x4f7   : > { %868 = vrot.lane.b32.xlu1 %v1474_v41, %s1319_s12 }
 0x551   : > { %v864_v3 = vpop.xlane.xlu1 %863 }
 0x552   : > { %1166 = vrcp.f32 %v864_v3 }
 0x558   : > { %v1167_v5 = vpop.eup %1166 }
 0x559   : > { %v866_v6 = vmul.f32 %v1167_v5, %v1163_v50 }
 0x55b   : > { %v705_v2 = vpop.f32.mrf.mxu0  ;;  %v867_v9 = vpack.c.bf16 %v866_v6, %v866_v6 }
 0x55c   : > { %v711_v4 = vpack.c.bf16 %v705_v2, %v705_v2 }
 0x55e   : > { %1071 = vmatmul.msk.bf16.vlgmr.msrb.gmra.mxu1 %vm587_vm5, %v711_v4 }
 0x563   : > { %v707_v41 = vpop.f32.mrf.mxu0 }
 0x569   : > { %v869_v7 = vpop.permute.xlu1 %868 }
 0x56a   : > { %v874_v8 = vsel %vm630_vm6, %v869_v7, 0 }
 0x56b   : > { %883 = vmatpush.bf16.msrb.mxu3 %v874_v8 }
 0x56e   : > { %1077 = vmatmul.msk.bf16.vlgmr.msrb.gmra.mxu3 %vm587_vm5, %v867_v9 }
 0x570   : > { %v804_v10 = vpop.f32.mrf.mxu0 }
 0x571   : > { %v810_v11 = vpack.c.bf16 %v804_v10, %v804_v10 }
 0x573   : > { %1075 = vmatmul.msk.bf16.vlgmr.msra.gmra.mxu1 %vm587_vm5, %v810_v11 }
 0x578   : > { %v806_v12 = vpop.f32.mrf.mxu0 }
 0x5db   : > { %v727_v16 = vpop.f32.mrf.mxu1 }
 0x5dc   : > { %v747_v18 = vadd.f32 %v1510_v24, %v727_v16 }
 0x5e3   : > { %v729_v17 = vpop.f32.mrf.mxu1 }
 0x5f0   : > { %v826_v19 = vpop.f32.mrf.mxu1 }
 0x5f1   : > { %v830_v20 = vadd.f32 %v826_v19, %v747_v18  ;;  %v885_v21 = vpop.f32.mrf.mxu3 }
 0x5f2   : > { %v891_v22 = vpack.c.bf16 %v885_v21, %v885_v21 }
 0x5f4   : > { %1078 = vmatmul.msk.bf16.vlgmr.msrb.gmra.mxu0 %vm587_vm5, %v891_v22 }
 0x5f8   : > { %v828_v23 = vpop.f32.mrf.mxu1 }
 0x5f9   : > { %v887_v25 = vpop.f32.mrf.mxu3 }
 0x671   : > { %v907_v26 = vpop.f32.mrf.mxu0 }
 0x672   : > { %v911_v27 = vadd.f32 %v907_v26, %v830_v20 }
 0x674   : > { %v912_v29 = vadd.f32 %v911_v27, %v1451_v0 }
 0x676   : > { %v917_v30 = vadd.f32 %v1147_v28, %v912_v29 }
 0x678   : > { %918 = vst.msk [vmem:[%s471_s23] sm:$0xff] %vm476_vm0, %v917_v30 }
 0x679   : > { %v909_v24 = vpop.f32.mrf.mxu0 }
 0x67a PF: > { %s24_s16 = sadd.s32 1, %s1306_s16  }
 0x67b   : > { %p21_p7 = scmp.ge.s32.totalorder %s24_s16, 4  }
 0x67d   :  { %23 = sbr.rel (!%p21_p7) target bundleno = 3 (0x3), region = 117 }
 0x682   :  { %938 = vsyncpa [#allocation3], 1 }
 0x683   :  { %940 = vsyncpa [#allocation3 + $0x1], 1 }
 0x684   :  { %941 = vsyncpa [#allocation5], 1 }
 0x685   :  { %942 = vsyncpa [#allocation8], 1 }

// kernel: _lambda_.22
= control target key start
LH: loop header
LB: loop body
LE: loop exit
PB: predicated region body
PF: predicated region fallthrough
CT: control target
= control target key end

     0   :  { %12 = vsyncpa [#allocation3], 0  ;;  %s859_s0 = inlined_call_operand.vmem [shape: f32[2,8,32], index: 0, kind: input, shape index: {}]   ;;  %s860_s1 = inlined_call_operand.vmem [shape: f32[1,32], index: 1, kind: input, shape index: {}]   ;;  %s861_s2 = inlined_call_operand.hbm [shape: f32[1,32], index: 2, kind: input, shape index: {}]   ;;  %s862_s3 = inlined_call_operand.vmem [shape: bf16[32,64], index: 3, kind: input, shape index: {}]   ;;  %s863_s4 = inlined_call_operand.hbm [shape: f32[1,64], index: 4, kind: input, shape index: {}]   ;;  %s864_s5 = inlined_call_operand.vmem [shape: bf16[64,32], index: 5, kind: input, shape index: {}]   ;;  %s865_s6 = inlined_call_operand.hbm [shape: f32[1,32], index: 6, kind: input, shape index: {}]   ;;  %s866_s7 = inlined_call_operand.vmem [shape: f32[2,8,32], index: 7, kind: output, shape index: {}]  }
   0x1   :  { %13 = vsyncpa [#allocation5], 0  ;;  %s783_s24 = smov 0  }
   0x2 LB: > { %s232_s27 = sshll.u32 %s863_s4, 4  ;;  %s538_s28 = sadd.s32 4294967295, %s737_s24   ;;  %s737_s24 = sphi %s783_s24, %s19_s24   ;;  %s233_s27 = int_to_ptr.hbm [resolvable:$true] %s232_s27 }
   0x3   : > { %p540_p0 = scmp.ge.s32.totalorder %s737_s24, 1  ;;  %p202_p1 = scmp.lt.s32.totalorder %s737_s24, 3 }
   0x4   : > { %p607_p2 = scmp.eq.s32.totalorder %s538_s28, 0  ;;  %s739_s30 = smov [#allocation4]  }
   0x5   : > { %p794_p3 = pnand %p540_p0, %p202_p1  ;;  %s234_s8 = sshll.u32 %s739_s30, 4  ;;  %s235_s8 = int_to_ptr.vmem [resolvable:$true] %s234_s8 }
   0x6   : > { %s217_s11 = sshll.u32 %s861_s2, 4  ;;  %s247_s14 = sshll.u32 %s865_s6, 4  ;;  %s218_s11 = int_to_ptr.hbm [resolvable:$true] %s217_s11  ;;  %s248_s14 = int_to_ptr.hbm [resolvable:$true] %s247_s14 }
   0x7   : > { %p597_p4 = pneg %p794_p3  ;;  %s740_s15 = smov [#allocation2]  }
   0x8   : > { %s219_s16 = sshll.u32 %s740_s15, 4  ;;  %s741_s17 = smov [#allocation6]   ;;  %s220_s16 = int_to_ptr.vmem [resolvable:$true] %s219_s16 }
   0x9   : > { %p598_p5 = pnand %p607_p2, %p597_p4  ;;  %s249_s18 = sshll.u32 %s741_s17, 4  ;;  %s250_s18 = int_to_ptr.vmem [resolvable:$true] %s249_s18 }
   0xa   : > { %269 = sbr.rel (%p794_p3) target bundleno = 560 (0x230), region = 48 }
   0xb   : > { %603 = dma.hbm_to_vmem [thread:$0]  (!%p598_p5), %s233_s27, 16, %s235_s8, [#allocation5]  }
   0xc   : > { %600 = dma.hbm_to_vmem [thread:$0]  (!%p598_p5), %s218_s11, 16, %s220_s16, [#allocation3]  }
   0xd   : > { %606 = dma.hbm_to_vmem [thread:$0]  (!%p598_p5), %s248_s14, 16, %s250_s18, [#allocation5]  }
   0xf   : > { %728 = dma.done.wait (%p607_p2), [#allocation3], 16  }
  0x10   : > { %730 = vsyncadd (%p607_p2), [#allocation3], 4294967280 }
  0x11   : > { %732 = dma.done.wait (%p607_p2), [#allocation5], 32  }
  0x12   : > { %734 = vsyncadd (%p607_p2), [#allocation5], 4294967264  ;;  %p310_p6 = scmp.lt.s32.totalorder %s538_s28, 1  ;;  %vm320_vm0 = vcmask 261120   ;;  %v742_v2 = vmov 32.0   ;;  %v580_v14 = vld [vmem:[%s862_s3 + $0x8] sm:$0xff] }
  0x13   : > { %629 = vrcp.f32 %v742_v2  ;;  %390 = vmatpush.bf16.msra.mxu0 %v580_v14  ;;  %v579_v15 = vld [vmem:[%s862_s3] sm:$0xff]  ;;  %v584_v16 = vld [vmem:[%s864_s5 + $0x18] sm:$0xff]  ;;  %v583_v19 = vld [vmem:[%s864_s5 + $0x10] sm:$0xff]  ;;  %vm435_vm5 = vcmask 523264  }
  0x14   : > { %s869_s28 = smov (!%p310_p6, %s538_s28), 1  ;;  %443 = vmatpush.bf16.msra.mxu1 %v584_v16  ;;  %v625_v27 = vld [vmem:[%s860_s1] ss:$0 sm:$0xff]  ;;  %v582_v34 = vld [vmem:[%s864_s5 + $0x8] sm:$0xff]  ;;  %v627_v36 = vld [vmem:[#allocation4] ss:$0 sm:$0xff] }
  0x15   : > { %s549_s19 = sshll.u32 %s869_s28, 3  ;;  %v626_v30 = vld [vmem:[#allocation2] ss:$0 sm:$0xff]  ;;  %v628_v42 = vld [vmem:[#allocation6] ss:$0 sm:$0xff] }
  0x16   : > { %s313_s22 = scalar_lea.vmem %s859_s0, %s549_s19  ;;  %v581_v35 = vld [vmem:[%s864_s5] sm:$0xff]  ;;  %s317_s18 = scalar_lea.vmem %s866_s7, %s549_s19 }
  0x17   : > { %v821_v0 = vld [vmem:[%s313_s22] sm:$0xff]  ;;  %391 = vmatpush.bf16.msra.mxu0 %v579_v15 }
  0x18   : > { %v321_v1 = vsel %vm320_vm0, %v821_v0, 0.0  ;;  %444 = vmatpush.bf16.msra.mxu1 %v583_v19 }
  0x19   : > { %322 = vadd.xlane.f32.xlu0 %v321_v1  ;;  %v630_v3 = vpop.eup %629 }
  0x1a   : > { %v325_v4 = vmul.f32 32.0, %v630_v3  ;;  %vm329_vm1 = vweird.f32 %v630_v3 }
  0x1c   : > { %v326_v5 = vsub.f32 1.0, %v325_v4  ;;  %445 = vmatpush.bf16.msra.mxu1 %v582_v34 }
  0x1e   : > { %v327_v6 = vmul.f32 %v630_v3, %v326_v5 }
  0x20   : > { %v328_v7 = vadd.f32 %v630_v3, %v327_v6  ;;  %446 = vmatpush.bf16.msra.mxu1 %v581_v35 }
  0x22   : > { %v330_v8 = vsel %vm329_vm1, %v630_v3, %v328_v7 }
  0x8c   : > { %v323_v9 = vpop.xlane.xlu0 %322 }
  0x8d   : > { %v331_v10 = vmul.f32 %v330_v8, %v323_v9 }
  0x8f   : > { %v332_v11 = vsub.f32 %v821_v0, %v331_v10 }
  0x91   : > { %v333_v12 = vmul.f32 %v332_v11, %v332_v11 }
  0x93   : > { %v334_v13 = vsel %vm320_vm0, %v333_v12, 0.0 }
  0x94   : > { %335 = vadd.xlane.f32.xlu0 %v334_v13 }
 0x107   : > { %v336_v17 = vpop.xlane.xlu0 %335 }
 0x108   : > { %v337_v18 = vmul.f32 %v336_v17, %v330_v8 }
 0x10a   : > { %v338_v20 = vadd.f32 1e-05, %v337_v18 }
 0x10c   : > { %631 = vrsqrt.f32 %v338_v20  ;;  %vm345_vm3 = vweird.f32 %v338_v20 }
 0x112   : > { %v632_v21 = vpop.eup %631 }
 0x113   : > { %v340_v22 = vmul.f32 %v632_v21, %v338_v20  ;;  %vm346_vm2 = vweird.f32 %v632_v21 }
 0x114   : > { %vm347_vm4 = vmor %vm345_vm3, %vm346_vm2 }
 0x115   : > { %v341_v23 = vmul.f32 %v632_v21, %v340_v22 }
 0x117   : > { %v342_v24 = vmul.f32 0.5, %v341_v23 }
 0x119   : > { %v343_v25 = vsub.f32 1.5, %v342_v24 }
 0x11b   : > { %v344_v26 = vmul.f32 %v632_v21, %v343_v25 }
 0x11d   : > { %v348_v28 = vsel %vm347_vm4, %v632_v21, %v344_v26 }
 0x11e   : > { %v349_v29 = vmul.f32 %v348_v28, %v332_v11 }
 0x120   : > { %v354_v31 = vmul.f32 %v625_v27, %v349_v29 }
 0x122   : > { %v359_v32 = vadd.f32 %v626_v30, %v354_v31 }
 0x124   : > { %v360_v33 = vpack.c.bf16 %v359_v32, %v359_v32 }
 0x126   : > { %559 = vmatmul.msk.bf16.vlgmr.msra.gmra.mxu0 %vm320_vm0, %v360_v33 }
 0x1a3   : > { %v393_v37 = vpop.f32.mrf.mxu0 }
 0x1a4   : > { %v394_v38 = vadd.f32 %v627_v36, %v393_v37 }
 0x1a6   : > { %v397_v39 = vmax.f32 %v394_v38, 0.0 }
 0x1a8   : > { %v398_v40 = vpack.c.bf16 %v397_v39, %v397_v39 }
 0x1aa   : > { %576 = vmatmul.msk.bf16.vlgmr.msra.gmra.mxu1 %vm435_vm5, %v398_v40 }
 0x1ab   : > { %v395_v41 = vpop.f32.mrf.mxu0 }
 0x227   : > { %v448_v43 = vpop.f32.mrf.mxu1 }
 0x228   : > { %v449_v44 = vadd.f32 %v628_v42, %v448_v43 }
 0x22a   : > { %v452_v45 = vadd.f32 %v449_v44, %v821_v0 }
 0x22c   : > { %453 = vst.msk [vmem:[%s317_s18] sm:$0xff] %vm320_vm0, %v452_v45 }
 0x22f   : > { %v450_v46 = vpop.f32.mrf.mxu1 }
 0x230 PF: > { %s19_s24 = sadd.s32 1, %s737_s24  }
 0x231   : > { %p16_p7 = scmp.ge.s32.totalorder %s19_s24, 4  }
 0x233   :  { %18 = sbr.rel (!%p16_p7) target bundleno = 2 (0x2), region = 91 }
 0x238   :  { %473 = vsyncpa [#allocation3], 1 }
 0x239   :  { %475 = vsyncpa [#allocation3 + $0x1], 1 }
 0x23a   :  { %476 = vsyncpa [#allocation5], 1 }

// kernel: _lambda_.23
= control target key start
LH: loop header
LB: loop body
LE: loop exit
PB: predicated region body
PF: predicated region fallthrough
CT: control target
= control target key end

     0   :  { %8 = vsyncpa [#allocation3], 0  ;;  %s389_s12 = smov 0   ;;  %s422_s0 = inlined_call_operand.vmem [shape: f32[2,8,32], index: 0, kind: input, shape index: {}]   ;;  %s423_s1 = inlined_call_operand.vmem [shape: f32[1,32], index: 1, kind: input, shape index: {}]   ;;  %s424_s2 = inlined_call_operand.hbm [shape: f32[1,32], index: 2, kind: input, shape index: {}]   ;;  %s425_s3 = inlined_call_operand.vmem [shape: f32[2,8,32], index: 3, kind: output, shape index: {}]  }
   0x1 LB: > { %s288_s13 = sadd.s32 4294967295, %s365_s12   ;;  %p290_p0 = scmp.ge.s32.totalorder %s365_s12, 1  ;;  %s365_s12 = sphi %s389_s12, %s14_s12  }
   0x2   : > { %p113_p1 = scmp.lt.s32.totalorder %s365_s12, 3  ;;  %s128_s16 = sshll.u32 %s424_s2, 4  ;;  %s129_s16 = int_to_ptr.hbm [resolvable:$true] %s128_s16 }
   0x3   : > { %p307_p3 = scmp.eq.s32.totalorder %s288_s13, 0  ;;  %s367_s17 = smov [#allocation2]  }
   0x4   : > { %p114_p2 = pnand %p290_p0, %p113_p1  ;;  %s130_s18 = sshll.u32 %s367_s17, 4  ;;  %s131_s18 = int_to_ptr.vmem [resolvable:$true] %s130_s18 }
   0x6   : > { %p303_p4 = pneg %p114_p2  ;;  %150 = sbr.rel (%p114_p2) target bundleno = 287 (0x11f), region = 32 }
   0x8   : > { %p304_p5 = pnand %p307_p3, %p303_p4 }
   0xa   : > { %306 = dma.hbm_to_vmem [thread:$0]  (!%p304_p5), %s129_s16, 16, %s131_s18, [#allocation3]  }
   0xb   : > { %360 = dma.done.wait (%p307_p3), [#allocation3], 16  }
   0xc   : > { %362 = vsyncadd (%p307_p3), [#allocation3], 4294967280  ;;  %p173_p6 = scmp.lt.s32.totalorder %s288_s13, 1  ;;  %vm182_vm0 = vcmask 261120   ;;  %v368_v2 = vmov 32.0  }
   0xd   : > { %321 = vrcp.f32 %v368_v2  ;;  %v319_v23 = vld [vmem:[%s423_s1] ss:$0 sm:$0xff] }
   0xe   : > { %s427_s13 = smov (!%p173_p6, %s288_s13), 1  ;;  %v320_v25 = vld [vmem:[#allocation2] ss:$0 sm:$0xff] }
   0xf   : > { %s295_s19 = sshll.u32 %s427_s13, 3 }
  0x10   : > { %s176_s22 = scalar_lea.vmem %s422_s0, %s295_s19  ;;  %s180_s27 = scalar_lea.vmem %s425_s3, %s295_s19 }
  0x11   : > { %v181_v0 = vld [vmem:[%s176_s22] sm:$0xff] }
  0x12   : > { %v183_v1 = vsel %vm182_vm0, %v181_v0, 0.0 }
  0x13   : > { %184 = vadd.xlane.f32.xlu0 %v183_v1  ;;  %v322_v3 = vpop.eup %321 }
  0x14   : > { %v187_v4 = vmul.f32 32.0, %v322_v3  ;;  %vm191_vm1 = vweird.f32 %v322_v3 }
  0x16   : > { %v188_v5 = vsub.f32 1.0, %v187_v4 }
  0x18   : > { %v189_v6 = vmul.f32 %v322_v3, %v188_v5 }
  0x1a   : > { %v190_v7 = vadd.f32 %v322_v3, %v189_v6 }
  0x1c   : > { %v192_v8 = vsel %vm191_vm1, %v322_v3, %v190_v7 }
  0x86   : > { %v185_v9 = vpop.xlane.xlu0 %184 }
  0x87   : > { %v193_v10 = vmul.f32 %v192_v8, %v185_v9 }
  0x89   : > { %v194_v11 = vsub.f32 %v181_v0, %v193_v10 }
  0x8b   : > { %v195_v12 = vmul.f32 %v194_v11, %v194_v11 }
  0x8d   : > { %v196_v13 = vsel %vm182_vm0, %v195_v12, 0.0 }
  0x8e   : > { %197 = vadd.xlane.f32.xlu0 %v196_v13 }
 0x101   : > { %v198_v14 = vpop.xlane.xlu0 %197 }
 0x102   : > { %v199_v15 = vmul.f32 %v198_v14, %v192_v8 }
 0x104   : > { %v200_v16 = vadd.f32 1e-05, %v199_v15 }
 0x106   : > { %323 = vrsqrt.f32 %v200_v16  ;;  %vm207_vm3 = vweird.f32 %v200_v16 }
 0x10c   : > { %v324_v17 = vpop.eup %323 }
 0x10d   : > { %v202_v18 = vmul.f32 %v324_v17, %v200_v16  ;;  %vm208_vm2 = vweird.f32 %v324_v17 }
 0x10e   : > { %vm209_vm4 = vmor %vm207_vm3, %vm208_vm2 }
 0x10f   : > { %v203_v19 = vmul.f32 %v324_v17, %v202_v18 }
 0x111   : > { %v204_v20 = vmul.f32 0.5, %v203_v19 }
 0x113   : > { %v205_v21 = vsub.f32 1.5, %v204_v20 }
 0x115   : > { %v206_v22 = vmul.f32 %v324_v17, %v205_v21 }
 0x117   : > { %v210_v24 = vsel %vm209_vm4, %v324_v17, %v206_v22 }
 0x118   : > { %v211_v26 = vmul.f32 %v210_v24, %v194_v11 }
 0x11a   : > { %v216_v27 = vmul.f32 %v319_v23, %v211_v26 }
 0x11c   : > { %v221_v28 = vadd.f32 %v320_v25, %v216_v27 }
 0x11e   : > { %222 = vst.msk [vmem:[%s180_s27] sm:$0xff] %vm182_vm0, %v221_v28 }
 0x11f PF: > { %s14_s12 = sadd.s32 1, %s365_s12  }
 0x120   : > { %p11_p7 = scmp.ge.s32.totalorder %s14_s12, 4  }
 0x122   :  { %13 = sbr.rel (!%p11_p7) target bundleno = 1 (0x1), region = 67 }
 0x127   :  { %242 = vsyncpa [#allocation3], 1 }
 0x128   :  { %244 = vsyncpa [#allocation3 + $0x1], 1 }

// kernel: _lambda_.37
= control target key start
LH: loop header
LB: loop body
LE: loop exit
PB: predicated region body
PF: predicated region fallthrough
CT: control target
= control target key end

     0   :  { %13 = vsyncpa [#allocation3], 0  ;;  %s882_s0 = inlined_call_operand.vmem [shape: f32[2,8,32], index: 0, kind: input, shape index: {}]   ;;  %s883_s1 = inlined_call_operand.vmem [shape: f32[1,32], index: 1, kind: input, shape index: {}]   ;;  %s884_s2 = inlined_call_operand.vmem [shape: f32[1,32], index: 2, kind: input, shape index: {}]   ;;  %s885_s3 = inlined_call_operand.vmem [shape: bf16[32,128], index: 3, kind: input, shape index: {}]   ;;  %s886_s4 = inlined_call_operand.vmem [shape: f32[1,128], index: 4, kind: input, shape index: {}]   ;;  %s887_s5 = inlined_call_operand.vmem [shape: s32[2,8,1], index: 5, kind: input, shape index: {}]   ;;  %s888_s6 = inlined_call_operand.hbm [shape: f32[2,8,128], index: 6, kind: output, shape index: {0}]   ;;  %s889_s7 = inlined_call_operand.hbm [shape: f32[1,1], index: 7, kind: output, shape index: {1}]  }
   0x1   :  { %15 = vsyncpa [#allocation3 + $0x1], 0 }
   0x2   :  { %16 = vsyncpa [#allocation5], 0  ;;  %s746_s24 = smov 0   ;;  %s748_s25 = smov 0  }
   0x3   :  { %s750_s26 = smov 0   ;;  %s752_s27 = smov 0  }
   0x4 LB: > { %s767_s28 = sadd.s32 4294967295, %s700_s27   ;;  %s519_s29 = sadd.s32 4294967294, %s700_s27   ;;  %s700_s27 = sphi %s752_s27, %s895_s27   ;;  %s696_s26 = sphi %s750_s26, %s894_s26   ;;  %s692_s25 = sphi %s748_s25, %s893_s25   ;;  %s688_s24 = sphi %s746_s24, %s892_s24  }
   0x5   : > { %s771_s30 = sadd.s32 1, %s700_s27   ;;  %s165_s8 = sadd.s32 1, %s696_s26 }
   0x6   : > { %s162_s9 = ssub.s32 %s700_s27, %s771_s30  ;;  %p175_p0 = scmp.ne.s32.totalorder %s696_s26, %s692_s25 }
   0x7   : > { %p163_p1 = scmp.eq.s32.totalorder %s162_s9, 0  ;;  %p176_p2 = scmp.eq.s32.totalorder %s767_s28, 1 }
   0x8   : > { %p181_p3 = scmp.ne.s32.totalorder %s692_s25, %s688_s24  ;;  %p182_p4 = scmp.eq.s32.totalorder %s519_s29, 1 }
   0x9   : > { %s782_s10 = scalar_select %p163_p1, %s696_s26, %s165_s8  }
   0xa   : > { %p786_p5 = por %p176_p2, %p175_p0  ;;  %p790_p6 = por %p182_p4, %p181_p3 }
   0xb   : > { %p522_p7 = scmp.ge.s32.totalorder %s700_s27, 1  ;;  %p247_p8 = scmp.lt.s32.totalorder %s700_s27, 3 }
   0xd   : > { %p248_p9 = pnand %p522_p7, %p247_p8 }
   0xe   : > { %p282_p10 = scmp.lt.s32.totalorder (!%p248_p9), %s767_s28, 1  ;;  %s277_s9 = sand.u32 (!%p248_p9), 1, %s692_s25  }
   0xf   : > { %251 = sbr.rel (%p248_p9) target bundleno = 716 (0x2cc), region = 44  ;;  %s824_s15 = sshll.u32 (!%p248_p9), %s277_s9, 3 }
  0x10   : > { %s279_s18 = scalar_lea.vmem (!%p248_p9), [#allocation2], %s824_s15  ;;  %p535_p11 = scmp.ne.s32.totalorder (!%p248_p9), %s767_s28, 0 }
  0x14   : > { %s798_s13 = scalar_select %p282_p10, %s767_s28, 1  ;;  %vm292_vm0 = vcmask 261120   ;;  %v702_v2 = vmov 32.0   ;;  %v543_v14 = vld [vmem:[%s885_s3 + $0x8] sm:$0xff]  ;;  %v542_v15 = vld [vmem:[%s885_s3] sm:$0xff]  ;;  %v703_v32 = vmov 0   ;;  %v381_v42 = vlaneseq }
  0x15   : > { %598 = vrcp.f32 %v702_v2  ;;  %362 = vmatpush.bf16.msra.mxu0 %v543_v14  ;;  %v595_v25 = vld [vmem:[%s883_s1] ss:$0 sm:$0xff]  ;;  %593 = vset.pattern.permute.xlu1 %v703_v32 }
  0x16   : > { %s524_s14 = sshll.u32 %s798_s13, 3  ;;  %v596_v28 = vld [vmem:[%s884_s2] ss:$0 sm:$0xff]  ;;  %594 = vset.pattern.permute.xlu0 %v703_v32  ;;  %v382_v43 = vand.u32 127, %v381_v42 }
  0x17   : > { %s285_s17 = scalar_lea.vmem %s882_s0, %s524_s14  ;;  %v597_v33 = vld [vmem:[%s886_s4] ss:$0 sm:$0xff]  ;;  %s289_s21 = scalar_lea.vmem %s887_s5, %s524_s14 }
  0x18   : > { %v291_v0 = vld [vmem:[%s285_s17] sm:$0xff] }
  0x19   : > { %v293_v1 = vsel %vm292_vm0, %v291_v0, 0.0  ;;  %363 = vmatpush.bf16.msra.mxu0 %v542_v15  ;;  %v370_v37 = vld [vmem:[%s289_s21] sm:$0xff] }
  0x1a   : > { %294 = vadd.xlane.f32.xlu0 %v293_v1 }
  0x1b   : > { %v599_v3 = vpop.eup %598 }
  0x1c   : > { %v297_v4 = vmul.f32 32.0, %v599_v3  ;;  %vm301_vm1 = vweird.f32 %v599_v3 }
  0x1e   : > { %v298_v5 = vsub.f32 1.0, %v297_v4 }
  0x20   : > { %v299_v6 = vmul.f32 %v599_v3, %v298_v5 }
  0x22   : > { %v300_v7 = vadd.f32 %v599_v3, %v299_v6 }
  0x24   : > { %v302_v8 = vsel %vm301_vm1, %v599_v3, %v300_v7 }
  0x8d   : > { %v295_v9 = vpop.xlane.xlu0 %294 }
  0x8e   : > { %v303_v10 = vmul.f32 %v302_v8, %v295_v9 }
  0x90   : > { %v304_v11 = vsub.f32 %v291_v0, %v303_v10 }
  0x92   : > { %v305_v12 = vmul.f32 %v304_v11, %v304_v11 }
  0x94   : > { %v306_v13 = vsel %vm292_vm0, %v305_v12, 0.0 }
  0x95   : > { %307 = vadd.xlane.f32.xlu0 %v306_v13 }
 0x108   : > { %v308_v16 = vpop.xlane.xlu0 %307 }
 0x109   : > { %v309_v17 = vmul.f32 %v308_v16, %v302_v8 }
 0x10b   : > { %v310_v18 = vadd.f32 1e-05, %v309_v17 }
 0x10d   : > { %600 = vrsqrt.f32 %v310_v18  ;;  %vm317_vm3 = vweird.f32 %v310_v18 }
 0x113   : > { %v601_v19 = vpop.eup %600 }
 0x114   : > { %v312_v20 = vmul.f32 %v601_v19, %v310_v18  ;;  %vm318_vm2 = vweird.f32 %v601_v19 }
 0x115   : > { %vm319_vm4 = vmor %vm317_vm3, %vm318_vm2 }
 0x116   : > { %v313_v21 = vmul.f32 %v601_v19, %v312_v20 }
 0x118   : > { %v314_v22 = vmul.f32 0.5, %v313_v21 }
 0x11a   : > { %v315_v23 = vsub.f32 1.5, %v314_v22 }
 0x11c   : > { %v316_v24 = vmul.f32 %v601_v19, %v315_v23 }
 0x11e   : > { %v320_v26 = vsel %vm319_vm4, %v601_v19, %v316_v24 }
 0x11f   : > { %v321_v27 = vmul.f32 %v320_v26, %v304_v11 }
 0x121   : > { %v326_v29 = vmul.f32 %v595_v25, %v321_v27 }
 0x123   : > { %v331_v30 = vadd.f32 %v596_v28, %v326_v29 }
 0x125   : > { %v332_v31 = vpack.c.bf16 %v331_v30, %v331_v30 }
 0x127   : > { %534 = vmatmul.msk.bf16.vlgmr.msra.gmra.mxu0 %vm292_vm0, %v332_v31 }
 0x1a4   : > { %v365_v34 = vpop.f32.mrf.mxu0 }
 0x1a5   : > { %v366_v35 = vadd.f32 %v597_v33, %v365_v34 }
 0x1a7   : > { %369 = vst [vmem:[%s279_s18] sm:$0xff] %v366_v35  ;;  %371 = vmax.xlane.f32.xlu1 %v366_v35 }
 0x1ac   : > { %v367_v36 = vpop.f32.mrf.mxu0 }
 0x1c0   : > { %384 = vperm.xlu1 %593, %v370_v37  }
 0x21a   : > { %v372_v38 = vpop.xlane.xlu1 %371 }
 0x21b   : > { %v373_v39 = vsub.f32 %v366_v35, %v372_v38 }
 0x21d   : > { %v374_v40 = vmul.f32 1.442695, %v373_v39 }
 0x21f   : > { %602 = vpow2.f32 %v374_v40 }
 0x225   : > { %v603_v41 = vpop.eup %602 }
 0x226   : > { %376 = vadd.xlane.f32.xlu2 %v603_v41 }
 0x232   : > { %v385_v44 = vpop.permute.xlu1 %384 }
 0x233   : > { %vm386_vm5 = vcmp.eq.s32.totalorder %v382_v43, %v385_v44 }
 0x234   : > { %v387_v45 = vsel %vm386_vm5, %v366_v35, 0.0 }
 0x235   : > { %388 = vadd.xlane.f32.xlu2 %v387_v45 }
 0x299   : > { %v377_v46 = vpop.xlane.xlu2 %376 }
 0x29a   : > { %604 = vlog2.f32 %v377_v46 }
 0x2a0   : > { %v605_v47 = vpop.eup %604 }
 0x2a1   : > { %v379_v48 = vmul.f32 0.6931472, %v605_v47 }
 0x2a3   : > { %v380_v49 = vadd.f32 %v379_v48, %v372_v38 }
 0x2a8   : > { %v389_v50 = vpop.xlane.xlu2 %388 }
 0x2a9   : > { %v390_v51 = vsub.f32 %v380_v49, %v389_v50 }
 0x2ab   : > { %v391_v52 = vrot.slane %v390_v51, 4 }
 0x2ad   : > { %v392_v53 = vadd.f32 %v391_v52, %v390_v51 }
 0x2af   : > { %v393_v54 = vrot.slane %v392_v53, 2 }
 0x2b1   : > { %v394_v55 = vadd.f32 %v393_v54, %v392_v53  ;;  %400 = sbr.rel (%p535_p11) target bundleno = 696 (0x2b8), region = 48 }
 0x2b3   : > { %v395_v56 = vrot.slane %v394_v55, 1 }
 0x2b5   : > { %v396_v57 = vadd.f32 %v395_v56, %v394_v55 }
 0x2b6   : > { %vm401_vm6 = vcmask 0   ;;  %v704_v58 = vmov 0.0  }
 0x2b7   : > { %402 = vst.msk [vmem:[#allocation4] sm:$0x1] %vm401_vm6, %v704_v58 }
 0x2b8 PF: > { %v404_v60 = vmul.f32 0.0625, %v396_v57  ;;  %s537_s13 = sshll.u32 %s767_s28, 3  ;;  %vm406_vm7 = vcmask 0   ;;  %s421_s29 = sshll.u32 %s279_s18, 4  ;;  %s422_s29 = int_to_ptr.vmem [resolvable:$true] %s421_s29 }
 0x2b9   : > { %s419_s23 = scalar_lea.hbm %s888_s6, %s537_s13  ;;  %s409_s16 = scalar_lea.sflag [#allocation3], %s277_s9 }
 0x2ba   : > { %s423_s8 = sshll.u32 %s419_s23, 4  ;;  %s626_s13 = scalar_lea.hbm %s888_s6, 16  ;;  %s424_s8 = int_to_ptr.hbm [resolvable:$true] %s423_s8 }
 0x2bb   : > { %s620_s17 = sshra.s32 %s424_s8, 4  ;;  %s621_s17 = int_to_ptr.hbm [resolvable:$true] %s620_s17 }
 0x2bc   : > { %s622_s19 = scalar_lea.hbm %s621_s17, 8  ;;  %p627_p1 = scmp.lt.s32.totalorder %s621_s17, %s888_s6 }
 0x2bd   : > { %p623_p12 = scmp.ne.s32.totalorder %s621_s17, %s622_s19  ;;  %p628_p3 = scmp.lt.s32.totalorder %s626_s13, %s622_s19 }
 0x2be   : > { %v403_v59 = vld [vmem:[#allocation4] sm:$0x1] }
 0x2bf   : > { %v405_v61 = vadd.f32 %v404_v60, %v403_v59  ;;  %p624_p13 = pnand %p623_p12, %p786_p5  ;;  %p629_p4 = por %p628_p3, %p627_p1 }
 0x2c1   : > { %407 = vst.msk [vmem:[#allocation4] sm:$0x1] %vm406_vm7, %v405_v61  ;;  %p625_p0 = pneg %p624_p13 }
 0x2c3   : > { %p630_p7 = pnand %p629_p4, %p625_p0 }
 0x2c5   : > { %633 = shalt.err (!%p630_p7)
}
 0x2c6   : > { %544 = dma.vmem_to_hbm [thread:$0]  (%p786_p5), %s422_s29, 128, %s424_s8, %s409_s16  }
 0x2c7   : > { %s435_s22 = sshll.u32 %s889_s7, 4  ;;  %s705_s23 = smov [#allocation4]   ;;  %s436_s22 = int_to_ptr.hbm [resolvable:$true] %s435_s22 }
 0x2c8   : > { %s433_s20 = sshll.u32 %s705_s23, 4  ;;  %s434_s20 = int_to_ptr.vmem [resolvable:$true] %s433_s20 }
 0x2c9   : > { %546 = dma.vmem_to_hbm [thread:$0]  (%p176_p2), %s434_s20, 16, %s436_s22, [#allocation5]  }
 0x2ca   : > { %679 = dma.done.wait (%p176_p2), [#allocation5], 16  }
 0x2cb   : > { %681 = vsyncadd (%p176_p2), [#allocation5], 4294967280 }
 0x2cc PF: > { %p556_p5 = scmp.ge.s32.totalorder %s700_s27, 2  ;;  %s452_s11 = sand.u32 1, %s688_s24  }
 0x2cd   : > { %s453_s29 = scalar_lea.sflag [#allocation3], %s452_s11 }
 0x2ce   : > { %p551_p8 = pnand %p556_p5, %p790_p6 }
 0x2d0   : > { %p552_p9 = pneg %p551_p8 }
 0x2d2   : > { %683 = dma.done.wait (%p552_p9), %s453_s29, 128  }
 0x2d3   : > { %685 = vsyncadd (%p552_p9), %s453_s29, 4294967168  ;;  %p19_p10 = scmp.ge.s32.totalorder %s771_s30, 4   ;;  %s892_s24 = smov %s692_s25 }
 0x2d4   : > { %s893_s25 = smov %s696_s26  ;;  %s894_s26 = smov %s782_s10 }
 0x2d5   : > { %s895_s27 = smov %s771_s30  ;;  %21 = sbr.rel (!%p19_p10) target bundleno = 4 (0x4), region = 94 }
 0x2da   :  { %459 = vsyncpa [#allocation3], 1 }
 0x2db   :  { %461 = vsyncpa [#allocation3 + $0x1], 1 }
 0x2dc   :  { %462 = vsyncpa [#allocation5], 1 }

// kernel: _lambda_.31
= control target key start
LH: loop header
LB: loop body
LE: loop exit
PB: predicated region body
PF: predicated region fallthrough
CT: control target
= control target key end

     0   :  { %16 = vsyncpa [#allocation3], 0  ;;  %s1562_s0 = inlined_call_operand.vmem [shape: f32[2,8,32], index: 0, kind: input, shape index: {}]   ;;  %s1563_s1 = inlined_call_operand.vmem [shape: f32[2,8,32], index: 1, kind: input, shape index: {}]   ;;  %s1564_s2 = inlined_call_operand.vmem [shape: f32[1,32], index: 2, kind: input, shape index: {}]   ;;  %s1565_s3 = inlined_call_operand.hbm [shape: f32[1,32], index: 3, kind: input, shape index: {}]   ;;  %s1566_s4 = inlined_call_operand.vmem [shape: bf16[32,32], index: 4, kind: input, shape index: {}]   ;;  %s1567_s5 = inlined_call_operand.hbm [shape: f32[1,32], index: 5, kind: input, shape index: {}]   ;;  %s1568_s6 = inlined_call_operand.vmem [shape: bf16[32,64], index: 6, kind: input, shape index: {}]   ;;  %s1569_s7 = inlined_call_operand.hbm [shape: f32[1,64], index: 7, kind: input, shape index: {}]   ;;  %s1570_s8 = inlined_call_operand.vmem [shape: f32[32,32], index: 8, kind: input, shape index: {}]   ;;  %s1571_s9 = inlined_call_operand.hbm [shape: f32[1,32], index: 9, kind: input, shape index: {}]   ;;  %s1572_s10 = inlined_call_operand.vmem [shape: f32[2,1,8], index: 10, kind: input, shape index: {}]   ;;  %s1573_s11 = inlined_call_operand.vmem [shape: f32[2,8,32], index: 11, kind: output, shape index: {}]  }
   0x1   :  { %17 = vsyncpa [#allocation5], 0 }
   0x2   :  { %18 = vsyncpa [#allocation8], 0  ;;  %s1386_s17 = smov 0  }
   0x3 LB: > { %s331_s20 = sshll.u32 %s1567_s5, 4  ;;  %s1395_s21 = sadd.s32 4294967295, %s1312_s17   ;;  %s1312_s17 = sphi %s1386_s17, %s24_s17   ;;  %s332_s20 = int_to_ptr.hbm [resolvable:$true] %s331_s20 }
   0x4   : > { %p1041_p0 = scmp.ge.s32.totalorder %s1312_s17, 1  ;;  %p301_p1 = scmp.lt.s32.totalorder %s1312_s17, 3 }
   0x5   : > { %p1120_p2 = scmp.eq.s32.totalorder %s1395_s21, 0  ;;  %s1314_s23 = smov [#allocation4]  }
   0x6   : > { %p1400_p3 = pnand %p1041_p0, %p301_p1  ;;  %s333_s24 = sshll.u32 %s1314_s23, 4  ;;  %s334_s24 = int_to_ptr.vmem [resolvable:$true] %s333_s24 }
   0x7   : > { %s316_s27 = sshll.u32 %s1565_s3, 4  ;;  %s346_s30 = sshll.u32 %s1569_s7, 4  ;;  %s317_s27 = int_to_ptr.hbm [resolvable:$true] %s316_s27  ;;  %s347_s30 = int_to_ptr.hbm [resolvable:$true] %s346_s30 }
   0x8   : > { %p1107_p4 = pneg %p1400_p3  ;;  %s1315_s13 = smov [#allocation2]  }
   0x9   : > { %s318_s14 = sshll.u32 %s1315_s13, 4  ;;  %s1316_s15 = smov [#allocation6]   ;;  %s319_s14 = int_to_ptr.vmem [resolvable:$true] %s318_s14 }
   0xa   : > { %p1414_p5 = pnand %p1120_p2, %p1107_p4  ;;  %s348_s16 = sshll.u32 %s1316_s15, 4  ;;  %s349_s16 = int_to_ptr.vmem [resolvable:$true] %s348_s16 }
   0xb   : > { %s361_s23 = sshll.u32 %s1571_s9, 4  ;;  %s1317_s25 = smov [#allocation7]   ;;  %s362_s23 = int_to_ptr.hbm [resolvable:$true] %s361_s23 }
   0xc   : > { %1113 = dma.hbm_to_vmem [thread:$0]  (!%p1414_p5), %s332_s20, 16, %s334_s24, [#allocation5]  }
   0xd   : > { %1110 = dma.hbm_to_vmem [thread:$0]  (!%p1414_p5), %s317_s27, 16, %s319_s14, [#allocation3]  }
   0xe   : > { %1116 = dma.hbm_to_vmem [thread:$0]  (!%p1414_p5), %s347_s30, 16, %s349_s16, [#allocation5]  }
   0xf   : > { %s363_s26 = sshll.u32 %s1317_s25, 4  ;;  %396 = sbr.rel (%p1400_p3) target bundleno = 1651 (0x673), region = 64  ;;  %s364_s26 = int_to_ptr.vmem [resolvable:$true] %s363_s26 }
  0x10   : > { %1119 = dma.hbm_to_vmem [thread:$0]  (!%p1414_p5), %s362_s23, 16, %s364_s26, [#allocation8]  }
  0x14   : > { %1299 = dma.done.wait (%p1120_p2), [#allocation3], 16  }
  0x15   : > { %1301 = vsyncadd (%p1120_p2), [#allocation3], 4294967280 }
  0x16   : > { %1303 = dma.done.wait (%p1120_p2), [#allocation5], 32  }
  0x17   : > { %1305 = vsyncadd (%p1120_p2), [#allocation5], 4294967264 }
  0x18   : > { %1307 = dma.done.wait (%p1120_p2), [#allocation8], 16  }
  0x19   : > { %1309 = vsyncadd (%p1120_p2), [#allocation8], 4294967280  ;;  %p457_p6 = scmp.lt.s32.totalorder %s1395_s21, 1  ;;  %vm476_vm0 = vcmask 261120   ;;  %v1318_v2 = vmov 32.0   ;;  %v1090_v3 = vld [vmem:[%s1568_s6 + $0x8] sm:$0xff] }
  0x1a   : > { %1154 = vrcp.f32 %v1318_v2  ;;  %582 = vmatpush.bf16.msra.mxu1 %v1090_v3  ;;  %v1089_v15 = vld [vmem:[%s1568_s6] sm:$0xff]  ;;  %v1088_v18 = vld [vmem:[%s1566_s4 + $0x8] sm:$0xff]  ;;  %vm592_vm5 = vcmask 64512   ;;  %s1319_s28 = smov 96   ;;  %s1320_s29 = smov 120   ;;  %vm635_vm6 = vcmask 1043456  }
  0x1b   : > { %s1577_s21 = smov (!%p457_p6, %s1395_s21), 1  ;;  %544 = vmatpush.bf16.msra.mxu0 %v1088_v18  ;;  %v1087_v19 = vld [vmem:[%s1566_s4] sm:$0xff]  ;;  %s1321_s12 = smov 112  }
  0x1c   : > { %s1448_s20 = sshll.u32 %s1577_s21, 3  ;;  %s467_s30 = scalar_lea.vmem %s1572_s10, %s1577_s21  ;;  %v1148_v29 = vld [vmem:[%s1564_s2] ss:$0 sm:$0xff]  ;;  %v1150_v36 = vld [vmem:[#allocation6] ss:$0 sm:$0xff] }
  0x1d   : > { %s460_s27 = scalar_lea.vmem %s1562_s0, %s1448_s20  ;;  %s464_s16 = scalar_lea.vmem %s1563_s1, %s1448_s20  ;;  %v1149_v32 = vld [vmem:[#allocation2] ss:$0 sm:$0xff]  ;;  %v1151_v42 = vld [vmem:[#allocation4] ss:$0 sm:$0xff] }
  0x1e   : > { %v1454_v0 = vld [vmem:[%s460_s27] sm:$0xff]  ;;  %583 = vmatpush.bf16.msra.mxu1 %v1089_v15  ;;  %s1322_s13 = smov 104   ;;  %s1324_s18 = smov 80  }
  0x1f   : > { %v477_v1 = vsel %vm476_vm0, %v1454_v0, 0.0  ;;  %v551_v16 = vld [vmem:[%s464_s16] sm:$0xff]  ;;  %545 = vmatpush.bf16.msra.mxu0 %v1087_v19  ;;  %s1323_s16 = smov 88   ;;  %s1325_s19 = smov 72  }
  0x20   : > { %478 = vadd.xlane.f32.xlu0 %v477_v1  ;;  %v1155_v4 = vpop.eup %1154  ;;  %v552_v17 = vpack.c.bf16 %v551_v16, %v551_v16  ;;  %v1500_v51 = vld [vmem:[%s467_s30] ss:$0 sm:$0xff] }
  0x21   : > { %v481_v5 = vmul.f32 32.0, %v1155_v4  ;;  %vm485_vm1 = vweird.f32 %v1155_v4  ;;  %v652_v62 = vld [vmem:[%s1570_s8] sm:$0xff] }
  0x22   : > { %1072 = vmatmul.msk.bf16.vlgmr.msra.gmra.mxu1 %vm476_vm0, %v552_v17  ;;  %v653_v63 = vpack.c.bf16 %v652_v62, %v652_v62 }
  0x23   : > { %v482_v6 = vsub.f32 1.0, %v481_v5 }
  0x24   : > { %v740_v1 = vsel %vm635_vm6, %v653_v63, 0 }
  0x25   : > { %v483_v7 = vmul.f32 %v1155_v4, %v482_v6 }
  0x27   : > { %v484_v8 = vadd.f32 %v1155_v4, %v483_v7 }
  0x29   : > { %v486_v9 = vsel %vm485_vm1, %v1155_v4, %v484_v8 }
  0x93   : > { %v479_v10 = vpop.xlane.xlu0 %478 }
  0x94   : > { %v487_v11 = vmul.f32 %v486_v9, %v479_v10 }
  0x96   : > { %v488_v12 = vsub.f32 %v1454_v0, %v487_v11 }
  0x98   : > { %v489_v13 = vmul.f32 %v488_v12, %v488_v12 }
  0x9a   : > { %v490_v14 = vsel %vm476_vm0, %v489_v13, 0.0 }
  0x9b   : > { %491 = vadd.xlane.f32.xlu0 %v490_v14 }
  0x9f   : > { %v585_v37 = vpop.f32.mrf.mxu1 }
  0xa0   : > { %v586_v38 = vadd.f32 %v1150_v36, %v585_v37 }
  0xa2   : > { %v1485_v39 = vpack.c.bf16 %v586_v38, %v586_v38 }
  0xa4   : > { %630 = vrot.lane.b32.xlu2 %v1485_v39, %s1319_s28  ;;  %v597_v40 = vsel %vm592_vm5, %v1485_v39, 0 }
  0xa5   : > { %606 = vmatpush.bf16.xpose.msra.mxu2 %v597_v40 }
  0xa7   : > { %v587_v41 = vpop.f32.mrf.mxu1 }
  0xac   : > { %658 = vrot.lane.b32.xlu2 %v1485_v39, %s1320_s29 }
  0xad   : > { %749 = vmatpush.bf16.msrb.mxu2 %v740_v1  ;;  %v813_v1 = vld [vmem:[%s1570_s8 + $0x10] sm:$0xff] }
  0xb4   : > { %757 = vrot.lane.b32.xlu2 %v1485_v39, %s1321_s12 }
  0xfe   : > { %v631_v47 = vpop.permute.xlu2 %630 }
  0xff   : > { %v637_v48 = vsel %vm635_vm6, %v631_v47, 0 }
 0x100   : > { %646 = vmatpush.bf16.msra.mxu3 %v637_v48 }
 0x106   : > { %v659_v49 = vpop.permute.xlu2 %658 }
 0x107   : > { %v664_v50 = vsel %vm592_vm5, %v659_v49, 0 }
 0x108   : > { %673 = vmatpush.bf16.xpose.msrb.mxu3 %v664_v50 }
 0x10e   : > { %v492_v20 = vpop.xlane.xlu0 %491  ;;  %v758_v5 = vpop.permute.xlu2 %757 }
 0x10f   : > { %v493_v21 = vmul.f32 %v492_v20, %v486_v9  ;;  %v763_v7 = vsel %vm592_vm5, %v758_v5, 0 }
 0x111   : > { %v494_v22 = vadd.f32 1e-05, %v493_v21 }
 0x113   : > { %1156 = vrsqrt.f32 %v494_v22  ;;  %vm501_vm3 = vweird.f32 %v494_v22 }
 0x119   : > { %v1157_v23 = vpop.eup %1156 }
 0x11a   : > { %v496_v24 = vmul.f32 %v1157_v23, %v494_v22  ;;  %vm502_vm2 = vweird.f32 %v1157_v23 }
 0x11b   : > { %vm503_vm4 = vmor %vm501_vm3, %vm502_vm2 }
 0x11c   : > { %v497_v25 = vmul.f32 %v1157_v23, %v496_v24 }
 0x11e   : > { %v498_v26 = vmul.f32 0.5, %v497_v25 }
 0x120   : > { %v499_v27 = vsub.f32 1.5, %v498_v26 }
 0x122   : > { %v500_v28 = vmul.f32 %v1157_v23, %v499_v27 }
 0x124   : > { %v504_v30 = vsel %vm503_vm4, %v1157_v23, %v500_v28 }
 0x125   : > { %v505_v31 = vmul.f32 %v504_v30, %v488_v12 }
 0x127   : > { %v509_v33 = vmul.f32 %v1148_v29, %v505_v31 }
 0x129   : > { %v513_v34 = vadd.f32 %v1149_v32, %v509_v33 }
 0x12b   : > { %v514_v35 = vpack.c.bf16 %v513_v34, %v513_v34 }
 0x12d   : > { %1063 = vmatmul.msk.bf16.vlgmr.msra.gmra.mxu0 %vm476_vm0, %v514_v35 }
 0x1aa   : > { %v547_v43 = vpop.f32.mrf.mxu0 }
 0x1ab   : > { %v548_v44 = vadd.f32 %v1151_v42, %v547_v43 }
 0x1ad   : > { %v590_v45 = vpack.c.bf16 %v548_v44, %v548_v44 }
 0x1af   : > { %836 = vrot.lane.b32.xlu2 %v590_v45, %s1322_s13  ;;  %656 = vrot.lane.b32.xlu0 %v590_v45, %s1320_s29 }
 0x1b0   : > { %1073 = vmatmul.msk.bf16.vlgmr.msra.gmra.mxu2 %vm592_vm5, %v590_v45 }
 0x1b2   : > { %v549_v46 = vpop.f32.mrf.mxu0 }
 0x1b7   : > { %755 = vrot.lane.b32.xlu2 %v590_v45, %s1321_s12  ;;  %s471_s12 = scalar_lea.vmem %s1573_s11, %s1448_s20 }
 0x209   : > { %v837_v11 = vpop.permute.xlu2 %836 }
 0x211   : > { %v756_v12 = vpop.permute.xlu2 %755 }
 0x221   : > { %v657_v10 = vpop.permute.xlu0 %656 }
 0x233   : > { %v608_v52 = vpop.f32.mrf.mxu2 }
 0x234   : > { %v612_v53 = vmul.f32 0.35355338, %v608_v52 }
 0x236   : > { %v616_v54 = vadd.f32 %v1500_v51, %v612_v53 }
 0x238   : > { %v617_v55 = vsel %vm592_vm5, %v616_v54, -inf }
 0x239   : > { %618 = vmax.xlane.f32.xlu1 %v617_v55 }
 0x23b   : > { %v610_v56 = vpop.f32.mrf.mxu2 }
 0x2ac   : > { %v619_v57 = vpop.xlane.xlu1 %618 }
 0x2ad   : > { %v620_v58 = vsub.f32 %v616_v54, %v619_v57 }
 0x2af   : > { %v621_v59 = vmul.f32 1.442695, %v620_v58 }
 0x2b1   : > { %1158 = vpow2.f32 %v621_v59 }
 0x2b7   : > { %v1159_v60 = vpop.eup %1158 }
 0x2b8   : > { %v623_v61 = vsel %vm592_vm5, %v1159_v60, 0.0 }
 0x2b9   : > { %624 = vadd.xlane.f32.xlu1 %v623_v61  ;;  %v714_v61 = vld [vmem:[%s1570_s8 + $0x8] sm:$0xff] }
 0x2ba   : > { %v715_v62 = vpack.c.bf16 %v714_v61, %v714_v61 }
 0x2bc   : > { %v721_v63 = vsel %vm635_vm6, %v715_v62, 0 }
 0x2bd   : > { %730 = vmatpush.bf16.msrb.mxu1 %v721_v63 }
 0x2d2   : > { %838 = vrot.lane.b32.xlu1 %v1485_v39, %s1322_s13 }
 0x32c   : > { %v625_v2 = vpop.xlane.xlu1 %624 }
 0x32d   : > { %1160 = vrcp.f32 %v625_v2  ;;  %v814_v2 = vpack.c.bf16 %v813_v1, %v813_v1 }
 0x333   : > { %v1161_v3 = vpop.eup %1160 }
 0x334   : > { %v627_v4 = vmul.f32 %v1161_v3, %v1159_v60  ;;  %v820_v3 = vsel %vm635_vm6, %v814_v2, 0 }
 0x335   : > { %829 = vmatpush.bf16.msra.mxu1 %v820_v3 }
 0x336   : > { %v628_v6 = vpack.c.bf16 %v627_v4, %v627_v4 }
 0x338   : > { %1074 = vmatmul.msk.bf16.vlgmr.msra.gmra.mxu3 %vm592_vm5, %v628_v6 }
 0x339   : > { %772 = vmatpush.bf16.xpose.msra.mxu3 %v763_v7 }
 0x344   : > { %v839_v8 = vpop.permute.xlu1 %838 }
 0x345   : > { %v844_v9 = vsel %vm592_vm5, %v839_v8, 0 }
 0x346   : > { %853 = vmatpush.bf16.xpose.msra.mxu2 %v844_v9 }
 0x348   : > { %1075 = vmatmul.msk.bf16.vlgmr.msrb.gmra.mxu3 %vm592_vm5, %v657_v10 }
 0x358   : > { %1079 = vmatmul.msk.bf16.vlgmr.msra.gmra.mxu3 %vm592_vm5, %v756_v12 }
 0x3bb   : > { %v648_v13 = vpop.f32.mrf.mxu3 }
 0x3bc   : > { %v654_v14 = vpack.c.bf16 %v648_v13, %v648_v13 }
 0x3be   : > { %1078 = vmatmul.msk.bf16.vlgmr.msrb.gmra.mxu2 %vm592_vm5, %v654_v14 }
 0x3c3   : > { %v650_v15 = vpop.f32.mrf.mxu3 }
 0x3c4   : > { %v894_v15 = vld [vmem:[%s1570_s8 + $0x18] sm:$0xff] }
 0x3cb   : > { %v675_v16 = vpop.f32.mrf.mxu3 }
 0x3cc   : > { %v679_v17 = vmul.f32 0.35355338, %v675_v16  ;;  %v895_v16 = vpack.c.bf16 %v894_v15, %v894_v15 }
 0x3ce   : > { %1082 = vmatmul.msk.bf16.vlgmr.msra.gmra.mxu2 %vm592_vm5, %v837_v11  ;;  %v680_v18 = vadd.f32 %v1500_v51, %v679_v17  ;;  %v901_v17 = vsel %vm635_vm6, %v895_v16, 0 }
 0x3d0   : > { %v681_v19 = vsel %vm592_vm5, %v680_v18, -inf }
 0x3d1   : > { %682 = vmax.xlane.f32.xlu0 %v681_v19 }
 0x3d3   : > { %v677_v20 = vpop.f32.mrf.mxu3 }
 0x3db   : > { %v774_v21 = vpop.f32.mrf.mxu3 }
 0x3dc   : > { %v778_v22 = vmul.f32 0.35355338, %v774_v21 }
 0x3de   : > { %v779_v23 = vadd.f32 %v1500_v51, %v778_v22 }
 0x3e0   : > { %v780_v24 = vsel %vm592_vm5, %v779_v23, -inf }
 0x3e1   : > { %781 = vmax.xlane.f32.xlu1 %v780_v24 }
 0x3e3   : > { %v776_v25 = vpop.f32.mrf.mxu3 }
 0x441   : > { %v1521_v26 = vpop.f32.mrf.mxu2 }
 0x444   : > { %v683_v27 = vpop.xlane.xlu0 %682 }
 0x445   : > { %v684_v28 = vsub.f32 %v680_v18, %v683_v27 }
 0x447   : > { %v685_v29 = vmul.f32 1.442695, %v684_v28 }
 0x449   : > { %1162 = vpow2.f32 %v685_v29  ;;  %v753_v30 = vpop.f32.mrf.mxu2 }
 0x44a   : > { %v1153_v30 = vld [vmem:[#allocation7] ss:$0 sm:$0xff] }
 0x44f   : > { %v1163_v31 = vpop.eup %1162 }
 0x450   : > { %v687_v32 = vsel %vm592_vm5, %v1163_v31, 0.0 }
 0x451   : > { %688 = vadd.xlane.f32.xlu0 %v687_v32  ;;  %v855_v33 = vpop.f32.mrf.mxu2 }
 0x452   : > { %v859_v34 = vmul.f32 0.35355338, %v855_v33 }
 0x454   : > { %v782_v35 = vpop.xlane.xlu1 %781  ;;  %v860_v36 = vadd.f32 %v1500_v51, %v859_v34 }
 0x455   : > { %v783_v37 = vsub.f32 %v779_v23, %v782_v35 }
 0x456   : > { %v861_v38 = vsel %vm592_vm5, %v860_v36, -inf }
 0x457   : > { %v784_v40 = vmul.f32 1.442695, %v783_v37  ;;  %862 = vmax.xlane.f32.xlu2 %v861_v38 }
 0x459   : > { %1164 = vpow2.f32 %v784_v40  ;;  %v857_v41 = vpop.f32.mrf.mxu2 }
 0x45f   : > { %v1165_v42 = vpop.eup %1164 }
 0x460   : > { %v786_v43 = vsel %vm592_vm5, %v1165_v42, 0.0 }
 0x461   : > { %787 = vadd.xlane.f32.xlu0 %v786_v43 }
 0x46f   : > { %693 = vrot.lane.b32.xlu2 %v1485_v39, %s1323_s16 }
 0x475   : > { %792 = vrot.lane.b32.xlu0 %v1485_v39, %s1324_s18 }
 0x4c4   : > { %v689_v44 = vpop.xlane.xlu0 %688 }
 0x4c5   : > { %1166 = vrcp.f32 %v689_v44 }
 0x4ca   : > { %v863_v45 = vpop.xlane.xlu2 %862 }
 0x4cb   : > { %v864_v46 = vsub.f32 %v860_v36, %v863_v45  ;;  %v1167_v48 = vpop.eup %1166 }
 0x4cc   : > { %v691_v49 = vmul.f32 %v1167_v48, %v1163_v31 }
 0x4cd   : > { %v865_v47 = vmul.f32 1.442695, %v864_v46 }
 0x4ce   : > { %v692_v53 = vpack.c.bf16 %v691_v49, %v691_v49 }
 0x4cf   : > { %1168 = vpow2.f32 %v865_v47 }
 0x4d2   : > { %v694_v50 = vpop.permute.xlu2 %693 }
 0x4d3   : > { %v699_v51 = vsel %vm635_vm6, %v694_v50, 0 }
 0x4d4   : > { %708 = vmatpush.bf16.msrb.mxu0 %v699_v51  ;;  %v788_v55 = vpop.xlane.xlu0 %787 }
 0x4d5   : > { %v1169_v52 = vpop.eup %1168  ;;  %1170 = vrcp.f32 %v788_v55 }
 0x4d6   : > { %v867_v54 = vsel %vm592_vm5, %v1169_v52, 0.0 }
 0x4d7   : > { %868 = vadd.xlane.f32.xlu1 %v867_v54  ;;  %1076 = vmatmul.msk.bf16.vlgmr.msrb.gmra.mxu0 %vm592_vm5, %v692_v53 }
 0x4db   : > { %v1171_v56 = vpop.eup %1170 }
 0x4dc   : > { %v790_v57 = vmul.f32 %v1171_v56, %v1165_v42 }
 0x4de   : > { %v791_v60 = vpack.c.bf16 %v790_v57, %v790_v57 }
 0x4e7   : > { %v793_v58 = vpop.permute.xlu0 %792 }
 0x4e8   : > { %v798_v59 = vsel %vm635_vm6, %v793_v58, 0 }
 0x4e9   : > { %807 = vmatpush.bf16.msra.mxu0 %v798_v59 }
 0x4ec   : > { %1080 = vmatmul.msk.bf16.vlgmr.msra.gmra.mxu0 %vm592_vm5, %v791_v60 }
 0x4ed   : > { %910 = vmatpush.bf16.msrb.mxu0 %v901_v17 }
 0x4f0   : > { %873 = vrot.lane.b32.xlu1 %v1485_v39, %s1325_s19 }
 0x54a   : > { %v869_v5 = vpop.xlane.xlu1 %868 }
 0x54b   : > { %1172 = vrcp.f32 %v869_v5 }
 0x551   : > { %v1173_v7 = vpop.eup %1172 }
 0x552   : > { %v871_v8 = vmul.f32 %v1173_v7, %v1169_v52 }
 0x554   : > { %v710_v4 = vpop.f32.mrf.mxu0  ;;  %v872_v11 = vpack.c.bf16 %v871_v8, %v871_v8 }
 0x555   : > { %v716_v6 = vpack.c.bf16 %v710_v4, %v710_v4 }
 0x557   : > { %1077 = vmatmul.msk.bf16.vlgmr.msrb.gmra.mxu1 %vm592_vm5, %v716_v6 }
 0x55c   : > { %v712_v39 = vpop.f32.mrf.mxu0 }
 0x562   : > { %v874_v9 = vpop.permute.xlu1 %873 }
 0x563   : > { %v879_v10 = vsel %vm635_vm6, %v874_v9, 0 }
 0x564   : > { %888 = vmatpush.bf16.msrb.mxu3 %v879_v10 }
 0x567   : > { %1083 = vmatmul.msk.bf16.vlgmr.msrb.gmra.mxu3 %vm592_vm5, %v872_v11 }
 0x569   : > { %v809_v12 = vpop.f32.mrf.mxu0 }
 0x56a   : > { %v815_v13 = vpack.c.bf16 %v809_v12, %v809_v12 }
 0x56c   : > { %1081 = vmatmul.msk.bf16.vlgmr.msra.gmra.mxu1 %vm592_vm5, %v815_v13 }
 0x571   : > { %v811_v14 = vpop.f32.mrf.mxu0 }
 0x5d4   : > { %v732_v18 = vpop.f32.mrf.mxu1 }
 0x5d5   : > { %v752_v20 = vadd.f32 %v1521_v26, %v732_v18 }
 0x5dc   : > { %v734_v19 = vpop.f32.mrf.mxu1 }
 0x5e9   : > { %v831_v21 = vpop.f32.mrf.mxu1 }
 0x5ea   : > { %v835_v22 = vadd.f32 %v831_v21, %v752_v20  ;;  %v890_v23 = vpop.f32.mrf.mxu3 }
 0x5eb   : > { %v896_v24 = vpack.c.bf16 %v890_v23, %v890_v23 }
 0x5ed   : > { %1084 = vmatmul.msk.bf16.vlgmr.msrb.gmra.mxu0 %vm592_vm5, %v896_v24 }
 0x5f1   : > { %v833_v25 = vpop.f32.mrf.mxu1 }
 0x5f2   : > { %v892_v27 = vpop.f32.mrf.mxu3 }
 0x66a   : > { %v912_v28 = vpop.f32.mrf.mxu0 }
 0x66b   : > { %v916_v29 = vadd.f32 %v912_v28, %v835_v22 }
 0x66d   : > { %v917_v31 = vadd.f32 %v916_v29, %v1454_v0 }
 0x66f   : > { %v922_v32 = vadd.f32 %v1153_v30, %v917_v31 }
 0x671   : > { %923 = vst.msk [vmem:[%s471_s12] sm:$0xff] %vm476_vm0, %v922_v32 }
 0x672   : > { %v914_v26 = vpop.f32.mrf.mxu0 }
 0x673 PF: > { %s24_s17 = sadd.s32 1, %s1312_s17  }
 0x674   : > { %p21_p7 = scmp.ge.s32.totalorder %s24_s17, 4  }
 0x676   :  { %23 = sbr.rel (!%p21_p7) target bundleno = 3 (0x3), region = 117 }
 0x67b   :  { %943 = vsyncpa [#allocation3], 1 }
 0x67c   :  { %945 = vsyncpa [#allocation3 + $0x1], 1 }
 0x67d   :  { %946 = vsyncpa [#allocation5], 1 }
 0x67e   :  { %947 = vsyncpa [#allocation8], 1 }

// kernel: _lambda_.33
= control target key start
LH: loop header
LB: loop body
LE: loop exit
PB: predicated region body
PF: predicated region fallthrough
CT: control target
= control target key end

     0   :  { %16 = vsyncpa [#allocation3], 0  ;;  %s1519_s0 = inlined_call_operand.vmem [shape: f32[2,8,32], index: 0, kind: input, shape index: {}, may-alias: {0,1}]   ;;  %s1520_s1 = inlined_call_operand.vmem [shape: f32[2,8,32], index: 1, kind: input, shape index: {}, may-alias: {0,1}]   ;;  %s1521_s2 = inlined_call_operand.vmem [shape: f32[1,32], index: 2, kind: input, shape index: {}]   ;;  %s1522_s3 = inlined_call_operand.hbm [shape: f32[1,32], index: 3, kind: input, shape index: {}]   ;;  %s1523_s4 = inlined_call_operand.vmem [shape: bf16[32,32], index: 4, kind: input, shape index: {}]   ;;  %s1524_s5 = inlined_call_operand.hbm [shape: f32[1,32], index: 5, kind: input, shape index: {}]   ;;  %s1525_s6 = inlined_call_operand.vmem [shape: bf16[32,64], index: 6, kind: input, shape index: {}]   ;;  %s1526_s7 = inlined_call_operand.hbm [shape: f32[1,64], index: 7, kind: input, shape index: {}]   ;;  %s1527_s8 = inlined_call_operand.vmem [shape: f32[32,32], index: 8, kind: input, shape index: {}]   ;;  %s1528_s9 = inlined_call_operand.hbm [shape: f32[1,32], index: 9, kind: input, shape index: {}]   ;;  %s1529_s10 = inlined_call_operand.vmem [shape: f32[1,8,8], index: 10, kind: input, shape index: {}]   ;;  %s1530_s11 = inlined_call_operand.vmem [shape: f32[2,8,32], index: 11, kind: output, shape index: {}]  }
   0x1   :  { %17 = vsyncpa [#allocation5], 0 }
   0x2   :  { %18 = vsyncpa [#allocation8], 0  ;;  %s1353_s16 = smov 0  }
   0x3 LB: > { %s326_s19 = sshll.u32 %s1524_s5, 4  ;;  %s1362_s20 = sadd.s32 4294967295, %s1279_s16   ;;  %s1279_s16 = sphi %s1353_s16, %s24_s16   ;;  %s327_s19 = int_to_ptr.hbm [resolvable:$true] %s326_s19 }
   0x4   : > { %p1010_p0 = scmp.ge.s32.totalorder %s1279_s16, 1  ;;  %p296_p1 = scmp.lt.s32.totalorder %s1279_s16, 3 }
   0x5   : > { %p1088_p2 = scmp.eq.s32.totalorder %s1362_s20, 0  ;;  %s1281_s22 = smov [#allocation4]  }
   0x6   : > { %p1367_p3 = pnand %p1010_p0, %p296_p1  ;;  %s328_s23 = sshll.u32 %s1281_s22, 4  ;;  %s329_s23 = int_to_ptr.vmem [resolvable:$true] %s328_s23 }
   0x7   : > { %s311_s26 = sshll.u32 %s1522_s3, 4  ;;  %s341_s1 = sshll.u32 %s1526_s7, 4  ;;  %s312_s26 = int_to_ptr.hbm [resolvable:$true] %s311_s26  ;;  %s342_s1 = int_to_ptr.hbm [resolvable:$true] %s341_s1 }
   0x8   : > { %p1075_p4 = pneg %p1367_p3  ;;  %s1282_s30 = smov [#allocation2]  }
   0x9   : > { %s313_s12 = sshll.u32 %s1282_s30, 4  ;;  %s1283_s13 = smov [#allocation6]   ;;  %s314_s12 = int_to_ptr.vmem [resolvable:$true] %s313_s12 }
   0xa   : > { %p1381_p5 = pnand %p1088_p2, %p1075_p4  ;;  %s343_s14 = sshll.u32 %s1283_s13, 4  ;;  %s344_s14 = int_to_ptr.vmem [resolvable:$true] %s343_s14 }
   0xb   : > { %s356_s18 = sshll.u32 %s1528_s9, 4  ;;  %s1284_s22 = smov [#allocation7]   ;;  %s357_s18 = int_to_ptr.hbm [resolvable:$true] %s356_s18 }
   0xc   : > { %1081 = dma.hbm_to_vmem [thread:$0]  (!%p1381_p5), %s327_s19, 16, %s329_s23, [#allocation5]  }
   0xd   : > { %1078 = dma.hbm_to_vmem [thread:$0]  (!%p1381_p5), %s312_s26, 16, %s314_s12, [#allocation3]  }
   0xe   : > { %1084 = dma.hbm_to_vmem [thread:$0]  (!%p1381_p5), %s342_s1, 16, %s344_s14, [#allocation5]  }
   0xf   : > { %s358_s24 = sshll.u32 %s1284_s22, 4  ;;  %388 = sbr.rel (%p1367_p3) target bundleno = 1658 (0x67a), region = 64  ;;  %s359_s24 = int_to_ptr.vmem [resolvable:$true] %s358_s24 }
  0x10   : > { %1087 = dma.hbm_to_vmem [thread:$0]  (!%p1381_p5), %s357_s18, 16, %s359_s24, [#allocation8]  }
  0x14   : > { %1266 = dma.done.wait (%p1088_p2), [#allocation3], 16  }
  0x15   : > { %1268 = vsyncadd (%p1088_p2), [#allocation3], 4294967280 }
  0x16   : > { %1270 = dma.done.wait (%p1088_p2), [#allocation5], 32  }
  0x17   : > { %1272 = vsyncadd (%p1088_p2), [#allocation5], 4294967264 }
  0x18   : > { %1274 = dma.done.wait (%p1088_p2), [#allocation8], 16  }
  0x19   : > { %1276 = vsyncadd (%p1088_p2), [#allocation8], 4294967280  ;;  %p446_p6 = scmp.lt.s32.totalorder %s1362_s20, 1  ;;  %vm462_vm0 = vcmask 261120   ;;  %v1285_v2 = vmov 32.0   ;;  %v1056_v14 = vld [vmem:[%s1523_s4 + $0x8] sm:$0xff] }
  0x1a   : > { %1121 = vrcp.f32 %v1285_v2  ;;  %v1058_v15 = vld [vmem:[%s1525_s6 + $0x8] sm:$0xff]  ;;  %530 = vmatpush.bf16.msra.mxu0 %v1056_v14  ;;  %v1055_v16 = vld [vmem:[%s1523_s4] sm:$0xff]  ;;  %vm573_vm5 = vcmask 64512   ;;  %s1286_s17 = smov 96   ;;  %s1287_s18 = smov 120   ;;  %vm613_vm6 = vcmask 1043456  }
  0x1b   : > { %s1534_s20 = smov (!%p446_p6, %s1362_s20), 1  ;;  %563 = vmatpush.bf16.msra.mxu1 %v1058_v15  ;;  %v1057_v17 = vld [vmem:[%s1525_s6] sm:$0xff]  ;;  %s1288_s22 = smov 112  }
  0x1c   : > { %s1021_s19 = sshll.u32 %s1534_s20, 3  ;;  %v1116_v27 = vld [vmem:[%s1521_s2] ss:$0 sm:$0xff]  ;;  %v1118_v34 = vld [vmem:[#allocation4] ss:$0 sm:$0xff]  ;;  %s1289_s24 = smov 104  }
  0x1d   : > { %s449_s25 = scalar_lea.vmem %s1519_s0, %s1021_s19  ;;  %v1117_v30 = vld [vmem:[#allocation2] ss:$0 sm:$0xff]  ;;  %v1119_v35 = vld [vmem:[#allocation6] ss:$0 sm:$0xff]  ;;  %s1290_s27 = smov 88  }
  0x1e   : > { %v1420_v0 = vld [vmem:[%s449_s25] sm:$0xff]  ;;  %531 = vmatpush.bf16.msra.mxu0 %v1055_v16  ;;  %s1291_s28 = smov 80   ;;  %s1292_s1 = smov 72  }
  0x1f   : > { %v463_v1 = vsel %vm462_vm0, %v1420_v0, 0.0  ;;  %564 = vmatpush.bf16.msra.mxu1 %v1057_v17  ;;  %v1456_v50 = vld [vmem:[%s1529_s10] sm:$0xff] }
  0x20   : > { %464 = vadd.xlane.f32.xlu0 %v463_v1  ;;  %v1122_v3 = vpop.eup %1121  ;;  %v630_v60 = vld [vmem:[%s1527_s8] sm:$0xff] }
  0x21   : > { %v467_v4 = vmul.f32 32.0, %v1122_v3  ;;  %vm471_vm1 = vweird.f32 %v1122_v3  ;;  %v631_v61 = vpack.c.bf16 %v630_v60, %v630_v60 }
  0x23   : > { %v468_v5 = vsub.f32 1.0, %v467_v4  ;;  %v718_v62 = vsel %vm613_vm6, %v631_v61, 0 }
  0x25   : > { %v469_v6 = vmul.f32 %v1122_v3, %v468_v5 }
  0x27   : > { %v470_v7 = vadd.f32 %v1122_v3, %v469_v6 }
  0x29   : > { %v472_v8 = vsel %vm471_vm1, %v1122_v3, %v470_v7 }
  0x93   : > { %v465_v9 = vpop.xlane.xlu0 %464 }
  0x94   : > { %v473_v10 = vmul.f32 %v472_v8, %v465_v9 }
  0x96   : > { %v474_v11 = vsub.f32 %v1420_v0, %v473_v10 }
  0x98   : > { %v475_v12 = vmul.f32 %v474_v11, %v474_v11 }
  0x9a   : > { %v476_v13 = vsel %vm462_vm0, %v475_v12, 0.0 }
  0x9b   : > { %477 = vadd.xlane.f32.xlu0 %v476_v13 }
 0x10e   : > { %v478_v18 = vpop.xlane.xlu0 %477 }
 0x10f   : > { %v479_v19 = vmul.f32 %v478_v18, %v472_v8 }
 0x111   : > { %v480_v20 = vadd.f32 1e-05, %v479_v19 }
 0x113   : > { %1123 = vrsqrt.f32 %v480_v20  ;;  %vm487_vm3 = vweird.f32 %v480_v20 }
 0x119   : > { %v1124_v21 = vpop.eup %1123 }
 0x11a   : > { %v482_v22 = vmul.f32 %v1124_v21, %v480_v20  ;;  %vm488_vm2 = vweird.f32 %v1124_v21 }
 0x11b   : > { %vm489_vm4 = vmor %vm487_vm3, %vm488_vm2 }
 0x11c   : > { %v483_v23 = vmul.f32 %v1124_v21, %v482_v22 }
 0x11e   : > { %v484_v24 = vmul.f32 0.5, %v483_v23 }
 0x120   : > { %v485_v25 = vsub.f32 1.5, %v484_v24 }
 0x122   : > { %v486_v26 = vmul.f32 %v1124_v21, %v485_v25 }
 0x124   : > { %v490_v28 = vsel %vm489_vm4, %v1124_v21, %v486_v26 }
 0x125   : > { %v491_v29 = vmul.f32 %v490_v28, %v474_v11 }
 0x127   : > { %v495_v31 = vmul.f32 %v1116_v27, %v491_v29 }
 0x129   : > { %v499_v32 = vadd.f32 %v1117_v30, %v495_v31 }
 0x12b   : > { %v500_v33 = vpack.c.bf16 %v499_v32, %v499_v32 }
 0x12d   : > { %1031 = vmatmul.msk.bf16.vlgmr.msra.gmra.mxu0 %vm462_vm0, %v500_v33  ;;  %1040 = vmatmul.msk.bf16.vlgmr.msra.gmra.mxu1 %vm462_vm0, %v500_v33 }
 0x1aa   : > { %v533_v36 = vpop.f32.mrf.mxu0  ;;  %v566_v37 = vpop.f32.mrf.mxu1 }
 0x1ab   : > { %v534_v38 = vadd.f32 %v1118_v34, %v533_v36  ;;  %v567_v39 = vadd.f32 %v1119_v35, %v566_v37 }
 0x1ad   : > { %v571_v40 = vpack.c.bf16 %v534_v38, %v534_v38  ;;  %v1443_v41 = vpack.c.bf16 %v567_v39, %v567_v39 }
 0x1af   : > { %608 = vrot.lane.b32.xlu2 %v1443_v41, %s1286_s17  ;;  %634 = vrot.lane.b32.xlu0 %v571_v40, %s1287_s18  ;;  %v578_v42 = vsel %vm573_vm5, %v1443_v41, 0 }
 0x1b0   : > { %587 = vmatpush.bf16.xpose.msra.mxu2 %v578_v42 }
 0x1b2   : > { %v535_v43 = vpop.f32.mrf.mxu0  ;;  %v568_v44 = vpop.f32.mrf.mxu1 }
 0x1b7   : > { %636 = vrot.lane.b32.xlu2 %v1443_v41, %s1287_s18  ;;  %1041 = vmatmul.msk.bf16.vlgmr.msra.gmra.mxu2 %vm573_vm5, %v571_v40 }
 0x1b8   : > { %727 = vmatpush.bf16.msrb.mxu2 %v718_v62  ;;  %v791_v62 = vld [vmem:[%s1527_s8 + $0x10] sm:$0xff] }
 0x1bf   : > { %735 = vrot.lane.b32.xlu2 %v1443_v41, %s1288_s22 }
 0x1c7   : > { %814 = vrot.lane.b32.xlu2 %v571_v40, %s1289_s24 }
 0x1cf   : > { %733 = vrot.lane.b32.xlu2 %v571_v40, %s1288_s22  ;;  %s457_s22 = scalar_lea.vmem %s1530_s11, %s1021_s19 }
 0x209   : > { %v609_v45 = vpop.permute.xlu2 %608 }
 0x20a   : > { %v615_v46 = vsel %vm613_vm6, %v609_v45, 0 }
 0x20b   : > { %624 = vmatpush.bf16.msra.mxu3 %v615_v46 }
 0x211   : > { %v637_v47 = vpop.permute.xlu2 %636 }
 0x212   : > { %v642_v48 = vsel %vm573_vm5, %v637_v47, 0 }
 0x213   : > { %651 = vmatpush.bf16.xpose.msrb.mxu3 %v642_v48 }
 0x219   : > { %v736_v3 = vpop.permute.xlu2 %735 }
 0x21a   : > { %v741_v5 = vsel %vm573_vm5, %v736_v3, 0 }
 0x221   : > { %v635_v8 = vpop.permute.xlu0 %634  ;;  %v815_v9 = vpop.permute.xlu2 %814 }
 0x229   : > { %v734_v10 = vpop.permute.xlu2 %733 }
 0x23a   : > { %v589_v49 = vpop.f32.mrf.mxu2 }
 0x23b   : > { %v593_v51 = vmul.f32 0.35355338, %v589_v49 }
 0x23d   : > { %v594_v52 = vadd.f32 %v593_v51, %v1456_v50 }
 0x23f   : > { %v595_v53 = vsel %vm573_vm5, %v594_v52, -inf }
 0x240   : > { %596 = vmax.xlane.f32.xlu1 %v595_v53 }
 0x242   : > { %v591_v54 = vpop.f32.mrf.mxu2 }
 0x2b3   : > { %v597_v55 = vpop.xlane.xlu1 %596 }
 0x2b4   : > { %v598_v56 = vsub.f32 %v594_v52, %v597_v55 }
 0x2b6   : > { %v599_v57 = vmul.f32 1.442695, %v598_v56 }
 0x2b8   : > { %1125 = vpow2.f32 %v599_v57 }
 0x2be   : > { %v1126_v58 = vpop.eup %1125 }
 0x2bf   : > { %v601_v59 = vsel %vm573_vm5, %v1126_v58, 0.0 }
 0x2c0   : > { %602 = vadd.xlane.f32.xlu1 %v601_v59  ;;  %v692_v59 = vld [vmem:[%s1527_s8 + $0x8] sm:$0xff] }
 0x2c1   : > { %v693_v60 = vpack.c.bf16 %v692_v59, %v692_v59 }
 0x2c3   : > { %v699_v61 = vsel %vm613_vm6, %v693_v60, 0 }
 0x2c4   : > { %708 = vmatpush.bf16.msrb.mxu1 %v699_v61 }
 0x2d9   : > { %816 = vrot.lane.b32.xlu1 %v1443_v41, %s1289_s24 }
 0x333   : > { %v603_v63 = vpop.xlane.xlu1 %602 }
 0x334   : > { %1127 = vrcp.f32 %v603_v63  ;;  %v792_v63 = vpack.c.bf16 %v791_v62, %v791_v62 }
 0x33a   : > { %v1128_v1 = vpop.eup %1127 }
 0x33b   : > { %v605_v2 = vmul.f32 %v1128_v1, %v1126_v58  ;;  %v798_v1 = vsel %vm613_vm6, %v792_v63, 0 }
 0x33c   : > { %807 = vmatpush.bf16.msra.mxu1 %v798_v1 }
 0x33d   : > { %v606_v4 = vpack.c.bf16 %v605_v2, %v605_v2 }
 0x33f   : > { %1042 = vmatmul.msk.bf16.vlgmr.msra.gmra.mxu3 %vm573_vm5, %v606_v4 }
 0x340   : > { %750 = vmatpush.bf16.xpose.msra.mxu3 %v741_v5 }
 0x34b   : > { %v817_v6 = vpop.permute.xlu1 %816 }
 0x34c   : > { %v822_v7 = vsel %vm573_vm5, %v817_v6, 0 }
 0x34d   : > { %831 = vmatpush.bf16.xpose.msra.mxu2 %v822_v7 }
 0x34f   : > { %1043 = vmatmul.msk.bf16.vlgmr.msrb.gmra.mxu3 %vm573_vm5, %v635_v8 }
 0x35f   : > { %1047 = vmatmul.msk.bf16.vlgmr.msra.gmra.mxu3 %vm573_vm5, %v734_v10 }
 0x3c2   : > { %v626_v11 = vpop.f32.mrf.mxu3 }
 0x3c3   : > { %v632_v12 = vpack.c.bf16 %v626_v11, %v626_v11 }
 0x3c5   : > { %1046 = vmatmul.msk.bf16.vlgmr.msrb.gmra.mxu2 %vm573_vm5, %v632_v12 }
 0x3ca   : > { %v628_v13 = vpop.f32.mrf.mxu3 }
 0x3cb   : > { %v872_v13 = vld [vmem:[%s1527_s8 + $0x18] sm:$0xff] }
 0x3d2   : > { %v653_v14 = vpop.f32.mrf.mxu3 }
 0x3d3   : > { %v657_v15 = vmul.f32 0.35355338, %v653_v14  ;;  %v873_v14 = vpack.c.bf16 %v872_v13, %v872_v13 }
 0x3d5   : > { %1050 = vmatmul.msk.bf16.vlgmr.msra.gmra.mxu2 %vm573_vm5, %v815_v9  ;;  %v658_v16 = vadd.f32 %v657_v15, %v1456_v50  ;;  %v879_v15 = vsel %vm613_vm6, %v873_v14, 0 }
 0x3d7   : > { %v659_v17 = vsel %vm573_vm5, %v658_v16, -inf }
 0x3d8   : > { %660 = vmax.xlane.f32.xlu0 %v659_v17 }
 0x3da   : > { %v655_v18 = vpop.f32.mrf.mxu3 }
 0x3e2   : > { %v752_v19 = vpop.f32.mrf.mxu3 }
 0x3e3   : > { %v756_v20 = vmul.f32 0.35355338, %v752_v19 }
 0x3e5   : > { %v757_v21 = vadd.f32 %v756_v20, %v1456_v50 }
 0x3e7   : > { %v758_v22 = vsel %vm573_vm5, %v757_v21, -inf }
 0x3e8   : > { %759 = vmax.xlane.f32.xlu1 %v758_v22 }
 0x3ea   : > { %v754_v23 = vpop.f32.mrf.mxu3 }
 0x448   : > { %v1477_v24 = vpop.f32.mrf.mxu2 }
 0x44b   : > { %v661_v25 = vpop.xlane.xlu0 %660 }
 0x44c   : > { %v662_v26 = vsub.f32 %v658_v16, %v661_v25 }
 0x44e   : > { %v663_v27 = vmul.f32 1.442695, %v662_v26 }
 0x450   : > { %1129 = vpow2.f32 %v663_v27  ;;  %v731_v28 = vpop.f32.mrf.mxu2 }
 0x451   : > { %v1120_v28 = vld [vmem:[#allocation7] ss:$0 sm:$0xff] }
 0x456   : > { %v1130_v29 = vpop.eup %1129 }
 0x457   : > { %v665_v30 = vsel %vm573_vm5, %v1130_v29, 0.0 }
 0x458   : > { %666 = vadd.xlane.f32.xlu0 %v665_v30  ;;  %v833_v31 = vpop.f32.mrf.mxu2 }
 0x459   : > { %v837_v32 = vmul.f32 0.35355338, %v833_v31 }
 0x45b   : > { %v760_v33 = vpop.xlane.xlu1 %759  ;;  %v838_v34 = vadd.f32 %v837_v32, %v1456_v50 }
 0x45c   : > { %v761_v35 = vsub.f32 %v757_v21, %v760_v33 }
 0x45d   : > { %v839_v36 = vsel %vm573_vm5, %v838_v34, -inf }
 0x45e   : > { %v762_v37 = vmul.f32 1.442695, %v761_v35  ;;  %840 = vmax.xlane.f32.xlu2 %v839_v36 }
 0x460   : > { %1131 = vpow2.f32 %v762_v37  ;;  %v835_v38 = vpop.f32.mrf.mxu2 }
 0x466   : > { %v1132_v39 = vpop.eup %1131 }
 0x467   : > { %v764_v40 = vsel %vm573_vm5, %v1132_v39, 0.0 }
 0x468   : > { %765 = vadd.xlane.f32.xlu0 %v764_v40 }
 0x476   : > { %671 = vrot.lane.b32.xlu2 %v1443_v41, %s1290_s27 }
 0x47c   : > { %770 = vrot.lane.b32.xlu0 %v1443_v41, %s1291_s28 }
 0x4cb   : > { %v667_v42 = vpop.xlane.xlu0 %666 }
 0x4cc   : > { %1133 = vrcp.f32 %v667_v42 }
 0x4d1   : > { %v841_v43 = vpop.xlane.xlu2 %840 }
 0x4d2   : > { %v842_v44 = vsub.f32 %v838_v34, %v841_v43  ;;  %v1134_v46 = vpop.eup %1133 }
 0x4d3   : > { %v669_v47 = vmul.f32 %v1134_v46, %v1130_v29 }
 0x4d4   : > { %v843_v45 = vmul.f32 1.442695, %v842_v44 }
 0x4d5   : > { %v670_v51 = vpack.c.bf16 %v669_v47, %v669_v47 }
 0x4d6   : > { %1135 = vpow2.f32 %v843_v45 }
 0x4d9   : > { %v672_v48 = vpop.permute.xlu2 %671 }
 0x4da   : > { %v677_v49 = vsel %vm613_vm6, %v672_v48, 0 }
 0x4db   : > { %686 = vmatpush.bf16.msrb.mxu0 %v677_v49  ;;  %v766_v53 = vpop.xlane.xlu0 %765 }
 0x4dc   : > { %v1136_v50 = vpop.eup %1135  ;;  %1137 = vrcp.f32 %v766_v53 }
 0x4dd   : > { %v845_v52 = vsel %vm573_vm5, %v1136_v50, 0.0 }
 0x4de   : > { %846 = vadd.xlane.f32.xlu1 %v845_v52  ;;  %1044 = vmatmul.msk.bf16.vlgmr.msrb.gmra.mxu0 %vm573_vm5, %v670_v51 }
 0x4e2   : > { %v1138_v54 = vpop.eup %1137 }
 0x4e3   : > { %v768_v55 = vmul.f32 %v1138_v54, %v1132_v39 }
 0x4e5   : > { %v769_v58 = vpack.c.bf16 %v768_v55, %v768_v55 }
 0x4ee   : > { %v771_v56 = vpop.permute.xlu0 %770 }
 0x4ef   : > { %v776_v57 = vsel %vm613_vm6, %v771_v56, 0 }
 0x4f0   : > { %785 = vmatpush.bf16.msra.mxu0 %v776_v57 }
 0x4f3   : > { %1048 = vmatmul.msk.bf16.vlgmr.msra.gmra.mxu0 %vm573_vm5, %v769_v58 }
 0x4f4   : > { %888 = vmatpush.bf16.msrb.mxu0 %v879_v15 }
 0x4f7   : > { %851 = vrot.lane.b32.xlu1 %v1443_v41, %s1292_s1 }
 0x551   : > { %v847_v3 = vpop.xlane.xlu1 %846 }
 0x552   : > { %1139 = vrcp.f32 %v847_v3 }
 0x558   : > { %v1140_v5 = vpop.eup %1139 }
 0x559   : > { %v849_v6 = vmul.f32 %v1140_v5, %v1136_v50 }
 0x55b   : > { %v688_v2 = vpop.f32.mrf.mxu0  ;;  %v850_v9 = vpack.c.bf16 %v849_v6, %v849_v6 }
 0x55c   : > { %v694_v4 = vpack.c.bf16 %v688_v2, %v688_v2 }
 0x55e   : > { %1045 = vmatmul.msk.bf16.vlgmr.msrb.gmra.mxu1 %vm573_vm5, %v694_v4 }
 0x563   : > { %v690_v41 = vpop.f32.mrf.mxu0 }
 0x569   : > { %v852_v7 = vpop.permute.xlu1 %851 }
 0x56a   : > { %v857_v8 = vsel %vm613_vm6, %v852_v7, 0 }
 0x56b   : > { %866 = vmatpush.bf16.msrb.mxu3 %v857_v8 }
 0x56e   : > { %1051 = vmatmul.msk.bf16.vlgmr.msrb.gmra.mxu3 %vm573_vm5, %v850_v9 }
 0x570   : > { %v787_v10 = vpop.f32.mrf.mxu0 }
 0x571   : > { %v793_v11 = vpack.c.bf16 %v787_v10, %v787_v10 }
 0x573   : > { %1049 = vmatmul.msk.bf16.vlgmr.msra.gmra.mxu1 %vm573_vm5, %v793_v11 }
 0x578   : > { %v789_v12 = vpop.f32.mrf.mxu0 }
 0x5db   : > { %v710_v16 = vpop.f32.mrf.mxu1 }
 0x5dc   : > { %v730_v18 = vadd.f32 %v1477_v24, %v710_v16 }
 0x5e3   : > { %v712_v17 = vpop.f32.mrf.mxu1 }
 0x5f0   : > { %v809_v19 = vpop.f32.mrf.mxu1 }
 0x5f1   : > { %v813_v20 = vadd.f32 %v809_v19, %v730_v18  ;;  %v868_v21 = vpop.f32.mrf.mxu3 }
 0x5f2   : > { %v874_v22 = vpack.c.bf16 %v868_v21, %v868_v21 }
 0x5f4   : > { %1052 = vmatmul.msk.bf16.vlgmr.msrb.gmra.mxu0 %vm573_vm5, %v874_v22 }
 0x5f8   : > { %v811_v23 = vpop.f32.mrf.mxu1 }
 0x5f9   : > { %v870_v25 = vpop.f32.mrf.mxu3 }
 0x671   : > { %v890_v26 = vpop.f32.mrf.mxu0 }
 0x672   : > { %v894_v27 = vadd.f32 %v890_v26, %v813_v20 }
 0x674   : > { %v895_v29 = vadd.f32 %v894_v27, %v1420_v0 }
 0x676   : > { %v900_v30 = vadd.f32 %v1120_v28, %v895_v29 }
 0x678   : > { %901 = vst.msk [vmem:[%s457_s22] sm:$0xff] %vm462_vm0, %v900_v30 }
 0x679   : > { %v892_v24 = vpop.f32.mrf.mxu0 }
 0x67a PF: > { %s24_s16 = sadd.s32 1, %s1279_s16  }
 0x67b   : > { %p21_p7 = scmp.ge.s32.totalorder %s24_s16, 4  }
 0x67d   :  { %23 = sbr.rel (!%p21_p7) target bundleno = 3 (0x3), region = 114 }
 0x682   :  { %921 = vsyncpa [#allocation3], 1 }
 0x683   :  { %923 = vsyncpa [#allocation3 + $0x1], 1 }
 0x684   :  { %924 = vsyncpa [#allocation5], 1 }
 0x685   :  { %925 = vsyncpa [#allocation8], 1 }

</bundles_post_ra>
